<compile_context>
chip_gen: v7x
topology: tpu7x:2x2x1
jax: 0.10.0
libtpu: 0.0.40
codegen_flags: <defaults>
</compile_context>

<pallas_src>
import functools
import math

import jax
import jax.numpy as jnp
from jax.experimental import pallas as pl
from jax.experimental.pallas import tpu as pltpu


def get_sinusoidal_embedding(num_embeddings: int, embedding_dim: int, offset: int):
    """JAX port of FSGPTSinusoidalPositionalEmbedding.get_embedding (reference only)."""
    half_dim = embedding_dim // 2
    emb = math.log(10000.0) / (half_dim - 1)
    emb = jnp.exp(jnp.arange(half_dim, dtype=jnp.float32) * -emb)
    emb = jnp.arange(num_embeddings, dtype=jnp.float32)[:, None] * emb[None, :]
    emb = jnp.concatenate([jnp.sin(emb), jnp.cos(emb)], axis=1).reshape(num_embeddings, -1)
    if embedding_dim % 2 == 1:
        emb = jnp.concatenate([emb, jnp.zeros((num_embeddings, 1), jnp.float32)], axis=1)
    if offset is not None:
        emb = emb.at[offset - 1, :].set(0.0)
    return emb


def _pos_emb_kernel(ids_ref, tri_ref, freq_ref, sin_sel_ref, cos_sel_ref,
                    out_ref, carry_ref, *, padding_idx: int, offset: int):
    si = pl.program_id(1)

    # Reset the running non-padding count at the first sequence tile.
    @pl.when(si == 0)
    def _init():
        carry_ref[...] = jnp.zeros_like(carry_ref)

    ids = ids_ref[...]                                        # (TB, TS) int32
    mask_f = (ids != padding_idx).astype(jnp.float32)         # (TB, TS) 0/1

    # Within-tile inclusive cumsum on the MXU: bf16 0/1 inputs, f32 accumulation
    # (exact for counts <= TS).  tri is upper-triangular ones, resident in VMEM.
    csum = jnp.dot(mask_f.astype(jnp.bfloat16), tri_ref[...],
                   preferred_element_type=jnp.float32)        # (TB, TS)

    carried = carry_ref[...]                                  # (TB, 1) running count
    # positions = cumsum(mask) * mask + offset - 1   (exact small ints in f32)
    pos = (csum + carried) * mask_f + float(offset - 1)       # (TB, TS)
    # Carry the total non-padding count of this tile to the next seq tile.
    carry_ref[...] = carried + csum[:, -1:]

    # Direct sinusoid: angle[b, s, d] = pos[b, s] * inv_freq_full[d]
    freq = freq_ref[...]                                      # (1, D)
    sin_sel = sin_sel_ref[...]                                # (1, D)
    cos_sel = cos_sel_ref[...]                                # (1, D)
    angle = pos[:, :, None] * freq[None, :, :]                # (TB, TS, D)
    emb = sin_sel[None, :, :] * jnp.sin(angle) + cos_sel[None, :, :] * jnp.cos(angle)

    # Padding tokens map to the zeroed table row (offset-1) -> zero embedding.
    out_ref[...] = (emb * mask_f[:, :, None]).astype(out_ref.dtype)


def fsgpt_sinusoidal_positional_embedding(input_ids, embedding_dim: int,
                                          padding_idx: int, offset: int = 2,
                                          out_dtype=jnp.float32, seq_tile: int = 128):
    """input_ids: (bsz, seq_len) int32  ->  (bsz, seq_len, embedding_dim) out_dtype."""
    B, S = input_ids.shape
    D = embedding_dim
    half = D // 2

    # Tile sizes.  Seq tiles must be a multiple of 128 (lane dim of the ids
    # block) or the full sequence; batch is kept whole per tile (small B).
    TS = seq_tile if (S % seq_tile == 0 and S >= seq_tile) else S
    TB = B

    # --- tiny resident constants (built once in the wrapper, not per grid step) ---
    inv_freq = jnp.exp(jnp.arange(half, dtype=jnp.float32)
                       * -(math.log(10000.0) / (half - 1)))
    odd_pad = jnp.zeros((D % 2,), jnp.float32)
    freq_full = jnp.concatenate([inv_freq, inv_freq, odd_pad])[None, :]          # (1, D)
    sin_sel = jnp.concatenate([jnp.ones((half,), jnp.float32),
                               jnp.zeros((half + D % 2,), jnp.float32)])[None, :]  # (1, D)
    cos_sel = jnp.concatenate([jnp.zeros((half,), jnp.float32),
                               jnp.ones((half,), jnp.float32), odd_pad])[None, :]  # (1, D)

    # Upper-triangular ones (TS, TS) in bf16 for the in-tile cumsum matmul.
    row = jax.lax.broadcasted_iota(jnp.int32, (TS, TS), 0)
    col = jax.lax.broadcasted_iota(jnp.int32, (TS, TS), 1)
    tri = (row <= col).astype(jnp.bfloat16)

    kernel = functools.partial(_pos_emb_kernel, padding_idx=padding_idx, offset=offset)
    grid = (B // TB, S // TS)

    return pl.pallas_call(
        kernel,
        out_shape=jax.ShapeDtypeStruct((B, S, D), out_dtype),
        grid_spec=pltpu.PrefetchScalarGridSpec(
            num_scalar_prefetch=0,
            grid=grid,
            in_specs=[
                pl.BlockSpec((TB, TS), lambda bi, si: (bi, si)),   # token ids tile
                pl.BlockSpec((TS, TS), lambda bi, si: (0, 0)),     # triangular (resident)
                pl.BlockSpec((1, D), lambda bi, si: (0, 0)),       # inv_freq replicated
                pl.BlockSpec((1, D), lambda bi, si: (0, 0)),       # sin selector
                pl.BlockSpec((1, D), lambda bi, si: (0, 0)),       # cos selector
            ],
            out_specs=pl.BlockSpec((TB, TS, D), lambda bi, si: (bi, si, 0)),
            scratch_shapes=[pltpu.VMEM((TB, 1), jnp.float32)],     # cumsum carry
        ),
        compiler_params=pltpu.CompilerParams(
            dimension_semantics=("parallel", "arbitrary"),
            vmem_limit_bytes=64 * 1024 * 1024,
        ),
    )(input_ids, tri, freq_full, sin_sel, cos_sel)


if __name__ == "__main__":
    # Module config (matches defaults of the PyTorch module, small embedding dim).
    embedding_dim = 32
    padding_idx = 1
    num_positions = 1024
    offset = 2

    # Example input: [bsz x seqlen] token ids, some equal to padding_idx.
    bsz, seq_len = 2, 256
    key = jax.random.PRNGKey(0)
    input_ids = jax.random.randint(key, (bsz, seq_len), 0, 50, dtype=jnp.int32)
    input_ids = input_ids.at[0, :3].set(padding_idx)
    input_ids = input_ids.at[1, 200:].set(padding_idx)

    out = fsgpt_sinusoidal_positional_embedding(input_ids, embedding_dim, padding_idx, offset)
    out = jax.block_until_ready(out)

    # Pure-JAX reference (same semantics as the PyTorch forward: table gather).
    weights = get_sinusoidal_embedding(num_positions + offset, embedding_dim, offset)
    mask = (input_ids != padding_idx).astype(jnp.int32)
    positions = jnp.cumsum(mask, axis=1) * mask + offset - 1
    ref = jnp.take(weights, positions.reshape(-1), axis=0).reshape(bsz, seq_len, embedding_dim)

    assert out.shape == (bsz, seq_len, embedding_dim)
    max_err = float(jnp.max(jnp.abs(out.astype(jnp.float32) - ref)))
    assert max_err < 1e-3, f"mismatch vs reference, max abs err = {max_err}"
    print("KERNEL_OK")
</pallas_src>

<mosaic_0001>
module attributes {stable_mosaic.version = 11 : i64} {
  func.func @_pos_emb_kernel(%arg0: i32, %arg1: i32, %arg2: memref<2x128xi32, #tpu.memory_space<vmem>>, %arg3: memref<128x128xbf16, #tpu.memory_space<vmem>>, %arg4: memref<1x32xf32, #tpu.memory_space<vmem>>, %arg5: memref<1x32xf32, #tpu.memory_space<vmem>>, %arg6: memref<1x32xf32, #tpu.memory_space<vmem>>, %arg7: memref<2x128x32xf32, #tpu.memory_space<vmem>>, %arg8: memref<2x1xf32, #tpu.memory_space<vmem>>) attributes {dimension_semantics = [#tpu.dimension_semantics<parallel>, #tpu.dimension_semantics<arbitrary>], iteration_bounds = array<i64: 1, 2>, scalar_prefetch = 0 : i64, scratch_operands = 1 : i64, tpu.core_type = #tpu.core_type<tc>, window_params = [{transform_indices = @transform_0, window_bounds = array<i64: 2, 128>}, {pipeline_mode = #tpu.pipeline_mode<synchronous>, transform_indices = @transform_1, window_bounds = array<i64: 128, 128>}, {pipeline_mode = #tpu.pipeline_mode<synchronous>, transform_indices = @transform_2, window_bounds = array<i64: 1, 32>}, {pipeline_mode = #tpu.pipeline_mode<synchronous>, transform_indices = @transform_3, window_bounds = array<i64: 1, 32>}, {pipeline_mode = #tpu.pipeline_mode<synchronous>, transform_indices = @transform_4, window_bounds = array<i64: 1, 32>}, {transform_indices = @transform_5, window_bounds = array<i64: 2, 128, 32>}]} {
    %c0_i32 = arith.constant 0 : i32
    %0 = arith.cmpi eq, %arg1, %c0_i32 : i32
    %1 = arith.extui %0 : i1 to i32
    %c0_i32_0 = arith.constant 0 : i32
    %2 = arith.cmpi ne, %1, %c0_i32_0 : i32
    scf.if %2 {
      %cst_18 = arith.constant 0.000000e+00 : f32
      %41 = vector.broadcast %cst_18 : f32 to vector<2x1xf32>
      %c0_19 = arith.constant 0 : index
      %c0_20 = arith.constant 0 : index
      %42 = vector.load %arg8[%c0_19, %c0_20] : memref<2x1xf32, #tpu.memory_space<vmem>>, vector<2x1xf32>
      tpu.vector_store %arg8[%c0_19, %c0_20], %41 {strides = array<i32>} : memref<2x1xf32, #tpu.memory_space<vmem>>, vector<2x1xf32>,
    } else {
    }
    %c0 = arith.constant 0 : index
    %c0_1 = arith.constant 0 : index
    %3 = vector.load %arg2[%c0, %c0_1] : memref<2x128xi32, #tpu.memory_space<vmem>>, vector<2x128xi32>
    %c1_i32 = arith.constant 1 : i32
    %4 = vector.broadcast %c1_i32 : i32 to vector<2x128xi32>
    %5 = arith.cmpi ne, %3, %4 : vector<2x128xi32>
    %6 = arith.extui %5 : vector<2x128xi1> to vector<2x128xi32>
    %7 = arith.sitofp %6 : vector<2x128xi32> to vector<2x128xf32>
    %8 = arith.truncf %7 : vector<2x128xf32> to vector<2x128xbf16>
    %c0_2 = arith.constant 0 : index
    %c0_3 = arith.constant 0 : index
    %9 = vector.load %arg3[%c0_2, %c0_3] : memref<128x128xbf16, #tpu.memory_space<vmem>>, vector<128x128xbf16>
    %cst = arith.constant dense<0.000000e+00> : vector<2x128xf32>
    %10 = tpu.matmul %8, %9, %cst {dimension_numbers = #tpu.dot_dimension_numbers<[1], [0], [0], [1], [0, 0, 1, 1], [], []>} : vector<2x128xbf16>, vector<128x128xbf16>, vector<2x128xf32> -> vector<2x128xf32>
    %c0_4 = arith.constant 0 : index
    %c0_5 = arith.constant 0 : index
    %11 = vector.load %arg8[%c0_4, %c0_5] : memref<2x1xf32, #tpu.memory_space<vmem>>, vector<2x1xf32>
    %12 = vector.broadcast %11 : vector<2x1xf32> to vector<2x128xf32>
    %13 = arith.addf %10, %12 : vector<2x128xf32>
    %14 = arith.mulf %13, %7 : vector<2x128xf32>
    %cst_6 = arith.constant 1.000000e+00 : f32
    %15 = vector.broadcast %cst_6 : f32 to vector<2x128xf32>
    %16 = arith.addf %14, %15 : vector<2x128xf32>
    %17 = vector.extract_strided_slice %10 {offsets = [0, 127], sizes = [2, 1], strides = [1, 1]} : vector<2x128xf32> to vector<2x1xf32>
    %18 = arith.addf %11, %17 : vector<2x1xf32>
    %c0_7 = arith.constant 0 : index
    %c0_8 = arith.constant 0 : index
    %19 = vector.load %arg8[%c0_7, %c0_8] : memref<2x1xf32, #tpu.memory_space<vmem>>, vector<2x1xf32>
    tpu.vector_store %arg8[%c0_7, %c0_8], %18 {strides = array<i32>} : memref<2x1xf32, #tpu.memory_space<vmem>>, vector<2x1xf32>,
    %c0_9 = arith.constant 0 : index
    %c0_10 = arith.constant 0 : index
    %20 = vector.load %arg4[%c0_9, %c0_10] : memref<1x32xf32, #tpu.memory_space<vmem>>, vector<1x32xf32>
    %c0_11 = arith.constant 0 : index
    %c0_12 = arith.constant 0 : index
    %21 = vector.load %arg5[%c0_11, %c0_12] : memref<1x32xf32, #tpu.memory_space<vmem>>, vector<1x32xf32>
    %c0_13 = arith.constant 0 : index
    %c0_14 = arith.constant 0 : index
    %22 = vector.load %arg6[%c0_13, %c0_14] : memref<1x32xf32, #tpu.memory_space<vmem>>, vector<1x32xf32>
    %23 = vector.shape_cast %16 : vector<2x128xf32> to vector<2x128x1xf32>
    %24 = vector.shape_cast %20 : vector<1x32xf32> to vector<1x1x32xf32>
    %25 = vector.broadcast %23 : vector<2x128x1xf32> to vector<2x128x32xf32>
    %26 = vector.broadcast %24 : vector<1x1x32xf32> to vector<2x128x32xf32>
    %27 = arith.mulf %25, %26 : vector<2x128x32xf32>
    %28 = vector.shape_cast %21 : vector<1x32xf32> to vector<1x1x32xf32>
    %29 = math.sin %27 : vector<2x128x32xf32>
    %30 = vector.broadcast %28 : vector<1x1x32xf32> to vector<2x128x32xf32>
    %31 = arith.mulf %30, %29 : vector<2x128x32xf32>
    %32 = vector.shape_cast %22 : vector<1x32xf32> to vector<1x1x32xf32>
    %33 = math.cos %27 : vector<2x128x32xf32>
    %34 = vector.broadcast %32 : vector<1x1x32xf32> to vector<2x128x32xf32>
    %35 = arith.mulf %34, %33 : vector<2x128x32xf32>
    %36 = arith.addf %31, %35 : vector<2x128x32xf32>
    %37 = vector.shape_cast %7 : vector<2x128xf32> to vector<2x128x1xf32>
    %38 = vector.broadcast %37 : vector<2x128x1xf32> to vector<2x128x32xf32>
    %39 = arith.mulf %36, %38 : vector<2x128x32xf32>
    %c0_15 = arith.constant 0 : index
    %c0_16 = arith.constant 0 : index
    %c0_17 = arith.constant 0 : index
    %40 = vector.load %arg7[%c0_15, %c0_16, %c0_17] : memref<2x128x32xf32, #tpu.memory_space<vmem>>, vector<2x128x32xf32>
    tpu.vector_store %arg7[%c0_15, %c0_16, %c0_17], %39 {strides = array<i32>} : memref<2x128x32xf32, #tpu.memory_space<vmem>>, vector<2x128x32xf32>,
    return
  }
  func.func @transform_0(%arg0: i32, %arg1: i32) -> (i32, i32) {
    %c0_i32 = arith.constant 0 : i32
    return %arg0, %arg1 : i32, i32
  }
  func.func @transform_1(%arg0: i32, %arg1: i32) -> (i32, i32) {
    %c0_i32 = arith.constant 0 : i32
    %c0_i32_0 = arith.constant 0 : i32
    %c0_i32_1 = arith.constant 0 : i32
    return %c0_i32, %c0_i32_0 : i32, i32
  }
  func.func @transform_2(%arg0: i32, %arg1: i32) -> (i32, i32) {
    %c0_i32 = arith.constant 0 : i32
    %c0_i32_0 = arith.constant 0 : i32
    %c0_i32_1 = arith.constant 0 : i32
    return %c0_i32, %c0_i32_0 : i32, i32
  }
  func.func @transform_3(%arg0: i32, %arg1: i32) -> (i32, i32) {
    %c0_i32 = arith.constant 0 : i32
    %c0_i32_0 = arith.constant 0 : i32
    %c0_i32_1 = arith.constant 0 : i32
    return %c0_i32, %c0_i32_0 : i32, i32
  }
  func.func @transform_4(%arg0: i32, %arg1: i32) -> (i32, i32) {
    %c0_i32 = arith.constant 0 : i32
    %c0_i32_0 = arith.constant 0 : i32
    %c0_i32_1 = arith.constant 0 : i32
    return %c0_i32, %c0_i32_0 : i32, i32
  }
  func.func @transform_5(%arg0: i32, %arg1: i32) -> (i32, i32, i32) {
    %c0_i32 = arith.constant 0 : i32
    %c0_i32_0 = arith.constant 0 : i32
    return %arg0, %arg1, %c0_i32 : i32, i32, i32
  }
}

</mosaic_0001>

<bundles_post_ra>
// kernel: tpu_custom_call.1
= control target key start
LH: loop header
LB: loop body
LE: loop exit
PB: predicated region body
PF: predicated region fallthrough
CT: control target
= control target key end

     0   :  { %10 = vsyncpa [#allocation4], 0  ;;  %s12280_s0 = inlined_call_operand.hbm [shape: s32[2,256], index: 0, kind: input, shape index: {}]   ;;  %s12281_s1 = inlined_call_operand.hbm [shape: bf16[128,128], index: 1, kind: input, shape index: {}]   ;;  %s12282_s2 = inlined_call_operand.hbm [shape: f32[1,32], index: 2, kind: input, shape index: {}]   ;;  %s12283_s3 = inlined_call_operand.hbm [shape: f32[1,32], index: 3, kind: input, shape index: {}]   ;;  %s12284_s4 = inlined_call_operand.hbm [shape: f32[1,32], index: 4, kind: input, shape index: {}]   ;;  %s12285_s5 = inlined_call_operand.hbm [shape: f32[2,256,32], index: 5, kind: output, shape index: {}]  }
   0x1   :  { %12 = vsyncpa [#allocation4 + $0x1], 0 }
   0x2   :  { %13 = vsyncpa [#allocation7], 0 }
   0x3   :  { %14 = vsyncpa [#allocation10], 0 }
   0x4   :  { %15 = vsyncpa [#allocation5], 0 }
   0x5   :  { %17 = vsyncpa [#allocation5 + $0x1], 0  ;;  %s8707_s18 = smov 0   ;;  %s8709_s19 = smov 0  }
   0x6   :  { %s8711_s20 = smov 0   ;;  %s8713_s21 = smov 0  }
   0x7   :  { %s8715_s22 = smov 0   ;;  %s8717_s23 = smov 0  }
   0x8 LB: > { %s7720_s24 = sadd.s32 4294967295, %s8649_s23   ;;  %p7722_p0 = scmp.ge.s32.totalorder %s8649_s23, 1  ;;  %s8649_s23 = sphi %s8717_s23, %s23_s23   ;;  %s8645_s22 = sphi %s8715_s22, %s12979_s22   ;;  %s8641_s21 = sphi %s8713_s21, %s12978_s21   ;;  %s8637_s20 = sphi %s8711_s20, %s12977_s20   ;;  %s8633_s19 = sphi %s8709_s19, %s12976_s19   ;;  %s8629_s18 = sphi %s8707_s18, %s12975_s18  }
   0x9   : > { %p8741_p1 = scmp.eq.s32.totalorder %s7720_s24, 0  ;;  %p180_p2 = scmp.lt.s32.totalorder %s8649_s23, 3 }
   0xa   : > { %s8651_s27 = smov [#allocation6]   ;;  %s8652_s30 = smov [#allocation9]  }
   0xb   : > { %s12528_s25 = scalar_select %p8741_p1, 1, 0 }
   0xc   : > { %p8746_p3 = pnand %p7722_p0, %p180_p2  ;;  %s192_s28 = sshll.u32 %s8651_s27, 4  ;;  %s8750_s28 = int_to_ptr.vmem [resolvable:$true] %s192_s28 }
   0xd   : > { %s217_s6 = sshll.u32 %s8652_s30, 4  ;;  %s8653_s7 = smov [#allocation8]   ;;  %s8761_s6 = int_to_ptr.vmem [resolvable:$true] %s217_s6 }
   0xe   : > { %s12529_s26 = scalar_select %p8746_p3, 1, 0 }
   0xf   : > { %p8197_p4 = pneg %p8746_p3  ;;  %s8763_s8 = sshll.u32 %s8653_s7, 4  ;;  %s207_s8 = int_to_ptr.vmem [resolvable:$true] %s8763_s8 }
  0x10   : > { %s8445_s11 = scalar_lea.hbm %s12281_s1, 1024 }
  0x11   : > { %p8757_p6 = pnand %p8197_p4, %p8741_p1  ;;  %p8446_p7 = scmp.ne.s32.totalorder %s12281_s1, %s8445_s11 }
  0x12   : > { %p8452_p11 = scmp.lt.u32.totalorder %s8445_s11, %s12281_s1 }
  0x13   : > { %p8773_p8 = pneg %p8757_p6 }
  0x15   : > { %p8448_p9 = pnand %p8773_p8, %p8446_p7 }
  0x17   : > { %p8449_p10 = pneg %p8448_p9 }
  0x19   : > { %p8454_p12 = pnand %p8452_p11, %p8449_p10 }
  0x1b   : > { %8457 = shalt.err (!%p8454_p12)
}
  0x1c   : > { %s8458_s17 = scalar_lea.vmem %s8750_s28, 1024  ;;  %p8466_p4 = scmp.lt.s32.totalorder %s8750_s28, %s8750_s28 }
  0x1d   : > { %p8459_p13 = scmp.ne.s32.totalorder %s8750_s28, %s8458_s17  ;;  %p8467_p5 = scmp.lt.s32.totalorder %s8458_s17, %s8458_s17 }
  0x1f   : > { %p8461_p0 = pnand %p8459_p13, %p8773_p8  ;;  %p8468_p7 = por %p8467_p5, %p8466_p4 }
  0x21   : > { %p8462_p2 = pneg %p8461_p0 }
  0x23   : > { %p8469_p9 = pnand %p8468_p7, %p8462_p2 }
  0x25   : > { %8472 = shalt.err (!%p8469_p9)
}
  0x26   : > { %s8654_s27 = smov 64   ;;  %s8655_s30 = smov 4  }
  0x27   : > { %8200 = dma.hbm_to_vmem [thread:$0]  (!%p8757_p6), %s12281_s1, 1024, %s8750_s28, [#allocation7], %s8654_s27, %s8654_s27, %s8655_s30  }
  0x28   : > { %s8473_s12 = scalar_lea.hbm %s12283_s3, 16 }
  0x29   : > { %p8474_p5 = scmp.ne.s32.totalorder %s12283_s3, %s8473_s12  ;;  %p8480_p12 = scmp.lt.u32.totalorder %s8473_s12, %s12283_s3 }
  0x2b   : > { %p8476_p10 = pnand %p8474_p5, %p8773_p8 }
  0x2d   : > { %p8477_p11 = pneg %p8476_p10 }
  0x2f   : > { %p8482_p13 = pnand %p8480_p12, %p8477_p11 }
  0x31   : > { %8485 = shalt.err (!%p8482_p13)
}
  0x32   : > { %s8486_s28 = scalar_lea.vmem %s8761_s6, 16  ;;  %s8493_s27 = scalar_lea.vmem %s8761_s6, 32 }
  0x33   : > { %p8487_p0 = scmp.ne.s32.totalorder %s8761_s6, %s8486_s28  ;;  %p8494_p7 = scmp.lt.s32.totalorder %s8761_s6, %s8761_s6 }
  0x34   : > { %p8495_p9 = scmp.lt.s32.totalorder %s8493_s27, %s8486_s28 }
  0x35   : > { %p8489_p2 = pnand %p8487_p0, %p8773_p8 }
  0x36   : > { %p8496_p5 = por %p8495_p9, %p8494_p7 }
  0x37   : > { %p8490_p4 = pneg %p8489_p2 }
  0x39   : > { %p8497_p10 = pnand %p8496_p5, %p8490_p4 }
  0x3b   : > { %8500 = shalt.err (!%p8497_p10)
}
  0x3c   : > { %8206 = dma.hbm_to_vmem [thread:$0]  (!%p8757_p6), %s12283_s3, 16, %s8761_s6, [#allocation10]  }
  0x3d   : > { %s8501_s11 = scalar_lea.hbm %s12282_s2, 16 }
  0x3e   : > { %p8502_p11 = scmp.ne.s32.totalorder %s12282_s2, %s8501_s11  ;;  %p8508_p0 = scmp.lt.u32.totalorder %s8501_s11, %s12282_s2 }
  0x40   : > { %p8504_p12 = pnand %p8502_p11, %p8773_p8 }
  0x42   : > { %p8505_p13 = pneg %p8504_p12 }
  0x44   : > { %p8510_p2 = pnand %p8508_p0, %p8505_p13 }
  0x46   : > { %8513 = shalt.err (!%p8510_p2)
}
  0x47   : > { %s8514_s17 = scalar_lea.vmem %s207_s8, 16  ;;  %s8521_s6 = scalar_lea.vmem %s207_s8, 32 }
  0x48   : > { %p8515_p4 = scmp.ne.s32.totalorder %s207_s8, %s8514_s17  ;;  %p8522_p5 = scmp.lt.s32.totalorder %s207_s8, %s207_s8 }
  0x49   : > { %p8523_p10 = scmp.lt.s32.totalorder %s8521_s6, %s8514_s17 }
  0x4a   : > { %p8517_p7 = pnand %p8515_p4, %p8773_p8 }
  0x4b   : > { %p8524_p3 = por %p8523_p10, %p8522_p5 }
  0x4c   : > { %p8518_p9 = pneg %p8517_p7 }
  0x4e   : > { %p8525_p1 = pnand %p8524_p3, %p8518_p9 }
  0x50   : > { %8528 = shalt.err (!%p8525_p1)
}
  0x51   : > { %8203 = dma.hbm_to_vmem [thread:$0]  (!%p8757_p6), %s12282_s2, 16, %s207_s8, [#allocation7]  }
  0x52   : > { %s8656_s30 = smov [#allocation11]   ;;  %s8529_s11 = scalar_lea.hbm %s12284_s4, 16 }
  0x53   : > { %s228_s7 = sshll.u32 %s8656_s30, 4  ;;  %p8530_p11 = scmp.ne.s32.totalorder %s12284_s4, %s8529_s11  ;;  %s229_s7 = int_to_ptr.vmem [resolvable:$true] %s228_s7 }
  0x54   : > { %p8536_p12 = scmp.lt.u32.totalorder %s8529_s11, %s12284_s4 }
  0x55   : > { %p8532_p1 = pnand %p8530_p11, %p8773_p8 }
  0x57   : > { %p8533_p3 = pneg %p8532_p1 }
  0x59   : > { %p8538_p13 = pnand %p8536_p12, %p8533_p3 }
  0x5b   : > { %8541 = shalt.err (!%p8538_p13)
}
  0x5c   : > { %s8542_s8 = scalar_lea.vmem %s229_s7, 16  ;;  %s8549_s17 = scalar_lea.vmem %s229_s7, 32 }
  0x5d   : > { %p8543_p0 = scmp.ne.s32.totalorder %s229_s7, %s8542_s8  ;;  %p8550_p7 = scmp.lt.s32.totalorder %s229_s7, %s229_s7 }
  0x5e   : > { %p8551_p9 = scmp.lt.s32.totalorder %s8549_s17, %s8542_s8 }
  0x5f   : > { %p8545_p2 = pnand %p8543_p0, %p8773_p8 }
  0x60   : > { %p8552_p5 = por %p8551_p9, %p8550_p7 }
  0x61   : > { %p8546_p4 = pneg %p8545_p2 }
  0x63   : > { %p8553_p10 = pnand %p8552_p5, %p8546_p4 }
  0x65   : > { %8556 = shalt.err (!%p8553_p10)
}
  0x66   : > { %8209 = dma.hbm_to_vmem [thread:$0]  (!%p8757_p6), %s12284_s4, 16, %s229_s7, [#allocation10]  }
  0x67   : > { %s7721_s14 = sadd.s32 4294967294, %s8649_s23   ;;  %s32_s27 = sadd.s32 1, %s8645_s22 }
  0x68   : > { %p33_p8 = scmp.ge.s32.totalorder %s32_s27, 2  ;;  %s44_s29 = sadd.s32 1, %s8637_s20 }
  0x69   : > { %p51_p11 = scmp.ne.s32.totalorder %s8637_s20, %s8633_s19  ;;  %p52_p1 = scmp.eq.s32.totalorder %s8649_s23, 0 }
  0x6a   : > { %s12981_s27 = smov (%p33_p8, %s32_s27), 0  ;;  %p57_p12 = scmp.ne.s32.totalorder %s8633_s19, %s8629_s18 }
  0x6b   : > { %p8863_p3 = por %p52_p1, %p51_p11  ;;  %s40_s7 = ssub.s32 %s8645_s22, %s12981_s27 }
  0x6c   : > { %p167_p6 = scmp.eq.s32.totalorder %s7720_s24, 1  ;;  %p42_p13 = scmp.eq.s32.totalorder %s40_s7, 0 }
  0x6d   : > { %p12533_p0 = scmp.ne.s32.totalorder %s12528_s25, 0  ;;  %p173_p7 = scmp.eq.s32.totalorder %s7721_s14, 1 }
  0x6e   : > { %p8879_p4 = por %p167_p6, %p51_p11  ;;  %p8222_p5 = scmp.lt.s32.totalorder %s8649_s23, 2 }
  0x6f   : > { %p8875_p2 = por %p12533_p0, %p57_p12  ;;  %p8886_p9 = por %p173_p7, %p57_p12 }
  0x70   : > { %s12535_s10 = scalar_select %p8879_p4, 1, 0 }
  0x71   : > { %s8884_s11 = scalar_select %p42_p13, %s8637_s20, %s44_s29  }
  0x72   : > { %s12536_s12 = scalar_select %p8886_p9, 1, 0 }
  0x73   : > { %s239_s13 = sand.u32 1, %s8637_s20   ;;  %s7729_s24 = sshll.u32 %s8645_s22, 5 }
  0x74   : > { %s7728_s15 = sshll.u32 %s239_s13, 1  ;;  %s8896_s17 = scalar_lea.hbm %s12280_s0, %s7729_s24 }
  0x75   : > { %s243_s6 = scalar_lea.vmem [#allocation3], %s7728_s15  ;;  %p8900_p10 = pnand %p8222_p5, %p8863_p3 }
  0x76   : > { %s252_s28 = sshll.u32 %s243_s6, 4  ;;  %s240_s29 = scalar_lea.sflag [#allocation4], %s239_s13  ;;  %s8904_s28 = int_to_ptr.vmem [resolvable:$true] %s252_s28 }
  0x77   : > { %s8557_s7 = scalar_lea.hbm %s8896_s17, 32  ;;  %p8559_p11 = pneg %p8900_p10 }
  0x78   : > { %p8558_p8 = scmp.ne.s32.totalorder %s8896_s17, %s8557_s7  ;;  %s8562_s30 = scalar_lea.hbm %s12280_s0, 64 }
  0x79   : > { %p8563_p3 = scmp.lt.u32.totalorder %s8896_s17, %s12280_s0  ;;  %p8564_p6 = scmp.lt.u32.totalorder %s8562_s30, %s8557_s7 }
  0x7a   : > { %p8560_p1 = pnand %p8559_p11, %p8558_p8  ;;  %p8566_p0 = scmp.lt.u32.totalorder %s8557_s7, %s8896_s17 }
  0x7b   : > { %p8565_p13 = por %p8564_p6, %p8563_p3 }
  0x7c   : > { %p8561_p12 = pneg %p8560_p1 }
  0x7d   : > { %p8567_p7 = por %p8566_p0, %p8565_p13 }
  0x7f   : > { %p8568_p5 = pnand %p8567_p7, %p8561_p12 }
  0x81   : > { %8571 = shalt.err (!%p8568_p5)
}
  0x82   : > { %s8572_s13 = scalar_lea.vmem %s8904_s28, 32  ;;  %s8657_s6 = smov [#allocation3]  }
  0x83   : > { %p8573_p8 = scmp.ne.s32.totalorder %s8904_s28, %s8572_s13  ;;  %s8577_s24 = sshll.u32 %s8657_s6, 4  ;;  %s8578_s24 = int_to_ptr.vmem [resolvable:$false] %s8577_s24 }
  0x84   : > { %s8579_s15 = scalar_lea.vmem %s8578_s24, 64  ;;  %p8580_p4 = scmp.lt.s32.totalorder %s8904_s28, %s8578_s24 }
  0x85   : > { %p8575_p1 = pnand %p8573_p8, %p8559_p11  ;;  %p8581_p3 = scmp.lt.s32.totalorder %s8579_s15, %s8572_s13 }
  0x87   : > { %p8576_p9 = pneg %p8575_p1  ;;  %p8582_p6 = por %p8581_p3, %p8580_p4 }
  0x89   : > { %p8583_p13 = pnand %p8582_p6, %p8576_p9 }
  0x8b   : > { %8586 = shalt.err (!%p8583_p13)
}
  0x8c   : > { %8213 = dma.hbm_to_vmem [thread:$0]  (!%p8900_p10), %s8896_s17, 32, %s8904_s28, %s240_s29  }
  0x8d   : > { %p12538_p12 = scmp.ne.s32.totalorder %s12529_s26, 0 }
  0x8f   : > { %261 = sbr.rel (%p12538_p12) target bundleno = 1485 (0x5cd), region = 40 }
  0x96   : > { %s8934_s7 = sand.u32 1, %s8633_s19  }
  0x97   : > { %s7731_s30 = sshll.u32 %s8934_s7, 1  ;;  %s264_s16 = scalar_lea.sflag [#allocation4], %s8934_s7 }
  0x98   : > { %s267_s8 = scalar_lea.vmem [#allocation3], %s7731_s30 }
  0x99   : > { %8612 = dma.done.wait (%p8875_p2), %s264_s16, 32  }
  0x9a   : > { %8614 = vsyncadd (%p8875_p2), %s264_s16, 4294967264  ;;  %p12539_p4 = scmp.ne.s32.totalorder %s12528_s25, 0 }
  0x9c   : > { %8616 = dma.done.wait (%p12539_p4), [#allocation7], 1040  }
  0x9d   : > { %8618 = vsyncadd (%p12539_p4), [#allocation7], 4294966256 }
  0x9e   : > { %8620 = dma.done.wait (%p12539_p4), [#allocation10], 32  }
  0x9f   : > { %8622 = vsyncadd (%p12539_p4), [#allocation10], 4294967264  ;;  %s7736_s26 = sshll.u32 %s8934_s7, 8  ;;  %p7737_p9 = scmp.ne.s32.totalorder %s8641_s21, 0 }
  0xa0   : > { %s8951_s17 = scalar_lea.vmem [#allocation12], %s7736_s26  ;;  %vm317_vm0 = vcmask (!%p7737_p9), 1024   ;;  %v8658_v0 = vmov (!%p7737_p9), 0.0  }
  0xa1   : > { %316 = sbr.rel (%p7737_p9) target bundleno = 168 (0xa8), region = 64  ;;  %318 = vst.msk [vmem:[#allocation2] sm:$0x3] (!%p7737_p9), %vm317_vm0, %v8658_v0 }
  0xa8 PF: > { %v8302_v1 = vld [vmem:[#allocation6] sm:$0xff]   ;;  %v8659_v2 = vmov 0.0   ;;  %v8303_v3 = vld [vmem:[#allocation6 + $0x8] sm:$0xff]   ;;  %vm8660_vm1 = vmmov 0   ;;  %v8661_v4 = vmov 0   ;;  %v8304_v5 = vld [vmem:[#allocation6 + $0x10] sm:$0xff]   ;;  %v447_v15 = vlaneseq }
  0xa9   : > { %8023 = vmatprep.subr.bf16.mxu0 %v8659_v2  ;;  %8039 = vmatprep.mubr.msk.bf16.mxu0 %vm8660_vm1, %v8659_v2  ;;  %v319_v6 = vld [vmem:[%s267_s8] sm:$0x3]  ;;  %v428_v7 = vld [vmem:[#allocation2] sm:$0x3]  ;;  %v8306_v10 = vld [vmem:[#allocation6 + $0x20] sm:$0xff]   ;;  %s8663_s25 = smov 1  }
  0xaa   : > { %8024 = vmatpush3.bf16.msra.mxu0 %v8302_v1  ;;  %8301 = vset.pattern.permute.xlu0 %v8661_v4  ;;  %vm320_vm2 = vcmp.ne.s32.totalorder %v319_v6, 1  ;;  %v8305_v8 = vld [vmem:[#allocation6 + $0x18] sm:$0xff]   ;;  %v8307_v11 = vld [vmem:[#allocation6 + $0x28] sm:$0xff]   ;;  %v8308_v12 = vld [vmem:[#allocation6 + $0x30] sm:$0xff]   ;;  %v8662_v14 = vmov 1.0|1.0  }
  0xab   : > { %8025 = vmatprep.subr.bf16.mxu0 %v8659_v2  ;;  %431 = vperm.xlu0 %8301, %v428_v7   ;;  %v8955_v9 = vsel %vm320_vm2, 1.0, %v8659_v2  ;;  %v8309_v13 = vld [vmem:[#allocation6 + $0x38] sm:$0xff]   ;;  %vm7747_vm3 = vmpackc.low %vm320_vm2, %vm320_vm2  ;;  %v448_v17 = vshrl.u32 %v447_v15, 7  ;;  %v8962_v31 = vld [vmem:[#allocation8] ss:$0 sm:$0xff]  ;;  %s7551_s9 = scalar_lea.sflag [#allocation5], %s8934_s7 }
  0xac   : > { %v12303_v7 = vmov 2475754826  }
  0xad   : > { %v449_v22 = vsub.s32 0, %v448_v17  ;;  %v516_v27 = vsub.s32 1, %v448_v17 }
  0xae   : > { %8026 = vmatpush3.bf16.msra.mxu0 %v8303_v3 }
  0xaf   : > { %8027 = vmatprep.subr.bf16.mxu0 %v8659_v2  ;;  %v7354_v29 = vrot.slane %v8955_v9, %v449_v22  ;;  %v7421_v30 = vrot.slane %v8955_v9, %v516_v27 }
  0xb2   : > { %8028 = vmatpush3.bf16.msra.mxu0 %v8304_v5  ;;  %v12305_v5 = vmov 683565275  }
  0xb3   : > { %8029 = vmatprep.subr.bf16.mxu0 %v8659_v2 }
  0xb6   : > { %8030 = vmatpush3.bf16.msra.mxu0 %v8305_v8 }
  0xb7   : > { %8031 = vmatprep.subr.bf16.mxu0 %v8659_v2 }
  0xba   : > { %8032 = vmatpush3.bf16.msra.mxu0 %v8306_v10  ;;  %v12301_v10 = vmov 2131351028  }
  0xbb   : > { %8033 = vmatprep.subr.bf16.mxu0 %v8659_v2 }
  0xbe   : > { %8034 = vmatpush3.bf16.msra.mxu0 %v8307_v11 }
  0xbf   : > { %8035 = vmatprep.subr.bf16.mxu0 %v8659_v2 }
  0xc2   : > { %8036 = vmatpush3.bf16.msra.mxu0 %v8308_v12  ;;  %v12298_v12 = vmov 2102212464  }
  0xc3   : > { %8037 = vmatprep.subr.bf16.mxu0 %v8659_v2 }
  0xc6   : > { %8038 = vmatpush3.bf16.msra.mxu0 %v8309_v13 }
  0xc9   : > { %8040 = vmatmul.mubr.msk.bf16.vlgmr.msra.gmra.mrb[0].mxu0 %vm7747_vm3, %v8662_v14  ;;  %v12296_v14 = vmov 920167782  }
 0x12a   : > { %v432_v16 = vpop.permute.xlu0 %431 }
 0x19c   : > { %v422_v18 = vpop.f32.mrb[0].mxu0 }
 0x19d   : > { %v434_v19 = vadd.f32 %v432_v16, %v422_v18  ;;  %v8041_v20 = vpop.f32.mrb[1].mxu0 }
 0x19e   : > { %v425_v21 = vpop.f32.mrb[2].mxu0 }
 0x19f   : > { %v435_v23 = vmul.f32 %v8955_v9, %v434_v19  ;;  %v8042_v24 = vpop.f32.mrb[3].mxu0  ;;  %v12294_v21 = vmov 1326507024  }
 0x1a1   : > { %v436_v25 = vadd.f32 1.0, %v435_v23 }
 0x1a3   : > { %v450_v26 = vrot.slane %v436_v25, %v449_v22  ;;  %v517_v28 = vrot.slane %v436_v25, %v516_v27 }
 0x1a5   : > { %456 = vbcast.lane.b32.xlu1 %v450_v26, 264  ;;  %452 = vbcast.lane.b32.xlu0 %v450_v26, 256 }
 0x1a9   : > { %460 = vbcast.lane.b32.xlu1 %v450_v26, 272  ;;  %464 = vbcast.lane.b32.xlu0 %v450_v26, 280 }
 0x1ad   : > { %468 = vbcast.lane.b32.xlu1 %v450_v26, 288  ;;  %472 = vbcast.lane.b32.xlu0 %v450_v26, 296 }
 0x1b1   : > { %476 = vbcast.lane.b32.xlu1 %v450_v26, 304  ;;  %480 = vbcast.lane.b32.xlu0 %v450_v26, 312 }
 0x1b5   : > { %484 = vbcast.lane.b32.xlu1 %v450_v26, 320  ;;  %488 = vbcast.lane.b32.xlu0 %v450_v26, 328 }
 0x1b9   : > { %492 = vbcast.lane.b32.xlu1 %v450_v26, 336  ;;  %496 = vbcast.lane.b32.xlu0 %v450_v26, 344 }
 0x1bd   : > { %500 = vbcast.lane.b32.xlu1 %v450_v26, 352  ;;  %504 = vbcast.lane.b32.xlu0 %v450_v26, 360 }
 0x1c1   : > { %508 = vbcast.lane.b32.xlu1 %v450_v26, 368  ;;  %512 = vbcast.lane.b32.xlu0 %v450_v26, 376 }
 0x1c5   : > { %519 = vbcast.lane.b32.xlu1 %v517_v28, 256  ;;  %523 = vbcast.lane.b32.xlu0 %v517_v28, 264 }
 0x1c9   : > { %527 = vbcast.lane.b32.xlu1 %v517_v28, 272  ;;  %531 = vbcast.lane.b32.xlu0 %v517_v28, 280 }
 0x1cd   : > { %535 = vbcast.lane.b32.xlu1 %v517_v28, 288  ;;  %539 = vbcast.lane.b32.xlu0 %v517_v28, 296 }
 0x1d1   : > { %543 = vbcast.lane.b32.xlu1 %v517_v28, 304  ;;  %547 = vbcast.lane.b32.xlu0 %v517_v28, 312 }
 0x1d5   : > { %551 = vbcast.lane.b32.xlu1 %v517_v28, 320  ;;  %555 = vbcast.lane.b32.xlu0 %v517_v28, 328 }
 0x1d9   : > { %559 = vbcast.lane.b32.xlu1 %v517_v28, 336  ;;  %563 = vbcast.lane.b32.xlu0 %v517_v28, 344 }
 0x1dd   : > { %567 = vbcast.lane.b32.xlu1 %v517_v28, 352  ;;  %571 = vbcast.lane.b32.xlu0 %v517_v28, 360 }
 0x1e1   : > { %575 = vbcast.lane.b32.xlu1 %v517_v28, 368  ;;  %579 = vbcast.lane.b32.xlu0 %v517_v28, 376 }
 0x1e5   : > { %438 = vrot.lane.b32.xlu1 %v422_v18, %s8663_s25  ;;  %7356 = vbcast.lane.b32.xlu0 %v7354_v29, 256 }
 0x1e9   : > { %7360 = vbcast.lane.b32.xlu1 %v7354_v29, 264  ;;  %7364 = vbcast.lane.b32.xlu0 %v7354_v29, 272 }
 0x1ed   : > { %7368 = vbcast.lane.b32.xlu1 %v7354_v29, 280  ;;  %7372 = vbcast.lane.b32.xlu0 %v7354_v29, 288 }
 0x1f1   : > { %7376 = vbcast.lane.b32.xlu1 %v7354_v29, 296  ;;  %7380 = vbcast.lane.b32.xlu0 %v7354_v29, 304 }
 0x1f5   : > { %7384 = vbcast.lane.b32.xlu1 %v7354_v29, 312  ;;  %7388 = vbcast.lane.b32.xlu0 %v7354_v29, 320 }
 0x1f9   : > { %7392 = vbcast.lane.b32.xlu1 %v7354_v29, 328  ;;  %7396 = vbcast.lane.b32.xlu0 %v7354_v29, 336 }
 0x1fd   : > { %7400 = vbcast.lane.b32.xlu1 %v7354_v29, 344  ;;  %7404 = vbcast.lane.b32.xlu0 %v7354_v29, 352 }
 0x201   : > { %7408 = vbcast.lane.b32.xlu1 %v7354_v29, 360  ;;  %7412 = vbcast.lane.b32.xlu0 %v7354_v29, 368 }
 0x205   : > { %7416 = vbcast.lane.b32.xlu1 %v7354_v29, 376  ;;  %7423 = vbcast.lane.b32.xlu0 %v7421_v30, 256 }
 0x209   : > { %7427 = vbcast.lane.b32.xlu1 %v7421_v30, 264  ;;  %7431 = vbcast.lane.b32.xlu0 %v7421_v30, 272 }
 0x20d   : > { %7435 = vbcast.lane.b32.xlu1 %v7421_v30, 280  ;;  %7439 = vbcast.lane.b32.xlu0 %v7421_v30, 288 }
 0x211   : > { %7443 = vbcast.lane.b32.xlu1 %v7421_v30, 296  ;;  %7447 = vbcast.lane.b32.xlu0 %v7421_v30, 304 }
 0x215   : > { %7451 = vbcast.lane.b32.xlu1 %v7421_v30, 312  ;;  %7455 = vbcast.lane.b32.xlu0 %v7421_v30, 320 }
 0x217   : > { %v457_v32 = vpop.permute.xlu1 %456  ;;  %v453_v33 = vpop.permute.xlu0 %452 }
 0x218   : > { %v8965_v34 = vmul.f32 %v8962_v31, %v457_v32  ;;  %v8968_v35 = vmul.f32 %v8962_v31, %v453_v33 }
 0x219   : > { %7459 = vbcast.lane.b32.xlu1 %v7421_v30, 328  ;;  %7463 = vbcast.lane.b32.xlu0 %v7421_v30, 336 }
 0x21a   : > { %v723_v36 = vand.u32 2147483647, %v8965_v34  ;;  %v726_v37 = vand.u32 2139095040, %v8965_v34  ;;  %v619_v38 = vand.u32 2147483647, %v8968_v35  ;;  %v622_v39 = vand.u32 2139095040, %v8968_v35 }
 0x21b   : > { %v461_v40 = vpop.permute.xlu1 %460  ;;  %v465_v52 = vpop.permute.xlu0 %464 }
 0x21c   : > { %v727_v41 = vshrl.u32 %v726_v37, 23  ;;  %v730_v42 = vand.u32 8388607, %v723_v36  ;;  %v8977_v43 = vmul.f32 %v8962_v31, %v461_v40  ;;  %v623_v44 = vshrl.u32 %v622_v39, 23 }
 0x21d   : > { %v626_v45 = vand.u32 8388607, %v619_v38  ;;  %7467 = vbcast.lane.b32.xlu1 %v7421_v30, 344  ;;  %7471 = vbcast.lane.b32.xlu0 %v7421_v30, 352  ;;  %v8988_v59 = vmul.f32 %v8962_v31, %v465_v52 }
 0x21e   : > { %12540 = vst [vmem:[#allocation19_spill] sm:$0xff] %v8977_v43  ;;  %v7754_v46 = vadd.s32 4294967169, %v727_v41  ;;  %v827_v47 = vand.u32 2147483647, %v8977_v43  ;;  %v7750_v48 = vadd.s32 4294967169, %v623_v44  ;;  %v830_v49 = vand.u32 2139095040, %v8977_v43 }
 0x21f   : > { %v731_v50 = vor.u32 8388608, %v730_v42  ;;  %v627_v53 = vor.u32 8388608, %v626_v45  ;;  %12541 = vst [vmem:[#allocation20_spill] sm:$0xff] %v8988_v59 }
 0x220   : > { %v733_v51 = vadd.s32 1, %v7754_v46  ;;  %v629_v54 = vadd.s32 1, %v7750_v48  ;;  %v831_v55 = vshrl.u32 %v830_v49, 23  ;;  %v8985_v56 = vand.u32 8388607, %v827_v47 }
 0x221   : > { %7475 = vbcast.lane.b32.xlu1 %v7421_v30, 360  ;;  %7479 = vbcast.lane.b32.xlu0 %v7421_v30, 368  ;;  %v8990_v62 = vshll.u32 %v731_v50, 8  ;;  %v8996_v2 = vshll.u32 %v627_v53, 8 }
 0x222   : > { %vm734_vm4 = vcmp.gt.s32.totalorder %v733_v51, 0  ;;  %vm630_vm5 = vcmp.gt.s32.totalorder %v629_v54, 0  ;;  %v7758_v58 = vadd.s32 4294967169, %v831_v55  ;;  %v835_v3 = vor.u32 8388608, %v8985_v56 }
 0x223   : > { %v735_v57 = vsel %vm734_vm4, %v733_v51, 0  ;;  %v631_v63 = vsel %vm630_vm5, %v629_v54, 0 }
 0x224   : > { %v736_v60 = vshrl.u32 %v735_v57, 5  ;;  %v737_v61 = vand.u32 31, %v735_v57  ;;  %v8992_v0 = vshrl.u32 %v631_v63, 5  ;;  %v8994_v1 = vand.u32 31, %v631_v63 }
 0x225   : > { %7483 = vbcast.lane.b32.xlu1 %v7421_v30, 376  ;;  %v9001_v9 = vadd.s32 1, %v7758_v58 }
 0x226   : > { %v738_v4 = vsub.s32 32, %v737_v61  ;;  %v740_v6 = vshll.u32 %v12305_v5, %v737_v61  ;;  %v743_v8 = vshll.u32 %v12303_v7, %v737_v61  ;;  %v746_v11 = vshll.u32 %v12301_v10, %v737_v61 }
 0x227   : > { %v749_v13 = vshll.u32 %v12298_v12, %v737_v61  ;;  %v752_v15 = vshll.u32 %v12296_v14, %v737_v61  ;;  %vm755_vm6 = vcmp.lt.s32.totalorder %v736_v60, 1  ;;  %vm756_vm7 = vcmp.lt.s32.totalorder %v736_v60, 2 }
 0x228   : > { %v741_v16 = vshrl.u32 %v12303_v7, %v738_v4  ;;  %v744_v17 = vshrl.u32 %v12301_v10, %v738_v4  ;;  %v747_v18 = vshrl.u32 %v12298_v12, %v738_v4  ;;  %v739_v19 = vshrl.u32 %v12305_v5, %v738_v4 }
 0x229   : > { %v750_v20 = vshrl.u32 %v12296_v14, %v738_v4  ;;  %v753_v22 = vshrl.u32 %v12294_v21, %v738_v4  ;;  %vm757_vm8 = vcmp.lt.s32.totalorder %v736_v60, 3  ;;  %v634_v26 = vsub.s32 32, %v8994_v1 }
 0x22a   : > { %v742_v23 = vor.u32 %v741_v16, %v740_v6  ;;  %v745_v24 = vor.u32 %v744_v17, %v743_v8  ;;  %v748_v25 = vor.u32 %v747_v18, %v746_v11  ;;  %vm758_vm9 = vcmp.lt.s32.totalorder %v736_v60, 4 }
 0x22b   : > { %v751_v27 = vor.u32 %v750_v20, %v749_v13  ;;  %v754_v28 = vor.u32 %v753_v22, %v752_v15  ;;  %v636_v29 = vshll.u32 %v12305_v5, %v8994_v1  ;;  %v639_v42 = vshll.u32 %v12303_v7, %v8994_v1 }
 0x22c   : > { %v759_v30 = vsel %vm755_vm6, %v739_v19, %v742_v23  ;;  %v760_v32 = vsel %vm758_vm9, %v748_v25, 2102212464  ;;  %v763_v33 = vsel %vm755_vm6, %v742_v23, %v745_v24  ;;  %v767_v37 = vsel %vm755_vm6, %v745_v24, %v748_v25 }
 0x22d   : > { %v761_v39 = vsel %vm757_vm8, %v745_v24, %v760_v32  ;;  %v764_v40 = vsel %vm758_vm9, %v751_v27, 920167782  ;;  %v768_v41 = vsel %vm758_vm9, %v754_v28, 1326507024  ;;  %v635_v46 = vshrl.u32 %v12305_v5, %v634_v26 }
 0x22e   : > { %v765_v44 = vsel %vm757_vm8, %v748_v25, %v764_v40  ;;  %v769_v45 = vsel %vm757_vm8, %v751_v27, %v768_v41  ;;  %v637_v48 = vshrl.u32 %v12303_v7, %v634_v26  ;;  %v762_v49 = vsel %vm756_vm7, %v759_v30, %v761_v39 }
 0x22f   : > { %v766_v50 = vsel %vm756_vm7, %v763_v33, %v765_v44  ;;  %v770_v51 = vsel %vm756_vm7, %v767_v37, %v769_v45  ;;  %v640_v52 = vshrl.u32 %v12301_v10, %v634_v26  ;;  %v642_v63 = vshll.u32 %v12301_v10, %v8994_v1 }
 0x230   : > { %v9030_v53 = vmul.u32.u64.low %v8990_v62, %v770_v51  ;;  %v9031_v54 = vmul.u32.u64.high %v8990_v62, %v770_v51, %v9030_v53  ;;  %v9034_v55 = vmul.u32.u64.low %v8990_v62, %v766_v50  ;;  %v9035_v57 = vmul.u32.u64.high %v8990_v62, %v766_v50, %v9034_v55 }
 0x231   : > { %v638_v58 = vor.u32 %v637_v48, %v636_v29  ;;  %v641_v61 = vor.u32 %v640_v52, %v639_v42  ;;  %v643_v4 = vshrl.u32 %v12298_v12, %v634_v26  ;;  %v778_v60 = vmul.u32 %v8990_v62, %v762_v49 }
 0x232   : > { %v645_v6 = vshll.u32 %v12298_v12, %v8994_v1  ;;  %v646_v8 = vshrl.u32 %v12296_v14, %v634_v26  ;;  %v649_v11 = vshrl.u32 %v12294_v21, %v634_v26  ;;  %v648_v15 = vshll.u32 %v12296_v14, %v8994_v1 }
 0x233   : > { %v644_v13 = vor.u32 %v643_v4, %v642_v63  ;;  %vm651_vm10 = vcmp.lt.s32.totalorder %v8992_v0, 1  ;;  %vm652_vm11 = vcmp.lt.s32.totalorder %v8992_v0, 2  ;;  %vm780_vm12 = vc.u32 %v9031_v54, %v9034_v55 }
 0x234   : > { %v781_v62 = vadd.s32 1, %v9035_v57  ;;  %v647_v16 = vor.u32 %v646_v8, %v645_v6  ;;  %vm653_vm13 = vcmp.lt.s32.totalorder %v8992_v0, 3  ;;  %v650_v17 = vor.u32 %v649_v11, %v648_v15 }
 0x235   : > { %vm654_vm14 = vcmp.lt.s32.totalorder %v8992_v0, 4  ;;  %v655_v18 = vsel %vm651_vm10, %v635_v46, %v638_v58  ;;  %v659_v19 = vsel %vm651_vm10, %v638_v58, %v641_v61  ;;  %v663_v23 = vsel %vm651_vm10, %v641_v61, %v644_v13 }
 0x236   : > { %v782_v20 = vsel %vm780_vm12, %v781_v62, %v9035_v57  ;;  %v656_v1 = vsel %vm654_vm14, %v644_v13, 2102212464  ;;  %v660_v22 = vsel %vm654_vm14, %v647_v16, 920167782  ;;  %v664_v27 = vsel %vm654_vm14, %v650_v17, 1326507024 }
 0x237   : > { %v783_v24 = vadd.s32 %v782_v20, %v778_v60  ;;  %v657_v25 = vsel %vm653_vm13, %v641_v61, %v656_v1  ;;  %v661_v26 = vsel %vm653_vm13, %v644_v13, %v660_v22  ;;  %v665_v29 = vsel %vm653_vm13, %v647_v16, %v664_v27 }
 0x238   : > { %v662_v28 = vsel %vm652_vm11, %v659_v19, %v661_v26  ;;  %vm838_vm15 = vcmp.gt.s32.totalorder %v9001_v9, 0  ;;  %v934_v30 = vand.u32 2139095040, %v8988_v59  ;;  %v666_v33 = vsel %vm652_vm11, %v663_v23, %v665_v29 }
 0x239   : > { %v784_v32 = vadd.s32 536870912, %v783_v24  ;;  %v9063_v37 = vmul.u32.u64.low %v8996_v2, %v662_v28  ;;  %v9064_v39 = vmul.u32.u64.high %v8996_v2, %v662_v28, %v9063_v37  ;;  %v658_v40 = vsel %vm652_vm11, %v655_v18, %v657_v25 }
 0x23a   : > { %v9070_v41 = vmul.u32.u64.low %v8996_v2, %v666_v33  ;;  %v9071_v42 = vmul.u32.u64.high %v8996_v2, %v666_v33, %v9070_v41  ;;  %v839_v44 = vsel %vm838_vm15, %v9001_v9, 0  ;;  %v9078_v48 = vshll.u32 %v835_v3, 8 }
 0x23b   : > { %v9074_v45 = vshrl.u32 %v784_v32, 30  ;;  %v841_v46 = vand.u32 31, %v839_v44  ;;  %v935_v49 = vshrl.u32 %v934_v30, 23  ;;  %v674_v51 = vmul.u32 %v8996_v2, %v658_v40 }
 0x23c   : > { %v677_v0 = vadd.s32 1, %v9064_v39  ;;  %vm676_vm0 = vc.u32 %v9071_v42, %v9063_v37  ;;  %v840_v53 = vshrl.u32 %v839_v44, 5 }
 0x23d   : > { %v786_v50 = vshll.u32 %v9074_v45, 30  ;;  %v842_v52 = vsub.s32 32, %v841_v46  ;;  %v844_v9 = vshll.u32 %v12305_v5, %v841_v46  ;;  %v847_v57 = vshll.u32 %v12303_v7, %v841_v46 }
 0x23e   : > { %v678_v56 = vsel %vm676_vm0, %v677_v0, %v9064_v39  ;;  %v850_v61 = vshll.u32 %v12301_v10, %v841_v46  ;;  %v853_v60 = vshll.u32 %v12298_v12, %v841_v46  ;;  %v856_v13 = vshll.u32 %v12296_v14, %v841_v46 }
 0x23f   : > { %v9087_v58 = vsub.s32 %v783_v24, %v786_v50  ;;  %v845_v3 = vshrl.u32 %v12303_v7, %v842_v52  ;;  %v679_v2 = vadd.s32 %v678_v56, %v674_v51  ;;  %v848_v63 = vshrl.u32 %v12301_v10, %v842_v52 }
 0x240   : > { %v851_v4 = vshrl.u32 %v12298_v12, %v842_v52  ;;  %v854_v11 = vshrl.u32 %v12296_v14, %v842_v52  ;;  %v857_v17 = vshrl.u32 %v12294_v21, %v842_v52  ;;  %v843_v19 = vshrl.u32 %v12305_v5, %v842_v52 }
 0x241   : > { %v789_v6 = vsub.s32 0, %v9087_v58  ;;  %v846_v8 = vor.u32 %v845_v3, %v844_v9  ;;  %v680_v15 = vadd.s32 536870912, %v679_v2  ;;  %v849_v62 = vor.u32 %v848_v63, %v847_v57 }
 0x242   : > { %v852_v16 = vor.u32 %v851_v4, %v850_v61  ;;  %v855_v20 = vor.u32 %v854_v11, %v853_v60  ;;  %v7762_v1 = vadd.s32 4294967169, %v935_v49  ;;  %v858_v23 = vor.u32 %v857_v17, %v856_v13 }
 0x243   : > { %v7755_v18 = vmin.u32 %v789_v6, %v9087_v58  ;;  %v9101_v22 = vshrl.u32 %v680_v15, 30  ;;  %vm859_vm1 = vcmp.lt.s32.totalorder %v840_v53, 1  ;;  %vm862_vm2 = vcmp.lt.s32.totalorder %v840_v53, 4 }
 0x244   : > { %vm860_vm3 = vcmp.lt.s32.totalorder %v840_v53, 2  ;;  %v864_v25 = vsel %vm862_vm2, %v852_v16, 2102212464  ;;  %v867_v26 = vsel %vm859_vm1, %v846_v8, %v849_v62  ;;  %vm861_vm4 = vcmp.lt.s32.totalorder %v840_v53, 3 }
 0x245   : > { %v791_v24 = vclz %v7755_v18  ;;  %v682_v27 = vshll.u32 %v9101_v22, 30  ;;  %v868_v28 = vsel %vm862_vm2, %v855_v20, 920167782  ;;  %v871_v29 = vsel %vm859_vm1, %v849_v62, %v852_v16 }
 0x246   : > { %v863_v32 = vsel %vm859_vm1, %v843_v19, %v846_v8  ;;  %v869_v33 = vsel %vm861_vm4, %v852_v16, %v868_v28  ;;  %v872_v39 = vsel %vm862_vm2, %v858_v23, 1326507024  ;;  %v865_v41 = vsel %vm861_vm4, %v849_v62, %v864_v25 }
 0x247   : > { %v7756_v30 = vadd.s32 4294967294, %v791_v24  ;;  %v9104_v40 = vsub.s32 %v679_v2, %v682_v27  ;;  %v870_v44 = vsel %vm860_vm3, %v867_v26, %v869_v33  ;;  %v873_v46 = vsel %vm861_vm4, %v855_v20, %v872_v39 }
 0x248   : > { %v874_v49 = vsel %vm860_vm3, %v871_v29, %v873_v46  ;;  %v9109_v50 = vmul.u32.u64.low %v9078_v48, %v870_v44  ;;  %v9110_v51 = vmul.u32.u64.high %v9078_v48, %v870_v44, %v9109_v50  ;;  %v866_v57 = vsel %vm860_vm3, %v863_v32, %v865_v41  ;;  %v469_v29 = vpop.permute.xlu1 %468 }
 0x249   : > { %v685_v0 = vsub.s32 0, %v9104_v40  ;;  %v9115_v52 = vmul.u32.u64.low %v9078_v48, %v874_v49  ;;  %v9116_v9 = vmul.u32.u64.high %v9078_v48, %v874_v49, %v9115_v52  ;;  %vm7757_vm5 = vcmp.lt.s32.totalorder %v7756_v30, 0 }
 0x24a   : > { %v941_v56 = vadd.s32 1, %v7762_v1  ;;  %v885_v61 = vadd.s32 1, %v9110_v51  ;;  %v12292_v2 = vand.u32 2147483647, %v8988_v59  ;;  %v9122_v63 = vsel %vm7757_vm5, 0, %v7756_v30 }
 0x24b   : > { %v7751_v3 = vmin.u32 %v685_v0, %v9104_v40  ;;  %v882_v4 = vmul.u32 %v9078_v48, %v866_v57  ;;  %vm884_vm7 = vc.u32 %v9116_v9, %v9109_v50  ;;  %v799_v13 = vsub.s32 4294967266, %v9122_v63 }
 0x24c   : > { %vm942_vm6 = vcmp.gt.s32.totalorder %v941_v56, 0  ;;  %v886_v53 = vsel %vm884_vm7, %v885_v61, %v9110_v51  ;;  %v938_v15 = vand.u32 8388607, %v12292_v2  ;;  %v779_v48 = vadd.s32 %v9034_v55, %v9031_v54 }
 0x24d   : > { %v943_v60 = vsel %vm942_vm6, %v941_v56, 0  ;;  %v687_v6 = vclz %v7751_v3  ;;  %v887_v8 = vadd.s32 %v886_v53, %v882_v4  ;;  %v800_v19 = vadd.s32 127, %v799_v13 }
 0x24e   : > { %v945_v11 = vand.u32 31, %v943_v60  ;;  %v939_v20 = vor.u32 8388608, %v938_v15  ;;  %v795_v28 = vsub.s32 32, %v9122_v63  ;;  %v944_v54 = vshrl.u32 %v943_v60, 5 }
 0x24f   : > { %v888_v62 = vadd.s32 536870912, %v887_v8  ;;  %v7752_v17 = vadd.s32 4294967294, %v687_v6  ;;  %v796_v51 = vshll.u32 %v9087_v58, %v9122_v63  ;;  %v801_v0 = vshll.u32 %v800_v19, 23 }
 0x250   : > { %v946_v16 = vsub.s32 32, %v945_v11  ;;  %v948_v25 = vshll.u32 %v12305_v5, %v945_v11  ;;  %v951_v26 = vshll.u32 %v12303_v7, %v945_v11  ;;  %v954_v55 = vshll.u32 %v12301_v10, %v945_v11 }
 0x251   : > { %v9133_v18 = vshrl.u32 %v888_v62, 30  ;;  %vm7753_vm8 = vcmp.lt.s32.totalorder %v7752_v17, 0  ;;  %v957_v39 = vshll.u32 %v12298_v12, %v945_v11  ;;  %v960_v46 = vshll.u32 %v12296_v14, %v945_v11 }
 0x252   : > { %v949_v1 = vshrl.u32 %v12303_v7, %v946_v16  ;;  %v952_v23 = vshrl.u32 %v12301_v10, %v946_v16  ;;  %v955_v27 = vshrl.u32 %v12298_v12, %v946_v16  ;;  %v958_v44 = vshrl.u32 %v12296_v14, %v946_v16 }
 0x253   : > { %12542 = vst [vmem:[#allocation21_spill] sm:$0xff] %v9133_v18  ;;  %v890_v24 = vshll.u32 %v9133_v18, 30  ;;  %v961_v49 = vshrl.u32 %v12294_v21, %v946_v16  ;;  %v9153_v57 = vmul.f32 %v8962_v31, %v469_v29  ;;  %v797_v56 = vshrl.u32 %v779_v48, %v795_v28 }
 0x254   : > { %v950_v32 = vor.u32 %v949_v1, %v948_v25  ;;  %v953_v33 = vor.u32 %v952_v23, %v951_v26  ;;  %v956_v41 = vor.u32 %v955_v27, %v954_v55  ;;  %v959_v3 = vor.u32 %v958_v44, %v957_v39 }
 0x255   : > { %v9143_v30 = vsub.s32 %v887_v8, %v890_v24  ;;  %12543 = vst [vmem:[#allocation22_spill] sm:$0xff] %v9153_v57  ;;  %v962_v61 = vor.u32 %v961_v49, %v960_v46  ;;  %v979_v4 = vshll.u32 %v939_v20, 8  ;;  %v690_v60 = vsel %vm7753_vm8, 0, %v7752_v17 }
 0x256   : > { %vm963_vm9 = vcmp.lt.s32.totalorder %v944_v54, 1  ;;  %vm966_vm10 = vcmp.lt.s32.totalorder %v944_v54, 4  ;;  %vm965_vm11 = vcmp.lt.s32.totalorder %v944_v54, 3  ;;  %v802_v63 = vor.u32 4788187, %v801_v0 }
 0x257   : > { %v893_v52 = vsub.s32 0, %v9143_v30  ;;  %v968_v53 = vsel %vm966_vm10, %v956_v41, 2102212464  ;;  %v971_v8 = vsel %vm963_vm9, %v950_v32, %v953_v33  ;;  %v972_v58 = vsel %vm966_vm10, %v959_v3, 920167782 }
 0x258   : > { %v947_v11 = vshrl.u32 %v12305_v5, %v946_v16  ;;  %vm964_vm12 = vcmp.lt.s32.totalorder %v944_v54, 2  ;;  %v973_v13 = vsel %vm965_vm11, %v956_v41, %v972_v58  ;;  %v975_v48 = vsel %vm963_vm9, %v953_v33, %v956_v41  ;;  %v477_v58 = vpop.permute.xlu1 %476 }
 0x259   : > { %v7759_v6 = vmin.u32 %v893_v52, %v9143_v30  ;;  %v974_v62 = vsel %vm964_vm12, %v971_v8, %v973_v13  ;;  %v976_v19 = vsel %vm966_vm10, %v962_v61, 1326507024  ;;  %v695_v20 = vsub.s32 4294967266, %v690_v60 }
 0x25a   : > { %v967_v17 = vsel %vm963_vm9, %v947_v11, %v950_v32  ;;  %v969_v1 = vsel %vm965_vm11, %v953_v33, %v968_v53  ;;  %v977_v23 = vsel %vm965_vm11, %v959_v3, %v976_v19  ;;  %v1038_v27 = vand.u32 2139095040, %v9153_v57 }
 0x25b   : > { %v895_v15 = vclz %v7759_v6  ;;  %v978_v24 = vsel %vm964_vm12, %v975_v48, %v977_v23  ;;  %v9160_v25 = vmul.u32.u64.low %v979_v4, %v974_v62  ;;  %v9161_v26 = vmul.u32.u64.high %v979_v4, %v974_v62, %v9160_v25 }
 0x25c   : > { %v798_v16 = vor.u32 %v797_v56, %v796_v51  ;;  %v9165_v28 = vmul.u32.u64.low %v979_v4, %v978_v24  ;;  %v9166_v55 = vmul.u32.u64.high %v979_v4, %v978_v24, %v9165_v28  ;;  %v970_v39 = vsel %vm964_vm12, %v967_v17, %v969_v1  ;;  %v473_v51 = vpop.permute.xlu0 %472 }
 0x25d   : > { %v7760_v29 = vadd.s32 4294967294, %v895_v15  ;;  %v1039_v41 = vshrl.u32 %v1038_v27, 23  ;;  %v803_v44 = vand.u32 2147483647, %v802_v63  ;;  %v691_v32 = vsub.s32 32, %v690_v60 }
 0x25e   : > { %v696_v33 = vadd.s32 127, %v695_v20  ;;  %v989_v46 = vadd.s32 1, %v9161_v26  ;;  %v805_v0 = vcvt.s32.f32 %v798_v16  ;;  %v675_v52 = vadd.s32 %v9063_v37, %v9071_v42 }
 0x25f   : > { %v7766_v49 = vadd.s32 4294967169, %v1039_v41  ;;  %v986_v3 = vmul.u32 %v979_v4, %v970_v39  ;;  %vm988_vm13 = vc.u32 %v9166_v55, %v9160_v25  ;;  %vm7761_vm14 = vcmp.lt.s32.totalorder %v7760_v29, 0 }
 0x260   : > { %v990_v54 = vsel %vm988_vm13, %v989_v46, %v9161_v26  ;;  %v9175_v61 = vmul.f32 %v805_v0, %v803_v44  ;;  %v693_v6 = vshrl.u32 %v675_v52, %v691_v32  ;;  %v697_v53 = vshll.u32 %v696_v33, 23 }
 0x261   : > { %v1045_v56 = vadd.s32 1, %v7766_v49  ;;  %v991_v8 = vadd.s32 %v990_v54, %v986_v3  ;;  %v12291_v63 = vand.u32 2147483647, %v9153_v57  ;;  %v9179_v37 = vmul.f32 %v8962_v31, %v473_v51 }
 0x262   : > { %v692_v42 = vshll.u32 %v9104_v40, %v690_v60  ;;  %v9182_v4 = vsel %vm7761_vm14, 0, %v7760_v29  ;;  %v9185_v62 = vmul.f32 %v8962_v31, %v477_v58  ;;  %v807_v48 = vxor.u32 2147483648, %v9175_v61 }
 0x263   : > { %vm1046_vm15 = vcmp.gt.s32.totalorder %v1045_v56, 0  ;;  %v992_v11 = vadd.s32 536870912, %v991_v8  ;;  %v698_v20 = vor.u32 4788187, %v697_v53  ;;  %v903_v1 = vsub.s32 4294967266, %v9182_v4 }
 0x264   : > { %v1047_v13 = vsel %vm1046_vm15, %v1045_v56, 0  ;;  %12544 = vst [vmem:[#allocation23_spill] sm:$0xff] %v9185_v62  ;;  %v9188_v19 = vor.u32 %v693_v6, %v692_v42  ;;  %v1042_v40 = vand.u32 8388607, %v12291_v63  ;;  %v1142_v23 = vand.u32 2139095040, %v9179_v37 }
 0x265   : > { %v1049_v15 = vand.u32 31, %v1047_v13  ;;  %v9190_v17 = vshrl.u32 %v992_v11, 30  ;;  %v1048_v26 = vshrl.u32 %v1047_v13, 5  ;;  %vm12374_vm0 = vcmp.lt.s32.totalorder %v8965_v34, 0 }
 0x266   : > { %v699_v51 = vand.u32 2147483647, %v698_v20  ;;  %v1043_v56 = vor.u32 8388608, %v1042_v40  ;;  %v899_v53 = vsub.s32 32, %v9182_v4  ;;  %v1143_v42 = vshrl.u32 %v1142_v23, 23 }
 0x267   : > { %12545 = vst [vmem:[#allocation24_spill] sm:$0xff] %v9190_v17  ;;  %v1050_v60 = vsub.s32 32, %v1049_v15  ;;  %v994_v24 = vshll.u32 %v9190_v17, 30  ;;  %v1052_v27 = vshll.u32 %v12305_v5, %v1049_v15  ;;  %v1055_v16 = vshll.u32 %v12303_v7, %v1049_v15 }
 0x268   : > { %v1058_v39 = vshll.u32 %v12301_v10, %v1049_v15  ;;  %v1061_v32 = vshll.u32 %v12298_v12, %v1049_v15  ;;  %v1064_v3 = vshll.u32 %v12296_v14, %v1049_v15  ;;  %vm1067_vm1 = vcmp.lt.s32.totalorder %v1048_v26, 1 }
 0x269   : > { %v1053_v28 = vshrl.u32 %v12303_v7, %v1050_v60  ;;  %v1056_v29 = vshrl.u32 %v12301_v10, %v1050_v60  ;;  %v1059_v41 = vshrl.u32 %v12298_v12, %v1050_v60  ;;  %v9203_v44 = vsub.s32 %v991_v8, %v994_v24 }
 0x26a   : > { %v1062_v33 = vshrl.u32 %v12296_v14, %v1050_v60  ;;  %v1065_v46 = vshrl.u32 %v12294_v21, %v1050_v60  ;;  %v904_v8 = vadd.s32 127, %v903_v1  ;;  %v1051_v11 = vshrl.u32 %v12305_v5, %v1050_v60 }
 0x26b   : > { %v1054_v49 = vor.u32 %v1053_v28, %v1052_v27  ;;  %v1057_v0 = vor.u32 %v1056_v29, %v1055_v16  ;;  %v1060_v52 = vor.u32 %v1059_v41, %v1058_v39  ;;  %v997_v54 = vsub.s32 0, %v9203_v44 }
 0x26c   : > { %v1063_v6 = vor.u32 %v1062_v33, %v1061_v32  ;;  %v1066_v58 = vor.u32 %v1065_v46, %v1064_v3  ;;  %vm1069_vm2 = vcmp.lt.s32.totalorder %v1048_v26, 3  ;;  %vm1070_vm3 = vcmp.lt.s32.totalorder %v1048_v26, 4 }
 0x26d   : > { %v7763_v13 = vmin.u32 %v997_v54, %v9203_v44  ;;  %v1072_v15 = vsel %vm1070_vm3, %v1060_v52, 2102212464  ;;  %v1075_v24 = vsel %vm1067_vm1, %v1054_v49, %v1057_v0  ;;  %vm1068_vm4 = vcmp.lt.s32.totalorder %v1048_v26, 2 }
 0x26e   : > { %v1076_v27 = vsel %vm1070_vm3, %v1063_v6, 920167782  ;;  %v1079_v16 = vsel %vm1067_vm1, %v1057_v0, %v1060_v52  ;;  %v1083_v40 = vshll.u32 %v1043_v56, 8  ;;  %v1071_v28 = vsel %vm1067_vm1, %v1051_v11, %v1054_v49 }
 0x26f   : > { %v1077_v20 = vsel %vm1069_vm2, %v1060_v52, %v1076_v27  ;;  %v1080_v1 = vsel %vm1070_vm3, %v1066_v58, 1326507024  ;;  %v7770_v39 = vadd.s32 4294967169, %v1143_v42  ;;  %v1073_v23 = vsel %vm1069_vm2, %v1057_v0, %v1072_v15 }
 0x270   : > { %v1078_v29 = vsel %vm1068_vm4, %v1075_v24, %v1077_v20  ;;  %v1081_v41 = vsel %vm1069_vm2, %v1063_v6, %v1080_v1  ;;  %v999_v33 = vclz %v7763_v13  ;;  %v12290_v3 = vand.u32 2147483647, %v9179_v37 }
 0x271   : > { %v9215_v60 = vmul.u32.u64.low %v1083_v40, %v1078_v29  ;;  %v9216_v32 = vmul.u32.u64.high %v1083_v40, %v1078_v29, %v9215_v60  ;;  %v1082_v46 = vsel %vm1068_vm4, %v1079_v16, %v1081_v41  ;;  %v1149_v54 = vadd.s32 1, %v7770_v39 }
 0x272   : > { %v701_v52 = vcvt.s32.f32 %v9188_v19  ;;  %v883_v49 = vadd.s32 %v9109_v50, %v9116_v9  ;;  %v9224_v56 = vmul.u32.u64.low %v1083_v40, %v1082_v46  ;;  %v9225_v58 = vmul.u32.u64.high %v1083_v40, %v1082_v46, %v9224_v56 }
 0x273   : > { %v808_v0 = vsel %vm12374_vm0, %v807_v48, %v9175_v61  ;;  %v1074_v6 = vsel %vm1068_vm4, %v1071_v28, %v1073_v23  ;;  %vm1150_vm5 = vcmp.gt.s32.totalorder %v1149_v54, 0  ;;  %v905_v13 = vshll.u32 %v904_v8, 23 }
 0x274   : > { %v9231_v42 = vmul.f32 %v701_v52, %v699_v51  ;;  %v901_v11 = vshrl.u32 %v883_v49, %v899_v53  ;;  %v1093_v15 = vadd.s32 1, %v9216_v32  ;;  %v7764_v19 = vadd.s32 4294967294, %v999_v33 }
 0x275   : > { %v1146_v50 = vand.u32 8388607, %v12290_v3  ;;  %v1151_v9 = vsel %vm1150_vm5, %v1149_v54, 0  ;;  %v1246_v24 = vand.u32 2139095040, %v9185_v62  ;;  %vm9239_vm6 = vcmp.le.f32.partialorder %v723_v36, 0.7853982 }
 0x276   : > { %v900_v48 = vshll.u32 %v9143_v30, %v9182_v4  ;;  %v1090_v26 = vmul.u32 %v1083_v40, %v1074_v6  ;;  %vm1092_vm7 = vc.u32 %v9225_v58, %v9215_v60  ;;  %v9250_v51 = vsel %vm9239_vm6, %v8965_v34, %v808_v0 }
 0x277   : > { %v1094_v53 = vsel %vm1092_vm7, %v1093_v15, %v9216_v32  ;;  %v1153_v8 = vand.u32 31, %v1151_v9  ;;  %v703_v36 = vxor.u32 2147483648, %v9231_v42  ;;  %v906_v20 = vor.u32 4788187, %v905_v13 }
 0x278   : > { %v902_v27 = vor.u32 %v901_v11, %v900_v48  ;;  %v1095_v16 = vadd.s32 %v1094_v53, %v1090_v26  ;;  %vm7765_vm8 = vcmp.lt.s32.totalorder %v7764_v19, 0  ;;  %v1147_v28 = vor.u32 8388608, %v1146_v50 }
 0x279   : > { %v1154_v30 = vsub.s32 32, %v1153_v8  ;;  %v1247_v4 = vshrl.u32 %v1246_v24, 23  ;;  %v1152_v29 = vshrl.u32 %v1151_v9, 5  ;;  %v1156_v1 = vshll.u32 %v12305_v5, %v1153_v8 }
 0x27a   : > { %v1096_v40 = vadd.s32 536870912, %v1095_v16  ;;  %v1159_v39 = vshll.u32 %v12303_v7, %v1153_v8  ;;  %v1162_v32 = vshll.u32 %v12301_v10, %v1153_v8  ;;  %v1165_v54 = vshll.u32 %v12298_v12, %v1153_v8 }
 0x27b   : > { %v1157_v23 = vshrl.u32 %v12303_v7, %v1154_v30  ;;  %v1160_v41 = vshrl.u32 %v12301_v10, %v1154_v30  ;;  %v1163_v33 = vshrl.u32 %v12298_v12, %v1154_v30  ;;  %v1166_v52 = vshrl.u32 %v12296_v14, %v1154_v30 }
 0x27c   : > { %v9260_v46 = vshrl.u32 %v1096_v40, 30  ;;  %v1168_v49 = vshll.u32 %v12296_v14, %v1153_v8  ;;  %v1169_v11 = vshrl.u32 %v12294_v21, %v1154_v30  ;;  %v907_v13 = vand.u32 2147483647, %v906_v20 }
 0x27d   : > { %v1158_v56 = vor.u32 %v1157_v23, %v1156_v1  ;;  %v1161_v0 = vor.u32 %v1160_v41, %v1159_v39  ;;  %v1164_v6 = vor.u32 %v1163_v33, %v1162_v32  ;;  %v1167_v50 = vor.u32 %v1166_v52, %v1165_v54 }
 0x27e   : > { %12548 = vst [vmem:[#allocation25_spill] sm:$0xff] %v9260_v46  ;;  %v1098_v15 = vshll.u32 %v9260_v46, 30  ;;  %v12293_v9 = vand.u32 2147483647, %v9185_v62  ;;  %v9269_v24 = vsel %vm7765_vm8, 0, %v7764_v19  ;;  %v1170_v48 = vor.u32 %v1169_v11, %v1168_v49 }
 0x27f   : > { %v1187_v26 = vshll.u32 %v1147_v28, 8  ;;  %v7774_v53 = vadd.s32 4294967169, %v1247_v4  ;;  %v1155_v8 = vshrl.u32 %v12305_v5, %v1154_v30  ;;  %vm1171_vm9 = vcmp.lt.s32.totalorder %v1152_v29, 1 }
 0x280   : > { %v9271_v40 = vsub.s32 %v1095_v16, %v1098_v15  ;;  %vm1174_vm10 = vcmp.lt.s32.totalorder %v1152_v29, 4  ;;  %vm1173_vm11 = vcmp.lt.s32.totalorder %v1152_v29, 3  ;;  %v1179_v20 = vsel %vm1171_vm9, %v1158_v56, %v1161_v0 }
 0x281   : > { %v1176_v1 = vsel %vm1174_vm10, %v1164_v6, 2102212464  ;;  %v1180_v39 = vsel %vm1174_vm10, %v1167_v50, 920167782  ;;  %vm1172_vm12 = vcmp.lt.s32.totalorder %v1152_v29, 2  ;;  %v1183_v32 = vsel %vm1171_vm9, %v1161_v0, %v1164_v6 }
 0x282   : > { %v1101_v23 = vsub.s32 0, %v9271_v40  ;;  %v1181_v41 = vsel %vm1173_vm11, %v1164_v6, %v1180_v39  ;;  %v1007_v19 = vsub.s32 4294967266, %v9269_v24  ;;  %v1175_v33 = vsel %vm1171_vm9, %v1155_v8, %v1158_v56  ;;  %v481_v39 = vpop.permute.xlu0 %480 }
 0x283   : > { %v1182_v28 = vsel %vm1172_vm12, %v1179_v20, %v1181_v41  ;;  %v1184_v16 = vsel %vm1174_vm10, %v1170_v48, 1326507024  ;;  %v1177_v30 = vsel %vm1173_vm11, %v1161_v0, %v1176_v1  ;;  %v1253_v52 = vadd.s32 1, %v7774_v53 }
 0x284   : > { %v7767_v4 = vmin.u32 %v1101_v23, %v9271_v40  ;;  %v1185_v54 = vsel %vm1173_vm11, %v1167_v50, %v1184_v16  ;;  %v909_v49 = vcvt.s32.f32 %v902_v27  ;;  %vm12369_vm14 = vcmp.lt.s32.totalorder %v8968_v35, 0 }
 0x285   : > { %v1186_v11 = vsel %vm1172_vm12, %v1183_v32, %v1185_v54  ;;  %v9279_v15 = vmul.u32.u64.low %v1187_v26, %v1182_v28  ;;  %v9280_v3 = vmul.u32.u64.high %v1187_v26, %v1182_v28, %v9279_v15  ;;  %vm1254_vm13 = vcmp.gt.s32.totalorder %v1253_v52, 0 }
 0x286   : > { %v1103_v6 = vclz %v7767_v4  ;;  %v9283_v63 = vmul.u32.u64.low %v1187_v26, %v1186_v11  ;;  %v9284_v2 = vmul.u32.u64.high %v1187_v26, %v1186_v11, %v9283_v63  ;;  %v9287_v56 = vmul.f32 %v909_v49, %v907_v13 }
 0x287   : > { %v1178_v0 = vsel %vm1172_vm12, %v1175_v33, %v1177_v30  ;;  %v1255_v50 = vsel %vm1254_vm13, %v1253_v52, 0  ;;  %v1008_v27 = vadd.s32 127, %v1007_v19  ;;  %v1250_v48 = vand.u32 8388607, %v12293_v9 }
 0x288   : > { %v1257_v53 = vand.u32 31, %v1255_v50  ;;  %v9293_v8 = vmul.f32 %v8962_v31, %v481_v39  ;;  %8310 = vcosq.f32 %v9250_v51  ;;  %v9301_v63 = vsel %vm12369_vm14, %v703_v36, %v9231_v42 }
 0x289   : > { %v7768_v29 = vadd.s32 4294967294, %v1103_v6  ;;  %v1197_v13 = vadd.s32 1, %v9280_v3  ;;  %v987_v1 = vadd.s32 %v9160_v25, %v9166_v55  ;;  %v1194_v20 = vmul.u32 %v1187_v26, %v1178_v0 }
 0x28a   : > { %12549 = vst [vmem:[#allocation26_spill] sm:$0xff] %v9293_v8  ;;  %vm1196_vm15 = vc.u32 %v9284_v2, %v9279_v15  ;;  %v1258_v31 = vsub.s32 32, %v1257_v53  ;;  %v911_v23 = vxor.u32 2147483648, %v9287_v56  ;;  %v1003_v41 = vsub.s32 32, %v9269_v24 }
 0x28b   : > { %v1004_v32 = vshll.u32 %v9203_v44, %v9269_v24  ;;  %v1198_v42 = vsel %vm1196_vm15, %v1197_v13, %v9280_v3  ;;  %v1009_v36 = vshll.u32 %v1008_v27, 23  ;;  %v1251_v33 = vor.u32 8388608, %v1250_v48 }
 0x28c   : > { %v1199_v19 = vadd.s32 %v1198_v42, %v1194_v20  ;;  %v12300_v28 = vand.u32 2147483647, %v9293_v8  ;;  %vm7769_vm1 = vcmp.lt.s32.totalorder %v7768_v29, 0  ;;  %v1261_v25 = vshrl.u32 %v12303_v7, %v1258_v31 }
 0x28d   : > { %v1264_v55 = vshrl.u32 %v12301_v10, %v1258_v31  ;;  %v1350_v26 = vand.u32 2139095040, %v9293_v8  ;;  %v1260_v4 = vshll.u32 %v12305_v5, %v1257_v53  ;;  %v1263_v30 = vshll.u32 %v12303_v7, %v1257_v53 }
 0x28e   : > { %v1200_v16 = vadd.s32 536870912, %v1199_v19  ;;  %v1267_v44 = vshrl.u32 %v12298_v12, %v1258_v31  ;;  %v1256_v3 = vshrl.u32 %v1255_v50, 5  ;;  %v1266_v24 = vshll.u32 %v12301_v10, %v1257_v53 }
 0x28f   : > { %v1269_v54 = vshll.u32 %v12298_v12, %v1257_v53  ;;  %v1270_v52 = vshrl.u32 %v12296_v14, %v1258_v31  ;;  %v9323_v49 = vsel %vm7769_vm1, 0, %v7768_v29  ;;  %v1262_v39 = vor.u32 %v1261_v25, %v1260_v4 }
 0x290   : > { %v9325_v11 = vshrl.u32 %v1200_v16, 30  ;;  %v1265_v6 = vor.u32 %v1264_v55, %v1263_v30  ;;  %v1268_v0 = vor.u32 %v1267_v44, %v1266_v24  ;;  %v1272_v48 = vshll.u32 %v12296_v14, %v1257_v53 }
 0x291   : > { %v1271_v27 = vor.u32 %v1270_v52, %v1269_v54  ;;  %v1273_v13 = vshrl.u32 %v12294_v21, %v1258_v31  ;;  %vm9331_vm2 = vcmp.le.f32.partialorder %v619_v38, 0.7853982  ;;  %vm12353_vm3 = vcmp.lt.s32.totalorder %v8977_v43, 0 }
 0x292   : > { %12550 = vst [vmem:[#allocation27_spill] sm:$0xff] %v9325_v11  ;;  %v1005_v29 = vshrl.u32 %v987_v1, %v1003_v41  ;;  %v1010_v20 = vor.u32 4788187, %v1009_v36  ;;  %v1202_v42 = vshll.u32 %v9325_v11, 30  ;;  %v1291_v25 = vshll.u32 %v1251_v33, 8  ;;  %v9337_v55 = vpop.eup %8310 }
 0x293   : > { %v1111_v16 = vsub.s32 4294967266, %v9323_v49  ;;  %v1274_v53 = vor.u32 %v1273_v13, %v1272_v48  ;;  %vm1275_vm4 = vcmp.lt.s32.totalorder %v1256_v3, 1  ;;  %v1351_v4 = vshrl.u32 %v1350_v26, 23 }
 0x294   : > { %v9340_v30 = vsub.s32 %v1199_v19, %v1202_v42  ;;  %vm1277_vm5 = vcmp.lt.s32.totalorder %v1256_v3, 3  ;;  %vm1278_vm7 = vcmp.lt.s32.totalorder %v1256_v3, 4  ;;  %v1283_v38 = vsel %vm1275_vm4, %v1262_v39, %v1265_v6 }
 0x295   : > { %v1280_v44 = vsel %vm1278_vm7, %v1268_v0, 2102212464  ;;  %v1284_v24 = vsel %vm1278_vm7, %v1271_v27, 920167782  ;;  %v1287_v1 = vsel %vm1275_vm4, %v1265_v6, %v1268_v0  ;;  %v1288_v41 = vsel %vm1278_vm7, %v1274_v53, 1326507024 }
 0x296   : > { %vm9346_vm8 = vcmp.le.f32.partialorder %v827_v47, 0.7853982  ;;  %v12553_v36 = vmov 0  ;;  %v1205_v33 = vsub.s32 0, %v9340_v30  ;;  %v1259_v19 = vshrl.u32 %v12305_v5, %v1258_v31 }
 0x297   : > { %v12554_v36 = vsel %vm9346_vm8, 4294967295, %v12553_v36  ;;  %vm1276_vm9 = vcmp.lt.s32.totalorder %v1256_v3, 2  ;;  %v1285_v26 = vsel %vm1277_vm5, %v1268_v0, %v1284_v24  ;;  %v1112_v54 = vadd.s32 127, %v1111_v16 }
 0x298   : > { %12555 = vst [vmem:[#allocation28_spill] sm:$0xff] %v12554_v36  ;;  %v1286_v52 = vsel %vm1276_vm9, %v1283_v38, %v1285_v26  ;;  %v1289_v48 = vsel %vm1277_vm5, %v1271_v27, %v1288_v41  ;;  %v7778_v13 = vadd.s32 4294967169, %v1351_v4  ;;  %v7771_v42 = vmin.u32 %v1205_v33, %v9340_v30  ;;  %v485_v4 = vpop.permute.xlu1 %484 }
 0x299   : > { %v1279_v47 = vsel %vm1275_vm4, %v1259_v19, %v1262_v39  ;;  %v1281_v53 = vsel %vm1277_vm5, %v1265_v6, %v1280_v44  ;;  %v1290_v9 = vsel %vm1276_vm9, %v1287_v1, %v1289_v48  ;;  %8312 = vsinq.f32 %v9250_v51  ;;  %v9387_v44 = vld [vmem:[#allocation8] ss:$0 sm:$0xff] }
 0x29a   : > { %v9359_v21 = vmul.u32.u64.low %v1291_v25, %v1290_v9  ;;  %v9360_v14 = vmul.u32.u64.high %v1291_v25, %v1290_v9, %v9359_v21  ;;  %v9362_v31 = vmul.u32.u64.low %v1291_v25, %v1286_v52  ;;  %v9363_v12 = vmul.u32.u64.high %v1291_v25, %v1286_v52, %v9362_v31 }
 0x29b   : > { %v1006_v0 = vor.u32 %v1005_v29, %v1004_v32  ;;  %v1207_v27 = vclz %v7771_v42  ;;  %v1357_v16 = vadd.s32 1, %v7778_v13  ;;  %v9371_v39 = vsel %vm9331_vm2, %v8968_v35, %v9301_v63 }
 0x29c   : > { %v912_v21 = vsel %vm12353_vm3, %v911_v23, %v9287_v56  ;;  %v1091_v9 = vadd.s32 %v9215_v60, %v9225_v58  ;;  %v1282_v51 = vsel %vm1276_vm9, %v1279_v47, %v1281_v53  ;;  %v1011_v32 = vand.u32 2147483647, %v1010_v20 }
 0x29d   : > { %v1107_v6 = vsub.s32 32, %v9323_v49  ;;  %v1354_v29 = vand.u32 8388607, %v12300_v28  ;;  %vm1358_vm10 = vcmp.gt.s32.totalorder %v1357_v16, 0  ;;  %v1113_v63 = vshll.u32 %v1112_v54, 23 }
 0x29e   : > { %vm1300_vm11 = vc.u32 %v9360_v14, %v9362_v31  ;;  %v1301_v38 = vadd.s32 1, %v9363_v12  ;;  %v9390_v56 = vmul.f32 %v9387_v44, %v485_v4  ;;  %v1013_v60 = vcvt.s32.f32 %v1006_v0 }
 0x29f   : > { %v7772_v58 = vadd.s32 4294967294, %v1207_v27  ;;  %v1298_v23 = vmul.u32 %v1291_v25, %v1282_v51  ;;  %v1359_v3 = vsel %vm1358_vm10, %v1357_v16, 0  ;;  %8314 = vcosq.f32 %v9371_v39 }
 0x2a0   : > { %12556 = vst [vmem:[#allocation29_spill] sm:$0xff] %v9390_v56  ;;  %v9396_v20 = vsel %vm9346_vm8, %v8977_v43, %v912_v21  ;;  %v1302_v24 = vsel %vm1300_vm11, %v1301_v38, %v9363_v12  ;;  %v1361_v1 = vand.u32 31, %v1359_v3  ;;  %v9399_v41 = vmul.f32 %v1013_v60, %v1011_v32 }
 0x2a1   : > { %v1108_v33 = vshll.u32 %v9271_v40, %v9323_v49  ;;  %v1109_v19 = vshrl.u32 %v1091_v9, %v1107_v6  ;;  %v1303_v26 = vadd.s32 %v1302_v24, %v1298_v23  ;;  %v9403_v54 = vor.u32 4788187, %v1113_v63 }
 0x2a2   : > { %v1355_v25 = vor.u32 8388608, %v1354_v29  ;;  %v1362_v52 = vsub.s32 32, %v1361_v1  ;;  %v1454_v48 = vand.u32 2139095040, %v9390_v56  ;;  %vm7773_vm12 = vcmp.lt.s32.totalorder %v7772_v58, 0 }
 0x2a3   : > { %v1304_v13 = vadd.s32 536870912, %v1303_v26  ;;  %v1364_v42 = vshll.u32 %v12305_v5, %v1361_v1  ;;  %v1367_v12 = vshll.u32 %v12303_v7, %v1361_v1  ;;  %v1370_v40 = vshll.u32 %v12301_v10, %v1361_v1  ;;  %v9412_v27 = vpop.eup %8312 }
 0x2a4   : > { %v1365_v47 = vshrl.u32 %v12303_v7, %v1362_v52  ;;  %v1368_v53 = vshrl.u32 %v12301_v10, %v1362_v52  ;;  %v12557_v49 = vmov 2102212464   ;;  %v1360_v4 = vshrl.u32 %v1359_v3, 5 }
 0x2a5   : > { %v1371_v0 = vshrl.u32 %v12557_v49, %v1362_v52  ;;  %v9414_v16 = vshrl.u32 %v1304_v13, 30  ;;  %v1373_v21 = vshll.u32 %v12557_v49, %v1361_v1  ;;  %v12559_v9 = vmov 920167782  }
 0x2a6   : > { %v1374_v51 = vshrl.u32 %v12559_v9, %v1362_v52  ;;  %v1110_v32 = vor.u32 %v1109_v19, %v1108_v33  ;;  %v1366_v6 = vor.u32 %v1365_v47, %v1364_v42  ;;  %v1369_v29 = vor.u32 %v1368_v53, %v1367_v12 }
 0x2a7   : > { %12558 = vst [vmem:[#allocation30_spill] sm:$0xff] %v9414_v16  ;;  %v1372_v63 = vor.u32 %v1371_v0, %v1370_v40  ;;  %v1115_v38 = vand.u32 2147483647, %v9403_v54  ;;  %v1306_v60 = vshll.u32 %v9414_v16, 30  ;;  %v1395_v24 = vshll.u32 %v1355_v25, 8 }
 0x2a8   : > { %v1375_v23 = vor.u32 %v1374_v51, %v1373_v21  ;;  %v9421_v28 = vsel %vm7773_vm12, 0, %v7772_v58  ;;  %v1376_v13 = vshll.u32 %v12559_v9, %v1361_v1  ;;  %v12560_v3 = vmov 1326507024  }
 0x2a9   : > { %v1377_v10 = vshrl.u32 %v12560_v3, %v1362_v52  ;;  %v1455_v7 = vshrl.u32 %v1454_v48, 23  ;;  %v9425_v5 = vsub.s32 %v1303_v26, %v1306_v60  ;;  %vm1379_vm13 = vcmp.lt.s32.totalorder %v1360_v4, 1  ;;  %v9427_v33 = vpop.eup %8314 }
 0x2aa   : > { %vm1381_vm15 = vcmp.lt.s32.totalorder %v1360_v4, 3  ;;  %vm1382_vm1 = vcmp.lt.s32.totalorder %v1360_v4, 4  ;;  %v1387_v42 = vsel %vm1379_vm13, %v1366_v6, %v1369_v29  ;;  %v12561_v12 = vmov 683565275  }
 0x2ab   : > { %v1378_v19 = vor.u32 %v1377_v10, %v1376_v13  ;;  %v1384_v54 = vsel %vm1382_vm1, %v1372_v63, 2102212464  ;;  %v1388_v25 = vsel %vm1382_vm1, %v1375_v23, 920167782  ;;  %v1309_v58 = vsub.s32 0, %v9425_v5 }
 0x2ac   : > { %v1363_v47 = vshrl.u32 %v12561_v12, %v1362_v52  ;;  %vm1380_vm4 = vcmp.lt.s32.totalorder %v1360_v4, 2  ;;  %v1389_v1 = vsel %vm1381_vm15, %v1372_v63, %v1388_v25  ;;  %v1215_v26 = vsub.s32 4294967266, %v9421_v28 }
 0x2ad   : > { %v1390_v48 = vsel %vm1380_vm4, %v1387_v42, %v1389_v1  ;;  %v1391_v53 = vsel %vm1379_vm13, %v1369_v29, %v1372_v63  ;;  %v1392_v40 = vsel %vm1382_vm1, %v1378_v19, 1326507024  ;;  %v7775_v10 = vmin.u32 %v1309_v58, %v9425_v5  ;;  %v489_v58 = vpop.permute.xlu0 %488 }
 0x2ae   : > { %v1383_v0 = vsel %vm1379_vm13, %v1363_v47, %v1366_v6  ;;  %v1385_v21 = vsel %vm1381_vm15, %v1369_v29, %v1384_v54  ;;  %v1393_v51 = vsel %vm1381_vm15, %v1375_v23, %v1392_v40  ;;  %v7782_v25 = vadd.s32 4294967169, %v1455_v7 }
 0x2af   : > { %v1394_v52 = vsel %vm1380_vm4, %v1391_v53, %v1393_v51  ;;  %v9441_v60 = vmul.u32.u64.low %v1395_v24, %v1390_v48  ;;  %v9442_v13 = vmul.u32.u64.high %v1395_v24, %v1390_v48, %v9441_v60  ;;  %v1117_v16 = vcvt.s32.f32 %v1110_v32 }
 0x2b0   : > { %v1311_v42 = vclz %v7775_v10  ;;  %v9445_v1 = vmul.u32.u64.low %v1395_v24, %v1394_v52  ;;  %v9446_v63 = vmul.u32.u64.high %v1395_v24, %v1394_v52, %v9445_v1  ;;  %8316 = vsinq.f32 %v9371_v39 }
 0x2b1   : > { %v1015_v6 = vxor.u32 2147483648, %v9399_v41  ;;  %v1386_v29 = vsel %vm1380_vm4, %v1383_v0, %v1385_v21  ;;  %v1461_v19 = vadd.s32 1, %v7782_v25  ;;  %8318 = vcosq.f32 %v9396_v20 }
 0x2b2   : > { %vm12368_vm5 = vcmp.lt.s32.totalorder %v8988_v59, 0  ;;  %v9453_v23 = vmul.f32 %v1117_v16, %v1115_v38  ;;  %v1216_v54 = vadd.s32 127, %v1215_v26  ;;  %v1405_v7 = vadd.s32 1, %v9442_v13 }
 0x2b3   : > { %v12309_v32 = vand.u32 2147483647, %v9390_v56  ;;  %vm1462_vm7 = vcmp.gt.s32.totalorder %v1461_v19, 0  ;;  %v7776_v47 = vadd.s32 4294967294, %v1311_v42  ;;  %v1402_v39 = vmul.u32 %v1395_v24, %v1386_v29 }
 0x2b4   : > { %vm1404_vm9 = vc.u32 %v9446_v63, %v9441_v60  ;;  %v1463_v4 = vsel %vm1462_vm7, %v1461_v19, 0  ;;  %8320 = vsinq.f32 %v9396_v20  ;;  %v9463_v16 = vsel %vm12368_vm5, %v1015_v6, %v9399_v41 }
 0x2b5   : > { %v1406_v38 = vsel %vm1404_vm9, %v1405_v7, %v9442_v13  ;;  %v1465_v26 = vand.u32 31, %v1463_v4  ;;  %v1195_v53 = vadd.s32 %v9279_v15, %v9284_v2  ;;  %v9470_v40 = vmul.f32 %v9387_v44, %v489_v58 }
 0x2b6   : > { %v1407_v24 = vadd.s32 %v1406_v38, %v1402_v39  ;;  %v1211_v10 = vsub.s32 32, %v9421_v28  ;;  %v1217_v20 = vshll.u32 %v1216_v54, 23  ;;  %v1458_v0 = vand.u32 8388607, %v12309_v32 }
 0x2b7   : > { %12562 = vst [vmem:[#allocation31_spill] sm:$0xff] %v9470_v40  ;;  %v1466_v41 = vsub.s32 32, %v1465_v26  ;;  %vm7777_vm10 = vcmp.lt.s32.totalorder %v7776_v47, 0  ;;  %v9475_v51 = vshrl.u32 %v1463_v4, 5  ;;  %v1468_v52 = vshll.u32 %v12561_v12, %v1465_v26 }
 0x2b8   : > { %v1408_v21 = vadd.s32 536870912, %v1407_v24  ;;  %v12563_v13 = vmov 2475754826   ;;  %v12564_v15 = vmov 2131351028   ;;  %v1477_v19 = vshll.u32 %v12557_v49, %v1465_v26 }
 0x2b9   : > { %v1469_v25 = vshrl.u32 %v12563_v13, %v1466_v41  ;;  %v1471_v2 = vshll.u32 %v12563_v13, %v1465_v26  ;;  %v1472_v42 = vshrl.u32 %v12564_v15, %v1466_v41  ;;  %v1475_v1 = vshrl.u32 %v12557_v49, %v1466_v41 }
 0x2ba   : > { %v9482_v6 = vshrl.u32 %v1408_v21, 30  ;;  %v1474_v29 = vshll.u32 %v12564_v15, %v1465_v26  ;;  %v1478_v54 = vshrl.u32 %v12559_v9, %v1466_v41  ;;  %v9487_v7 = vpop.eup %8316  ;;  %v1212_v58 = vshll.u32 %v9340_v30, %v9421_v28 }
 0x2bb   : > { %v1213_v39 = vshrl.u32 %v1195_v53, %v1211_v10  ;;  %v1470_v4 = vor.u32 %v1469_v25, %v1468_v52  ;;  %v1473_v38 = vor.u32 %v1472_v42, %v1471_v2  ;;  %v9491_v32 = vpop.eup %8318  ;;  %v12567_v48 = vand.u32 2147483647, %v8988_v59 }
 0x2bc   : > { %12565 = vst [vmem:[#allocation32_spill] sm:$0xff] %v9482_v6  ;;  %12566 = vst [vmem:[#allocation33_spill] sm:$0xff] %v9491_v32  ;;  %v12568_v21 = vmov 0  ;;  %v1218_v46 = vor.u32 4788187, %v1217_v20  ;;  %v1410_v11 = vshll.u32 %v9482_v6, 30  ;;  %v1476_v36 = vor.u32 %v1475_v1, %v1474_v29 }
 0x2bd   : > { %vm9495_vm11 = vcmp.le.f32.partialorder %v12567_v48, 0.7853982  ;;  %v1479_v43 = vor.u32 %v1478_v54, %v1477_v19  ;;  %vm12335_vm12 = vcmp.lt.s32.totalorder %v9153_v57, 0  ;;  %v9502_v28 = vsel %vm7777_vm10, 0, %v7776_v47 }
 0x2be   : > { %v12569_v21 = vsel %vm9495_vm11, 4294967295, %v12568_v21  ;;  %v1480_v30 = vshll.u32 %v12559_v9, %v1465_v26  ;;  %v1481_v53 = vshrl.u32 %v12560_v3, %v1466_v41  ;;  %v1558_v10 = vand.u32 2139095040, %v9470_v40  ;;  %v9511_v20 = vpop.eup %8320 }
 0x2bf   : > { %12570 = vst [vmem:[#allocation34_spill] sm:$0xff] %v12569_v21  ;;  %v9507_v48 = vsub.s32 %v1407_v24, %v1410_v11  ;;  %v1459_v52 = vor.u32 8388608, %v1458_v0  ;;  %vm1483_vm13 = vcmp.lt.s32.totalorder %v9475_v51, 1  ;;  %vm1486_vm15 = vcmp.lt.s32.totalorder %v9475_v51, 4  ;;  %12571 = vst [vmem:[#allocation35_spill] sm:$0xff] %v9511_v20 }
 0x2c0   : > { %v1482_v25 = vor.u32 %v1481_v53, %v1480_v30  ;;  %vm1485_vm1 = vcmp.lt.s32.totalorder %v9475_v51, 3  ;;  %v1491_v47 = vsel %vm1483_vm13, %v1470_v4, %v1473_v38  ;;  %v1492_v26 = vsel %vm1486_vm15, %v1479_v43, 920167782 }
 0x2c1   : > { %v12572_v2 = vand.u32 2147483647, %v9153_v57  ;;  %v12573_v42 = vmov 0  ;;  %v1319_v11 = vsub.s32 4294967266, %v9502_v28  ;;  %v1413_v24 = vsub.s32 0, %v9507_v48 }
 0x2c2   : > { %v1467_v0 = vshrl.u32 %v12561_v12, %v1466_v41  ;;  %v1493_v1 = vsel %vm1485_vm1, %v1476_v36, %v1492_v26  ;;  %vm1484_vm7 = vcmp.lt.s32.totalorder %v9475_v51, 2  ;;  %v1488_v29 = vsel %vm1486_vm15, %v1476_v36, 2102212464 }
 0x2c3   : > { %vm9518_vm4 = vcmp.le.f32.partialorder %v12572_v2, 0.7853982  ;;  %v1495_v19 = vsel %vm1483_vm13, %v1473_v38, %v1476_v36  ;;  %v1496_v54 = vsel %vm1486_vm15, %v1482_v25, 1326507024  ;;  %v7779_v30 = vmin.u32 %v1413_v24, %v9507_v48 }
 0x2c4   : > { %v12574_v42 = vsel %vm9518_vm4, 4294967295, %v12573_v42  ;;  %v1494_v53 = vsel %vm1484_vm7, %v1491_v47, %v1493_v1  ;;  %v1497_v2 = vsel %vm1485_vm1, %v1479_v43, %v1496_v54  ;;  %v1499_v6 = vshll.u32 %v1459_v52, 8  ;;  %v493_v47 = vpop.permute.xlu1 %492 }
 0x2c5   : > { %12575 = vst [vmem:[#allocation36_spill] sm:$0xff] %v12574_v42  ;;  %v1214_v41 = vor.u32 %v1213_v39, %v1212_v58  ;;  %v1487_v26 = vsel %vm1483_vm13, %v1467_v0, %v1470_v4  ;;  %v1498_v32 = vsel %vm1484_vm7, %v1495_v19, %v1497_v2  ;;  %v1559_v20 = vshrl.u32 %v1558_v10, 23 }
 0x2c6   : > { %v1415_v18 = vclz %v7779_v30  ;;  %v1489_v36 = vsel %vm1485_vm1, %v1473_v38, %v1488_v29  ;;  %v9541_v25 = vmul.u32.u64.low %v1499_v6, %v1498_v32  ;;  %v9542_v24 = vmul.u32.u64.high %v1499_v6, %v1498_v32, %v9541_v25 }
 0x2c7   : > { %v1019_v43 = vsel %vm9495_vm11, %v8988_v59, %v9463_v16  ;;  %v1219_v58 = vand.u32 2147483647, %v1218_v46  ;;  %v9548_v39 = vmul.u32.u64.low %v1499_v6, %v1494_v53  ;;  %v9549_v4 = vmul.u32.u64.high %v1499_v6, %v1494_v53, %v9548_v39 }
 0x2c8   : > { %v12576_v10 = vxor.u32 2147483648, %v9453_v23  ;;  %v1315_v32 = vsub.s32 32, %v9502_v28  ;;  %v1320_v52 = vadd.s32 127, %v1319_v11  ;;  %v7786_v0 = vadd.s32 4294967169, %v1559_v20 }
 0x2c9   : > { %v1221_v1 = vcvt.s32.f32 %v1214_v41  ;;  %v1490_v29 = vsel %vm1484_vm7, %v1487_v26, %v1489_v36  ;;  %v12323_v46 = vand.u32 2147483647, %v9470_v40  ;;  %v9562_v16 = vmul.f32 %v9387_v44, %v493_v47 }
 0x2ca   : > { %v1120_v38 = vsel %vm12335_vm12, %v12576_v10, %v9453_v23  ;;  %v1299_v19 = vadd.s32 %v9362_v31, %v9360_v14  ;;  %v7780_v54 = vadd.s32 4294967294, %v1415_v18  ;;  %vm1508_vm9 = vc.u32 %v9542_v24, %v9548_v39 }
 0x2cb   : > { %12577 = vst [vmem:[#allocation37_spill] sm:$0xff] %v9562_v16  ;;  %v1565_v23 = vadd.s32 1, %v7786_v0  ;;  %8322 = vcosq.f32 %v1019_v43  ;;  %v9571_v20 = vsel %vm9518_vm4, %v9153_v57, %v1120_v38  ;;  %v9573_v51 = vmul.f32 %v1221_v1, %v1219_v58 }
 0x2cc   : > { %v1509_v11 = vadd.s32 1, %v9549_v4  ;;  %v1317_v30 = vshrl.u32 %v1299_v19, %v1315_v32  ;;  %v1321_v53 = vshll.u32 %v1320_v52, 23  ;;  %v1506_v2 = vmul.u32 %v1499_v6, %v1490_v29 }
 0x2cd   : > { %vm1566_vm10 = vcmp.gt.s32.totalorder %v1565_v23, 0  ;;  %v1562_v18 = vand.u32 8388607, %v12323_v46  ;;  %v1662_v41 = vand.u32 2139095040, %v9562_v16  ;;  %8324 = vsinq.f32 %v1019_v43 }
 0x2ce   : > { %v1510_v14 = vsel %vm1508_vm9, %v1509_v11, %v9549_v4  ;;  %v1567_v31 = vsel %vm1566_vm10, %v1565_v23, 0  ;;  %v1316_v26 = vshll.u32 %v9425_v5, %v9502_v28  ;;  %vm7781_vm13 = vcmp.lt.s32.totalorder %v7780_v54, 0 }
 0x2cf   : > { %v1511_v36 = vadd.s32 %v1510_v14, %v1506_v2  ;;  %8326 = vcosq.f32 %v9571_v20  ;;  %v1569_v25 = vand.u32 31, %v1567_v31  ;;  %v9586_v58 = vor.u32 4788187, %v1321_v53 }
 0x2d0   : > { %v9584_v47 = vor.u32 %v1317_v30, %v1316_v26  ;;  %v9588_v10 = vsel %vm7781_vm13, 0, %v7780_v54  ;;  %v1563_v38 = vor.u32 8388608, %v1562_v18  ;;  %v1663_v43 = vshrl.u32 %v1662_v41, 23 }
 0x2d1   : > { %v1512_v4 = vadd.s32 536870912, %v1511_v36  ;;  %v1570_v32 = vsub.s32 32, %v1569_v25  ;;  %v1568_v5 = vshrl.u32 %v1567_v31, 5  ;;  %v1572_v28 = vshll.u32 %v12561_v12, %v1569_v25 }
 0x2d2   : > { %v1575_v0 = vshll.u32 %v12563_v13, %v1569_v25  ;;  %v1578_v19 = vshll.u32 %v12564_v15, %v1569_v25  ;;  %v1581_v11 = vshll.u32 %v12557_v49, %v1569_v25  ;;  %v1584_v53 = vshll.u32 %v12559_v9, %v1569_v25 }
 0x2d3   : > { %v9590_v52 = vshrl.u32 %v1512_v4, 30  ;;  %v1573_v1 = vshrl.u32 %v12563_v13, %v1570_v32  ;;  %v1576_v29 = vshrl.u32 %v12564_v15, %v1570_v32  ;;  %v1579_v23 = vshrl.u32 %v12557_v49, %v1570_v32 }
 0x2d4   : > { %v1582_v30 = vshrl.u32 %v12559_v9, %v1570_v32  ;;  %v1585_v41 = vshrl.u32 %v12560_v3, %v1570_v32  ;;  %vm12350_vm15 = vcmp.lt.s32.totalorder %v9179_v37, 0  ;;  %v1323_v26 = vand.u32 2147483647, %v9586_v58 }
 0x2d5   : > { %12578 = vst [vmem:[#allocation38_spill] sm:$0xff] %v9590_v52  ;;  %v1514_v54 = vshll.u32 %v9590_v52, 30  ;;  %v9602_v2 = vpop.eup %8322  ;;  %v1574_v14 = vor.u32 %v1573_v1, %v1572_v28  ;;  %v1577_v18 = vor.u32 %v1576_v29, %v1575_v0  ;;  %v1580_v31 = vor.u32 %v1579_v23, %v1578_v19 }
 0x2d6   : > { %12579 = vst [vmem:[#allocation39_spill] sm:$0xff] %v9602_v2  ;;  %v1583_v46 = vor.u32 %v1582_v30, %v1581_v11  ;;  %v1419_v52 = vsub.s32 32, %v9588_v10  ;;  %v1586_v42 = vor.u32 %v1585_v41, %v1584_v53  ;;  %vm1587_vm1 = vcmp.lt.s32.totalorder %v1568_v5, 1 }
 0x2d7   : > { %v9607_v4 = vsub.s32 %v1511_v36, %v1514_v54  ;;  %v1603_v25 = vshll.u32 %v1563_v38, 8  ;;  %v9611_v57 = vpop.eup %8324  ;;  %vm1590_vm7 = vcmp.lt.s32.totalorder %v1568_v5, 4  ;;  %v1595_v0 = vsel %vm1587_vm1, %v1574_v14, %v1577_v18 }
 0x2d8   : > { %12580 = vst [vmem:[#allocation40_spill] sm:$0xff] %v9611_v57  ;;  %v7790_v1 = vadd.s32 4294967169, %v1663_v43  ;;  %vm1589_vm9 = vcmp.lt.s32.totalorder %v1568_v5, 3  ;;  %v1596_v36 = vsel %vm1590_vm7, %v1583_v46, 920167782  ;;  %v1599_v58 = vsel %vm1587_vm1, %v1577_v18, %v1580_v31 }
 0x2d9   : > { %v1517_v28 = vsub.s32 0, %v9607_v4  ;;  %v9615_v29 = vpop.eup %8326  ;;  %v1600_v19 = vsel %vm1590_vm7, %v1586_v42, 1326507024  ;;  %vm1588_vm10 = vcmp.lt.s32.totalorder %v1568_v5, 2  ;;  %v1592_v54 = vsel %vm1590_vm7, %v1580_v31, 2102212464 }
 0x2da   : > { %12581 = vst [vmem:[#allocation41_spill] sm:$0xff] %v9615_v29  ;;  %v1597_v38 = vsel %vm1589_vm9, %v1580_v31, %v1596_v36  ;;  %v1423_v11 = vsub.s32 4294967266, %v9588_v10  ;;  %v1571_v30 = vshrl.u32 %v12561_v12, %v1570_v32  ;;  %v1601_v43 = vsel %vm1589_vm9, %v1583_v46, %v1600_v19  ;;  %v497_v19 = vpop.permute.xlu0 %496 }
 0x2db   : > { %v7783_v23 = vmin.u32 %v1517_v28, %v9607_v4  ;;  %v1598_v53 = vsel %vm1588_vm10, %v1595_v0, %v1597_v38  ;;  %v1602_v6 = vsel %vm1588_vm10, %v1599_v58, %v1601_v43  ;;  %v12582_v29 = vand.u32 2147483647, %v9562_v16 }
 0x2dc   : > { %v1669_v2 = vadd.s32 1, %v7790_v1  ;;  %v1591_v28 = vsel %vm1587_vm1, %v1571_v30, %v1574_v14  ;;  %v1593_v57 = vsel %vm1589_vm9, %v1577_v18, %v1592_v54  ;;  %v12583_v46 = vxor.u32 2147483648, %v9573_v51 }
 0x2dd   : > { %v1519_v41 = vclz %v7783_v23  ;;  %v1666_v42 = vand.u32 8388607, %v12582_v29  ;;  %v9629_v31 = vmul.u32.u64.low %v1603_v25, %v1602_v6  ;;  %v9630_v36 = vmul.u32.u64.high %v1603_v25, %v1602_v6, %v9629_v31 }
 0x2de   : > { %v9632_v32 = vmul.u32.u64.low %v1603_v25, %v1598_v53  ;;  %v9633_v59 = vmul.u32.u64.high %v1603_v25, %v1598_v53, %v9632_v32  ;;  %vm1670_vm13 = vcmp.gt.s32.totalorder %v1669_v2, 0  ;;  %v9641_v0 = vsel %vm12350_vm15, %v12583_v46, %v9573_v51 }
 0x2df   : > { %v7784_v21 = vadd.s32 4294967294, %v1519_v41  ;;  %v1325_v14 = vcvt.s32.f32 %v9584_v47  ;;  %v1424_v1 = vadd.s32 127, %v1423_v11  ;;  %v1671_v18 = vsel %vm1670_vm13, %v1669_v2, 0 }
 0x2e0   : > { %v1403_v6 = vadd.s32 %v9441_v60, %v9446_v63  ;;  %v1594_v29 = vsel %vm1588_vm10, %v1591_v28, %v1593_v57  ;;  %v1673_v58 = vand.u32 31, %v1671_v18  ;;  %v9651_v54 = vadd.s32 %v9548_v39, %v9542_v24 }
 0x2e1   : > { %vm7785_vm1 = vcmp.lt.s32.totalorder %v7784_v21, 0  ;;  %v9647_v23 = vmul.f32 %v1325_v14, %v1323_v26  ;;  %vm1612_vm7 = vc.u32 %v9630_v36, %v9632_v32  ;;  %v1420_v47 = vshll.u32 %v9507_v48, %v9588_v10 }
 0x2e2   : > { %v9653_v51 = vsel %vm7785_vm1, 0, %v7784_v21  ;;  %v1421_v60 = vshrl.u32 %v1403_v6, %v1419_v52  ;;  %v1613_v63 = vadd.s32 1, %v9633_v59  ;;  %v1667_v57 = vor.u32 8388608, %v1666_v42 }
 0x2e3   : > { %v1425_v5 = vshll.u32 %v1424_v1, 23  ;;  %v1610_v2 = vmul.u32 %v1603_v25, %v1594_v29  ;;  %v1674_v26 = vsub.s32 32, %v1673_v58  ;;  %v9661_v38 = vmul.f32 %v9387_v44, %v497_v19 }
 0x2e4   : > { %v1527_v24 = vsub.s32 4294967266, %v9653_v51  ;;  %v1614_v21 = vsel %vm1612_vm7, %v1613_v63, %v9633_v59  ;;  %v1672_v39 = vshrl.u32 %v1671_v18, 5  ;;  %v1676_v11 = vshll.u32 %v12561_v12, %v1673_v58 }
 0x2e5   : > { %12584 = vst [vmem:[#allocation42_spill] sm:$0xff] %v9661_v38  ;;  %v1615_v30 = vadd.s32 %v1614_v21, %v1610_v2  ;;  %v1677_v48 = vshrl.u32 %v12563_v13, %v1674_v26  ;;  %v1679_v10 = vshll.u32 %v12563_v13, %v1673_v58  ;;  %v1680_v52 = vshrl.u32 %v12564_v15, %v1674_v26 }
 0x2e6   : > { %v1682_v25 = vshll.u32 %v12564_v15, %v1673_v58  ;;  %v1683_v53 = vshrl.u32 %v12557_v49, %v1674_v26  ;;  %v1685_v43 = vshll.u32 %v12557_v49, %v1673_v58  ;;  %v1686_v41 = vshrl.u32 %v12559_v9, %v1674_v26 }
 0x2e7   : > { %v1422_v42 = vor.u32 %v1421_v60, %v1420_v47  ;;  %v1616_v59 = vadd.s32 536870912, %v1615_v30  ;;  %v1678_v28 = vor.u32 %v1677_v48, %v1676_v11  ;;  %v1681_v31 = vor.u32 %v1680_v52, %v1679_v10 }
 0x2e8   : > { %v1426_v46 = vor.u32 4788187, %v1425_v5  ;;  %v1684_v14 = vor.u32 %v1683_v53, %v1682_v25  ;;  %v1687_v1 = vor.u32 %v1686_v41, %v1685_v43  ;;  %v1707_v18 = vshll.u32 %v1667_v57, 8 }
 0x2e9   : > { %v9673_v6 = vshrl.u32 %v1616_v59, 30  ;;  %v1688_v29 = vshll.u32 %v12559_v9, %v1673_v58  ;;  %v1689_v19 = vshrl.u32 %v12560_v3, %v1674_v26  ;;  %v1766_v63 = vand.u32 2139095040, %v9661_v38 }
 0x2ea   : > { %v1523_v2 = vsub.s32 32, %v9653_v51  ;;  %v1528_v21 = vadd.s32 127, %v1527_v24  ;;  %vm1691_vm9 = vcmp.lt.s32.totalorder %v1672_v39, 1  ;;  %vm1694_vm10 = vcmp.lt.s32.totalorder %v1672_v39, 4 }
 0x2eb   : > { %12585 = vst [vmem:[#allocation43_spill] sm:$0xff] %v9673_v6  ;;  %v12586_v47 = vand.u32 2147483647, %v9179_v37  ;;  %v12587_v60 = vmov 0  ;;  %v1618_v57 = vshll.u32 %v9673_v6, 30  ;;  %v1690_v5 = vor.u32 %v1689_v19, %v1688_v29 }
 0x2ec   : > { %v1696_v11 = vsel %vm1694_vm10, %v1684_v14, 2102212464  ;;  %v1699_v58 = vsel %vm1691_vm9, %v1678_v28, %v1681_v31  ;;  %vm12344_vm1 = vcmp.lt.s32.totalorder %v9185_v62, 0  ;;  %v1675_v48 = vshrl.u32 %v12561_v12, %v1674_v26 }
 0x2ed   : > { %vm9681_vm13 = vcmp.le.f32.partialorder %v12586_v47, 0.7853982  ;;  %vm1693_vm7 = vcmp.lt.s32.totalorder %v1672_v39, 3  ;;  %v1700_v24 = vsel %vm1694_vm10, %v1687_v1, 920167782  ;;  %v1703_v10 = vsel %vm1691_vm9, %v1681_v31, %v1684_v14 }
 0x2ee   : > { %v12588_v60 = vsel %vm9681_vm13, 4294967295, %v12587_v60  ;;  %v9690_v52 = vsub.s32 %v1615_v30, %v1618_v57  ;;  %vm1692_vm12 = vcmp.lt.s32.totalorder %v1672_v39, 2  ;;  %v1701_v25 = vsel %vm1693_vm7, %v1684_v14, %v1700_v24 }
 0x2ef   : > { %12589 = vst [vmem:[#allocation44_spill] sm:$0xff] %v12588_v60  ;;  %v1704_v53 = vsel %vm1694_vm10, %v1690_v5, 1326507024  ;;  %v1695_v43 = vsel %vm1691_vm9, %v1675_v48, %v1678_v28  ;;  %v1697_v41 = vsel %vm1693_vm7, %v1681_v31, %v1696_v11  ;;  %v1702_v59 = vsel %vm1692_vm12, %v1699_v58, %v1701_v25  ;;  %v501_v5 = vpop.permute.xlu1 %500 }
 0x2f0   : > { %v1705_v29 = vsel %vm1693_vm7, %v1687_v1, %v1704_v53  ;;  %v1621_v19 = vsub.s32 0, %v9690_v52  ;;  %v9696_v26 = vmul.u32.u64.low %v1707_v18, %v1702_v59  ;;  %v9697_v6 = vmul.u32.u64.high %v1707_v18, %v1702_v59, %v9696_v26 }
 0x2f1   : > { %v1706_v47 = vsel %vm1692_vm12, %v1703_v10, %v1705_v29  ;;  %v1327_v30 = vxor.u32 2147483648, %v9647_v23  ;;  %v1767_v14 = vshrl.u32 %v1766_v63, 23  ;;  %v1427_v28 = vand.u32 2147483647, %v1426_v46 }
 0x2f2   : > { %v9701_v57 = vmul.u32.u64.low %v1707_v18, %v1706_v47  ;;  %v9702_v17 = vmul.u32.u64.high %v1707_v18, %v1706_v47, %v9701_v57  ;;  %v1525_v31 = vshrl.u32 %v9651_v54, %v1523_v2  ;;  %v7787_v1 = vmin.u32 %v1621_v19, %v9690_v52 }
 0x2f3   : > { %v1698_v11 = vsel %vm1692_vm12, %v1695_v43, %v1697_v41  ;;  %v1429_v58 = vcvt.s32.f32 %v1422_v42  ;;  %v1529_v48 = vshll.u32 %v1528_v21, 23  ;;  %v12340_v24 = vand.u32 2147483647, %v9661_v38 }
 0x2f4   : > { %v7794_v10 = vadd.s32 4294967169, %v1767_v14  ;;  %v1524_v25 = vshll.u32 %v9607_v4, %v9653_v51  ;;  %v1623_v53 = vclz %v7787_v1  ;;  %v1717_v59 = vadd.s32 1, %v9697_v6 }
 0x2f5   : > { %v9712_v63 = vmul.f32 %v9387_v44, %v501_v5  ;;  %v1227_v54 = vsel %vm9681_vm13, %v9179_v37, %v9641_v0  ;;  %v1714_v39 = vmul.u32 %v1707_v18, %v1698_v11  ;;  %vm1716_vm12 = vc.u32 %v9702_v17, %v9696_v26 }
 0x2f6   : > { %v1773_v42 = vadd.s32 1, %v7794_v10  ;;  %v1328_v4 = vsel %vm12344_vm1, %v1327_v30, %v9647_v23  ;;  %v9723_v51 = vmul.f32 %v1429_v58, %v1427_v28  ;;  %v1526_v46 = vor.u32 %v1525_v31, %v1524_v25 }
 0x2f7   : > { %12590 = vst [vmem:[#allocation45_spill] sm:$0xff] %v9712_v63  ;;  %v1718_v2 = vsel %vm1716_vm12, %v1717_v59, %v9697_v6  ;;  %v1530_v21 = vor.u32 4788187, %v1529_v48  ;;  %v1770_v41 = vand.u32 8388607, %v12340_v24  ;;  %8328 = vsinq.f32 %v9571_v20 }
 0x2f8   : > { %v1719_v43 = vadd.s32 %v1718_v2, %v1714_v39  ;;  %vm1774_vm9 = vcmp.gt.s32.totalorder %v1773_v42, 0  ;;  %v7788_v0 = vadd.s32 4294967294, %v1623_v53  ;;  %v1870_v29 = vand.u32 2139095040, %v9712_v63 }
 0x2f9   : > { %v1775_v18 = vsel %vm1774_vm9, %v1773_v42, 0  ;;  %8330 = vcosq.f32 %v1227_v54  ;;  %v12591_v23 = vand.u32 2147483647, %v9185_v62  ;;  %v12592_v19 = vmov 0 }
 0x2fa   : > { %v1720_v6 = vadd.s32 536870912, %v1719_v43  ;;  %v1777_v47 = vand.u32 31, %v1775_v18  ;;  %8332 = vsinq.f32 %v1227_v54  ;;  %v1533_v57 = vcvt.s32.f32 %v1526_v46 }
 0x2fb   : > { %vm9732_vm10 = vcmp.le.f32.partialorder %v12591_v23, 0.7853982  ;;  %v1531_v14 = vand.u32 2147483647, %v1530_v21  ;;  %v1771_v28 = vor.u32 8388608, %v1770_v41  ;;  %vm7789_vm7 = vcmp.lt.s32.totalorder %v7788_v0, 0 }
 0x2fc   : > { %v12593_v19 = vsel %vm9732_vm10, 4294967295, %v12592_v19  ;;  %v9739_v30 = vsel %vm9732_vm10, %v9185_v62, %v1328_v4  ;;  %v9742_v5 = vshrl.u32 %v1720_v6, 30  ;;  %v1778_v31 = vsub.s32 32, %v1777_v47 }
 0x2fd   : > { %12594 = vst [vmem:[#allocation46_spill] sm:$0xff] %v12593_v19  ;;  %v1776_v1 = vshrl.u32 %v1775_v18, 5  ;;  %v1780_v11 = vshll.u32 %v12561_v12, %v1777_v47  ;;  %v1871_v58 = vshrl.u32 %v1870_v29, 23  ;;  %v1783_v25 = vshll.u32 %v12563_v13, %v1777_v47 }
 0x2fe   : > { %12595 = vst [vmem:[#allocation47_spill] sm:$0xff] %v9742_v5  ;;  %v1722_v48 = vshll.u32 %v9742_v5, 30  ;;  %v1781_v10 = vshrl.u32 %v12563_v13, %v1778_v31  ;;  %v1784_v53 = vshrl.u32 %v12564_v15, %v1778_v31  ;;  %v1786_v59 = vshll.u32 %v12564_v15, %v1777_v47 }
 0x2ff   : > { %v1787_v54 = vshrl.u32 %v12557_v49, %v1778_v31  ;;  %v1789_v39 = vshll.u32 %v12557_v49, %v1777_v47  ;;  %v1790_v42 = vshrl.u32 %v12559_v9, %v1778_v31  ;;  %v9753_v4 = vsel %vm7789_vm7, 0, %v7788_v0 }
 0x300   : > { %v9755_v46 = vsub.s32 %v1719_v43, %v1722_v48  ;;  %v1782_v2 = vor.u32 %v1781_v10, %v1780_v11  ;;  %v1785_v21 = vor.u32 %v1784_v53, %v1783_v25  ;;  %v1534_v41 = vmul.f32 %v1533_v57, %v1531_v14 }
 0x301   : > { %v1788_v18 = vor.u32 %v1787_v54, %v1786_v59  ;;  %v1791_v29 = vor.u32 %v1790_v42, %v1789_v39  ;;  %v1792_v24 = vshll.u32 %v12559_v9, %v1777_v47  ;;  %v1793_v20 = vshrl.u32 %v12560_v3, %v1778_v31  ;;  %v9761_v19 = vpop.eup %8328 }
 0x302   : > { %v1725_v6 = vsub.s32 0, %v9755_v46  ;;  %v1811_v5 = vshll.u32 %v1771_v28, 8  ;;  %12596 = vst [vmem:[#allocation48_spill] sm:$0xff] %v9761_v19  ;;  %v1631_v0 = vsub.s32 4294967266, %v9753_v4  ;;  %vm1795_vm12 = vcmp.lt.s32.totalorder %v1776_v1, 1 }
 0x303   : > { %vm1798_vm9 = vcmp.lt.s32.totalorder %v1776_v1, 4  ;;  %v7798_v43 = vadd.s32 4294967169, %v1871_v58  ;;  %v9764_v11 = vpop.eup %8330  ;;  %v1794_v14 = vor.u32 %v1793_v20, %v1792_v24  ;;  %v1803_v10 = vsel %vm1795_vm12, %v1782_v2, %v1785_v21 }
 0x304   : > { %12597 = vst [vmem:[#allocation49_spill] sm:$0xff] %v9764_v11  ;;  %v7791_v57 = vmin.u32 %v1725_v6, %v9755_v46  ;;  %v1800_v48 = vsel %vm1798_vm9, %v1788_v18, 2102212464  ;;  %v9768_v25 = vpop.eup %8332  ;;  %v1779_v47 = vshrl.u32 %v12561_v12, %v1778_v31  ;;  %vm1797_vm7 = vcmp.lt.s32.totalorder %v1776_v1, 3 }
 0x305   : > { %12598 = vst [vmem:[#allocation50_spill] sm:$0xff] %v9768_v25  ;;  %v1804_v28 = vsel %vm1798_vm9, %v1791_v29, 920167782  ;;  %v1807_v53 = vsel %vm1795_vm12, %v1785_v21, %v1788_v18  ;;  %vm1796_vm1 = vcmp.lt.s32.totalorder %v1776_v1, 2  ;;  %v1808_v58 = vsel %vm1798_vm9, %v1794_v14, 1326507024 }
 0x306   : > { %v1727_v59 = vclz %v7791_v57  ;;  %v1805_v54 = vsel %vm1797_vm7, %v1788_v18, %v1804_v28  ;;  %v1799_v39 = vsel %vm1795_vm12, %v1779_v47, %v1782_v2  ;;  %v1801_v42 = vsel %vm1797_vm7, %v1785_v21, %v1800_v48 }
 0x307   : > { %v1806_v24 = vsel %vm1796_vm1, %v1803_v10, %v1805_v54  ;;  %v1809_v20 = vsel %vm1797_vm7, %v1791_v29, %v1808_v58  ;;  %v1632_v31 = vadd.s32 127, %v1631_v0  ;;  %v1877_v57 = vadd.s32 1, %v7798_v43 }
 0x308   : > { %v7792_v6 = vadd.s32 4294967294, %v1727_v59  ;;  %v1810_v23 = vsel %vm1796_vm1, %v1807_v53, %v1809_v20  ;;  %v9775_v62 = vmul.u32.u64.low %v1811_v5, %v1806_v24  ;;  %v9776_v19 = vmul.u32.u64.high %v1811_v5, %v1806_v24, %v9775_v62 }
 0x309   : > { %v9779_v11 = vmul.u32.u64.low %v1811_v5, %v1810_v23  ;;  %v9780_v25 = vmul.u32.u64.high %v1811_v5, %v1810_v23, %v9779_v11  ;;  %8334 = vcosq.f32 %v9739_v30  ;;  %vm12352_vm12 = vcmp.lt.s32.totalorder %v9293_v8, 0 }
 0x30a   : > { %vm12351_vm9 = vcmp.lt.s32.totalorder %v9390_v56, 0  ;;  %v1535_v2 = vxor.u32 2147483648, %v1534_v41  ;;  %8336 = vsinq.f32 %v9739_v30  ;;  %vm7793_vm7 = vcmp.lt.s32.totalorder %v7792_v6, 0  ;;  %v505_v30 = vpop.permute.xlu0 %504 }
 0x30b   : > { %v1802_v21 = vsel %vm1796_vm1, %v1799_v39, %v1801_v42  ;;  %vm1878_vm15 = vcmp.gt.s32.totalorder %v1877_v57, 0  ;;  %v12599_v18 = vxor.u32 2147483648, %v9723_v51  ;;  %v1611_v23 = vadd.s32 %v9632_v32, %v9630_v36 }
 0x30c   : > { %v1627_v0 = vsub.s32 32, %v9753_v4  ;;  %v12600_v43 = vand.u32 2147483647, %v9712_v63  ;;  %v1633_v14 = vshll.u32 %v1632_v31, 23  ;;  %vm1820_vm1 = vc.u32 %v9780_v25, %v9775_v62 }
 0x30d   : > { %v9792_v29 = vsel %vm12352_vm12, %v12599_v18, %v9723_v51  ;;  %v1821_v1 = vadd.s32 1, %v9776_v19  ;;  %v1879_v48 = vsel %vm1878_vm15, %v1877_v57, 0  ;;  %v9804_v51 = vsel %vm12351_vm9, %v1535_v2, %v1534_v41 }
 0x30e   : > { %v1874_v11 = vand.u32 8388607, %v12600_v43  ;;  %v9806_v10 = vsel %vm7793_vm7, 0, %v7792_v6  ;;  %v1818_v36 = vmul.u32 %v1811_v5, %v1802_v21  ;;  %v1881_v32 = vand.u32 31, %v1879_v48 }
 0x30f   : > { %v1628_v47 = vshll.u32 %v9690_v52, %v9753_v4  ;;  %v1715_v28 = vadd.s32 %v9696_v26, %v9702_v17  ;;  %v1822_v53 = vsel %vm1820_vm1, %v1821_v1, %v9776_v19  ;;  %v9814_v59 = vmul.f32 %v9387_v44, %v505_v30 }
 0x310   : > { %v1629_v54 = vshrl.u32 %v1611_v23, %v1627_v0  ;;  %v1823_v58 = vadd.s32 %v1822_v53, %v1818_v36  ;;  %v1875_v39 = vor.u32 8388608, %v1874_v11  ;;  %v1882_v41 = vsub.s32 32, %v1881_v32 }
 0x311   : > { %12601 = vst [vmem:[#allocation51_spill] sm:$0xff] %v9814_v59  ;;  %v9816_v42 = vor.u32 4788187, %v1633_v14  ;;  %v1735_v5 = vsub.s32 4294967266, %v9806_v10  ;;  %v9819_v24 = vshrl.u32 %v1879_v48, 5  ;;  %v1884_v52 = vshll.u32 %v12561_v12, %v1881_v32 }
 0x312   : > { %v1824_v4 = vadd.s32 536870912, %v1823_v58  ;;  %v1887_v17 = vshll.u32 %v12563_v13, %v1881_v32  ;;  %v1890_v26 = vshll.u32 %v12564_v15, %v1881_v32  ;;  %v1893_v44 = vshll.u32 %v12557_v49, %v1881_v32 }
 0x313   : > { %v1885_v19 = vshrl.u32 %v12563_v13, %v1882_v41  ;;  %v1888_v20 = vshrl.u32 %v12564_v15, %v1882_v41  ;;  %v1891_v6 = vshrl.u32 %v12557_v49, %v1882_v41  ;;  %v1894_v31 = vshrl.u32 %v12559_v9, %v1882_v41  ;;  %v9829_v57 = vpop.eup %8334 }
 0x314   : > { %12602 = vst [vmem:[#allocation52_spill] sm:$0xff] %v9829_v57  ;;  %v1630_v2 = vor.u32 %v1629_v54, %v1628_v47  ;;  %v9831_v21 = vshrl.u32 %v1824_v4, 30  ;;  %v1896_v18 = vshll.u32 %v12559_v9, %v1881_v32  ;;  %v1897_v23 = vshrl.u32 %v12560_v3, %v1882_v41  ;;  %v9835_v0 = vpop.eup %8336  ;;  %v509_v57 = vpop.permute.xlu1 %508 }
 0x315   : > { %12604 = vst [vmem:[#allocation54_spill] sm:$0xff] %v9835_v0  ;;  %v1886_v43 = vor.u32 %v1885_v19, %v1884_v52  ;;  %v1889_v11 = vor.u32 %v1888_v20, %v1887_v17  ;;  %v1892_v30 = vor.u32 %v1891_v6, %v1890_v26  ;;  %v1895_v14 = vor.u32 %v1894_v31, %v1893_v44 }
 0x316   : > { %12603 = vst [vmem:[#allocation53_spill] sm:$0xff] %v9831_v21  ;;  %v1635_v1 = vand.u32 2147483647, %v9816_v42  ;;  %v1826_v48 = vshll.u32 %v9831_v21, 30  ;;  %v1898_v36 = vor.u32 %v1897_v23, %v1896_v18  ;;  %v1915_v53 = vshll.u32 %v1875_v39, 8 }
 0x317   : > { %v12605_v47 = vand.u32 2147483647, %v9293_v8  ;;  %v12606_v54 = vmov 0  ;;  %v1731_v32 = vsub.s32 32, %v9806_v10  ;;  %v1736_v4 = vadd.s32 127, %v1735_v5 }
 0x318   : > { %vm1899_vm7 = vcmp.lt.s32.totalorder %v9819_v24, 1  ;;  %v12609_v17 = vand.u32 2147483647, %v9390_v56  ;;  %v12610_v42 = vmov 0  ;;  %v9854_v39 = vsub.s32 %v1823_v58, %v1826_v48 }
 0x319   : > { %vm9841_vm15 = vcmp.le.f32.partialorder %v12605_v47, 0.7853982  ;;  %vm1902_vm9 = vcmp.lt.s32.totalorder %v9819_v24, 4  ;;  %v1907_v26 = vsel %vm1899_vm7, %v1886_v43, %v1889_v11  ;;  %v1974_v44 = vand.u32 2139095040, %v9814_v59 }
 0x31a   : > { %v12607_v54 = vsel %vm9841_vm15, 4294967295, %v12606_v54  ;;  %vm9850_vm1 = vcmp.le.f32.partialorder %v12609_v17, 0.7853982  ;;  %vm1901_vm12 = vcmp.lt.s32.totalorder %v9819_v24, 3  ;;  %v1908_v5 = vsel %vm1902_vm9, %v1895_v14, 920167782 }
 0x31b   : > { %12608 = vst [vmem:[#allocation55_spill] sm:$0xff] %v12607_v54  ;;  %v12611_v42 = vsel %vm9850_vm1, 4294967295, %v12610_v42  ;;  %v1911_v19 = vsel %vm1899_vm7, %v1889_v11, %v1892_v30  ;;  %v1912_v20 = vsel %vm1902_vm9, %v1898_v36, 1326507024  ;;  %v1829_v6 = vsub.s32 0, %v9854_v39 }
 0x31c   : > { %12612 = vst [vmem:[#allocation56_spill] sm:$0xff] %v12611_v42  ;;  %vm1900_vm3 = vcmp.lt.s32.totalorder %v9819_v24, 2  ;;  %v1904_v58 = vsel %vm1902_vm9, %v1892_v30, 2102212464  ;;  %v1909_v31 = vsel %vm1901_vm12, %v1892_v30, %v1908_v5  ;;  %v1733_v18 = vshrl.u32 %v1715_v28, %v1731_v32 }
 0x31d   : > { %v1883_v23 = vshrl.u32 %v12561_v12, %v1882_v41  ;;  %v1910_v48 = vsel %vm1900_vm3, %v1907_v26, %v1909_v31  ;;  %v1913_v47 = vsel %vm1901_vm12, %v1895_v14, %v1912_v20  ;;  %v1737_v17 = vshll.u32 %v1736_v4, 23 }
 0x31e   : > { %v7795_v36 = vmin.u32 %v1829_v6, %v9854_v39  ;;  %v1914_v52 = vsel %vm1900_vm3, %v1911_v19, %v1913_v47  ;;  %v1975_v21 = vshrl.u32 %v1974_v44, 23  ;;  %v1905_v28 = vsel %vm1901_vm12, %v1889_v11, %v1904_v58 }
 0x31f   : > { %v1903_v30 = vsel %vm1899_vm7, %v1883_v23, %v1886_v43  ;;  %v9879_v41 = vmul.u32.u64.low %v1915_v53, %v1914_v52  ;;  %v9880_v32 = vmul.u32.u64.high %v1915_v53, %v1914_v52, %v9879_v41  ;;  %v1637_v20 = vcvt.s32.f32 %v1630_v2  ;;  %v9890_v43 = vld [vmem:[#allocation8] ss:$0 sm:$0xff] }
 0x320   : > { %v1831_v26 = vclz %v7795_v36  ;;  %v9882_v5 = vmul.u32.u64.low %v1915_v53, %v1910_v48  ;;  %v9883_v14 = vmul.u32.u64.high %v1915_v53, %v1910_v48, %v9882_v5  ;;  %v7802_v4 = vadd.s32 4294967169, %v1975_v21 }
 0x321   : > { %v1732_v44 = vshll.u32 %v9755_v46, %v9806_v10  ;;  %v12613_v19 = vand.u32 2147483647, %v9814_v59  ;;  %v9893_v11 = vmul.f32 %v9890_v43, %v509_v57  ;;  %v1435_v52 = vsel %vm9841_vm15, %v9293_v8, %v9792_v29 }
 0x322   : > { %v7796_v58 = vadd.s32 4294967294, %v1831_v26  ;;  %v1906_v2 = vsel %vm1900_vm3, %v1903_v30, %v1905_v28  ;;  %v1981_v21 = vadd.s32 1, %v7802_v4  ;;  %v9905_v46 = vsel %vm9850_vm1, %v9390_v56, %v9804_v51 }
 0x323   : > { %v1978_v6 = vand.u32 8388607, %v12613_v19  ;;  %12614 = vst [vmem:[#allocation57_spill] sm:$0xff] %v9893_v11  ;;  %v9907_v10 = vmul.f32 %v1637_v20, %v1635_v1  ;;  %v9909_v57 = vor.u32 %v1733_v18, %v1732_v44  ;;  %vm1924_vm12 = vc.u32 %v9880_v32, %v9882_v5 }
 0x324   : > { %v9913_v31 = vor.u32 4788187, %v1737_v17  ;;  %vm7797_vm9 = vcmp.lt.s32.totalorder %v7796_v58, 0  ;;  %v1925_v29 = vadd.s32 1, %v9883_v14  ;;  %vm1982_vm3 = vcmp.gt.s32.totalorder %v1981_v21, 0 }
 0x325   : > { %v1922_v24 = vmul.u32 %v1915_v53, %v1906_v2  ;;  %v1979_v23 = vor.u32 8388608, %v1978_v6  ;;  %v1983_v48 = vsel %vm1982_vm3, %v1981_v21, 0  ;;  %v2078_v47 = vand.u32 2139095040, %v9893_v11 }
 0x326   : > { %8338 = vcosq.f32 %v1435_v52  ;;  %v1926_v51 = vsel %vm1924_vm12, %v1925_v29, %v9883_v14  ;;  %v9918_v1 = vsel %vm7797_vm9, 0, %v7796_v58  ;;  %v1985_v36 = vand.u32 31, %v1983_v48 }
 0x327   : > { %8340 = vsinq.f32 %v1435_v52  ;;  %v1927_v18 = vadd.s32 %v1926_v51, %v1922_v24  ;;  %v1739_v30 = vand.u32 2147483647, %v9913_v31  ;;  %v1741_v53 = vcvt.s32.f32 %v9909_v57 }
 0x328   : > { %8342 = vcosq.f32 %v9905_v46  ;;  %v1986_v41 = vsub.s32 32, %v1985_v36  ;;  %v9924_v26 = vshll.u32 %v1979_v23, 8  ;;  %v2079_v4 = vshrl.u32 %v2078_v47, 23 }
 0x329   : > { %v1928_v28 = vadd.s32 536870912, %v1927_v18  ;;  %v1839_v14 = vsub.s32 4294967266, %v9918_v1  ;;  %v1984_v20 = vshrl.u32 %v1983_v48, 5  ;;  %v1988_v44 = vshll.u32 %v12561_v12, %v1985_v36 }
 0x32a   : > { %v1989_v52 = vshrl.u32 %v12563_v13, %v1986_v41  ;;  %v1991_v58 = vshll.u32 %v12563_v13, %v1985_v36  ;;  %v1992_v2 = vshrl.u32 %v12564_v15, %v1986_v41  ;;  %v1994_v21 = vshll.u32 %v12564_v15, %v1985_v36 }
 0x32b   : > { %v9929_v6 = vshrl.u32 %v1928_v28, 30  ;;  %v1995_v57 = vshrl.u32 %v12557_v49, %v1986_v41  ;;  %v1997_v31 = vshll.u32 %v12557_v49, %v1985_v36  ;;  %v1998_v29 = vshrl.u32 %v12559_v9, %v1986_v41 }
 0x32c   : > { %v1990_v23 = vor.u32 %v1989_v52, %v1988_v44  ;;  %v1993_v48 = vor.u32 %v1992_v2, %v1991_v58  ;;  %v7806_v47 = vadd.s32 4294967169, %v2079_v4  ;;  %v2000_v17 = vshll.u32 %v12559_v9, %v1985_v36 }
 0x32d   : > { %12615 = vst [vmem:[#allocation58_spill] sm:$0xff] %v9929_v6  ;;  %v1930_v24 = vshll.u32 %v9929_v6, 30  ;;  %v1996_v51 = vor.u32 %v1995_v57, %v1994_v21  ;;  %v1999_v28 = vor.u32 %v1998_v29, %v1997_v31  ;;  %v2001_v19 = vshrl.u32 %v12560_v3, %v1986_v41 }
 0x32e   : > { %v1835_v42 = vsub.s32 32, %v9918_v1  ;;  %v1840_v56 = vadd.s32 127, %v1839_v14  ;;  %v1987_v54 = vshrl.u32 %v12561_v12, %v1986_v41  ;;  %vm2003_vm7 = vcmp.lt.s32.totalorder %v1984_v20, 1 }
 0x32f   : > { %v9942_v0 = vsub.s32 %v1927_v18, %v1930_v24  ;;  %v2002_v60 = vor.u32 %v2001_v19, %v2000_v17  ;;  %vm2005_vm12 = vcmp.lt.s32.totalorder %v1984_v20, 3  ;;  %vm2006_vm9 = vcmp.lt.s32.totalorder %v1984_v20, 4 }
 0x330   : > { %v9945_v8 = vpop.eup %8338  ;;  %v2008_v36 = vsel %vm2006_vm9, %v1996_v51, 2102212464  ;;  %v2011_v52 = vsel %vm2003_vm7, %v1990_v23, %v1993_v48  ;;  %v2012_v58 = vsel %vm2006_vm9, %v1999_v28, 920167782  ;;  %vm2004_vm3 = vcmp.lt.s32.totalorder %v1984_v20, 2 }
 0x331   : > { %12616 = vst [vmem:[#allocation59_spill] sm:$0xff] %v9945_v8  ;;  %v9947_v4 = vpop.eup %8340  ;;  %v1933_v44 = vsub.s32 0, %v9942_v0  ;;  %v2013_v18 = vsel %vm2005_vm12, %v1996_v51, %v2012_v58  ;;  %v2015_v14 = vsel %vm2003_vm7, %v1993_v48, %v1996_v51  ;;  %v2085_v41 = vadd.s32 1, %v7806_v47 }
 0x332   : > { %12617 = vst [vmem:[#allocation60_spill] sm:$0xff] %v9947_v4  ;;  %v9950_v2 = vpop.eup %8342  ;;  %v2007_v17 = vsel %vm2003_vm7, %v1987_v54, %v1990_v23  ;;  %v2014_v19 = vsel %vm2004_vm3, %v2011_v52, %v2013_v18  ;;  %v2016_v57 = vsel %vm2006_vm9, %v2002_v60, 1326507024  ;;  %v2009_v31 = vsel %vm2005_vm12, %v1993_v48, %v2008_v36 }
 0x333   : > { %12618 = vst [vmem:[#allocation61_spill] sm:$0xff] %v9950_v2  ;;  %v7799_v21 = vmin.u32 %v1933_v44, %v9942_v0  ;;  %v2017_v29 = vsel %vm2005_vm12, %v1999_v28, %v2016_v57  ;;  %v9958_v24 = vmul.u32.u64.low %v9924_v26, %v2014_v19  ;;  %v9959_v6 = vmul.u32.u64.high %v9924_v26, %v2014_v19, %v9958_v24  ;;  %v513_v44 = vpop.permute.xlu0 %512 }
 0x334   : > { %v9962_v2 = vmul.f32 %v1741_v53, %v1739_v30  ;;  %v1841_v58 = vshll.u32 %v1840_v56, 23  ;;  %v2018_v47 = vsel %vm2004_vm3, %v2015_v14, %v2017_v29  ;;  %v1819_v54 = vadd.s32 %v9775_v62, %v9780_v25  ;;  %v520_v62 = vpop.permute.xlu1 %519 }
 0x335   : > { %v1935_v51 = vclz %v7799_v21  ;;  %v9968_v60 = vmul.u32.u64.low %v9924_v26, %v2018_v47  ;;  %v9969_v23 = vmul.u32.u64.high %v9924_v26, %v2018_v47, %v9968_v60  ;;  %vm2086_vm7 = vcmp.gt.s32.totalorder %v2085_v41, 0 }
 0x336   : > { %v2010_v28 = vsel %vm2004_vm3, %v2007_v17, %v2009_v31  ;;  %v12619_v36 = vand.u32 2147483647, %v9893_v11  ;;  %v2087_v53 = vsel %vm2086_vm7, %v2085_v41, 0  ;;  %v1837_v56 = vshrl.u32 %v1819_v54, %v1835_v42 }
 0x337   : > { %v7800_v48 = vadd.s32 4294967294, %v1935_v51  ;;  %v2029_v52 = vadd.s32 1, %v9959_v6  ;;  %v2089_v18 = vand.u32 31, %v2087_v53  ;;  %v9976_v14 = vmul.f32 %v9890_v43, %v513_v44 }
 0x338   : > { %v2082_v30 = vand.u32 8388607, %v12619_v36  ;;  %v1836_v21 = vshll.u32 %v9854_v39, %v9918_v1  ;;  %v9981_v19 = vor.u32 4788187, %v1841_v58  ;;  %v2026_v41 = vmul.u32 %v9924_v26, %v2010_v28 }
 0x339   : > { %vm7801_vm12 = vcmp.lt.s32.totalorder %v7800_v48, 0  ;;  %vm2028_vm9 = vc.u32 %v9969_v23, %v9958_v24  ;;  %v2090_v42 = vsub.s32 32, %v2089_v18  ;;  %v1923_v17 = vadd.s32 %v9882_v5, %v9880_v32 }
 0x33a   : > { %v9983_v20 = vsel %vm7801_vm12, 0, %v7800_v48  ;;  %v2030_v57 = vsel %vm2028_vm9, %v2029_v52, %v9959_v6  ;;  %v2083_v31 = vor.u32 8388608, %v2082_v30  ;;  %v9992_v29 = vmul.f32 %v9890_v43, %v520_v62 }
 0x33b   : > { %v9994_v39 = vor.u32 %v1837_v56, %v1836_v21  ;;  %v2031_v1 = vadd.s32 %v2030_v57, %v2026_v41  ;;  %v2093_v58 = vshrl.u32 %v12563_v13, %v2090_v42  ;;  %v1943_v51 = vsub.s32 4294967266, %v9983_v20 }
 0x33c   : > { %12620 = vst [vmem:[#allocation62_spill] sm:$0xff] %v9992_v29  ;;  %v2092_v47 = vshll.u32 %v12561_v12, %v2089_v18  ;;  %v2095_v44 = vshll.u32 %v12563_v13, %v2089_v18  ;;  %v2096_v32 = vshrl.u32 %v12564_v15, %v2090_v42  ;;  %v2098_v54 = vshll.u32 %v12564_v15, %v2089_v18 }
 0x33d   : > { %v2032_v6 = vadd.s32 536870912, %v2031_v1  ;;  %v2099_v60 = vshrl.u32 %v12557_v49, %v2090_v42  ;;  %v2088_v48 = vshrl.u32 %v2087_v53, 5  ;;  %v10005_v30 = vshll.u32 %v2083_v31, 8 }
 0x33e   : > { %v2094_v28 = vor.u32 %v2093_v58, %v2092_v47  ;;  %v2097_v36 = vor.u32 %v2096_v32, %v2095_v44  ;;  %v2101_v62 = vshll.u32 %v12557_v49, %v2089_v18  ;;  %v2102_v21 = vshrl.u32 %v12559_v9, %v2090_v42 }
 0x33f   : > { %v10007_v56 = vshrl.u32 %v2032_v6, 30  ;;  %v2100_v52 = vor.u32 %v2099_v60, %v2098_v54  ;;  %v1944_v41 = vadd.s32 127, %v1943_v51  ;;  %v2104_v57 = vshll.u32 %v12559_v9, %v2089_v18 }
 0x340   : > { %v2105_v5 = vshrl.u32 %v12560_v3, %v2090_v42  ;;  %v2182_v25 = vand.u32 2139095040, %v9976_v14  ;;  %vm12381_vm3 = vcmp.lt.s32.totalorder %v9470_v40, 0  ;;  %v1939_v53 = vsub.s32 32, %v9983_v20 }
 0x341   : > { %12621 = vst [vmem:[#allocation63_spill] sm:$0xff] %v10007_v56  ;;  %v2034_v31 = vshll.u32 %v10007_v56, 30  ;;  %v2091_v58 = vshrl.u32 %v12561_v12, %v2090_v42  ;;  %v2103_v47 = vor.u32 %v2102_v21, %v2101_v62  ;;  %vm2107_vm12 = vcmp.lt.s32.totalorder %v2088_v48, 1 }
 0x342   : > { %v2106_v44 = vor.u32 %v2105_v5, %v2104_v57  ;;  %vm2109_vm9 = vcmp.lt.s32.totalorder %v2088_v48, 3  ;;  %vm2110_vm5 = vcmp.lt.s32.totalorder %v2088_v48, 4  ;;  %v2115_v32 = vsel %vm2107_vm12, %v2094_v28, %v2097_v36 }
 0x343   : > { %v10019_v18 = vsub.s32 %v2031_v1, %v2034_v31  ;;  %v2112_v51 = vsel %vm2110_vm5, %v2100_v52, 2102212464  ;;  %v2116_v6 = vsel %vm2110_vm5, %v2103_v47, 920167782  ;;  %v1945_v54 = vshll.u32 %v1944_v41, 23 }
 0x344   : > { %vm2108_vm14 = vcmp.lt.s32.totalorder %v2088_v48, 2  ;;  %v2117_v60 = vsel %vm2109_vm9, %v2100_v52, %v2116_v6  ;;  %v2119_v26 = vsel %vm2107_vm12, %v2097_v36, %v2100_v52  ;;  %v2111_v4 = vsel %vm2107_vm12, %v2091_v58, %v2094_v28 }
 0x345   : > { %v2037_v8 = vsub.s32 0, %v10019_v18  ;;  %v2118_v56 = vsel %vm2108_vm14, %v2115_v32, %v2117_v60  ;;  %v2120_v42 = vsel %vm2110_vm5, %v2106_v44, 1326507024  ;;  %v2113_v62 = vsel %vm2109_vm9, %v2097_v36, %v2112_v51 }
 0x346   : > { %v2121_v5 = vsel %vm2109_vm9, %v2103_v47, %v2120_v42  ;;  %v10024_v21 = vmul.u32.u64.low %v10005_v30, %v2118_v56  ;;  %v10025_v57 = vmul.u32.u64.high %v10005_v30, %v2118_v56, %v10024_v21  ;;  %v12622_v1 = vand.u32 2147483647, %v9470_v40 }
 0x347   : > { %v12623_v41 = vmov 0  ;;  %v12626_v52 = vand.u32 2147483647, %v9562_v16  ;;  %v12627_v28 = vmov 0  ;;  %v1941_v31 = vshrl.u32 %v1923_v17, %v1939_v53 }
 0x348   : > { %vm10030_vm0 = vcmp.le.f32.partialorder %v12622_v1, 0.7853982  ;;  %v7803_v36 = vmin.u32 %v2037_v8, %v10019_v18  ;;  %v2122_v58 = vsel %vm2108_vm14, %v2119_v26, %v2121_v5  ;;  %v2183_v56 = vshrl.u32 %v2182_v25, 23 }
 0x349   : > { %v12624_v41 = vsel %vm10030_vm0, 4294967295, %v12623_v41  ;;  %vm10036_vm7 = vcmp.le.f32.partialorder %v12626_v52, 0.7853982  ;;  %v1946_v47 = vor.u32 4788187, %v1945_v54  ;;  %v1940_v60 = vshll.u32 %v9942_v0, %v9983_v20 }
 0x34a   : > { %12625 = vst [vmem:[#allocation64_spill] sm:$0xff] %v12624_v41  ;;  %v12628_v28 = vsel %vm10036_vm7, 4294967295, %v12627_v28  ;;  %v10043_v44 = vmul.u32.u64.low %v10005_v30, %v2122_v58  ;;  %v10044_v51 = vmul.u32.u64.high %v10005_v30, %v2122_v58, %v10043_v44  ;;  %v12630_v32 = vand.u32 2147483647, %v9976_v14 }
 0x34b   : > { %12629 = vst [vmem:[#allocation65_spill] sm:$0xff] %v12628_v28  ;;  %v2039_v42 = vclz %v7803_v36  ;;  %v2114_v1 = vsel %vm2108_vm14, %v2111_v4, %v2113_v62  ;;  %v7810_v17 = vadd.s32 4294967169, %v2183_v56  ;;  %v12631_v8 = vxor.u32 2147483648, %v9907_v10 }
 0x34c   : > { %v2186_v6 = vand.u32 8388607, %v12630_v32  ;;  %v12632_v26 = vxor.u32 2147483648, %v9962_v2  ;;  %vm12633_vm5 = vcmp.lt.s32.totalorder %v9562_v16, 0  ;;  %v1845_v54 = vcvt.s32.f32 %v9994_v39 }
 0x34d   : > { %v1640_v25 = vsel %vm12381_vm3, %v12631_v8, %v9907_v10  ;;  %v2133_v0 = vadd.s32 1, %v10025_v57  ;;  %v1942_v20 = vor.u32 %v1941_v31, %v1940_v60  ;;  %v7804_v48 = vadd.s32 4294967294, %v2039_v42 }
 0x34e   : > { %v1744_v53 = vsel %vm12633_vm5, %v12632_v26, %v9962_v2  ;;  %v2189_v4 = vadd.s32 1, %v7810_v17  ;;  %v2286_v62 = vand.u32 2139095040, %v9992_v29  ;;  %v12634_v5 = vand.u32 2147483647, %v9981_v19 }
 0x34f   : > { %v1947_v10 = vand.u32 2147483647, %v1946_v47  ;;  %v2130_v36 = vmul.u32 %v10005_v30, %v2114_v1  ;;  %vm2132_vm14 = vc.u32 %v10044_v51, %v10024_v21  ;;  %vm7805_vm12 = vcmp.lt.s32.totalorder %v7804_v48, 0 }
 0x350   : > { %v10066_v52 = vmul.f32 %v1845_v54, %v12634_v5  ;;  %v2134_v2 = vsel %vm2132_vm14, %v2133_v0, %v10025_v57  ;;  %v2187_v39 = vor.u32 8388608, %v2186_v6  ;;  %vm2190_vm9 = vcmp.gt.s32.totalorder %v2189_v4, 0 }
 0x351   : > { %v10072_v31 = vsel %vm7805_vm12, 0, %v7804_v48  ;;  %v2135_v58 = vadd.s32 %v2134_v2, %v2130_v36  ;;  %v2191_v56 = vsel %vm2190_vm9, %v2189_v4, 0  ;;  %v12375_v44 = vand.u32 2147483647, %v9992_v29 }
 0x352   : > { %8344 = vsinq.f32 %v9905_v46  ;;  %v1949_v19 = vcvt.s32.f32 %v1942_v20  ;;  %v2047_v47 = vsub.s32 4294967266, %v10072_v31  ;;  %v2287_v30 = vshrl.u32 %v2286_v62, 23 }
 0x353   : > { %v10080_v32 = vsel %vm10030_vm0, %v9470_v40, %v1640_v25  ;;  %v10085_v57 = vsel %vm10036_vm7, %v9562_v16, %v1744_v53  ;;  %v2136_v6 = vadd.s32 536870912, %v2135_v58  ;;  %v2193_v60 = vand.u32 31, %v2191_v56 }
 0x354   : > { %v10088_v1 = vmul.f32 %v1949_v19, %v1947_v10  ;;  %v2027_v46 = vadd.s32 %v9958_v24, %v9969_v23  ;;  %v10092_v17 = vshll.u32 %v2187_v39, 8  ;;  %v2043_v8 = vsub.s32 32, %v10072_v31 }
 0x355   : > { %v10095_v25 = vshrl.u32 %v2136_v6, 30  ;;  %v2194_v26 = vsub.s32 32, %v2193_v60  ;;  %v10099_v53 = vand.u32 8388607, %v12375_v44  ;;  %v2048_v54 = vadd.s32 127, %v2047_v47 }
 0x356   : > { %v2192_v0 = vshrl.u32 %v2191_v56, 5  ;;  %v2196_v20 = vshll.u32 %v12561_v12, %v2193_v60  ;;  %v7814_v48 = vadd.s32 4294967169, %v2287_v30  ;;  %v2199_v23 = vshll.u32 %v12563_v13, %v2193_v60 }
 0x357   : > { %12635 = vst [vmem:[#allocation66_spill] sm:$0xff] %v10095_v25  ;;  %v2138_v4 = vshll.u32 %v10095_v25, 30  ;;  %v2197_v24 = vshrl.u32 %v12563_v13, %v2194_v26  ;;  %v2200_v62 = vshrl.u32 %v12564_v15, %v2194_v26  ;;  %v2202_v5 = vshll.u32 %v12564_v15, %v2193_v60 }
 0x358   : > { %v2203_v10 = vshrl.u32 %v12557_v49, %v2194_v26  ;;  %v2205_v36 = vshll.u32 %v12557_v49, %v2193_v60  ;;  %v2206_v2 = vshrl.u32 %v12559_v9, %v2194_v26  ;;  %v2045_v39 = vshrl.u32 %v2027_v46, %v2043_v8 }
 0x359   : > { %v10110_v56 = vsub.s32 %v2135_v58, %v2138_v4  ;;  %v2198_v19 = vor.u32 %v2197_v24, %v2196_v20  ;;  %v2201_v47 = vor.u32 %v2200_v62, %v2199_v23  ;;  %v2208_v44 = vshll.u32 %v12559_v9, %v2193_v60 }
 0x35a   : > { %v2204_v30 = vor.u32 %v2203_v10, %v2202_v5  ;;  %v2207_v6 = vor.u32 %v2206_v2, %v2205_v36  ;;  %v2209_v42 = vshrl.u32 %v12560_v3, %v2194_v26  ;;  %v2049_v25 = vshll.u32 %v2048_v54, 23  ;;  %v524_v2 = vpop.permute.xlu0 %523 }
 0x35b   : > { %v2141_v28 = vsub.s32 0, %v10110_v56  ;;  %vm2211_vm5 = vcmp.lt.s32.totalorder %v2192_v0, 1  ;;  %vm2214_vm14 = vcmp.lt.s32.totalorder %v2192_v0, 4  ;;  %vm12393_vm12 = vcmp.lt.s32.totalorder %v9661_v38, 0 }
 0x35c   : > { %v10115_v16 = vpop.eup %8344  ;;  %v2195_v58 = vshrl.u32 %v12561_v12, %v2194_v26  ;;  %v2210_v46 = vor.u32 %v2209_v42, %v2208_v44  ;;  %v2216_v8 = vsel %vm2214_vm14, %v2204_v30, 2102212464  ;;  %v2219_v20 = vsel %vm2211_vm5, %v2198_v19, %v2201_v47 }
 0x35d   : > { %12636 = vst [vmem:[#allocation67_spill] sm:$0xff] %v10115_v16  ;;  %v7807_v4 = vmin.u32 %v2141_v28, %v10110_v56  ;;  %vm2213_vm9 = vcmp.lt.s32.totalorder %v2192_v0, 3  ;;  %v2220_v60 = vsel %vm2214_vm14, %v2207_v6, 920167782  ;;  %v2223_v24 = vsel %vm2211_vm5, %v2201_v47, %v2204_v30 }
 0x35e   : > { %vm2212_vm3 = vcmp.lt.s32.totalorder %v2192_v0, 2  ;;  %v2215_v54 = vsel %vm2211_vm5, %v2195_v58, %v2198_v19  ;;  %v2221_v23 = vsel %vm2213_vm9, %v2204_v30, %v2220_v60  ;;  %v2224_v62 = vsel %vm2214_vm14, %v2210_v46, 1326507024 }
 0x35f   : > { %v12637_v5 = vand.u32 2147483647, %v9661_v38  ;;  %v12638_v10 = vmov 0  ;;  %v2143_v36 = vclz %v7807_v4  ;;  %v2217_v26 = vsel %vm2213_vm9, %v2201_v47, %v2216_v8 }
 0x360   : > { %v2222_v44 = vsel %vm2212_vm3, %v2219_v20, %v2221_v23  ;;  %v2225_v42 = vsel %vm2213_vm9, %v2207_v6, %v2224_v62  ;;  %v2044_v28 = vshll.u32 %v10019_v18, %v10072_v31  ;;  %v2050_v58 = vor.u32 4788187, %v2049_v25 }
 0x361   : > { %vm10122_vm7 = vcmp.le.f32.partialorder %v12637_v5, 0.7853982  ;;  %v2226_v16 = vsel %vm2212_vm3, %v2223_v24, %v2225_v42  ;;  %v10131_v19 = vmul.u32.u64.low %v10092_v17, %v2222_v44  ;;  %v10132_v30 = vmul.u32.u64.high %v10092_v17, %v2222_v44, %v10131_v19 }
 0x362   : > { %v12639_v10 = vsel %vm10122_vm7, 4294967295, %v12638_v10  ;;  %v7808_v46 = vadd.s32 4294967294, %v2143_v36  ;;  %v10136_v60 = vmul.u32.u64.low %v10092_v17, %v2226_v16  ;;  %v10137_v4 = vmul.u32.u64.high %v10092_v17, %v2226_v16, %v10136_v60 }
 0x363   : > { %12640 = vst [vmem:[#allocation68_spill] sm:$0xff] %v12639_v10  ;;  %8346 = vcosq.f32 %v10080_v32  ;;  %v2218_v47 = vsel %vm2212_vm3, %v2215_v54, %v2217_v26  ;;  %v2293_v6 = vadd.s32 1, %v7814_v48  ;;  %v10142_v18 = vmul.f32 %v9890_v43, %v524_v2 }
 0x364   : > { %8348 = vsinq.f32 %v10080_v32  ;;  %vm12390_vm5 = vcmp.lt.s32.totalorder %v9712_v63, 0  ;;  %v2046_v31 = vor.u32 %v2045_v39, %v2044_v28  ;;  %vm7809_vm14 = vcmp.lt.s32.totalorder %v7808_v46, 0 }
 0x365   : > { %12641 = vst [vmem:[#allocation69_spill] sm:$0xff] %v10142_v18  ;;  %8350 = vcosq.f32 %v10085_v57  ;;  %v1951_v25 = vxor.u32 2147483648, %v10088_v1  ;;  %v2237_v16 = vadd.s32 1, %v10132_v30  ;;  %vm2294_vm9 = vcmp.gt.s32.totalorder %v2293_v6, 0 }
 0x366   : > { %v12642_v0 = vxor.u32 2147483648, %v10066_v52  ;;  %v2051_v8 = vand.u32 2147483647, %v2050_v58  ;;  %v2234_v32 = vmul.u32 %v10092_v17, %v2218_v47  ;;  %v2291_v20 = vor.u32 8388608, %v10099_v53 }
 0x367   : > { %v10156_v39 = vsel %vm7809_vm14, 0, %v7808_v46  ;;  %vm2236_vm3 = vc.u32 %v10137_v4, %v10131_v19  ;;  %v2295_v24 = vsel %vm2294_vm9, %v2293_v6, 0  ;;  %v2390_v54 = vand.u32 2139095040, %v10142_v18 }
 0x368   : > { %v1848_v48 = vsel %vm12393_vm12, %v12642_v0, %v10066_v52  ;;  %8352 = vsinq.f32 %v10085_v57  ;;  %v2053_v23 = vcvt.s32.f32 %v2046_v31  ;;  %v2238_v62 = vsel %vm2236_vm3, %v2237_v16, %v10132_v30 }
 0x369   : > { %v12384_v52 = vand.u32 2147483647, %v10142_v18  ;;  %v10167_v17 = vsel %vm10122_vm7, %v9661_v38, %v1848_v48  ;;  %v10172_v53 = vsel %vm12390_vm5, %v1951_v25, %v10088_v1  ;;  %v2239_v5 = vadd.s32 %v2238_v62, %v2234_v32 }
 0x36a   : > { %v2297_v36 = vand.u32 31, %v2295_v24  ;;  %v10174_v26 = vmul.f32 %v2053_v23, %v2051_v8  ;;  %v2131_v57 = vadd.s32 %v10024_v21, %v10044_v51  ;;  %v2147_v44 = vsub.s32 32, %v10156_v39 }
 0x36b   : > { %v10179_v42 = vshll.u32 %v2291_v20, 8  ;;  %v2151_v2 = vsub.s32 4294967266, %v10156_v39  ;;  %v2240_v28 = vadd.s32 536870912, %v2239_v5  ;;  %v2391_v58 = vshrl.u32 %v2390_v54, 23 }
 0x36c   : > { %v2298_v30 = vsub.s32 32, %v2297_v36  ;;  %v2296_v46 = vshrl.u32 %v2295_v24, 5  ;;  %v2300_v1 = vshll.u32 %v12561_v12, %v2297_v36  ;;  %v2303_v60 = vshll.u32 %v12563_v13, %v2297_v36 }
 0x36d   : > { %v10186_v47 = vand.u32 8388607, %v12384_v52  ;;  %v10188_v6 = vpop.eup %8346  ;;  %v10190_v21 = vshrl.u32 %v2240_v28, 30  ;;  %v2306_v25 = vshll.u32 %v12564_v15, %v2297_v36  ;;  %v2309_v48 = vshll.u32 %v12557_v49, %v2297_v36 }
 0x36e   : > { %12643 = vst [vmem:[#allocation70_spill] sm:$0xff] %v10188_v6  ;;  %v2301_v51 = vshrl.u32 %v12563_v13, %v2298_v30  ;;  %v2304_v31 = vshrl.u32 %v12564_v15, %v2298_v30  ;;  %v10195_v16 = vpop.eup %8348  ;;  %v2307_v0 = vshrl.u32 %v12557_v49, %v2298_v30  ;;  %v2310_v8 = vshrl.u32 %v12559_v9, %v2298_v30 }
 0x36f   : > { %12644 = vst [vmem:[#allocation71_spill] sm:$0xff] %v10190_v21  ;;  %12645 = vst [vmem:[#allocation72_spill] sm:$0xff] %v10195_v16  ;;  %v2312_v32 = vshll.u32 %v12559_v9, %v2297_v36  ;;  %v10201_v20 = vpop.eup %8350  ;;  %v2242_v24 = vshll.u32 %v10190_v21, 30  ;;  %v2313_v62 = vshrl.u32 %v12560_v3, %v2298_v30  ;;  %v12647_v28 = vand.u32 2147483647, %v9712_v63 }
 0x370   : > { %12646 = vst [vmem:[#allocation73_spill] sm:$0xff] %v10201_v20  ;;  %v2302_v54 = vor.u32 %v2301_v51, %v2300_v1  ;;  %v2305_v23 = vor.u32 %v2304_v31, %v2303_v60  ;;  %v12648_v52 = vmov 0  ;;  %v2152_v10 = vadd.s32 127, %v2151_v2 }
 0x371   : > { %vm10207_vm14 = vcmp.le.f32.partialorder %v12647_v28, 0.7853982  ;;  %v2308_v38 = vor.u32 %v2307_v0, %v2306_v25  ;;  %v2311_v6 = vor.u32 %v2310_v8, %v2309_v48  ;;  %vm2315_vm9 = vcmp.lt.s32.totalorder %v2296_v46, 1 }
 0x372   : > { %v12649_v52 = vsel %vm10207_vm14, 4294967295, %v12648_v52  ;;  %v10211_v16 = vsub.s32 %v2239_v5, %v2242_v24  ;;  %v2314_v36 = vor.u32 %v2313_v62, %v2312_v32  ;;  %vm2316_vm3 = vcmp.lt.s32.totalorder %v2296_v46, 2  ;;  %v10213_v21 = vpop.eup %8352 }
 0x373   : > { %12650 = vst [vmem:[#allocation74_spill] sm:$0xff] %v12649_v52  ;;  %vm2318_vm5 = vcmp.lt.s32.totalorder %v2296_v46, 4  ;;  %12651 = vst [vmem:[#allocation75_spill] sm:$0xff] %v10213_v21  ;;  %vm2317_vm12 = vcmp.lt.s32.totalorder %v2296_v46, 3  ;;  %v2323_v60 = vsel %vm2315_vm9, %v2302_v54, %v2305_v23  ;;  %vm12399_vm7 = vcmp.lt.s32.totalorder %v9814_v59, 0  ;;  %v528_v46 = vpop.permute.xlu1 %527 }
 0x374   : > { %v2320_v1 = vsel %vm2318_vm5, %v2308_v38, 2102212464  ;;  %v2324_v51 = vsel %vm2318_vm5, %v2311_v6, 920167782  ;;  %v2245_v31 = vsub.s32 0, %v10211_v16  ;;  %v2299_v2 = vshrl.u32 %v12561_v12, %v2298_v30 }
 0x375   : > { %v2325_v25 = vsel %vm2317_vm12, %v2308_v38, %v2324_v51  ;;  %v2327_v5 = vsel %vm2315_vm9, %v2305_v23, %v2308_v38  ;;  %v2149_v0 = vshrl.u32 %v2131_v57, %v2147_v44  ;;  %v2328_v8 = vsel %vm2318_vm5, %v2314_v36, 1326507024 }
 0x376   : > { %v2326_v48 = vsel %vm2316_vm3, %v2323_v60, %v2325_v25  ;;  %v7818_v32 = vadd.s32 4294967169, %v2391_v58  ;;  %v7811_v24 = vmin.u32 %v2245_v31, %v10211_v16  ;;  %v2319_v62 = vsel %vm2315_vm9, %v2299_v2, %v2302_v54 }
 0x377   : > { %v2321_v28 = vsel %vm2317_vm12, %v2305_v23, %v2320_v1  ;;  %v2329_v20 = vsel %vm2317_vm12, %v2311_v6, %v2328_v8  ;;  %v2153_v21 = vshll.u32 %v2152_v10, 23  ;;  %v2148_v38 = vshll.u32 %v10110_v56, %v10156_v39 }
 0x378   : > { %v2330_v30 = vsel %vm2316_vm3, %v2327_v5, %v2329_v20  ;;  %v10228_v51 = vmul.u32.u64.low %v10179_v42, %v2326_v48  ;;  %v10229_v41 = vmul.u32.u64.high %v10179_v42, %v2326_v48, %v10228_v51  ;;  %v2247_v57 = vclz %v7811_v24 }
 0x379   : > { %v10235_v44 = vmul.u32.u64.low %v10179_v42, %v2330_v30  ;;  %v10236_v58 = vmul.u32.u64.high %v10179_v42, %v2330_v30, %v10235_v44  ;;  %8354 = vcosq.f32 %v10167_v17  ;;  %v2055_v6 = vxor.u32 2147483648, %v10174_v26 }
 0x37a   : > { %v2322_v10 = vsel %vm2316_vm3, %v2319_v62, %v2321_v28  ;;  %v2397_v20 = vadd.s32 1, %v7818_v32  ;;  %8356 = vsinq.f32 %v10167_v17  ;;  %v10246_v54 = vsel %vm10207_vm14, %v9712_v63, %v10172_v53 }
 0x37b   : > { %v10248_v56 = vor.u32 %v2149_v0, %v2148_v38  ;;  %v7812_v39 = vadd.s32 4294967294, %v2247_v57  ;;  %v10250_v23 = vor.u32 4788187, %v2153_v21  ;;  %v2341_v36 = vadd.s32 1, %v10229_v41  ;;  %v532_v38 = vpop.permute.xlu0 %531 }
 0x37c   : > { %v2395_v1 = vor.u32 8388608, %v10186_v47  ;;  %vm2398_vm12 = vcmp.gt.s32.totalorder %v2397_v20, 0  ;;  %v2338_v17 = vmul.u32 %v10179_v42, %v2322_v10  ;;  %vm2340_vm9 = vc.u32 %v10236_v58, %v10228_v51 }
 0x37d   : > { %vm7813_vm5 = vcmp.lt.s32.totalorder %v7812_v39, 0  ;;  %v2399_v60 = vsel %vm2398_vm12, %v2397_v20, 0  ;;  %v10260_v53 = vsel %vm12399_vm7, %v2055_v6, %v10174_v26  ;;  %v2342_v31 = vsel %vm2340_vm9, %v2341_v36, %v10229_v41 }
 0x37e   : > { %v10262_v21 = vsel %vm7813_vm5, 0, %v7812_v39  ;;  %v2401_v2 = vand.u32 31, %v2399_v60  ;;  %v2157_v47 = vcvt.s32.f32 %v10248_v56  ;;  %v2235_v25 = vadd.s32 %v10131_v19, %v10137_v4 }
 0x37f   : > { %v2343_v42 = vadd.s32 %v2342_v31, %v2338_v17  ;;  %v10269_v5 = vmul.f32 %v9890_v43, %v528_v46  ;;  %v2155_v0 = vand.u32 2147483647, %v10250_v23  ;;  %v2251_v48 = vsub.s32 32, %v10262_v21 }
 0x380   : > { %v2402_v26 = vsub.s32 32, %v2401_v2  ;;  %v10273_v8 = vshll.u32 %v2395_v1, 8  ;;  %v2255_v32 = vsub.s32 4294967266, %v10262_v21  ;;  %v2404_v24 = vshll.u32 %v12561_v12, %v2401_v2 }
 0x381   : > { %12652 = vst [vmem:[#allocation76_spill] sm:$0xff] %v10269_v5  ;;  %v2344_v41 = vadd.s32 536870912, %v2343_v42  ;;  %v2407_v62 = vshll.u32 %v12563_v13, %v2401_v2  ;;  %v2410_v28 = vshll.u32 %v12564_v15, %v2401_v2  ;;  %v2400_v44 = vshrl.u32 %v2399_v60, 5 }
 0x382   : > { %v2405_v19 = vshrl.u32 %v12563_v13, %v2402_v26  ;;  %v2408_v4 = vshrl.u32 %v12564_v15, %v2402_v26  ;;  %v2411_v30 = vshrl.u32 %v12557_v49, %v2402_v26  ;;  %v2413_v6 = vshll.u32 %v12557_v49, %v2401_v2 }
 0x383   : > { %v10282_v57 = vshrl.u32 %v2344_v41, 30  ;;  %v2414_v10 = vshrl.u32 %v12559_v9, %v2402_v26  ;;  %v10286_v20 = vpop.eup %8354  ;;  %v2494_v31 = vand.u32 2139095040, %v10269_v5  ;;  %v10294_v60 = vmul.f32 %v9890_v43, %v532_v38 }
 0x384   : > { %12654 = vst [vmem:[#allocation78_spill] sm:$0xff] %v10286_v20  ;;  %v2406_v56 = vor.u32 %v2405_v19, %v2404_v24  ;;  %v2409_v39 = vor.u32 %v2408_v4, %v2407_v62  ;;  %v2412_v23 = vor.u32 %v2411_v30, %v2410_v28  ;;  %v10289_v1 = vpop.eup %8356  ;;  %v12657_v41 = vand.u32 2147483647, %v9814_v59 }
 0x385   : > { %12653 = vst [vmem:[#allocation77_spill] sm:$0xff] %v10282_v57  ;;  %12655 = vst [vmem:[#allocation79_spill] sm:$0xff] %v10289_v1  ;;  %v2346_v46 = vshll.u32 %v10282_v57, 30  ;;  %v2415_v17 = vor.u32 %v2414_v10, %v2413_v6  ;;  %v12658_v52 = vmov 0  ;;  %v2253_v24 = vshrl.u32 %v2235_v25, %v2251_v48 }
 0x386   : > { %12656 = vst [vmem:[#allocation80_spill] sm:$0xff] %v10294_v60  ;;  %vm10298_vm3 = vcmp.le.f32.partialorder %v12657_v41, 0.7853982  ;;  %v2256_v62 = vadd.s32 127, %v2255_v32  ;;  %v2416_v19 = vshll.u32 %v12559_v9, %v2401_v2  ;;  %v2417_v4 = vshrl.u32 %v12560_v3, %v2402_v26 }
 0x387   : > { %v12659_v52 = vsel %vm10298_vm3, 4294967295, %v12658_v52  ;;  %v10304_v28 = vsub.s32 %v2343_v42, %v2346_v46  ;;  %vm2419_vm12 = vcmp.lt.s32.totalorder %v2400_v44, 1  ;;  %vm2421_vm5 = vcmp.lt.s32.totalorder %v2400_v44, 3 }
 0x388   : > { %12660 = vst [vmem:[#allocation81_spill] sm:$0xff] %v12659_v52  ;;  %vm2422_vm9 = vcmp.lt.s32.totalorder %v2400_v44, 4  ;;  %v2418_v30 = vor.u32 %v2417_v4, %v2416_v19  ;;  %v2427_v38 = vsel %vm2419_vm12, %v2406_v56, %v2409_v39  ;;  %v2403_v41 = vshrl.u32 %v12561_v12, %v2402_v26 }
 0x389   : > { %v2424_v43 = vsel %vm2422_vm9, %v2412_v23, 2102212464  ;;  %v2428_v6 = vsel %vm2422_vm9, %v2415_v17, 920167782  ;;  %v2349_v10 = vsub.s32 0, %v10304_v28  ;;  %vm2420_vm7 = vcmp.lt.s32.totalorder %v2400_v44, 2 }
 0x38a   : > { %v2429_v25 = vsel %vm2421_vm5, %v2412_v23, %v2428_v6  ;;  %v2257_v2 = vshll.u32 %v2256_v62, 23  ;;  %v2431_v42 = vsel %vm2419_vm12, %v2409_v39, %v2412_v23  ;;  %v2432_v32 = vsel %vm2422_vm9, %v2418_v30, 1326507024 }
 0x38b   : > { %v2430_v48 = vsel %vm2420_vm7, %v2427_v38, %v2429_v25  ;;  %v7815_v46 = vmin.u32 %v2349_v10, %v10304_v28  ;;  %v2423_v19 = vsel %vm2419_vm12, %v2403_v41, %v2406_v56  ;;  %v2425_v4 = vsel %vm2421_vm5, %v2409_v39, %v2424_v43 }
 0x38c   : > { %v2433_v36 = vsel %vm2421_vm5, %v2415_v17, %v2432_v32  ;;  %v10318_v26 = vmul.u32.u64.low %v10273_v8, %v2430_v48  ;;  %v10319_v63 = vmul.u32.u64.high %v10273_v8, %v2430_v48, %v10318_v26  ;;  %v2495_v62 = vshrl.u32 %v2494_v31, 23 }
 0x38d   : > { %v2434_v57 = vsel %vm2420_vm7, %v2431_v42, %v2433_v36  ;;  %v2158_v38 = vmul.f32 %v2157_v47, %v2155_v0  ;;  %v2351_v6 = vclz %v7815_v46  ;;  %v2252_v56 = vshll.u32 %v10211_v16, %v10262_v21 }
 0x38e   : > { %v10323_v23 = vmul.u32.u64.low %v10273_v8, %v2434_v57  ;;  %v10324_v30 = vmul.u32.u64.high %v10273_v8, %v2434_v57, %v10323_v23  ;;  %v2258_v39 = vor.u32 4788187, %v2257_v2  ;;  %v2426_v17 = vsel %vm2420_vm7, %v2423_v19, %v2425_v4 }
 0x38f   : > { %v7822_v43 = vadd.s32 4294967169, %v2495_v62  ;;  %8358 = vcosq.f32 %v10246_v54  ;;  %v10334_v36 = vsel %vm10298_vm3, %v9814_v59, %v10260_v53  ;;  %v7816_v47 = vadd.s32 4294967294, %v2351_v6 }
 0x390   : > { %v12661_v0 = vand.u32 2147483647, %v10269_v5  ;;  %v2254_v31 = vor.u32 %v2253_v24, %v2252_v56  ;;  %v2445_v10 = vadd.s32 1, %v10319_v63  ;;  %v2598_v21 = vand.u32 2139095040, %v10294_v60 }
 0x391   : > { %v2501_v16 = vadd.s32 1, %v7822_v43  ;;  %v2159_v44 = vxor.u32 2147483648, %v2158_v38  ;;  %vm7817_vm7 = vcmp.lt.s32.totalorder %v7816_v47, 0  ;;  %v2442_v41 = vmul.u32 %v10273_v8, %v2426_v17 }
 0x392   : > { %v2498_v57 = vand.u32 8388607, %v12661_v0  ;;  %vm2444_vm12 = vc.u32 %v10324_v30, %v10318_v26  ;;  %v2259_v25 = vand.u32 2147483647, %v2258_v39  ;;  %v10343_v53 = vsel %vm7817_vm7, 0, %v7816_v47 }
 0x393   : > { %v2446_v2 = vsel %vm2444_vm12, %v2445_v10, %v10319_v63  ;;  %vm2502_vm5 = vcmp.gt.s32.totalorder %v2501_v16, 0  ;;  %8360 = vsinq.f32 %v10246_v54  ;;  %v2261_v42 = vcvt.s32.f32 %v2254_v31 }
 0x394   : > { %v2447_v24 = vadd.s32 %v2446_v2, %v2442_v41  ;;  %v2499_v48 = vor.u32 8388608, %v2498_v57  ;;  %v2359_v32 = vsub.s32 4294967266, %v10343_v53  ;;  %v2503_v46 = vsel %vm2502_vm5, %v2501_v16, 0 }
 0x395   : > { %v2599_v19 = vshrl.u32 %v2598_v21, 23  ;;  %8362 = vcosq.f32 %v10334_v36  ;;  %vm12410_vm9 = vcmp.lt.s32.totalorder %v9893_v11, 0  ;;  %v10354_v63 = vmul.f32 %v2261_v42, %v2259_v25 }
 0x396   : > { %v2448_v8 = vadd.s32 536870912, %v2447_v24  ;;  %v10352_v4 = vsel %vm12410_vm9, %v2159_v44, %v2158_v38  ;;  %v2339_v54 = vadd.s32 %v10228_v51, %v10236_v58  ;;  %v2505_v62 = vand.u32 31, %v2503_v46 }
 0x397   : > { %v2355_v6 = vsub.s32 32, %v10343_v53  ;;  %v10361_v56 = vshll.u32 %v2499_v48, 8  ;;  %v2360_v43 = vadd.s32 127, %v2359_v32  ;;  %v7826_v47 = vadd.s32 4294967169, %v2599_v19 }
 0x398   : > { %v10359_v23 = vshrl.u32 %v2448_v8, 30  ;;  %v2506_v38 = vsub.s32 32, %v2505_v62  ;;  %v2504_v51 = vshrl.u32 %v2503_v46, 5  ;;  %v2508_v58 = vshll.u32 %v12561_v12, %v2505_v62 }
 0x399   : > { %v10366_v0 = vpop.eup %8358  ;;  %v2511_v31 = vshll.u32 %v12563_v13, %v2505_v62  ;;  %v2514_v21 = vshll.u32 %v12564_v15, %v2505_v62  ;;  %v2517_v25 = vshll.u32 %v12557_v49, %v2505_v62  ;;  %v2520_v48 = vshll.u32 %v12559_v9, %v2505_v62 }
 0x39a   : > { %12662 = vst [vmem:[#allocation82_spill] sm:$0xff] %v10359_v23  ;;  %12663 = vst [vmem:[#allocation83_spill] sm:$0xff] %v10366_v0  ;;  %v2450_v57 = vshll.u32 %v10359_v23, 30  ;;  %v2509_v10 = vshrl.u32 %v12563_v13, %v2506_v38  ;;  %v2512_v16 = vshrl.u32 %v12564_v15, %v2506_v38  ;;  %v2515_v44 = vshrl.u32 %v12557_v49, %v2506_v38 }
 0x39b   : > { %v2518_v2 = vshrl.u32 %v12559_v9, %v2506_v38  ;;  %v2521_v19 = vshrl.u32 %v12560_v3, %v2506_v38  ;;  %v12665_v23 = vand.u32 2147483647, %v10294_v60  ;;  %v2361_v0 = vshll.u32 %v2360_v43, 23 }
 0x39c   : > { %v10375_v41 = vsub.s32 %v2447_v24, %v2450_v57  ;;  %v2510_v42 = vor.u32 %v2509_v10, %v2508_v58  ;;  %v2513_v32 = vor.u32 %v2512_v16, %v2511_v31  ;;  %v2516_v46 = vor.u32 %v2515_v44, %v2514_v21 }
 0x39d   : > { %v10381_v8 = vpop.eup %8360  ;;  %v2519_v39 = vor.u32 %v2518_v2, %v2517_v25  ;;  %v2602_v24 = vand.u32 8388607, %v12665_v23  ;;  %v2605_v57 = vadd.s32 1, %v7826_v47  ;;  %v2522_v52 = vor.u32 %v2521_v19, %v2520_v48 }
 0x39e   : > { %12664 = vst [vmem:[#allocation84_spill] sm:$0xff] %v10381_v8  ;;  %v2453_v17 = vsub.s32 0, %v10375_v41  ;;  %vm2523_vm7 = vcmp.lt.s32.totalorder %v2504_v51, 1  ;;  %vm2526_vm12 = vcmp.lt.s32.totalorder %v2504_v51, 4  ;;  %v2507_v58 = vshrl.u32 %v12561_v12, %v2506_v38  ;;  %v536_v38 = vpop.permute.xlu1 %535 }
 0x39f   : > { %v10386_v59 = vpop.eup %8362  ;;  %v2528_v31 = vsel %vm2526_vm12, %v2516_v46, 2102212464  ;;  %v2531_v10 = vsel %vm2523_vm7, %v2510_v42, %v2513_v32  ;;  %vm2525_vm5 = vcmp.lt.s32.totalorder %v2504_v51, 3  ;;  %v2532_v16 = vsel %vm2526_vm12, %v2519_v39, 920167782 }
 0x3a0   : > { %12666 = vst [vmem:[#allocation85_spill] sm:$0xff] %v10386_v59  ;;  %v7819_v62 = vmin.u32 %v2453_v17, %v10375_v41  ;;  %v2535_v21 = vsel %vm2523_vm7, %v2513_v32, %v2516_v46  ;;  %v2536_v44 = vsel %vm2526_vm12, %v2522_v52, 1326507024  ;;  %v2357_v25 = vshrl.u32 %v2339_v54, %v2355_v6 }
 0x3a1   : > { %vm2524_vm9 = vcmp.lt.s32.totalorder %v2504_v51, 2  ;;  %v2533_v23 = vsel %vm2525_vm5, %v2516_v46, %v2532_v16  ;;  %v2527_v43 = vsel %vm2523_vm7, %v2507_v58, %v2510_v42  ;;  %v2529_v47 = vsel %vm2525_vm5, %v2513_v32, %v2528_v31  ;;  %v10402_v32 = vld [vmem:[#allocation8] ss:$0 sm:$0xff] }
 0x3a2   : > { %v2455_v2 = vclz %v7819_v62  ;;  %v2534_v48 = vsel %vm2524_vm9, %v2531_v10, %v2533_v23  ;;  %v2537_v19 = vsel %vm2525_vm5, %v2519_v39, %v2536_v44  ;;  %v10390_v8 = vor.u32 4788187, %v2361_v0 }
 0x3a3   : > { %v2538_v17 = vsel %vm2524_vm9, %v2535_v21, %v2537_v19  ;;  %vm2606_vm14 = vcmp.gt.s32.totalorder %v2605_v57, 0  ;;  %v2603_v40 = vor.u32 8388608, %v2602_v24  ;;  %v2530_v54 = vsel %vm2524_vm9, %v2527_v43, %v2529_v47 }
 0x3a4   : > { %v7820_v59 = vadd.s32 4294967294, %v2455_v2  ;;  %v10393_v20 = vmul.u32.u64.low %v10361_v56, %v2538_v17  ;;  %v10394_v1 = vmul.u32.u64.high %v10361_v56, %v2538_v17, %v10393_v20  ;;  %v2607_v52 = vsel %vm2606_vm14, %v2605_v57, 0 }
 0x3a5   : > { %v10397_v6 = vmul.u32.u64.low %v10361_v56, %v2534_v48  ;;  %v10398_v51 = vmul.u32.u64.high %v10361_v56, %v2534_v48, %v10397_v6  ;;  %v2263_v39 = vxor.u32 2147483648, %v10354_v63  ;;  %v2609_v42 = vand.u32 31, %v2607_v52 }
 0x3a6   : > { %vm7821_vm12 = vcmp.lt.s32.totalorder %v7820_v59, 0  ;;  %v10405_v46 = vmul.f32 %v10402_v32, %v536_v38  ;;  %v12668_v20 = vshll.u32 %v10304_v28, %v10343_v53  ;;  %v2363_v57 = vand.u32 2147483647, %v10390_v8 }
 0x3a7   : > { %v2458_v0 = vsel %vm7821_vm12, 0, %v7820_v59  ;;  %v2443_v62 = vadd.s32 %v10318_v26, %v10324_v30  ;;  %v2546_v59 = vmul.u32 %v10361_v56, %v2530_v54  ;;  %vm2548_vm14 = vc.u32 %v10394_v1, %v10397_v6 }
 0x3a8   : > { %12667 = vst [vmem:[#allocation86_spill] sm:$0xff] %v10405_v46  ;;  %v10410_v24 = vor.u32 %v2357_v25, %v12668_v20  ;;  %v2463_v58 = vsub.s32 4294967266, %v2458_v0  ;;  %v2459_v31 = vsub.s32 32, %v2458_v0  ;;  %v2610_v10 = vsub.s32 32, %v2609_v42 }
 0x3a9   : > { %v2549_v21 = vadd.s32 1, %v10398_v51  ;;  %v10419_v44 = vshrl.u32 %v2607_v52, 5  ;;  %v10421_v28 = vshll.u32 %v2603_v40, 8  ;;  %v2612_v53 = vshll.u32 %v12561_v12, %v2609_v42 }
 0x3aa   : > { %v2464_v16 = vadd.s32 127, %v2463_v58  ;;  %v2613_v25 = vshrl.u32 %v12563_v13, %v2610_v10  ;;  %v2615_v26 = vshll.u32 %v12563_v13, %v2609_v42  ;;  %v2616_v30 = vshrl.u32 %v12564_v15, %v2610_v10 }
 0x3ab   : > { %v2550_v2 = vsel %vm2548_vm14, %v2549_v21, %v10398_v51  ;;  %v2618_v23 = vshll.u32 %v12564_v15, %v2609_v42  ;;  %v2619_v43 = vshrl.u32 %v12557_v49, %v2610_v10  ;;  %v2460_v47 = vshll.u32 %v10375_v41, %v2458_v0 }
 0x3ac   : > { %v2465_v56 = vshll.u32 %v2464_v16, 23  ;;  %v2461_v48 = vshrl.u32 %v2443_v62, %v2459_v31  ;;  %v2551_v40 = vadd.s32 %v2550_v2, %v2546_v59  ;;  %v2614_v19 = vor.u32 %v2613_v25, %v2612_v53 }
 0x3ad   : > { %v2617_v17 = vor.u32 %v2616_v30, %v2615_v26  ;;  %v2620_v38 = vor.u32 %v2619_v43, %v2618_v23  ;;  %v2621_v52 = vshll.u32 %v12557_v49, %v2609_v42  ;;  %v2622_v54 = vshrl.u32 %v12559_v9, %v2610_v10 }
 0x3ae   : > { %v2466_v20 = vor.u32 4788187, %v2465_v56  ;;  %v2552_v58 = vadd.s32 536870912, %v2551_v40  ;;  %v2624_v51 = vshll.u32 %v12559_v9, %v2609_v42  ;;  %v2625_v16 = vshrl.u32 %v12560_v3, %v2610_v10 }
 0x3af   : > { %v12669_v21 = vand.u32 2147483647, %v9893_v11  ;;  %v12670_v41 = vmov 0  ;;  %v2611_v0 = vshrl.u32 %v12561_v12, %v2610_v10  ;;  %v2623_v62 = vor.u32 %v2622_v54, %v2621_v52 }
 0x3b0   : > { %vm2627_vm5 = vcmp.lt.s32.totalorder %v10419_v44, 1  ;;  %vm2630_vm12 = vcmp.lt.s32.totalorder %v10419_v44, 4  ;;  %v2462_v31 = vor.u32 %v2461_v48, %v2460_v47  ;;  %v10445_v59 = vshrl.u32 %v2552_v58, 30 }
 0x3b1   : > { %vm10438_vm7 = vcmp.le.f32.partialorder %v12669_v21, 0.7853982  ;;  %v2626_v53 = vor.u32 %v2625_v16, %v2624_v51  ;;  %v2632_v42 = vsel %vm2630_vm12, %v2620_v38, 2102212464  ;;  %v12674_v25 = vand.u32 2147483647, %v9976_v14 }
 0x3b2   : > { %v12671_v41 = vsel %vm10438_vm7, 4294967295, %v12670_v41  ;;  %12673 = vst [vmem:[#allocation88_spill] sm:$0xff] %v10445_v59  ;;  %v12675_v26 = vmov 0  ;;  %vm2628_vm9 = vcmp.lt.s32.totalorder %v10419_v44, 2  ;;  %vm2629_vm3 = vcmp.lt.s32.totalorder %v10419_v44, 3 }
 0x3b3   : > { %12672 = vst [vmem:[#allocation87_spill] sm:$0xff] %v12671_v41  ;;  %vm10451_vm14 = vcmp.le.f32.partialorder %v12674_v25, 0.7853982  ;;  %v2635_v10 = vsel %vm2627_vm5, %v2614_v19, %v2617_v17  ;;  %v2636_v30 = vsel %vm2630_vm12, %v2623_v62, 920167782  ;;  %v2554_v2 = vshll.u32 %v10445_v59, 30 }
 0x3b4   : > { %v12676_v26 = vsel %vm10451_vm14, 4294967295, %v12675_v26  ;;  %v2467_v56 = vand.u32 2147483647, %v2466_v20  ;;  %v2637_v23 = vsel %vm2629_vm3, %v2620_v38, %v2636_v30  ;;  %v2639_v43 = vsel %vm2627_vm5, %v2617_v17, %v2620_v38 }
 0x3b5   : > { %v2631_v47 = vsel %vm2627_vm5, %v2611_v0, %v2614_v19  ;;  %v2633_v48 = vsel %vm2629_vm3, %v2617_v17, %v2632_v42  ;;  %v2638_v52 = vsel %vm2628_vm9, %v2635_v10, %v2637_v23  ;;  %v2640_v54 = vsel %vm2630_vm12, %v2626_v53, 1326507024  ;;  %v540_v42 = vpop.permute.xlu0 %539 }
 0x3b6   : > { %v10464_v58 = vsub.s32 %v2551_v40, %v2554_v2  ;;  %v2641_v51 = vsel %vm2629_vm3, %v2623_v62, %v2640_v54  ;;  %v10467_v16 = vmul.u32.u64.low %v10421_v28, %v2638_v52  ;;  %v10468_v21 = vmul.u32.u64.high %v10421_v28, %v2638_v52, %v10467_v16 }
 0x3b7   : > { %v2365_v20 = vcvt.s32.f32 %v10410_v24  ;;  %v2642_v19 = vsel %vm2628_vm9, %v2639_v43, %v2641_v51  ;;  %v12419_v17 = vand.u32 2147483647, %v10405_v46  ;;  %v2702_v38 = vand.u32 2139095040, %v10405_v46 }
 0x3b8   : > { %vm12425_vm5 = vcmp.lt.s32.totalorder %v9992_v29, 0  ;;  %v2469_v0 = vcvt.s32.f32 %v2462_v31  ;;  %v2557_v40 = vsub.s32 0, %v10464_v58  ;;  %vm12677_vm3 = vcmp.lt.s32.totalorder %v9976_v14, 0 }
 0x3b9   : > { %v10479_v62 = vmul.u32.u64.low %v10421_v28, %v2642_v19  ;;  %v10480_v53 = vmul.u32.u64.high %v10421_v28, %v2642_v19, %v10479_v62  ;;  %v2264_v24 = vsel %vm12677_vm3, %v2263_v39, %v10354_v63  ;;  %v2366_v25 = vmul.f32 %v2365_v20, %v2363_v57  ;;  %v544_v19 = vpop.permute.xlu1 %543 }
 0x3ba   : > { %v2634_v31 = vsel %vm2628_vm9, %v2631_v47, %v2633_v48  ;;  %v2703_v10 = vshrl.u32 %v2702_v38, 23  ;;  %v2163_v30 = vsel %vm10438_vm7, %v9893_v11, %v10352_v4  ;;  %v2470_v2 = vmul.f32 %v2469_v0, %v2467_v56 }
 0x3bb   : > { %v7823_v23 = vmin.u32 %v2557_v40, %v10464_v58  ;;  %v2653_v43 = vadd.s32 1, %v10468_v21  ;;  %8364 = vsinq.f32 %v10334_v36  ;;  %v2706_v8 = vand.u32 8388607, %v12419_v17 }
 0x3bc   : > { %v7830_v63 = vadd.s32 4294967169, %v2703_v10  ;;  %v10502_v39 = vmul.f32 %v10402_v32, %v540_v42  ;;  %v2267_v57 = vsel %vm10451_vm14, %v9976_v14, %v2264_v24  ;;  %v2650_v4 = vmul.u32 %v10421_v28, %v2634_v31 }
 0x3bd   : > { %v2559_v44 = vclz %v7823_v23  ;;  %vm2652_vm9 = vc.u32 %v10480_v53, %v10467_v16  ;;  %8366 = vcosq.f32 %v2163_v30  ;;  %v2367_v56 = vxor.u32 2147483648, %v2366_v25 }
 0x3be   : > { %12678 = vst [vmem:[#allocation89_spill] sm:$0xff] %v10502_v39  ;;  %v2654_v36 = vsel %vm2652_vm9, %v2653_v43, %v10468_v21  ;;  %v2709_v47 = vadd.s32 1, %v7830_v63  ;;  %8368 = vsinq.f32 %v2163_v30  ;;  %v2471_v48 = vxor.u32 2147483648, %v2470_v2 }
 0x3bf   : > { %v7824_v52 = vadd.s32 4294967294, %v2559_v44  ;;  %v2655_v54 = vadd.s32 %v2654_v36, %v2650_v4  ;;  %8370 = vcosq.f32 %v2267_v57  ;;  %v2707_v51 = vor.u32 8388608, %v2706_v8 }
 0x3c0   : > { %vm2710_vm3 = vcmp.gt.s32.totalorder %v2709_v47, 0  ;;  %v2806_v20 = vand.u32 2139095040, %v10502_v39  ;;  %8372 = vsinq.f32 %v2267_v57  ;;  %v10514_v0 = vsel %vm12425_vm5, %v2367_v56, %v2366_v25 }
 0x3c1   : > { %vm7825_vm12 = vcmp.lt.s32.totalorder %v7824_v52, 0  ;;  %v2656_v28 = vadd.s32 536870912, %v2655_v54  ;;  %v2711_v38 = vsel %vm2710_vm3, %v2709_v47, 0  ;;  %v2547_v21 = vadd.s32 %v10397_v6, %v10394_v1 }
 0x3c2   : > { %v10518_v40 = vsel %vm7825_vm12, 0, %v7824_v52  ;;  %v2713_v62 = vand.u32 31, %v2711_v38  ;;  %vm12679_vm9 = vcmp.lt.s32.totalorder %v10142_v18, 0  ;;  %v10528_v10 = vmul.f32 %v10402_v32, %v544_v19 }
 0x3c3   : > { %v10522_v42 = vsel %vm12679_vm9, %v2471_v48, %v2470_v2  ;;  %v2567_v24 = vsub.s32 4294967266, %v10518_v40  ;;  %v10525_v31 = vshrl.u32 %v2656_v28, 30  ;;  %v2563_v25 = vsub.s32 32, %v10518_v40 }
 0x3c4   : > { %12681 = vst [vmem:[#allocation91_spill] sm:$0xff] %v10528_v10  ;;  %v2714_v30 = vsub.s32 32, %v2713_v62  ;;  %v10531_v23 = vshll.u32 %v2707_v51, 8  ;;  %v2807_v1 = vshrl.u32 %v2806_v20, 23  ;;  %v2716_v43 = vshll.u32 %v12561_v12, %v2713_v62 }
 0x3c5   : > { %12680 = vst [vmem:[#allocation90_spill] sm:$0xff] %v10525_v31  ;;  %v2658_v6 = vshll.u32 %v10525_v31, 30  ;;  %v2719_v2 = vshll.u32 %v12563_v13, %v2713_v62  ;;  %v2722_v63 = vshll.u32 %v12564_v15, %v2713_v62  ;;  %v10537_v8 = vpop.eup %8364  ;;  %v2568_v57 = vadd.s32 127, %v2567_v24 }
 0x3c6   : > { %v2717_v44 = vshrl.u32 %v12563_v13, %v2714_v30  ;;  %v2720_v4 = vshrl.u32 %v12564_v15, %v2714_v30  ;;  %v2723_v56 = vshrl.u32 %v12557_v49, %v2714_v30  ;;  %v2712_v47 = vshrl.u32 %v2711_v38, 5 }
 0x3c7   : > { %v10542_v36 = vsub.s32 %v2655_v54, %v2658_v6  ;;  %v2725_v48 = vshll.u32 %v12557_v49, %v2713_v62  ;;  %v2726_v52 = vshrl.u32 %v12559_v9, %v2714_v30  ;;  %v10546_v51 = vpop.eup %8366  ;;  %v12684_v59 = vand.u32 2147483647, %v9992_v29 }
 0x3c8   : > { %12682 = vst [vmem:[#allocation92_spill] sm:$0xff] %v10546_v51  ;;  %v2718_v20 = vor.u32 %v2717_v44, %v2716_v43  ;;  %v2721_v19 = vor.u32 %v2720_v4, %v2719_v2  ;;  %v2724_v28 = vor.u32 %v2723_v56, %v2722_v63  ;;  %v10549_v17 = vpop.eup %8368  ;;  %v12685_v31 = vmov 0 }
 0x3c9   : > { %12683 = vst [vmem:[#allocation93_spill] sm:$0xff] %v10549_v17  ;;  %vm10553_vm12 = vcmp.le.f32.partialorder %v12684_v59, 0.7853982  ;;  %v2564_v54 = vshll.u32 %v10464_v58, %v10518_v40  ;;  %v2661_v38 = vsub.s32 0, %v10542_v36  ;;  %v2727_v6 = vor.u32 %v2726_v52, %v2725_v48  ;;  %v10560_v43 = vpop.eup %8370 }
 0x3ca   : > { %v12686_v31 = vsel %vm10553_vm12, 4294967295, %v12685_v31  ;;  %v7834_v41 = vadd.s32 4294967169, %v2807_v1  ;;  %12688 = vst [vmem:[#allocation95_spill] sm:$0xff] %v10560_v43  ;;  %v12689_v2 = vand.u32 2147483647, %v10142_v18  ;;  %v12690_v63 = vmov 0  ;;  %v10570_v24 = vpop.eup %8372 }
 0x3cb   : > { %12687 = vst [vmem:[#allocation94_spill] sm:$0xff] %v12686_v31  ;;  %v2565_v44 = vshrl.u32 %v2547_v21, %v2563_v25  ;;  %v2569_v59 = vshll.u32 %v2568_v57, 23  ;;  %v2728_v4 = vshll.u32 %v12559_v9, %v2713_v62  ;;  %v2729_v56 = vshrl.u32 %v12560_v3, %v2714_v30 }
 0x3cc   : > { %vm10564_vm3 = vcmp.le.f32.partialorder %v12689_v2, 0.7853982  ;;  %v7827_v58 = vmin.u32 %v2661_v38, %v10542_v36  ;;  %vm2731_vm9 = vcmp.lt.s32.totalorder %v2712_v47, 1  ;;  %vm2733_vm5 = vcmp.lt.s32.totalorder %v2712_v47, 3 }
 0x3cd   : > { %v12691_v63 = vsel %vm10564_vm3, 4294967295, %v12690_v63  ;;  %vm2734_vm7 = vcmp.lt.s32.totalorder %v2712_v47, 4  ;;  %v2730_v40 = vor.u32 %v2729_v56, %v2728_v4  ;;  %v2739_v48 = vsel %vm2731_vm9, %v2718_v20, %v2721_v19 }
 0x3ce   : > { %12692 = vst [vmem:[#allocation96_spill] sm:$0xff] %v12691_v63  ;;  %v2736_v1 = vsel %vm2734_vm7, %v2724_v28, 2102212464  ;;  %v2740_v52 = vsel %vm2734_vm7, %v2727_v6, 920167782  ;;  %v2663_v2 = vclz %v7827_v58  ;;  %v2715_v21 = vshrl.u32 %v12561_v12, %v2714_v30 }
 0x3cf   : > { %vm2732_vm14 = vcmp.lt.s32.totalorder %v2712_v47, 2  ;;  %v2741_v62 = vsel %vm2733_vm5, %v2724_v28, %v2740_v52  ;;  %v2570_v25 = vor.u32 4788187, %v2569_v59  ;;  %v2743_v51 = vsel %vm2731_vm9, %v2721_v19, %v2724_v28 }
 0x3d0   : > { %v2742_v57 = vsel %vm2732_vm14, %v2739_v48, %v2741_v62  ;;  %v2744_v38 = vsel %vm2734_vm7, %v2730_v40, 1326507024  ;;  %v7828_v17 = vadd.s32 4294967294, %v2663_v2  ;;  %v2735_v11 = vsel %vm2731_vm9, %v2715_v21, %v2718_v20 }
 0x3d1   : > { %v2737_v4 = vsel %vm2733_vm5, %v2721_v19, %v2736_v1  ;;  %v2745_v56 = vsel %vm2733_vm5, %v2727_v6, %v2744_v38  ;;  %v10583_v30 = vmul.u32.u64.low %v10531_v23, %v2742_v57  ;;  %v10584_v43 = vmul.u32.u64.high %v10531_v23, %v2742_v57, %v10583_v30 }
 0x3d2   : > { %v2746_v58 = vsel %vm2732_vm14, %v2743_v51, %v2745_v56  ;;  %v2813_v59 = vadd.s32 1, %v7834_v41  ;;  %v2566_v52 = vor.u32 %v2565_v44, %v2564_v54  ;;  %vm7829_vm1 = vcmp.lt.s32.totalorder %v7828_v17, 0 }
 0x3d3   : > { %v10588_v28 = vmul.u32.u64.low %v10531_v23, %v2746_v58  ;;  %v10589_v40 = vmul.u32.u64.high %v10531_v23, %v2746_v58, %v10588_v28  ;;  %v10595_v20 = vsel %vm10553_vm12, %v9992_v29, %v10514_v0  ;;  %v2666_v19 = vsel %vm7829_vm1, 0, %v7828_v17 }
 0x3d4   : > { %v2738_v51 = vsel %vm2732_vm14, %v2735_v11, %v2737_v4  ;;  %vm2814_vm7 = vcmp.gt.s32.totalorder %v2813_v59, 0  ;;  %v10602_v41 = vsel %vm10564_vm3, %v10142_v18, %v10522_v42  ;;  %v2571_v54 = vand.u32 2147483647, %v2570_v25 }
 0x3d5   : > { %v2671_v6 = vsub.s32 4294967266, %v2666_v19  ;;  %v12693_v44 = vand.u32 2147483647, %v10502_v39  ;;  %v2667_v48 = vsub.s32 32, %v2666_v19  ;;  %v2757_v2 = vadd.s32 1, %v10584_v43 }
 0x3d6   : > { %v2815_v0 = vsel %vm2814_vm7, %v2813_v59, 0  ;;  %v2910_v17 = vand.u32 2139095040, %v10528_v10  ;;  %v2573_v47 = vcvt.s32.f32 %v2566_v52  ;;  %v2754_v21 = vmul.u32 %v10531_v23, %v2738_v51 }
 0x3d7   : > { %v2810_v1 = vand.u32 8388607, %v12693_v44  ;;  %v2672_v11 = vadd.s32 127, %v2671_v6  ;;  %vm2756_vm1 = vc.u32 %v10589_v40, %v10583_v30  ;;  %v2651_v42 = vadd.s32 %v10467_v16, %v10480_v53 }
 0x3d8   : > { %v2758_v62 = vsel %vm2756_vm1, %v2757_v2, %v10584_v43  ;;  %v2817_v25 = vand.u32 31, %v2815_v0  ;;  %v2574_v38 = vmul.f32 %v2573_v47, %v2571_v54  ;;  %v2668_v4 = vshll.u32 %v10542_v36, %v2666_v19 }
 0x3d9   : > { %v2759_v56 = vadd.s32 %v2758_v62, %v2754_v21  ;;  %v2811_v58 = vor.u32 8388608, %v2810_v1  ;;  %v2669_v59 = vshrl.u32 %v2651_v42, %v2667_v48  ;;  %v2816_v52 = vshrl.u32 %v2815_v0, 5 }
 0x3da   : > { %v2818_v28 = vsub.s32 32, %v2817_v25  ;;  %v2911_v23 = vshrl.u32 %v2910_v17, 23  ;;  %v2673_v51 = vshll.u32 %v2672_v11, 23  ;;  %v2820_v44 = vshll.u32 %v12561_v12, %v2817_v25 }
 0x3db   : > { %v2760_v6 = vadd.s32 536870912, %v2759_v56  ;;  %v2823_v16 = vshll.u32 %v12563_v13, %v2817_v25  ;;  %v2826_v54 = vshll.u32 %v12564_v15, %v2817_v25  ;;  %v2829_v1 = vshll.u32 %v12557_v49, %v2817_v25 }
 0x3dc   : > { %v2821_v53 = vshrl.u32 %v12563_v13, %v2818_v28  ;;  %v2824_v43 = vshrl.u32 %v12564_v15, %v2818_v28  ;;  %v2827_v36 = vshrl.u32 %v12557_v49, %v2818_v28  ;;  %v2830_v48 = vshrl.u32 %v12559_v9, %v2818_v28 }
 0x3dd   : > { %v10622_v19 = vshrl.u32 %v2760_v6, 30  ;;  %v2832_v2 = vshll.u32 %v12559_v9, %v2817_v25  ;;  %v2833_v11 = vshrl.u32 %v12560_v3, %v2818_v28  ;;  %vm12445_vm14 = vcmp.lt.s32.totalorder %v10269_v5, 0 }
 0x3de   : > { %v2822_v0 = vor.u32 %v2821_v53, %v2820_v44  ;;  %v2825_v17 = vor.u32 %v2824_v43, %v2823_v16  ;;  %v2828_v47 = vor.u32 %v2827_v36, %v2826_v54  ;;  %v2575_v21 = vxor.u32 2147483648, %v2574_v38 }
 0x3df   : > { %12694 = vst [vmem:[#allocation97_spill] sm:$0xff] %v10622_v19  ;;  %v2762_v42 = vshll.u32 %v10622_v19, 30  ;;  %v2831_v62 = vor.u32 %v2830_v48, %v2829_v1  ;;  %v2851_v57 = vshll.u32 %v2811_v58, 8  ;;  %v2670_v6 = vor.u32 %v2669_v59, %v2668_v4 }
 0x3e0   : > { %v2674_v31 = vor.u32 4788187, %v2673_v51  ;;  %v2834_v29 = vor.u32 %v2833_v11, %v2832_v2  ;;  %v7838_v63 = vadd.s32 4294967169, %v2911_v23  ;;  %v2819_v25 = vshrl.u32 %v12561_v12, %v2818_v28 }
 0x3e1   : > { %v10630_v18 = vsub.s32 %v2759_v56, %v2762_v42  ;;  %vm2835_vm5 = vcmp.lt.s32.totalorder %v2816_v52, 1  ;;  %vm2838_vm9 = vcmp.lt.s32.totalorder %v2816_v52, 4  ;;  %vm2837_vm7 = vcmp.lt.s32.totalorder %v2816_v52, 3 }
 0x3e2   : > { %v2840_v44 = vsel %vm2838_vm9, %v2828_v47, 2102212464  ;;  %v2843_v16 = vsel %vm2835_vm5, %v2822_v0, %v2825_v17  ;;  %v2844_v53 = vsel %vm2838_vm9, %v2831_v62, 920167782  ;;  %vm2836_vm1 = vcmp.lt.s32.totalorder %v2816_v52, 2 }
 0x3e3   : > { %v2765_v43 = vsub.s32 0, %v10630_v18  ;;  %v2845_v54 = vsel %vm2837_vm7, %v2828_v47, %v2844_v53  ;;  %v2847_v36 = vsel %vm2835_vm5, %v2825_v17, %v2828_v47  ;;  %v2675_v58 = vand.u32 2147483647, %v2674_v31 }
 0x3e4   : > { %v2846_v4 = vsel %vm2836_vm1, %v2843_v16, %v2845_v54  ;;  %v2848_v59 = vsel %vm2838_vm9, %v2834_v29, 1326507024  ;;  %v12695_v56 = vand.u32 2147483647, %v10528_v10  ;;  %v2839_v51 = vsel %vm2835_vm5, %v2819_v25, %v2822_v0 }
 0x3e5   : > { %v7831_v28 = vmin.u32 %v2765_v43, %v10630_v18  ;;  %v2841_v1 = vsel %vm2837_vm7, %v2825_v17, %v2840_v44  ;;  %v2849_v48 = vsel %vm2837_vm7, %v2831_v62, %v2848_v59  ;;  %v2677_v2 = vcvt.s32.f32 %v2670_v6 }
 0x3e6   : > { %v2914_v23 = vand.u32 8388607, %v12695_v56  ;;  %v2850_v11 = vsel %vm2836_vm1, %v2847_v36, %v2849_v48  ;;  %v10639_v42 = vmul.u32.u64.low %v2851_v57, %v2846_v4  ;;  %v10640_v19 = vmul.u32.u64.high %v2851_v57, %v2846_v4, %v10639_v42 }
 0x3e7   : > { %v2767_v47 = vclz %v7831_v28  ;;  %v10643_v31 = vmul.u32.u64.low %v2851_v57, %v2850_v11  ;;  %v10644_v53 = vmul.u32.u64.high %v2851_v57, %v2850_v11, %v10643_v31  ;;  %v2917_v29 = vadd.s32 1, %v7838_v63 }
 0x3e8   : > { %8374 = vcosq.f32 %v10595_v20  ;;  %v12696_v16 = vand.u32 2147483647, %v10269_v5  ;;  %v12697_v0 = vmov 0  ;;  %v2576_v17 = vsel %vm12445_vm14, %v2575_v21, %v2574_v38  ;;  %v548_v31 = vpop.permute.xlu0 %547 }
 0x3e9   : > { %v2842_v62 = vsel %vm2836_vm1, %v2839_v51, %v2841_v1  ;;  %8376 = vsinq.f32 %v10595_v20  ;;  %v10657_v6 = vmul.f32 %v2677_v2, %v2675_v58  ;;  %v7832_v25 = vadd.s32 4294967294, %v2767_v47 }
 0x3ea   : > { %vm10649_vm9 = vcmp.le.f32.partialorder %v12696_v16, 0.7853982  ;;  %vm2918_vm5 = vcmp.gt.s32.totalorder %v2917_v29, 0  ;;  %8378 = vcosq.f32 %v10602_v41  ;;  %v2861_v63 = vadd.s32 1, %v10640_v19 }
 0x3eb   : > { %v12698_v0 = vsel %vm10649_vm9, 4294967295, %v12697_v0  ;;  %v2915_v44 = vor.u32 8388608, %v2914_v23  ;;  %v2919_v43 = vsel %vm2918_vm5, %v2917_v29, 0  ;;  %v10664_v54 = vsel %vm10649_vm9, %v10269_v5, %v2576_v17 }
 0x3ec   : > { %12699 = vst [vmem:[#allocation98_spill] sm:$0xff] %v12698_v0  ;;  %vm7833_vm7 = vcmp.lt.s32.totalorder %v7832_v25, 0  ;;  %v2858_v38 = vmul.u32 %v2851_v57, %v2842_v62  ;;  %vm2860_vm1 = vc.u32 %v10644_v53, %v10639_v42  ;;  %v2755_v20 = vadd.s32 %v10583_v30, %v10589_v40 }
 0x3ed   : > { %v2770_v52 = vsel %vm7833_vm7, 0, %v7832_v25  ;;  %v2862_v21 = vsel %vm2860_vm1, %v2861_v63, %v10640_v19  ;;  %v2921_v36 = vand.u32 31, %v2919_v43  ;;  %v10672_v23 = vshrl.u32 %v2919_v43, 5 }
 0x3ee   : > { %v2771_v4 = vsub.s32 32, %v2770_v52  ;;  %v2775_v59 = vsub.s32 4294967266, %v2770_v52  ;;  %v2863_v56 = vadd.s32 %v2862_v21, %v2858_v38  ;;  %v10675_v51 = vshll.u32 %v2915_v44, 8 }
 0x3ef   : > { %v2922_v28 = vsub.s32 32, %v2921_v36  ;;  %v2924_v57 = vshll.u32 %v12561_v12, %v2921_v36  ;;  %v2927_v30 = vshll.u32 %v12563_v13, %v2921_v36  ;;  %v2930_v40 = vshll.u32 %v12564_v15, %v2921_v36 }
 0x3f0   : > { %v2776_v1 = vadd.s32 127, %v2775_v59  ;;  %v2864_v48 = vadd.s32 536870912, %v2863_v56  ;;  %v2773_v19 = vshrl.u32 %v2755_v20, %v2771_v4  ;;  %v2933_v17 = vshll.u32 %v12557_v49, %v2921_v36 }
 0x3f1   : > { %v2925_v2 = vshrl.u32 %v12563_v13, %v2922_v28  ;;  %v2928_v11 = vshrl.u32 %v12564_v15, %v2922_v28  ;;  %v2931_v47 = vshrl.u32 %v12557_v49, %v2922_v28  ;;  %v2934_v62 = vshrl.u32 %v12559_v9, %v2922_v28 }
 0x3f2   : > { %v2777_v29 = vshll.u32 %v2776_v1, 23  ;;  %v10682_v16 = vshrl.u32 %v2864_v48, 30  ;;  %v10686_v25 = vpop.eup %8374  ;;  %v2772_v63 = vshll.u32 %v10630_v18, %v2770_v52  ;;  %v10693_v1 = vmul.f32 %v10402_v32, %v548_v31 }
 0x3f3   : > { %12701 = vst [vmem:[#allocation100_spill] sm:$0xff] %v10686_v25  ;;  %v2926_v44 = vor.u32 %v2925_v2, %v2924_v57  ;;  %v2929_v43 = vor.u32 %v2928_v11, %v2927_v30  ;;  %v2932_v38 = vor.u32 %v2931_v47, %v2930_v40  ;;  %v10689_v20 = vpop.eup %8376  ;;  %v2935_v59 = vor.u32 %v2934_v62, %v2933_v17 }
 0x3f4   : > { %12700 = vst [vmem:[#allocation99_spill] sm:$0xff] %v10682_v16  ;;  %12702 = vst [vmem:[#allocation101_spill] sm:$0xff] %v10689_v20  ;;  %v2778_v21 = vor.u32 4788187, %v2777_v29  ;;  %v2866_v4 = vshll.u32 %v10682_v16, 30  ;;  %v10695_v48 = vpop.eup %8378  ;;  %v2774_v58 = vor.u32 %v2773_v19, %v2772_v63  ;;  %v2923_v0 = vshrl.u32 %v12561_v12, %v2922_v28 }
 0x3f5   : > { %12703 = vst [vmem:[#allocation102_spill] sm:$0xff] %v10695_v48  ;;  %v2936_v5 = vshll.u32 %v12559_v9, %v2921_v36  ;;  %v2937_v18 = vshrl.u32 %v12560_v3, %v2922_v28  ;;  %vm12458_vm5 = vcmp.lt.s32.totalorder %v10294_v60, 0  ;;  %vm2939_vm7 = vcmp.lt.s32.totalorder %v10672_v23, 1 }
 0x3f6   : > { %v10701_v52 = vsub.s32 %v2863_v56, %v2866_v4  ;;  %vm2941_vm1 = vcmp.lt.s32.totalorder %v10672_v23, 3  ;;  %vm2942_vm14 = vcmp.lt.s32.totalorder %v10672_v23, 4  ;;  %v2947_v40 = vsel %vm2939_vm7, %v2926_v44, %v2929_v43  ;;  %v552_v4 = vpop.permute.xlu1 %551 }
 0x3f7   : > { %v2938_v57 = vor.u32 %v2937_v18, %v2936_v5  ;;  %v2944_v30 = vsel %vm2942_vm14, %v2932_v38, 2102212464  ;;  %v2948_v19 = vsel %vm2942_vm14, %v2935_v59, 920167782  ;;  %v2779_v2 = vand.u32 2147483647, %v2778_v21 }
 0x3f8   : > { %v2869_v36 = vsub.s32 0, %v10701_v52  ;;  %vm2940_vm9 = vcmp.lt.s32.totalorder %v10672_v23, 2  ;;  %v2949_v56 = vsel %vm2941_vm1, %v2932_v38, %v2948_v19  ;;  %v2781_v28 = vcvt.s32.f32 %v2774_v58 }
 0x3f9   : > { %v2950_v11 = vsel %vm2940_vm9, %v2947_v40, %v2949_v56  ;;  %v2951_v5 = vsel %vm2939_vm7, %v2929_v43, %v2932_v38  ;;  %v2952_v47 = vsel %vm2942_vm14, %v2938_v57, 1326507024  ;;  %v2943_v29 = vsel %vm2939_vm7, %v2923_v0, %v2926_v44 }
 0x3fa   : > { %v7835_v31 = vmin.u32 %v2869_v36, %v10701_v52  ;;  %v2945_v17 = vsel %vm2941_vm1, %v2929_v43, %v2944_v30  ;;  %v2953_v62 = vsel %vm2941_vm1, %v2935_v59, %v2952_v47  ;;  %v3014_v38 = vand.u32 2139095040, %v10693_v1 }
 0x3fb   : > { %v2954_v58 = vsel %vm2940_vm9, %v2951_v5, %v2953_v62  ;;  %v10726_v63 = vmul.u32.u64.low %v10675_v51, %v2950_v11  ;;  %v10727_v21 = vmul.u32.u64.high %v10675_v51, %v2950_v11, %v10726_v63  ;;  %v2782_v18 = vmul.f32 %v2781_v28, %v2779_v2 }
 0x3fc   : > { %v2871_v57 = vclz %v7835_v31  ;;  %v10732_v0 = vmul.u32.u64.low %v10675_v51, %v2954_v58  ;;  %v10733_v44 = vmul.u32.u64.high %v10675_v51, %v2954_v58, %v10732_v0  ;;  %8380 = vsinq.f32 %v10602_v41 }
 0x3fd   : > { %v2946_v43 = vsel %vm2940_vm9, %v2943_v29, %v2945_v17  ;;  %v12447_v59 = vand.u32 2147483647, %v10693_v1  ;;  %v3015_v30 = vshrl.u32 %v3014_v38, 23  ;;  %8382 = vcosq.f32 %v10664_v54  ;;  %v556_v38 = vpop.permute.xlu0 %555 }
 0x3fe   : > { %v12704_v40 = vand.u32 2147483647, %v10294_v60  ;;  %v12705_v19 = vmov 0  ;;  %v7836_v2 = vadd.s32 4294967294, %v2871_v57  ;;  %v10747_v36 = vmul.f32 %v10402_v32, %v552_v4 }
 0x3ff   : > { %v12709_v41 = vxor.u32 2147483648, %v10657_v6  ;;  %v2859_v56 = vadd.s32 %v10639_v42, %v10644_v53  ;;  %v2965_v28 = vadd.s32 1, %v10727_v21  ;;  %v7842_v11 = vadd.s32 4294967169, %v3015_v30 }
 0x400   : > { %vm10742_vm14 = vcmp.le.f32.partialorder %v12704_v40, 0.7853982  ;;  %12708 = vst [vmem:[#allocation104_spill] sm:$0xff] %v10747_v36  ;;  %v2783_v5 = vxor.u32 2147483648, %v2782_v18  ;;  %vm7837_vm9 = vcmp.lt.s32.totalorder %v7836_v2, 0  ;;  %v2962_v47 = vmul.u32 %v10675_v51, %v2946_v43 }
 0x401   : > { %v12706_v19 = vsel %vm10742_vm14, 4294967295, %v12705_v19  ;;  %v2680_v23 = vsel %vm12458_vm5, %v12709_v41, %v10657_v6  ;;  %vm2964_vm7 = vc.u32 %v10733_v44, %v10726_v63  ;;  %v2874_v31 = vsel %vm7837_vm9, 0, %v7836_v2 }
 0x402   : > { %12707 = vst [vmem:[#allocation103_spill] sm:$0xff] %v12706_v19  ;;  %v2966_v29 = vsel %vm2964_vm7, %v2965_v28, %v10727_v21  ;;  %v3018_v17 = vand.u32 8388607, %v12447_v59  ;;  %v3021_v6 = vadd.s32 1, %v7842_v11  ;;  %v2875_v62 = vsub.s32 32, %v2874_v31 }
 0x403   : > { %v2879_v58 = vsub.s32 4294967266, %v2874_v31  ;;  %v2967_v42 = vadd.s32 %v2966_v29, %v2962_v47  ;;  %v3118_v53 = vand.u32 2139095040, %v10747_v36  ;;  %8384 = vsinq.f32 %v10664_v54 }
 0x404   : > { %v10768_v51 = vsel %vm10742_vm14, %v10294_v60, %v2680_v23  ;;  %vm12457_vm1 = vcmp.lt.s32.totalorder %v10405_v46, 0  ;;  %vm3022_vm9 = vcmp.gt.s32.totalorder %v3021_v6, 0  ;;  %v2877_v21 = vshrl.u32 %v2859_v56, %v2875_v62 }
 0x405   : > { %v2880_v4 = vadd.s32 127, %v2879_v58  ;;  %v2968_v57 = vadd.s32 536870912, %v2967_v42  ;;  %v3023_v0 = vsel %vm3022_vm9, %v3021_v6, 0  ;;  %v10773_v43 = vsel %vm12457_vm1, %v2783_v5, %v2782_v18 }
 0x406   : > { %v2876_v30 = vshll.u32 %v10701_v52, %v2874_v31  ;;  %v3025_v40 = vand.u32 31, %v3023_v0  ;;  %v10777_v54 = vmul.f32 %v10402_v32, %v556_v38  ;;  %v3019_v23 = vor.u32 8388608, %v3018_v17  ;;  %v10781_v11 = vpop.eup %8380 }
 0x407   : > { %v2881_v2 = vshll.u32 %v2880_v4, 23  ;;  %v10779_v41 = vshrl.u32 %v2968_v57, 30  ;;  %v3119_v28 = vshrl.u32 %v3118_v53, 23  ;;  %12711 = vst [vmem:[#allocation106_spill] sm:$0xff] %v10781_v11  ;;  %v3024_v47 = vshrl.u32 %v3023_v0, 5  ;;  %v10784_v18 = vpop.eup %8382 }
 0x408   : > { %v2878_v56 = vor.u32 %v2877_v21, %v2876_v30  ;;  %v3026_v29 = vsub.s32 32, %v3025_v40  ;;  %v3028_v6 = vshll.u32 %v12561_v12, %v3025_v40  ;;  %12712 = vst [vmem:[#allocation107_spill] sm:$0xff] %v10784_v18  ;;  %v3031_v31 = vshll.u32 %v12563_v13, %v3025_v40 }
 0x409   : > { %12710 = vst [vmem:[#allocation105_spill] sm:$0xff] %v10779_v41  ;;  %v2882_v5 = vor.u32 4788187, %v2881_v2  ;;  %v2970_v52 = vshll.u32 %v10779_v41, 30  ;;  %v3034_v62 = vshll.u32 %v12564_v15, %v3025_v40  ;;  %v3037_v38 = vshll.u32 %v12557_v49, %v3025_v40 }
 0x40a   : > { %v3029_v58 = vshrl.u32 %v12563_v13, %v3026_v29  ;;  %v3032_v17 = vshrl.u32 %v12564_v15, %v3026_v29  ;;  %v3035_v53 = vshrl.u32 %v12557_v49, %v3026_v29  ;;  %v3038_v57 = vshrl.u32 %v12559_v9, %v3026_v29 }
 0x40b   : > { %v2883_v21 = vand.u32 2147483647, %v2882_v5  ;;  %v10793_v4 = vsub.s32 %v2967_v42, %v2970_v52  ;;  %v3040_v0 = vshll.u32 %v12559_v9, %v3025_v40  ;;  %v3041_v41 = vshrl.u32 %v12560_v3, %v3026_v29 }
 0x40c   : > { %v3030_v30 = vor.u32 %v3029_v58, %v3028_v6  ;;  %v3033_v2 = vor.u32 %v3032_v17, %v3031_v31  ;;  %v3036_v59 = vor.u32 %v3035_v53, %v3034_v62  ;;  %v2885_v16 = vcvt.s32.f32 %v2878_v56 }
 0x40d   : > { %v2973_v18 = vsub.s32 0, %v10793_v4  ;;  %v3039_v19 = vor.u32 %v3038_v57, %v3037_v38  ;;  %v10800_v25 = vpop.eup %8384  ;;  %v12714_v42 = vand.u32 2147483647, %v10405_v46  ;;  %v12715_v5 = vmov 0 }
 0x40e   : > { %12713 = vst [vmem:[#allocation108_spill] sm:$0xff] %v10800_v25  ;;  %v3027_v40 = vshrl.u32 %v12561_v12, %v3026_v29  ;;  %v3042_v6 = vor.u32 %v3041_v41, %v3040_v0  ;;  %v3059_v52 = vshll.u32 %v3019_v23, 8  ;;  %v7846_v31 = vadd.s32 4294967169, %v3119_v28  ;;  %v560_v25 = vpop.permute.xlu1 %559 }
 0x40f   : > { %vm10804_vm7 = vcmp.le.f32.partialorder %v12714_v42, 0.7853982  ;;  %v2886_v62 = vmul.f32 %v2885_v16, %v2883_v21  ;;  %v7839_v56 = vmin.u32 %v2973_v18, %v10793_v4  ;;  %vm3043_vm9 = vcmp.lt.s32.totalorder %v3024_v47, 1 }
 0x410   : > { %v12716_v5 = vsel %vm10804_vm7, 4294967295, %v12715_v5  ;;  %vm3046_vm1 = vcmp.lt.s32.totalorder %v3024_v47, 4  ;;  %vm3045_vm14 = vcmp.lt.s32.totalorder %v3024_v47, 3  ;;  %v3051_v17 = vsel %vm3043_vm9, %v3030_v30, %v3033_v2 }
 0x411   : > { %12717 = vst [vmem:[#allocation109_spill] sm:$0xff] %v12716_v5  ;;  %v3048_v58 = vsel %vm3046_vm1, %v3036_v59, 2102212464  ;;  %v3052_v53 = vsel %vm3046_vm1, %v3039_v19, 920167782  ;;  %v2975_v38 = vclz %v7839_v56  ;;  %vm3044_vm12 = vcmp.lt.s32.totalorder %v3024_v47, 2 }
 0x412   : > { %v3053_v57 = vsel %vm3045_vm14, %v3036_v59, %v3052_v53  ;;  %v3055_v42 = vsel %vm3043_vm9, %v3033_v2, %v3036_v59  ;;  %v3047_v60 = vsel %vm3043_vm9, %v3027_v40, %v3030_v30  ;;  %v3056_v23 = vsel %vm3046_vm1, %v3042_v6, 1326507024 }
 0x413   : > { %v3054_v41 = vsel %vm3044_vm12, %v3051_v17, %v3053_v57  ;;  %v12718_v16 = vand.u32 2147483647, %v10747_v36  ;;  %v7840_v29 = vadd.s32 4294967294, %v2975_v38  ;;  %v3049_v18 = vsel %vm3045_vm14, %v3033_v2, %v3048_v58 }
 0x414   : > { %v3057_v21 = vsel %vm3045_vm14, %v3039_v19, %v3056_v23  ;;  %v3125_v0 = vadd.s32 1, %v7846_v31  ;;  %v2887_v20 = vxor.u32 2147483648, %v2886_v62  ;;  %v3050_v6 = vsel %vm3044_vm12, %v3047_v60, %v3049_v18 }
 0x415   : > { %v3122_v28 = vand.u32 8388607, %v12718_v16  ;;  %v3058_v48 = vsel %vm3044_vm12, %v3055_v42, %v3057_v21  ;;  %v10815_v11 = vmul.u32.u64.low %v3059_v52, %v3054_v41  ;;  %v10816_v56 = vmul.u32.u64.high %v3059_v52, %v3054_v41, %v10815_v11 }
 0x416   : > { %vm7841_vm5 = vcmp.lt.s32.totalorder %v7840_v29, 0  ;;  %v10819_v59 = vmul.u32.u64.low %v3059_v52, %v3058_v48  ;;  %v10820_v30 = vmul.u32.u64.high %v3059_v52, %v3058_v48, %v10819_v59  ;;  %vm3126_vm1 = vcmp.gt.s32.totalorder %v3125_v0, 0 }
 0x417   : > { %v2978_v40 = vsel %vm7841_vm5, 0, %v7840_v29  ;;  %v3127_v17 = vsel %vm3126_vm1, %v3125_v0, 0  ;;  %v10824_v19 = vmul.f32 %v10402_v32, %v560_v25  ;;  %v10830_v2 = vsel %vm10804_vm7, %v10405_v46, %v10773_v43 }
 0x418   : > { %v2963_v31 = vadd.s32 %v10726_v63, %v10733_v44  ;;  %v2979_v58 = vsub.s32 32, %v2978_v40  ;;  %v2983_v48 = vsub.s32 4294967266, %v2978_v40  ;;  %v3069_v53 = vadd.s32 1, %v10816_v56 }
 0x419   : > { %12719 = vst [vmem:[#allocation110_spill] sm:$0xff] %v10824_v19  ;;  %v3123_v38 = vor.u32 8388608, %v3122_v28  ;;  %v3129_v47 = vand.u32 31, %v3127_v17  ;;  %v12467_v60 = vand.u32 2147483647, %v10777_v54  ;;  %vm12720_vm12 = vcmp.lt.s32.totalorder %v10502_v39, 0 }
 0x41a   : > { %v10838_v32 = vsel %vm12720_vm12, %v2887_v20, %v2886_v62  ;;  %v2984_v25 = vadd.s32 127, %v2983_v48  ;;  %v3066_v57 = vmul.u32 %v3059_v52, %v3050_v6  ;;  %vm3068_vm5 = vc.u32 %v10820_v30, %v10815_v11 }
 0x41b   : > { %v2980_v43 = vshll.u32 %v10793_v4, %v2978_v40  ;;  %v2981_v63 = vshrl.u32 %v2963_v31, %v2979_v58  ;;  %v3070_v44 = vsel %vm3068_vm5, %v3069_v53, %v10816_v56  ;;  %v3130_v42 = vsub.s32 32, %v3129_v47 }
 0x41c   : > { %v2985_v41 = vshll.u32 %v2984_v25, 23  ;;  %v3071_v23 = vadd.s32 %v3070_v44, %v3066_v57  ;;  %v3132_v16 = vshll.u32 %v12561_v12, %v3129_v47  ;;  %v3135_v28 = vshll.u32 %v12563_v13, %v3129_v47 }
 0x41d   : > { %v3133_v20 = vshrl.u32 %v12563_v13, %v3130_v42  ;;  %v3136_v62 = vshrl.u32 %v12564_v15, %v3130_v42  ;;  %v3138_v52 = vshll.u32 %v12564_v15, %v3129_v47  ;;  %v3139_v29 = vshrl.u32 %v12557_v49, %v3130_v42 }
 0x41e   : > { %v2986_v18 = vor.u32 4788187, %v2985_v41  ;;  %v3072_v4 = vadd.s32 536870912, %v3071_v23  ;;  %v3128_v21 = vshrl.u32 %v3127_v17, 5  ;;  %v3141_v0 = vshll.u32 %v12557_v49, %v3129_v47 }
 0x41f   : > { %v3134_v56 = vor.u32 %v3133_v20, %v3132_v16  ;;  %v3137_v59 = vor.u32 %v3136_v62, %v3135_v28  ;;  %v3140_v40 = vor.u32 %v3139_v29, %v3138_v52  ;;  %v3142_v6 = vshrl.u32 %v12559_v9, %v3130_v42 }
 0x420   : > { %v10852_v31 = vshrl.u32 %v3072_v4, 30  ;;  %v3144_v58 = vshll.u32 %v12559_v9, %v3129_v47  ;;  %v3145_v48 = vshrl.u32 %v12560_v3, %v3130_v42  ;;  %v3163_v53 = vshll.u32 %v3123_v38, 8 }
 0x421   : > { %v12722_v25 = vand.u32 2147483647, %v10502_v39  ;;  %v12723_v57 = vmov 0  ;;  %v2982_v17 = vor.u32 %v2981_v63, %v2980_v43  ;;  %v2987_v44 = vand.u32 2147483647, %v2986_v18 }
 0x422   : > { %12721 = vst [vmem:[#allocation111_spill] sm:$0xff] %v10852_v31  ;;  %v3143_v41 = vor.u32 %v3142_v6, %v3141_v0  ;;  %v3222_v16 = vand.u32 2139095040, %v10777_v54  ;;  %v3074_v28 = vshll.u32 %v10852_v31, 30  ;;  %v3146_v20 = vor.u32 %v3145_v48, %v3144_v58 }
 0x423   : > { %vm10858_vm14 = vcmp.le.f32.partialorder %v12722_v25, 0.7853982  ;;  %vm3147_vm9 = vcmp.lt.s32.totalorder %v3128_v21, 1  ;;  %vm3150_vm1 = vcmp.lt.s32.totalorder %v3128_v21, 4  ;;  %vm3149_vm12 = vcmp.lt.s32.totalorder %v3128_v21, 3 }
 0x424   : > { %v12724_v57 = vsel %vm10858_vm14, 4294967295, %v12723_v57  ;;  %v3152_v47 = vsel %vm3150_vm1, %v3140_v40, 2102212464  ;;  %v3155_v38 = vsel %vm3147_vm9, %v3134_v56, %v3137_v59  ;;  %v3156_v62 = vsel %vm3150_vm1, %v3143_v41, 920167782 }
 0x425   : > { %12725 = vst [vmem:[#allocation112_spill] sm:$0xff] %v12724_v57  ;;  %v10865_v52 = vsub.s32 %v3071_v23, %v3074_v28  ;;  %v3131_v29 = vshrl.u32 %v12561_v12, %v3130_v42  ;;  %vm3148_vm5 = vcmp.lt.s32.totalorder %v3128_v21, 2  ;;  %v3157_v43 = vsel %vm3149_vm12, %v3140_v40, %v3156_v62 }
 0x426   : > { %v2989_v63 = vcvt.s32.f32 %v2982_v17  ;;  %v3158_v18 = vsel %vm3148_vm5, %v3155_v38, %v3157_v43  ;;  %v3159_v4 = vsel %vm3147_vm9, %v3137_v59, %v3140_v40  ;;  %v3160_v0 = vsel %vm3150_vm1, %v3146_v20, 1326507024 }
 0x427   : > { %vm12484_vm7 = vcmp.lt.s32.totalorder %v10528_v10, 0  ;;  %v3077_v6 = vsub.s32 0, %v10865_v52  ;;  %v3151_v58 = vsel %vm3147_vm9, %v3131_v29, %v3134_v56  ;;  %v3153_v23 = vsel %vm3149_vm12, %v3137_v59, %v3152_v47 }
 0x428   : > { %v3161_v48 = vsel %vm3149_vm12, %v3143_v41, %v3160_v0  ;;  %v2990_v42 = vmul.f32 %v2989_v63, %v2987_v44  ;;  %v10877_v28 = vmul.u32.u64.low %v3163_v53, %v3158_v18  ;;  %v10878_v17 = vmul.u32.u64.high %v3163_v53, %v3158_v18, %v10877_v28 }
 0x429   : > { %v3162_v25 = vsel %vm3148_vm5, %v3159_v4, %v3161_v48  ;;  %8386 = vcosq.f32 %v10768_v51  ;;  %v7843_v40 = vmin.u32 %v3077_v6, %v10865_v52  ;;  %v12726_v56 = vand.u32 2147483647, %v10528_v10 }
 0x42a   : > { %v10882_v20 = vmul.u32.u64.low %v3163_v53, %v3162_v25  ;;  %v10883_v38 = vmul.u32.u64.high %v3163_v53, %v3162_v25, %v10882_v20  ;;  %8388 = vsinq.f32 %v10768_v51  ;;  %v12727_v59 = vmov 0  ;;  %v10908_v25 = vld [vmem:[#allocation8] ss:$0 sm:$0xff] }
 0x42b   : > { %vm10888_vm9 = vcmp.le.f32.partialorder %v12726_v56, 0.7853982  ;;  %v3154_v44 = vsel %vm3148_vm5, %v3151_v58, %v3153_v23  ;;  %v3223_v41 = vshrl.u32 %v3222_v16, 23  ;;  %v12466_v47 = vand.u32 2147483647, %v10824_v19  ;;  %v564_v16 = vpop.permute.xlu0 %563 }
 0x42c   : > { %v12728_v59 = vsel %vm10888_vm9, 4294967295, %v12727_v59  ;;  %8390 = vcosq.f32 %v10830_v2  ;;  %v2891_v62 = vsel %vm10858_vm14, %v10502_v39, %v10838_v32  ;;  %v3079_v29 = vclz %v7843_v40 }
 0x42d   : > { %12729 = vst [vmem:[#allocation113_spill] sm:$0xff] %v12728_v59  ;;  %v3326_v51 = vand.u32 2139095040, %v10824_v19  ;;  %v2991_v43 = vxor.u32 2147483648, %v2990_v42  ;;  %v3173_v63 = vadd.s32 1, %v10878_v17  ;;  %v7850_v18 = vadd.s32 4294967169, %v3223_v41 }
 0x42e   : > { %v3226_v21 = vand.u32 8388607, %v12467_v60  ;;  %v7844_v4 = vadd.s32 4294967294, %v3079_v29  ;;  %v3170_v0 = vmul.u32 %v3163_v53, %v3154_v44  ;;  %vm3172_vm1 = vc.u32 %v10883_v38, %v10877_v28 }
 0x42f   : > { %v3327_v6 = vshrl.u32 %v3326_v51, 23  ;;  %8392 = vsinq.f32 %v10830_v2  ;;  %v3174_v32 = vsel %vm3172_vm1, %v3173_v63, %v10878_v17  ;;  %v3229_v58 = vadd.s32 1, %v7850_v18 }
 0x430   : > { %v3330_v23 = vand.u32 8388607, %v12466_v47  ;;  %8394 = vcosq.f32 %v2891_v62  ;;  %vm7845_vm12 = vcmp.lt.s32.totalorder %v7844_v4, 0  ;;  %v3175_v48 = vadd.s32 %v3174_v32, %v3170_v0 }
 0x431   : > { %v10911_v40 = vmul.f32 %v10908_v25, %v564_v16  ;;  %v2992_v53 = vsel %vm12484_vm7, %v2991_v43, %v2990_v42  ;;  %v3082_v20 = vsel %vm7845_vm12, 0, %v7844_v4  ;;  %v3227_v56 = vor.u32 8388608, %v3226_v21 }
 0x432   : > { %vm3230_vm5 = vcmp.gt.s32.totalorder %v3229_v58, 0  ;;  %8396 = vsinq.f32 %v2891_v62  ;;  %v3087_v2 = vsub.s32 4294967266, %v3082_v20  ;;  %v3176_v17 = vadd.s32 536870912, %v3175_v48 }
 0x433   : > { %12730 = vst [vmem:[#allocation114_spill] sm:$0xff] %v10911_v40  ;;  %v7854_v44 = vadd.s32 4294967169, %v3327_v6  ;;  %v3067_v41 = vadd.s32 %v10815_v11, %v10820_v30  ;;  %v3083_v29 = vsub.s32 32, %v3082_v20  ;;  %v3231_v51 = vsel %vm3230_vm5, %v3229_v58, 0  ;;  %v10917_v18 = vpop.eup %8386 }
 0x434   : > { %v3331_v63 = vor.u32 8388608, %v3330_v23  ;;  %12731 = vst [vmem:[#allocation115_spill] sm:$0xff] %v10917_v18  ;;  %v10922_v16 = vsel %vm10888_vm9, %v10528_v10, %v2992_v53  ;;  %v3088_v42 = vadd.s32 127, %v3087_v2  ;;  %v10924_v43 = vshrl.u32 %v3176_v17, 30  ;;  %v10927_v21 = vpop.eup %8388 }
 0x435   : > { %v10930_v4 = vadd.s32 %v10877_v28, %v10883_v38  ;;  %v3233_v11 = vand.u32 31, %v3231_v51  ;;  %v10932_v30 = vshll.u32 %v3227_v56, 8  ;;  %v3430_v0 = vand.u32 2139095040, %v10911_v40 }
 0x436   : > { %12732 = vst [vmem:[#allocation116_spill] sm:$0xff] %v10924_v43  ;;  %v10935_v6 = vpop.eup %8390  ;;  %v3084_v32 = vshll.u32 %v10865_v52, %v3082_v20  ;;  %v3089_v58 = vshll.u32 %v3088_v42, 23  ;;  %v3178_v23 = vshll.u32 %v10924_v43, 30  ;;  %v3333_v53 = vadd.s32 1, %v7854_v44 }
 0x437   : > { %12733 = vst [vmem:[#allocation117_spill] sm:$0xff] %v10935_v6  ;;  %v3085_v2 = vshrl.u32 %v3067_v41, %v3083_v29  ;;  %v3232_v17 = vshrl.u32 %v3231_v51, 5  ;;  %v3234_v47 = vsub.s32 32, %v3233_v11  ;;  %v10939_v60 = vshll.u32 %v3331_v63, 8 }
 0x438   : > { %v10941_v28 = vsub.s32 %v3175_v48, %v3178_v23  ;;  %v3236_v38 = vshll.u32 %v12561_v12, %v3233_v11  ;;  %v3239_v56 = vshll.u32 %v12563_v13, %v3233_v11  ;;  %v3242_v62 = vshll.u32 %v12564_v15, %v3233_v11 }
 0x439   : > { %v10946_v59 = vpop.eup %8392  ;;  %v3090_v52 = vor.u32 4788187, %v3089_v58  ;;  %v3237_v20 = vshrl.u32 %v12563_v13, %v3234_v47  ;;  %v3240_v44 = vshrl.u32 %v12564_v15, %v3234_v47  ;;  %v3243_v41 = vshrl.u32 %v12557_v49, %v3234_v47 }
 0x43a   : > { %12734 = vst [vmem:[#allocation118_spill] sm:$0xff] %v10946_v59  ;;  %v10951_v29 = vpop.eup %8394  ;;  %v3181_v48 = vsub.s32 0, %v10941_v28  ;;  %v3245_v51 = vshll.u32 %v12557_v49, %v3233_v11  ;;  %v3246_v63 = vshrl.u32 %v12559_v9, %v3234_v47  ;;  %v3248_v42 = vshll.u32 %v12559_v9, %v3233_v11 }
 0x43b   : > { %12735 = vst [vmem:[#allocation119_spill] sm:$0xff] %v10951_v29  ;;  %v3238_v23 = vor.u32 %v3237_v20, %v3236_v38  ;;  %v3241_v43 = vor.u32 %v3240_v44, %v3239_v56  ;;  %v3244_v10 = vor.u32 %v3243_v41, %v3242_v62  ;;  %v3249_v58 = vshrl.u32 %v12560_v3, %v3234_v47 }
 0x43c   : > { %v10958_v31 = vpop.eup %8396  ;;  %v3086_v6 = vor.u32 %v3085_v2, %v3084_v32  ;;  %v7847_v59 = vmin.u32 %v3181_v48, %v10941_v28  ;;  %v3247_v5 = vor.u32 %v3246_v63, %v3245_v51  ;;  %v3235_v46 = vshrl.u32 %v12561_v12, %v3234_v47 }
 0x43d   : > { %12736 = vst [vmem:[#allocation120_spill] sm:$0xff] %v10958_v31  ;;  %v3250_v57 = vor.u32 %v3249_v58, %v3248_v42  ;;  %vm3251_vm12 = vcmp.lt.s32.totalorder %v3232_v17, 1  ;;  %vm3254_vm5 = vcmp.lt.s32.totalorder %v3232_v17, 4  ;;  %v3091_v29 = vand.u32 2147483647, %v3090_v52 }
 0x43e   : > { %v3183_v39 = vclz %v7847_v59  ;;  %vm3253_vm7 = vcmp.lt.s32.totalorder %v3232_v17, 3  ;;  %v3256_v11 = vsel %vm3254_vm5, %v3244_v10, 2102212464  ;;  %v3259_v38 = vsel %vm3251_vm12, %v3238_v23, %v3241_v43 }
 0x43f   : > { %v3260_v62 = vsel %vm3254_vm5, %v3247_v5, 920167782  ;;  %v3263_v56 = vsel %vm3251_vm12, %v3241_v43, %v3244_v10  ;;  %v3264_v20 = vsel %vm3254_vm5, %v3250_v57, 1326507024  ;;  %v3093_v44 = vcvt.s32.f32 %v3086_v6 }
 0x440   : > { %v7848_v41 = vadd.s32 4294967294, %v3183_v39  ;;  %v3261_v32 = vsel %vm3253_vm7, %v3244_v10, %v3260_v62  ;;  %v3431_v2 = vshrl.u32 %v3430_v0, 23  ;;  %vm3252_vm9 = vcmp.lt.s32.totalorder %v3232_v17, 2 }
 0x441   : > { %v3255_v48 = vsel %vm3251_vm12, %v3235_v46, %v3238_v23  ;;  %v3257_v51 = vsel %vm3253_vm7, %v3241_v43, %v3256_v11  ;;  %v3265_v63 = vsel %vm3253_vm7, %v3247_v5, %v3264_v20  ;;  %v3262_v47 = vsel %vm3252_vm9, %v3259_v38, %v3261_v32 }
 0x442   : > { %vm7849_vm1 = vcmp.lt.s32.totalorder %v7848_v41, 0  ;;  %v3266_v42 = vsel %vm3252_vm9, %v3263_v56, %v3265_v63  ;;  %vm12737_vm14 = vcmp.gt.s32.totalorder %v3333_v53, 0  ;;  %v10963_v59 = vmul.f32 %v3093_v44, %v3091_v29 }
 0x443   : > { %v3335_v52 = vsel %vm12737_vm14, %v3333_v53, 0  ;;  %v3186_v58 = vsel %vm7849_vm1, 0, %v7848_v41  ;;  %v10966_v31 = vmul.u32.u64.low %v10932_v30, %v3266_v42  ;;  %v10967_v18 = vmul.u32.u64.high %v10932_v30, %v3266_v42, %v10966_v31 }
 0x444   : > { %v3187_v57 = vsub.s32 32, %v3186_v58  ;;  %v3191_v39 = vsub.s32 4294967266, %v3186_v58  ;;  %v3258_v10 = vsel %vm3252_vm9, %v3255_v48, %v3257_v51  ;;  %v10969_v0 = vshrl.u32 %v3335_v52, 5 }
 0x445   : > { %v10972_v46 = vmul.u32.u64.low %v10932_v30, %v3262_v47  ;;  %v10973_v5 = vmul.u32.u64.high %v10932_v30, %v3262_v47, %v10972_v46  ;;  %v3337_v43 = vand.u32 31, %v3335_v52  ;;  %v7858_v6 = vadd.s32 4294967169, %v3431_v2 }
 0x446   : > { %v3188_v53 = vshll.u32 %v10941_v28, %v3186_v58  ;;  %v3189_v17 = vshrl.u32 %v10930_v4, %v3187_v57  ;;  %v3192_v29 = vadd.s32 127, %v3191_v39  ;;  %v12738_v23 = vand.u32 2147483647, %v10911_v40 }
 0x447   : > { %v3095_v11 = vxor.u32 2147483648, %v10963_v59  ;;  %v3274_v38 = vmul.u32 %v10932_v30, %v3258_v10  ;;  %v3338_v62 = vsub.s32 32, %v3337_v43  ;;  %vm3355_vm7 = vcmp.lt.s32.totalorder %v10969_v0, 1 }
 0x448   : > { %v10980_v31 = vand.u32 8388607, %v12738_v23  ;;  %v3190_v56 = vor.u32 %v3189_v17, %v3188_v53  ;;  %v3193_v20 = vshll.u32 %v3192_v29, 23  ;;  %vm3276_vm14 = vc.u32 %v10967_v18, %v10972_v46 }
 0x449   : > { %v3340_v28 = vshll.u32 %v12561_v12, %v3337_v43  ;;  %v3277_v4 = vadd.s32 1, %v10973_v5  ;;  %v3341_v44 = vshrl.u32 %v12563_v13, %v3338_v62  ;;  %v3343_v41 = vshll.u32 %v12563_v13, %v3337_v43 }
 0x44a   : > { %v3344_v32 = vshrl.u32 %v12564_v15, %v3338_v62  ;;  %v3194_v2 = vor.u32 4788187, %v3193_v20  ;;  %v3346_v30 = vshll.u32 %v12564_v15, %v3337_v43  ;;  %v3347_v48 = vshrl.u32 %v12557_v49, %v3338_v62 }
 0x44b   : > { %v3349_v51 = vshll.u32 %v12557_v49, %v3337_v43  ;;  %v3278_v63 = vsel %vm3276_vm14, %v3277_v4, %v10973_v5  ;;  %v3342_v47 = vor.u32 %v3341_v44, %v3340_v28  ;;  %v3350_v52 = vshrl.u32 %v12559_v9, %v3338_v62 }
 0x44c   : > { %v3345_v42 = vor.u32 %v3344_v32, %v3343_v41  ;;  %v3195_v58 = vand.u32 2147483647, %v3194_v2  ;;  %v3197_v57 = vcvt.s32.f32 %v3190_v56  ;;  %v3279_v39 = vadd.s32 %v3278_v63, %v3274_v38 }
 0x44d   : > { %v3348_v10 = vor.u32 %v3347_v48, %v3346_v30  ;;  %v3339_v53 = vshrl.u32 %v12561_v12, %v3338_v62  ;;  %v3351_v17 = vor.u32 %v3350_v52, %v3349_v51  ;;  %v3352_v29 = vshll.u32 %v12559_v9, %v3337_v43 }
 0x44e   : > { %v3353_v23 = vshrl.u32 %v12560_v3, %v3338_v62  ;;  %v12739_v20 = vand.u32 2147483647, %v10693_v1  ;;  %v12740_v5 = vmov 0  ;;  %v3198_v28 = vmul.f32 %v3197_v57, %v3195_v58 }
 0x44f   : > { %v3280_v4 = vadd.s32 536870912, %v3279_v39  ;;  %vm3357_vm5 = vcmp.lt.s32.totalorder %v10969_v0, 3  ;;  %vm3358_vm14 = vcmp.lt.s32.totalorder %v10969_v0, 4  ;;  %v12742_v38 = vand.u32 2147483647, %v10747_v36 }
 0x450   : > { %vm11004_vm12 = vcmp.le.f32.partialorder %v12739_v20, 0.7853982  ;;  %v12743_v56 = vmov 0  ;;  %v3354_v43 = vor.u32 %v3353_v23, %v3352_v29  ;;  %v3360_v62 = vsel %vm3358_vm14, %v3348_v10, 2102212464 }
 0x451   : > { %v12741_v5 = vsel %vm11004_vm12, 4294967295, %v12740_v5  ;;  %vm11012_vm1 = vcmp.le.f32.partialorder %v12742_v38, 0.7853982  ;;  %v3363_v44 = vsel %vm3355_vm7, %v3342_v47, %v3345_v42  ;;  %v3364_v41 = vsel %vm3358_vm14, %v3351_v17, 920167782 }
 0x452   : > { %v12744_v56 = vsel %vm11012_vm1, 4294967295, %v12743_v56  ;;  %v11018_v32 = vshrl.u32 %v3280_v4, 30  ;;  %vm3356_vm9 = vcmp.lt.s32.totalorder %v10969_v0, 2  ;;  %v3359_v2 = vsel %vm3355_vm7, %v3339_v53, %v3342_v47 }
 0x453   : > { %12745 = vst [vmem:[#allocation121_spill] sm:$0xff] %v12744_v56  ;;  %v3365_v30 = vsel %vm3357_vm5, %v3348_v10, %v3364_v41  ;;  %v3199_v48 = vxor.u32 2147483648, %v3198_v28  ;;  %v3367_v63 = vsel %vm3355_vm7, %v3345_v42, %v3348_v10  ;;  %v3368_v52 = vsel %vm3358_vm14, %v3354_v43, 1326507024  ;;  %v568_v10 = vpop.permute.xlu1 %567 }
 0x454   : > { %12746 = vst [vmem:[#allocation122_spill] sm:$0xff] %v11018_v32  ;;  %v3366_v51 = vsel %vm3356_vm9, %v3363_v44, %v3365_v30  ;;  %v3282_v58 = vshll.u32 %v11018_v32, 30  ;;  %v3361_v57 = vsel %vm3357_vm5, %v3345_v42, %v3360_v62  ;;  %v3369_v29 = vsel %vm3357_vm5, %v3351_v17, %v3368_v52 }
 0x455   : > { %v3437_v47 = vadd.s32 1, %v7858_v6  ;;  %8398 = vcosq.f32 %v10922_v16  ;;  %v3370_v53 = vsel %vm3356_vm9, %v3367_v63, %v3369_v29  ;;  %vm12747_vm7 = vcmp.lt.s32.totalorder %v10693_v1, 0 }
 0x456   : > { %v11038_v23 = vmul.u32.u64.low %v10939_v60, %v3366_v51  ;;  %v11039_v20 = vmul.u32.u64.high %v10939_v60, %v3366_v51, %v11038_v23  ;;  %v3096_v4 = vsel %vm12747_vm7, %v3095_v11, %v10963_v59  ;;  %v11045_v42 = vsub.s32 %v3279_v39, %v3282_v58 }
 0x457   : > { %v11048_v17 = vmul.u32.u64.low %v10939_v60, %v3370_v53  ;;  %v11049_v6 = vmul.u32.u64.high %v10939_v60, %v3370_v53, %v11048_v17  ;;  %vm12748_vm5 = vcmp.lt.s32.totalorder %v10747_v36, 0  ;;  %v3362_v43 = vsel %vm3356_vm9, %v3359_v2, %v3361_v57 }
 0x458   : > { %v3200_v38 = vsel %vm12748_vm5, %v3199_v48, %v3198_v28  ;;  %v3435_v62 = vor.u32 8388608, %v10980_v31  ;;  %vm3438_vm14 = vcmp.gt.s32.totalorder %v3437_v47, 0  ;;  %8400 = vsinq.f32 %v10922_v16 }
 0x459   : > { %v3285_v44 = vsub.s32 0, %v11045_v42  ;;  %v3439_v59 = vsel %vm3438_vm14, %v3437_v47, 0  ;;  %v11059_v11 = vmul.f32 %v10908_v25, %v568_v10  ;;  %v11064_v39 = vsel %vm11004_vm12, %v10693_v1, %v3096_v4 }
 0x45a   : > { %v3275_v0 = vadd.s32 %v10972_v46, %v10967_v18  ;;  %v3381_v28 = vadd.s32 1, %v11039_v20  ;;  %v3441_v31 = vand.u32 31, %v3439_v59  ;;  %v11072_v16 = vsel %vm11012_vm1, %v10747_v36, %v3200_v38 }
 0x45b   : > { %v7851_v41 = vmin.u32 %v3285_v44, %v11045_v42  ;;  %v3378_v2 = vmul.u32 %v10939_v60, %v3362_v43  ;;  %vm3380_vm9 = vc.u32 %v11049_v6, %v11038_v23  ;;  %v11079_v48 = vshrl.u32 %v3439_v59, 5 }
 0x45c   : > { %v3382_v30 = vsel %vm3380_vm9, %v3381_v28, %v11039_v20  ;;  %v3442_v18 = vsub.s32 32, %v3441_v31  ;;  %v11081_v46 = vshll.u32 %v3435_v62, 8  ;;  %v3444_v52 = vshll.u32 %v12561_v12, %v3441_v31 }
 0x45d   : > { %v3287_v51 = vclz %v7851_v41  ;;  %v3383_v63 = vadd.s32 %v3382_v30, %v3378_v2  ;;  %v3447_v60 = vshll.u32 %v12563_v13, %v3441_v31  ;;  %v3450_v10 = vshll.u32 %v12564_v15, %v3441_v31 }
 0x45e   : > { %v3445_v57 = vshrl.u32 %v12563_v13, %v3442_v18  ;;  %v3448_v29 = vshrl.u32 %v12564_v15, %v3442_v18  ;;  %v3451_v47 = vshrl.u32 %v12557_v49, %v3442_v18  ;;  %v3454_v4 = vshrl.u32 %v12559_v9, %v3442_v18 }
 0x45f   : > { %v7852_v53 = vadd.s32 4294967294, %v3287_v51  ;;  %v3384_v20 = vadd.s32 536870912, %v3383_v63  ;;  %v11091_v17 = vpop.eup %8398  ;;  %v3443_v38 = vshrl.u32 %v12561_v12, %v3442_v18  ;;  %v3453_v43 = vshll.u32 %v12557_v49, %v3441_v31 }
 0x460   : > { %12749 = vst [vmem:[#allocation123_spill] sm:$0xff] %v11091_v17  ;;  %v3456_v62 = vshll.u32 %v12559_v9, %v3441_v31  ;;  %v3457_v44 = vshrl.u32 %v12560_v3, %v3442_v18  ;;  %v3446_v28 = vor.u32 %v3445_v57, %v3444_v52  ;;  %v3452_v41 = vor.u32 %v3451_v47, %v3450_v10 }
 0x461   : > { %vm7853_vm7 = vcmp.lt.s32.totalorder %v7852_v53, 0  ;;  %v11097_v59 = vshrl.u32 %v3384_v20, 30  ;;  %v3449_v30 = vor.u32 %v3448_v29, %v3447_v60  ;;  %v3455_v51 = vor.u32 %v3454_v4, %v3453_v43 }
 0x462   : > { %v3290_v2 = vsel %vm7853_vm7, 0, %v7852_v53  ;;  %v3458_v58 = vor.u32 %v3457_v44, %v3456_v62  ;;  %v11099_v56 = vpop.eup %8400  ;;  %vm3459_vm5 = vcmp.lt.s32.totalorder %v11079_v48, 1  ;;  %vm3460_vm14 = vcmp.lt.s32.totalorder %v11079_v48, 2 }
 0x463   : > { %12750 = vst [vmem:[#allocation124_spill] sm:$0xff] %v11097_v59  ;;  %12751 = vst [vmem:[#allocation125_spill] sm:$0xff] %v11099_v56  ;;  %v3291_v36 = vsub.s32 32, %v3290_v2  ;;  %v3295_v32 = vsub.s32 4294967266, %v3290_v2  ;;  %v3386_v17 = vshll.u32 %v11097_v59, 30  ;;  %v3292_v31 = vshll.u32 %v11045_v42, %v3290_v2 }
 0x464   : > { %vm3461_vm9 = vcmp.lt.s32.totalorder %v11079_v48, 3  ;;  %vm3462_vm1 = vcmp.lt.s32.totalorder %v11079_v48, 4  ;;  %v3463_v29 = vsel %vm3459_vm5, %v3443_v38, %v3446_v28  ;;  %v3467_v47 = vsel %vm3459_vm5, %v3446_v28, %v3449_v30 }
 0x465   : > { %v3293_v18 = vshrl.u32 %v3275_v0, %v3291_v36  ;;  %v3296_v52 = vadd.s32 127, %v3295_v32  ;;  %v11107_v57 = vsub.s32 %v3383_v63, %v3386_v17  ;;  %v3464_v60 = vsel %vm3462_vm1, %v3452_v41, 2102212464 }
 0x466   : > { %v3468_v53 = vsel %vm3462_vm1, %v3455_v51, 920167782  ;;  %v3472_v20 = vsel %vm3462_vm1, %v3458_v58, 1326507024  ;;  %v3471_v43 = vsel %vm3459_vm5, %v3449_v30, %v3452_v41  ;;  %v3465_v36 = vsel %vm3461_vm9, %v3449_v30, %v3464_v60  ;;  %v572_v30 = vpop.permute.xlu0 %571 }
 0x467   : > { %v3294_v42 = vor.u32 %v3293_v18, %v3292_v31  ;;  %v3297_v10 = vshll.u32 %v3296_v52, 23  ;;  %v3389_v4 = vsub.s32 0, %v11107_v57  ;;  %v3469_v32 = vsel %vm3461_vm9, %v3452_v41, %v3468_v53 }
 0x468   : > { %v3473_v0 = vsel %vm3461_vm9, %v3455_v51, %v3472_v20  ;;  %v3534_v63 = vand.u32 2139095040, %v11059_v11  ;;  %v3470_v62 = vsel %vm3460_vm14, %v3467_v47, %v3469_v32  ;;  %8402 = vcosq.f32 %v11064_v39 }
 0x469   : > { %v3298_v17 = vor.u32 4788187, %v3297_v10  ;;  %v3301_v58 = vcvt.s32.f32 %v3294_v42  ;;  %v7855_v38 = vmin.u32 %v3389_v4, %v11107_v57  ;;  %v3474_v44 = vsel %vm3460_vm14, %v3471_v43, %v3473_v0 }
 0x46a   : > { %v11129_v28 = vmul.u32.u64.low %v11081_v46, %v3470_v62  ;;  %v11130_v2 = vmul.u32.u64.high %v11081_v46, %v3470_v62, %v11129_v28  ;;  %v3535_v41 = vshrl.u32 %v3534_v63, 23  ;;  %v3466_v60 = vsel %vm3460_vm14, %v3463_v29, %v3465_v36 }
 0x46b   : > { %v3299_v51 = vand.u32 2147483647, %v3298_v17  ;;  %v3391_v31 = vclz %v7855_v38  ;;  %v11134_v18 = vmul.u32.u64.low %v11081_v46, %v3474_v44  ;;  %v11135_v52 = vmul.u32.u64.high %v11081_v46, %v3474_v44, %v11134_v18 }
 0x46c   : > { %v7862_v47 = vadd.s32 4294967169, %v3535_v41  ;;  %v12752_v53 = vand.u32 2147483647, %v11059_v11  ;;  %8404 = vsinq.f32 %v11064_v39  ;;  %v11144_v4 = vmul.f32 %v10908_v25, %v572_v30  ;;  %v576_v39 = vpop.permute.xlu1 %575 }
 0x46d   : > { %v3302_v42 = vmul.f32 %v3301_v58, %v3299_v51  ;;  %v7856_v10 = vadd.s32 4294967294, %v3391_v31  ;;  %8406 = vcosq.f32 %v11072_v16  ;;  %vm12502_vm1 = vcmp.lt.s32.totalorder %v10777_v54, 0 }
 0x46e   : > { %v3538_v20 = vand.u32 8388607, %v12752_v53  ;;  %v3485_v43 = vadd.s32 1, %v11130_v2  ;;  %v3541_v32 = vadd.s32 1, %v7862_v47  ;;  %v3379_v48 = vadd.s32 %v11038_v23, %v11049_v6 }
 0x46f   : > { %vm7857_vm7 = vcmp.lt.s32.totalorder %v7856_v10, 0  ;;  %v3482_v29 = vmul.u32 %v11081_v46, %v3466_v60  ;;  %vm3484_vm5 = vc.u32 %v11135_v52, %v11129_v28  ;;  %v3303_v17 = vxor.u32 2147483648, %v3302_v42 }
 0x470   : > { %v3394_v36 = vsel %vm7857_vm7, 0, %v7856_v10  ;;  %v3486_v0 = vsel %vm3484_vm5, %v3485_v43, %v11130_v2  ;;  %v3539_v63 = vor.u32 8388608, %v3538_v20  ;;  %vm3542_vm14 = vcmp.gt.s32.totalorder %v3541_v32, 0 }
 0x471   : > { %v3395_v58 = vsub.s32 32, %v3394_v36  ;;  %v3399_v38 = vsub.s32 4294967266, %v3394_v36  ;;  %v3638_v62 = vand.u32 2139095040, %v11144_v4  ;;  %8408 = vsinq.f32 %v11072_v16 }
 0x472   : > { %v3487_v23 = vadd.s32 %v3486_v0, %v3482_v29  ;;  %v3543_v6 = vsel %vm3542_vm14, %v3541_v32, 0  ;;  %v11158_v46 = vmul.f32 %v10908_v25, %v576_v39  ;;  %v3396_v44 = vshll.u32 %v11107_v57, %v3394_v36  ;;  %v11168_v10 = vpop.eup %8402 }
 0x473   : > { %v3397_v41 = vshrl.u32 %v3379_v48, %v3395_v58  ;;  %v3400_v30 = vadd.s32 127, %v3399_v38  ;;  %v11161_v51 = vshrl.u32 %v3543_v6, 5  ;;  %v3545_v31 = vand.u32 31, %v3543_v6  ;;  %12753 = vst [vmem:[#allocation126_spill] sm:$0xff] %v11168_v10 }
 0x474   : > { %v3488_v2 = vadd.s32 536870912, %v3487_v23  ;;  %v11163_v18 = vshll.u32 %v3539_v63, 8  ;;  %v3304_v16 = vsel %vm12502_vm1, %v3303_v17, %v3302_v42  ;;  %v3639_v20 = vshrl.u32 %v3638_v62, 23 }
 0x475   : > { %v3398_v47 = vor.u32 %v3397_v41, %v3396_v44  ;;  %v3401_v53 = vshll.u32 %v3400_v30, 23  ;;  %v12754_v57 = vand.u32 2147483647, %v10777_v54  ;;  %v12755_v43 = vmov 0 }
 0x476   : > { %v11176_v32 = vshrl.u32 %v3488_v2, 30  ;;  %v3546_v48 = vsub.s32 32, %v3545_v31  ;;  %v3548_v29 = vshll.u32 %v12561_v12, %v3545_v31  ;;  %v11180_v39 = vpop.eup %8404  ;;  %v3551_v0 = vshll.u32 %v12563_v13, %v3545_v31 }
 0x477   : > { %vm11172_vm9 = vcmp.le.f32.partialorder %v12754_v57, 0.7853982  ;;  %v3402_v42 = vor.u32 4788187, %v3401_v53  ;;  %v3405_v36 = vcvt.s32.f32 %v3398_v47  ;;  %v3554_v63 = vshll.u32 %v12564_v15, %v3545_v31  ;;  %v11184_v17 = vpop.eup %8406 }
 0x478   : > { %v12756_v43 = vsel %vm11172_vm9, 4294967295, %v12755_v43  ;;  %12758 = vst [vmem:[#allocation128_spill] sm:$0xff] %v11176_v32  ;;  %12759 = vst [vmem:[#allocation129_spill] sm:$0xff] %v11184_v17  ;;  %v3490_v58 = vshll.u32 %v11176_v32, 30  ;;  %v3549_v38 = vshrl.u32 %v12563_v13, %v3546_v48  ;;  %v3552_v62 = vshrl.u32 %v12564_v15, %v3546_v48 }
 0x479   : > { %12757 = vst [vmem:[#allocation127_spill] sm:$0xff] %v12756_v43  ;;  %v3557_v6 = vshll.u32 %v12557_v49, %v3545_v31  ;;  %v3403_v44 = vand.u32 2147483647, %v3402_v42  ;;  %v3555_v41 = vshrl.u32 %v12557_v49, %v3546_v48  ;;  %v3558_v30 = vshrl.u32 %v12559_v9, %v3546_v48 }
 0x47a   : > { %v3560_v2 = vshll.u32 %v12559_v9, %v3545_v31  ;;  %v11194_v47 = vsub.s32 %v3487_v23, %v3490_v58  ;;  %v3550_v53 = vor.u32 %v3549_v38, %v3548_v29  ;;  %v3553_v57 = vor.u32 %v3552_v62, %v3551_v0 }
 0x47b   : > { %v3561_v60 = vshrl.u32 %v12560_v3, %v3546_v48  ;;  %v3406_v59 = vmul.f32 %v3405_v36, %v3403_v44  ;;  %v3556_v32 = vor.u32 %v3555_v41, %v3554_v63  ;;  %v3559_v17 = vor.u32 %v3558_v30, %v3557_v6  ;;  %v11198_v56 = vpop.eup %8408 }
 0x47c   : > { %12760 = vst [vmem:[#allocation130_spill] sm:$0xff] %v11198_v56  ;;  %v12761_v42 = vand.u32 2147483647, %v10824_v19  ;;  %v12762_v10 = vmov 0  ;;  %v3493_v23 = vsub.s32 0, %v11194_v47  ;;  %v3547_v31 = vshrl.u32 %v12561_v12, %v3546_v48 }
 0x47d   : > { %v3562_v29 = vor.u32 %v3561_v60, %v3560_v2  ;;  %vm3566_vm5 = vcmp.lt.s32.totalorder %v11161_v51, 4  ;;  %vm3565_vm7 = vcmp.lt.s32.totalorder %v11161_v51, 3  ;;  %vm12765_vm14 = vcmp.lt.s32.totalorder %v11161_v51, 1 }
 0x47e   : > { %vm11202_vm1 = vcmp.le.f32.partialorder %v12761_v42, 0.7853982  ;;  %v3568_v36 = vsel %vm3566_vm5, %v3556_v32, 2102212464  ;;  %v3571_v0 = vsel %vm12765_vm14, %v3550_v53, %v3553_v57  ;;  %v3572_v63 = vsel %vm3566_vm5, %v3559_v17, 920167782  ;;  %vm12766_vm12 = vmmov %vm12765_vm14 }
 0x47f   : > { %v12763_v10 = vsel %vm11202_vm1, 4294967295, %v12762_v10  ;;  %v3407_v58 = vxor.u32 2147483648, %v3406_v59  ;;  %v7859_v38 = vmin.u32 %v3493_v23, %v11194_v47  ;;  %v3573_v62 = vsel %vm3565_vm7, %v3556_v32, %v3572_v63  ;;  %vm12768_vm14 = vmmov %vm12766_vm12 }
 0x480   : > { %12764 = vst [vmem:[#allocation131_spill] sm:$0xff] %v12763_v10  ;;  %v3575_v6 = vsel %vm12766_vm12, %v3553_v57, %v3556_v32  ;;  %v3307_v60 = vsel %vm11172_vm9, %v10777_v54, %v3304_v16  ;;  %vm12767_vm3 = vcmp.lt.s32.totalorder %v11161_v51, 2  ;;  %v3576_v44 = vsel %vm3566_vm5, %v3562_v29, 1326507024 }
 0x481   : > { %v3574_v48 = vsel %vm12767_vm3, %v3571_v0, %v3573_v62  ;;  %v7866_v41 = vadd.s32 4294967169, %v3639_v20  ;;  %v3495_v30 = vclz %v7859_v38  ;;  %v3567_v2 = vsel %vm12768_vm14, %v3547_v31, %v3550_v53  ;;  %vm12769_vm0 = vmmov %vm12767_vm3 }
 0x482   : > { %v3569_v42 = vsel %vm3565_vm7, %v3553_v57, %v3568_v36  ;;  %v3577_v56 = vsel %vm3565_vm7, %v3559_v17, %v3576_v44  ;;  %v11225_v32 = vmul.u32.u64.low %v11163_v18, %v3574_v48  ;;  %v11226_v63 = vmul.u32.u64.high %v11163_v18, %v3574_v48, %v11225_v32  ;;  %vm12771_vm12 = vmmov %vm12769_vm0 }
 0x483   : > { %v3578_v23 = vsel %vm12769_vm0, %v3575_v6, %v3577_v56  ;;  %v12508_v16 = vand.u32 2147483647, %v11158_v46  ;;  %vm12770_vm3 = vcmp.lt.s32.totalorder %v10824_v19, 0  ;;  %v7860_v20 = vadd.s32 4294967294, %v3495_v30 }
 0x484   : > { %v3408_v29 = vsel %vm12770_vm3, %v3407_v58, %v3406_v59  ;;  %v11233_v0 = vmul.u32.u64.low %v11163_v18, %v3578_v23  ;;  %v11234_v38 = vmul.u32.u64.high %v11163_v18, %v3578_v23, %v11233_v0  ;;  %8410 = vcosq.f32 %v3307_v60 }
 0x485   : > { %v3570_v17 = vsel %vm12771_vm12, %v3567_v2, %v3569_v42  ;;  %v12772_v56 = vand.u32 2147483647, %v11144_v4  ;;  %v3645_v57 = vadd.s32 1, %v7866_v41  ;;  %8412 = vsinq.f32 %v3307_v60 }
 0x486   : > { %v3483_v31 = vadd.s32 %v11129_v28, %v11135_v52  ;;  %vm7861_vm0 = vcmp.lt.s32.totalorder %v7860_v20, 0  ;;  %v3742_v59 = vand.u32 2139095040, %v11158_v46  ;;  %v11246_v36 = vsel %vm11202_vm1, %v10824_v19, %v3408_v29 }
 0x487   : > { %v3642_v53 = vand.u32 8388607, %v12772_v56  ;;  %v3498_v58 = vsel %vm7861_vm0, 0, %v7860_v20  ;;  %v3589_v51 = vadd.s32 1, %v11226_v63  ;;  %vm3646_vm7 = vcmp.gt.s32.totalorder %v3645_v57, 0 }
 0x488   : > { %v3499_v62 = vsub.s32 32, %v3498_v58  ;;  %v3503_v6 = vsub.s32 4294967266, %v3498_v58  ;;  %v3586_v48 = vmul.u32 %v11163_v18, %v3570_v17  ;;  %v3500_v44 = vshll.u32 %v11194_v47, %v3498_v58 }
 0x489   : > { %v3643_v60 = vor.u32 8388608, %v3642_v53  ;;  %vm3588_vm5 = vc.u32 %v11234_v38, %v11225_v32  ;;  %v3647_v28 = vsel %vm3646_vm7, %v3645_v57, 0  ;;  %v3743_v52 = vshrl.u32 %v3742_v59, 23 }
 0x48a   : > { %v3501_v41 = vshrl.u32 %v3483_v31, %v3499_v62  ;;  %v3504_v30 = vadd.s32 127, %v3503_v6  ;;  %v3590_v2 = vsel %vm3588_vm5, %v3589_v51, %v11226_v63  ;;  %v11254_v42 = vshrl.u32 %v3647_v28, 5 }
 0x48b   : > { %8414 = vcosq.f32 %v11246_v36  ;;  %v3591_v23 = vadd.s32 %v3590_v2, %v3586_v48  ;;  %v3649_v29 = vand.u32 31, %v3647_v28  ;;  %v11259_v18 = vand.u32 8388607, %v12508_v16 }
 0x48c   : > { %v3502_v47 = vor.u32 %v3501_v41, %v3500_v44  ;;  %v3505_v20 = vshll.u32 %v3504_v30, 23  ;;  %v11261_v0 = vshll.u32 %v3643_v60, 8  ;;  %v7870_v17 = vadd.s32 4294967169, %v3743_v52 }
 0x48d   : > { %v3592_v56 = vadd.s32 536870912, %v3591_v23  ;;  %v3650_v53 = vsub.s32 32, %v3649_v29  ;;  %v3652_v57 = vshll.u32 %v12561_v12, %v3649_v29  ;;  %vm3667_vm14 = vcmp.lt.s32.totalorder %v11254_v42, 1 }
 0x48e   : > { %v3506_v63 = vor.u32 4788187, %v3505_v20  ;;  %v3509_v31 = vcvt.s32.f32 %v3502_v47  ;;  %v3655_v59 = vshll.u32 %v12563_v13, %v3649_v29  ;;  %v3658_v58 = vshll.u32 %v12564_v15, %v3649_v29  ;;  %v11267_v51 = vpop.eup %8410 }
 0x48f   : > { %12773 = vst [vmem:[#allocation132_spill] sm:$0xff] %v11267_v51  ;;  %vm12521_vm3 = vcmp.lt.s32.totalorder %v10911_v40, 0  ;;  %v11270_v62 = vshrl.u32 %v3592_v56, 30  ;;  %v3653_v6 = vshrl.u32 %v12563_v13, %v3650_v53  ;;  %v3656_v48 = vshrl.u32 %v12564_v15, %v3650_v53  ;;  %v11275_v44 = vpop.eup %8412 }
 0x490   : > { %v3661_v60 = vshll.u32 %v12557_v49, %v3649_v29  ;;  %12775 = vst [vmem:[#allocation134_spill] sm:$0xff] %v11275_v44  ;;  %v3507_v28 = vand.u32 2147483647, %v3506_v63  ;;  %v3659_v52 = vshrl.u32 %v12557_v49, %v3650_v53  ;;  %v3662_v41 = vshrl.u32 %v12559_v9, %v3650_v53 }
 0x491   : > { %12774 = vst [vmem:[#allocation133_spill] sm:$0xff] %v11270_v62  ;;  %v3664_v30 = vshll.u32 %v12559_v9, %v3649_v29  ;;  %v3594_v2 = vshll.u32 %v11270_v62, 30  ;;  %v3654_v47 = vor.u32 %v3653_v6, %v3652_v57  ;;  %v3657_v20 = vor.u32 %v3656_v48, %v3655_v59  ;;  %v580_v6 = vpop.permute.xlu0 %579 }
 0x492   : > { %v3665_v56 = vshrl.u32 %v12560_v3, %v3650_v53  ;;  %v3510_v16 = vmul.f32 %v3509_v31, %v3507_v28  ;;  %v3651_v10 = vshrl.u32 %v12561_v12, %v3650_v53  ;;  %v3660_v19 = vor.u32 %v3659_v52, %v3658_v58 }
 0x493   : > { %v3663_v51 = vor.u32 %v3662_v41, %v3661_v60  ;;  %v11283_v43 = vsub.s32 %v3591_v23, %v3594_v2  ;;  %vm3669_vm12 = vcmp.lt.s32.totalorder %v11254_v42, 3  ;;  %vm3670_vm0 = vcmp.lt.s32.totalorder %v11254_v42, 4 }
 0x494   : > { %v3666_v63 = vor.u32 %v3665_v56, %v3664_v30  ;;  %v3511_v44 = vxor.u32 2147483648, %v3510_v16  ;;  %v3672_v29 = vsel %vm3670_vm0, %v3660_v19, 2102212464  ;;  %v3675_v57 = vsel %vm3667_vm14, %v3654_v47, %v3657_v20 }
 0x495   : > { %v3676_v59 = vsel %vm3670_vm0, %v3663_v51, 920167782  ;;  %v11289_v48 = vpop.eup %8414  ;;  %v3597_v53 = vsub.s32 0, %v11283_v43  ;;  %vm3668_vm7 = vcmp.lt.s32.totalorder %v11254_v42, 2  ;;  %v3679_v31 = vsel %vm3667_vm14, %v3657_v20, %v3660_v19 }
 0x496   : > { %12776 = vst [vmem:[#allocation135_spill] sm:$0xff] %v11289_v48  ;;  %v3677_v23 = vsel %vm3669_vm12, %v3660_v19, %v3676_v59  ;;  %v3671_v58 = vsel %vm3667_vm14, %v3651_v10, %v3654_v47  ;;  %v3673_v60 = vsel %vm3669_vm12, %v3657_v20, %v3672_v29  ;;  %v3680_v52 = vsel %vm3670_vm0, %v3666_v63, 1326507024  ;;  %v439_v63 = vpop.permute.xlu1 %438 }
 0x497   : > { %v3678_v28 = vsel %vm3668_vm7, %v3675_v57, %v3677_v23  ;;  %v7863_v41 = vmin.u32 %v3597_v53, %v11283_v43  ;;  %v3681_v30 = vsel %vm3669_vm12, %v3663_v51, %v3680_v52  ;;  %v3747_v2 = vor.u32 8388608, %v11259_v18  ;;  %v8442_v53 = vld [vmem:[#allocation2] sm:$0x3] }
 0x498   : > { %v11308_v56 = vmul.f32 %v10908_v25, %v580_v6  ;;  %v3512_v19 = vsel %vm12521_vm3, %v3511_v44, %v3510_v16  ;;  %v3682_v10 = vsel %vm3668_vm7, %v3679_v31, %v3681_v30  ;;  %v3674_v51 = vsel %vm3668_vm7, %v3671_v58, %v3673_v60 }
 0x499   : > { %v11315_v47 = vmul.u32.u64.low %v11261_v0, %v3678_v28  ;;  %v11316_v20 = vmul.u32.u64.high %v11261_v0, %v3678_v28, %v11315_v47  ;;  %v3599_v29 = vclz %v7863_v41  ;;  %8416 = vsinq.f32 %v11246_v36 }
 0x49a   : > { %v11322_v18 = vmul.u32.u64.low %v11261_v0, %v3682_v10  ;;  %v11323_v25 = vmul.u32.u64.high %v11261_v0, %v3682_v10, %v11322_v18  ;;  %v12777_v16 = vand.u32 2147483647, %v10911_v40  ;;  %v12778_v44 = vmov 0 }
 0x49b   : > { %v3587_v57 = vadd.s32 %v11225_v32, %v11234_v38  ;;  %v3749_v59 = vadd.s32 1, %v7870_v17  ;;  %v7864_v6 = vadd.s32 4294967294, %v3599_v29  ;;  %vm442_vm14 = vcmask 1024  }
 0x49c   : > { %vm11328_vm5 = vcmp.le.f32.partialorder %v12777_v16, 0.7853982  ;;  %v441_v23 = vadd.f32 %v8442_v53, %v439_v63  ;;  %v3690_v36 = vmul.u32 %v11261_v0, %v3674_v51  ;;  %v3693_v31 = vadd.s32 1, %v11316_v20 }
 0x49d   : > { %v12779_v44 = vsel %vm11328_vm5, 4294967295, %v12778_v44  ;;  %v11337_v42 = vsel %vm11328_vm5, %v10911_v40, %v3512_v19  ;;  %vm3750_vm12 = vcmp.gt.s32.totalorder %v3749_v59, 0  ;;  %v11341_v58 = vshll.u32 %v3747_v2, 8 }
 0x49e   : > { %12780 = vst [vmem:[#allocation136_spill] sm:$0xff] %v12779_v44  ;;  %vm7865_vm0 = vcmp.lt.s32.totalorder %v7864_v6, 0  ;;  %vm3692_vm7 = vc.u32 %v11323_v25, %v11315_v47  ;;  %v3751_v32 = vsel %vm3750_vm12, %v3749_v59, 0  ;;  %443 = vst.msk [vmem:[#allocation2] sm:$0x3] %vm442_vm14, %v441_v23  ;;  %v3846_v52 = vand.u32 2139095040, %v11308_v56 }
 0x49f   : > { %v3602_v17 = vsel %vm7865_vm0, 0, %v7864_v6  ;;  %v3694_v60 = vsel %vm3692_vm7, %v3693_v31, %v11316_v20  ;;  %v3753_v28 = vand.u32 31, %v3751_v32  ;;  %v3752_v19 = vshrl.u32 %v3751_v32, 5 }
 0x4a0   : > { %v3603_v0 = vsub.s32 32, %v3602_v17  ;;  %v3607_v41 = vsub.s32 4294967266, %v3602_v17  ;;  %v3695_v30 = vadd.s32 %v3694_v60, %v3690_v36  ;;  %v3604_v2 = vshll.u32 %v11283_v43, %v3602_v17 }
 0x4a1   : > { %v3754_v10 = vsub.s32 32, %v3753_v28  ;;  %v3756_v63 = vshll.u32 %v12561_v12, %v3753_v28  ;;  %v3759_v29 = vshll.u32 %v12563_v13, %v3753_v28  ;;  %v3762_v59 = vshll.u32 %v12564_v15, %v3753_v28 }
 0x4a2   : > { %v3605_v51 = vshrl.u32 %v3587_v57, %v3603_v0  ;;  %v3608_v18 = vadd.s32 127, %v3607_v41  ;;  %v3696_v16 = vadd.s32 536870912, %v3695_v30  ;;  %v3765_v23 = vshll.u32 %v12557_v49, %v3753_v28 }
 0x4a3   : > { %v3757_v20 = vshrl.u32 %v12563_v13, %v3754_v10  ;;  %v3760_v6 = vshrl.u32 %v12564_v15, %v3754_v10  ;;  %v3763_v53 = vshrl.u32 %v12557_v49, %v3754_v10  ;;  %v3766_v32 = vshrl.u32 %v12559_v9, %v3754_v10  ;;  %v11359_v17 = vpop.eup %8416 }
 0x4a4   : > { %v3606_v36 = vor.u32 %v3605_v51, %v3604_v2  ;;  %v3609_v43 = vshll.u32 %v3608_v18, 23  ;;  %v11356_v31 = vshrl.u32 %v3696_v16, 30  ;;  %v3755_v57 = vshrl.u32 %v12561_v12, %v3754_v10 }
 0x4a5   : > { %v3758_v60 = vor.u32 %v3757_v20, %v3756_v63  ;;  %v3761_v0 = vor.u32 %v3760_v6, %v3759_v29  ;;  %v3764_v41 = vor.u32 %v3763_v53, %v3762_v59  ;;  %v3767_v48 = vor.u32 %v3766_v32, %v3765_v23 }
 0x4a6   : > { %v3610_v38 = vor.u32 4788187, %v3609_v43  ;;  %v3698_v62 = vshll.u32 %v11356_v31, 30  ;;  %v3768_v44 = vshll.u32 %v12559_v9, %v3753_v28  ;;  %v3613_v40 = vcvt.s32.f32 %v3606_v36 }
 0x4a7   : > { %v3769_v2 = vshrl.u32 %v12560_v3, %v3754_v10  ;;  %vm3771_vm14 = vcmp.lt.s32.totalorder %v3752_v19, 1  ;;  %vm3772_vm12 = vcmp.lt.s32.totalorder %v3752_v19, 2  ;;  %vm3773_vm0 = vcmp.lt.s32.totalorder %v3752_v19, 3 }
 0x4a8   : > { %v3611_v51 = vand.u32 2147483647, %v3610_v38  ;;  %v11365_v18 = vsub.s32 %v3695_v30, %v3698_v62  ;;  %vm3774_vm7 = vcmp.lt.s32.totalorder %v3752_v19, 4  ;;  %v3779_v29 = vsel %vm3771_vm14, %v3758_v60, %v3761_v0 }
 0x4a9   : > { %v3770_v16 = vor.u32 %v3769_v2, %v3768_v44  ;;  %v3776_v63 = vsel %vm3774_vm7, %v3764_v41, 2102212464  ;;  %v3780_v59 = vsel %vm3774_vm7, %v3767_v48, 920167782  ;;  %v3775_v28 = vsel %vm3771_vm14, %v3755_v57, %v3758_v60 }
 0x4aa   : > { %v3614_v20 = vmul.f32 %v3613_v40, %v3611_v51  ;;  %v3701_v6 = vsub.s32 0, %v11365_v18  ;;  %v3781_v53 = vsel %vm3773_vm0, %v3764_v41, %v3780_v59  ;;  %v3777_v10 = vsel %vm3773_vm0, %v3761_v0, %v3776_v63 }
 0x4ab   : > { %v3782_v38 = vsel %vm3772_vm12, %v3779_v29, %v3781_v53  ;;  %v3783_v62 = vsel %vm3771_vm14, %v3761_v0, %v3764_v41  ;;  %v3784_v30 = vsel %vm3774_vm7, %v3770_v16, 1326507024  ;;  %v12781_v40 = vand.u32 2147483647, %v11308_v56 }
 0x4ac   : > { %v3615_v23 = vxor.u32 2147483648, %v3614_v20  ;;  %v7867_v44 = vmin.u32 %v3701_v6, %v11365_v18  ;;  %v3785_v36 = vsel %vm3773_vm0, %v3767_v48, %v3784_v30  ;;  %v3847_v2 = vshrl.u32 %v3846_v52, 23 }
 0x4ad   : > { %v3850_v43 = vand.u32 8388607, %v12781_v40  ;;  %v3786_v32 = vsel %vm3772_vm12, %v3783_v62, %v3785_v36  ;;  %v11380_v57 = vmul.u32.u64.low %v11341_v58, %v3782_v38  ;;  %v11381_v60 = vmul.u32.u64.high %v11341_v58, %v3782_v38, %v11380_v57 }
 0x4ae   : > { %v3703_v51 = vclz %v7867_v44  ;;  %v3778_v63 = vsel %vm3772_vm12, %v3775_v28, %v3777_v10  ;;  %v11385_v0 = vmul.u32.u64.low %v11341_v58, %v3786_v32  ;;  %v11386_v41 = vmul.u32.u64.high %v11341_v58, %v3786_v32, %v11385_v0 }
 0x4af   : > { %8418 = vcosq.f32 %v11337_v42  ;;  %v7874_v48 = vadd.s32 4294967169, %v3847_v2  ;;  %v809_v16 = vsub.s32 4, %v9074_v45  ;;  %v12782_v29 = vand.u32 2147483647, %v11059_v11 }
 0x4b0   : > { %8420 = vsinq.f32 %v11337_v42  ;;  %v12783_v59 = vmov 0  ;;  %vm12523_vm0 = vcmp.lt.s32.totalorder %v11059_v11, 0  ;;  %v7868_v52 = vadd.s32 4294967294, %v3703_v51 }
 0x4b1   : > { %vm11393_vm14 = vcmp.le.f32.partialorder %v12782_v29, 0.7853982  ;;  %v3616_v19 = vsel %vm12523_vm0, %v3615_v23, %v3614_v20  ;;  %v3794_v6 = vmul.u32 %v11341_v58, %v3778_v63  ;;  %v3797_v28 = vadd.s32 1, %v11381_v60 }
 0x4b2   : > { %v12784_v59 = vsel %vm11393_vm14, 4294967295, %v12783_v59  ;;  %v3853_v53 = vadd.s32 1, %v7874_v48  ;;  %vm7869_vm12 = vcmp.lt.s32.totalorder %v7868_v52, 0  ;;  %vm3796_vm7 = vc.u32 %v11386_v41, %v11380_v57 }
 0x4b3   : > { %v3851_v42 = vor.u32 8388608, %v3850_v43  ;;  %vm12785_vm3 = vcmp.lt.s32.totalorder %v8965_v34, 0  ;;  %v3706_v38 = vsel %vm7869_vm12, 0, %v7868_v52  ;;  %v3798_v62 = vsel %vm3796_vm7, %v3797_v28, %v11381_v60 }
 0x4b4   : > { %v810_v10 = vsel %vm12785_vm3, %v809_v16, %v9074_v45  ;;  %vm3854_vm1 = vcmp.gt.s32.totalorder %v3853_v53, 0  ;;  %v3691_v58 = vadd.s32 %v11315_v47, %v11323_v25  ;;  %v3707_v30 = vsub.s32 32, %v3706_v38 }
 0x4b5   : > { %v812_v20 = vsel %vm9239_vm6, 0, %v810_v10  ;;  %v3711_v23 = vsub.s32 4294967266, %v3706_v38  ;;  %v3799_v44 = vadd.s32 %v3798_v62, %v3794_v6  ;;  %v11414_v36 = vsel %vm11393_vm14, %v11059_v11, %v3616_v19 }
 0x4b6   : > { %v3855_v40 = vsel %vm3854_vm1, %v3853_v53, 0  ;;  %v816_v45 = vadd.s32 3, %v812_v20  ;;  %v820_v43 = vxor.u32 2147483648, %v9412_v27  ;;  %v3708_v32 = vshll.u32 %v11365_v18, %v3706_v38 }
 0x4b7   : > { %v3709_v60 = vshrl.u32 %v3691_v58, %v3707_v30  ;;  %v3712_v61 = vadd.s32 127, %v3711_v23  ;;  %v3800_v2 = vadd.s32 536870912, %v3799_v44  ;;  %v11419_v51 = vadd.s32 %v11380_v57, %v11386_v41 }
 0x4b8   : > { %v3857_v47 = vand.u32 31, %v3855_v40  ;;  %v11421_v25 = vshll.u32 %v3851_v42, 8  ;;  %v11423_v63 = vand.u32 3, %v812_v20  ;;  %v3856_v29 = vshrl.u32 %v3855_v40, 5 }
 0x4b9   : > { %v3710_v0 = vor.u32 %v3709_v60, %v3708_v32  ;;  %v3713_v48 = vshll.u32 %v3712_v61, 23  ;;  %v11425_v16 = vshrl.u32 %v3800_v2, 30  ;;  %v11427_v52 = vpop.eup %8418  ;;  %v11431_v28 = vand.u32 3, %v816_v45 }
 0x4ba   : > { %v3858_v19 = vsub.s32 32, %v3857_v47  ;;  %v3860_v18 = vshll.u32 %v12561_v12, %v3857_v47  ;;  %v3863_v6 = vshll.u32 %v12563_v13, %v3857_v47  ;;  %v11433_v57 = vpop.eup %8420  ;;  %v3866_v10 = vshll.u32 %v12564_v15, %v3857_v47 }
 0x4bb   : > { %v3714_v41 = vor.u32 4788187, %v3713_v48  ;;  %v3717_v53 = vcvt.s32.f32 %v3710_v0  ;;  %v3802_v42 = vshll.u32 %v11425_v16, 30  ;;  %v3869_v58 = vshll.u32 %v12557_v49, %v3857_v47 }
 0x4bc   : > { %v3861_v38 = vshrl.u32 %v12563_v13, %v3858_v19  ;;  %v3864_v62 = vshrl.u32 %v12564_v15, %v3858_v19  ;;  %v3867_v20 = vshrl.u32 %v12557_v49, %v3858_v19  ;;  %v3870_v40 = vshrl.u32 %v12559_v9, %v3858_v19 }
 0x4bd   : > { %v3715_v30 = vand.u32 2147483647, %v3714_v41  ;;  %v11442_v23 = vsub.s32 %v3799_v44, %v3802_v42  ;;  %v3872_v45 = vshll.u32 %v12559_v9, %v3857_v47  ;;  %v3873_v2 = vshrl.u32 %v12560_v3, %v3858_v19 }
 0x4be   : > { %v3862_v32 = vor.u32 %v3861_v38, %v3860_v18  ;;  %v3865_v60 = vor.u32 %v3864_v62, %v3863_v6  ;;  %v3868_v61 = vor.u32 %v3867_v20, %v3866_v10  ;;  %v3871_v15 = vor.u32 %v3870_v40, %v3869_v58 }
 0x4bf   : > { %v3718_v0 = vmul.f32 %v3717_v53, %v3715_v30  ;;  %v3805_v13 = vsub.s32 0, %v11442_v23  ;;  %vm3875_vm1 = vcmp.lt.s32.totalorder %v3856_v29, 1  ;;  %v3859_v48 = vshrl.u32 %v12561_v12, %v3858_v19 }
 0x4c0   : > { %v3874_v49 = vor.u32 %v3873_v2, %v3872_v45  ;;  %vm3876_vm3 = vcmp.lt.s32.totalorder %v3856_v29, 2  ;;  %vm3878_vm12 = vcmp.lt.s32.totalorder %v3856_v29, 4  ;;  %v3883_v9 = vsel %vm3875_vm1, %v3862_v32, %v3865_v60 }
 0x4c1   : > { %v3719_v44 = vxor.u32 2147483648, %v3718_v0  ;;  %v7871_v41 = vmin.u32 %v3805_v13, %v11442_v23  ;;  %v3880_v42 = vsel %vm3878_vm12, %v3868_v61, 2102212464  ;;  %vm3877_vm7 = vcmp.lt.s32.totalorder %v3856_v29, 3 }
 0x4c2   : > { %v3884_v47 = vsel %vm3878_vm12, %v3871_v15, 920167782  ;;  %v3887_v18 = vsel %vm3875_vm1, %v3865_v60, %v3868_v61  ;;  %v3888_v6 = vsel %vm3878_vm12, %v3874_v49, 1326507024  ;;  %v3879_v53 = vsel %vm3875_vm1, %v3859_v48, %v3862_v32 }
 0x4c3   : > { %v3807_v3 = vclz %v7871_v41  ;;  %v3881_v10 = vsel %vm3877_vm7, %v3865_v60, %v3880_v42  ;;  %v3885_v38 = vsel %vm3877_vm7, %v3868_v61, %v3884_v47  ;;  %v3889_v19 = vsel %vm3877_vm7, %v3871_v15, %v3888_v6 }
 0x4c4   : > { %v3886_v12 = vsel %vm3876_vm3, %v3883_v9, %v3885_v38  ;;  %v823_v62 = vxor.u32 2147483648, %v9337_v55  ;;  %vm12786_vm14 = vcmp.lt.s32.totalorder %v11144_v4, 0  ;;  %v3890_v30 = vsel %vm3876_vm3, %v3887_v18, %v3889_v19 }
 0x4c5   : > { %v3720_v20 = vsel %vm12786_vm14, %v3719_v44, %v3718_v0  ;;  %v7872_v58 = vadd.s32 4294967294, %v3807_v3  ;;  %vm4183_vm12 = vcmp.eq.s32.totalorder %v11423_v63, 0  ;;  %v12787_v40 = vand.u32 2147483647, %v11144_v4  ;;  %v11483_v44 = vld [vmem:[#allocation9] ss:$0 sm:$0xff] }
 0x4c6   : > { %v12788_v45 = vmov 0  ;;  %v3882_v32 = vsel %vm3876_vm3, %v3879_v53, %v3881_v10  ;;  %v11466_v60 = vmul.u32.u64.low %v11421_v25, %v3890_v30  ;;  %v11467_v61 = vmul.u32.u64.high %v11421_v25, %v3890_v30, %v11466_v60  ;;  %v7361_v30 = vpop.permute.xlu1 %7360 }
 0x4c7   : > { %vm11460_vm1 = vcmp.le.f32.partialorder %v12787_v40, 0.7853982  ;;  %vm819_vm7 = vcmp.eq.s32.totalorder %v11431_v28, 0  ;;  %vm7873_vm14 = vcmp.lt.s32.totalorder %v7872_v58, 0  ;;  %vm818_vm6 = vcmp.lt.s32.totalorder %v11431_v28, 2 }
 0x4c8   : > { %v12789_v45 = vsel %vm11460_vm1, 4294967295, %v12788_v45  ;;  %v11471_v2 = vmul.u32.u64.low %v11421_v25, %v3886_v12  ;;  %v11472_v0 = vmul.u32.u64.high %v11421_v25, %v3886_v12, %v11471_v2  ;;  %v821_v13 = vsel %vm819_vm7, %v9337_v55, %v820_v43 }
 0x4c9   : > { %v3810_v15 = vsel %vm7873_vm14, 0, %v7872_v58  ;;  %vm822_vm3 = vcmp.eq.s32.totalorder %v11431_v28, 2  ;;  %v4185_v29 = vsel %vm4183_vm12, %v9337_v55, %v820_v43  ;;  %vm4186_vm0 = vcmp.eq.s32.totalorder %v11423_v63, 2  ;;  %v11493_v43 = vld [vmem:[#allocation11] ss:$0 sm:$0xff] }
 0x4ca   : > { %v3811_v48 = vsub.s32 32, %v3810_v15  ;;  %v3815_v49 = vsub.s32 4294967266, %v3810_v15  ;;  %v824_v41 = vsel %vm822_vm3, %v823_v62, %v9412_v27  ;;  %v3812_v42 = vshll.u32 %v11442_v23, %v3810_v15 }
 0x4cb   : > { %vm3900_vm7 = vc.u32 %v11467_v61, %v11471_v2  ;;  %v825_v9 = vsel %vm818_vm6, %v821_v13, %v824_v41  ;;  %v4188_v28 = vsel %vm4186_vm0, %v823_v62, %v9412_v27  ;;  %v3901_v55 = vadd.s32 1, %v11472_v0  ;;  %v12794_v41 = vld [vmem:[#allocation24_spill] sm:$0xff] }
 0x4cc   : > { %v3813_v47 = vshrl.u32 %v11419_v51, %v3811_v48  ;;  %v3816_v18 = vadd.s32 127, %v3815_v49  ;;  %vm12790_vm12 = vweird.f32 %v8965_v34  ;;  %v3898_v3 = vmul.u32 %v11421_v25, %v3882_v32 }
 0x4cd   : > { %v826_v6 = vsel %vm12790_vm12, nan, %v825_v9  ;;  %vm12791_vm14 = vcmp.lt.s32.totalorder %v11423_v63, 2  ;;  %v705_v10 = vsub.s32 4, %v9101_v22  ;;  %v3902_v51 = vsel %vm3900_vm7, %v3901_v55, %v11472_v0  ;;  %vm12792_vm0 = vmmov %vm12790_vm12 }
 0x4ce   : > { %v3954_v23 = vmul.f32 %v11483_v44, %v826_v6  ;;  %v4189_v53 = vsel %vm12791_vm14, %v4185_v29, %v4188_v28  ;;  %v3814_v27 = vor.u32 %v3813_v47, %v3812_v42  ;;  %v3817_v38 = vshll.u32 %v3816_v18, 23 }
 0x4cf   : > { %v4190_v12 = vsel %vm12792_vm0, nan, %v4189_v53  ;;  %8422 = vcosq.f32 %v11414_v36  ;;  %v3903_v19 = vadd.s32 %v3902_v51, %v3898_v3  ;;  %vm12793_vm6 = vcmp.lt.s32.totalorder %v8968_v35, 0 }
 0x4d0   : > { %v7288_v62 = vmul.f32 %v11493_v43, %v4190_v12  ;;  %v706_v25 = vsel %vm12793_vm6, %v705_v10, %v9101_v22  ;;  %v11513_v63 = vsel %vm11460_vm1, %v11144_v4, %v3720_v20  ;;  %v3818_v58 = vor.u32 4788187, %v3817_v38 }
 0x4d1   : > { %vm7517_vm3 = vcmask 261120   ;;  %v708_v34 = vsel %vm9331_vm2, 0, %v706_v25  ;;  %v3821_v40 = vcvt.s32.f32 %v3814_v27  ;;  %v3904_v32 = vadd.s32 536870912, %v3903_v19 }
 0x4d2   : > { %v7320_v60 = vadd.f32 %v7288_v62, %v3954_v23  ;;  %v712_v0 = vadd.s32 3, %v708_v34  ;;  %v3819_v13 = vand.u32 2147483647, %v3818_v58  ;;  %v716_v15 = vxor.u32 2147483648, %v9487_v7  ;;  %v12795_v23 = vld [vmem:[#allocation20_spill] sm:$0xff] }
 0x4d3   : > { %v719_v22 = vxor.u32 2147483648, %v9427_v33  ;;  %v4078_v29 = vand.u32 3, %v708_v34  ;;  %v11519_v48 = vshrl.u32 %v3904_v32, 30  ;;  %v1017_v42 = vsub.s32 4, %v12794_v41  ;;  %v7357_v34 = vpop.permute.xlu0 %7356 }
 0x4d4   : > { %v7486_v20 = vmul.f32 %v7361_v30, %v7320_v60  ;;  %v713_v49 = vand.u32 3, %v712_v0  ;;  %v3822_v50 = vmul.f32 %v3821_v40, %v3819_v13  ;;  %vm711_vm2 = vweird.f32 %v8968_v35  ;;  %v12798_v40 = vld [vmem:[#allocation40_spill] sm:$0xff]  ;;  %v12799_v60 = vld [vmem:[#allocation39_spill] sm:$0xff] }
 0x4d5   : > { %vm4079_vm12 = vcmp.lt.s32.totalorder %v4078_v29, 2  ;;  %vm4080_vm14 = vcmp.eq.s32.totalorder %v4078_v29, 0  ;;  %v3906_v9 = vshll.u32 %v11519_v48, 30  ;;  %vm4083_vm1 = vcmp.eq.s32.totalorder %v4078_v29, 2 }
 0x4d6   : > { %7519 = vst.msk [vmem:[%s8951_s17 + $0x8] sm:$0xff] %vm7517_vm3, %v7486_v20  ;;  %vm715_vm0 = vcmp.eq.s32.totalorder %v713_v49, 0  ;;  %vm718_vm6 = vcmp.eq.s32.totalorder %v713_v49, 2  ;;  %vm714_vm5 = vcmp.lt.s32.totalorder %v713_v49, 2  ;;  %v4082_v18 = vsel %vm4080_vm14, %v9427_v33, %v716_v15 }
 0x4d7   : > { %v717_v28 = vsel %vm715_vm0, %v9427_v33, %v716_v15  ;;  %v720_v47 = vsel %vm718_vm6, %v719_v22, %v9487_v7  ;;  %v11530_v55 = vsub.s32 %v3903_v19, %v3906_v9  ;;  %v4085_v3 = vsel %vm4083_vm1, %v719_v22, %v9487_v7 }
 0x4d8   : > { %v721_v6 = vsel %vm714_vm5, %v717_v28, %v720_v47  ;;  %vm12796_vm7 = vcmp.lt.s32.totalorder %v12795_v23, 0  ;;  %8424 = vsinq.f32 %v11414_v36  ;;  %v4086_v27 = vsel %vm4079_vm12, %v4082_v18, %v4085_v3 }
 0x4d9   : > { %v1018_v53 = vsel %vm12796_vm7, %v1017_v42, %v12794_v41  ;;  %v722_v10 = vsel %vm711_vm2, nan, %v721_v6  ;;  %v11542_v33 = vpop.eup %8422  ;;  %v3823_v12 = vxor.u32 2147483648, %v3822_v50  ;;  %v3909_v19 = vsub.s32 0, %v11530_v55  ;;  %v12805_v6 = vld [vmem:[#allocation19_spill] sm:$0xff] }
 0x4da   : > { %v1020_v51 = vsel %vm9495_vm11, 0, %v1018_v53  ;;  %v3953_v7 = vmul.f32 %v11483_v44, %v722_v10  ;;  %v4087_v62 = vsel %vm711_vm2, nan, %v4086_v27  ;;  %8426 = vcosq.f32 %v11513_v63 }
 0x4db   : > { %v3899_v36 = vadd.s32 %v11471_v2, %v11467_v61  ;;  %v7287_v25 = vmul.f32 %v11493_v43, %v4087_v62  ;;  %v1024_v58 = vadd.s32 3, %v1020_v51  ;;  %v7875_v30 = vmin.u32 %v3909_v19, %v11530_v55  ;;  %v12803_v2 = vld [vmem:[#allocation21_spill] sm:$0xff] }
 0x4dc   : > { %v1028_v32 = vxor.u32 2147483648, %v12798_v40  ;;  %v1031_v0 = vxor.u32 2147483648, %v12799_v60  ;;  %v4387_v13 = vand.u32 3, %v1020_v51  ;;  %v12800_v15 = vand.u32 2147483647, %v11158_v46 }
 0x4dd   : > { %v7319_v22 = vadd.f32 %v7287_v25, %v3953_v7  ;;  %v1025_v61 = vand.u32 3, %v1024_v58  ;;  %v913_v29 = vsub.s32 4, %v12803_v2  ;;  %vm12804_vm1 = vcmp.lt.s32.totalorder %v11158_v46, 0 }
 0x4de   : > { %vm11557_vm11 = vcmp.le.f32.partialorder %v12800_v15, 0.7853982  ;;  %v3824_v20 = vsel %vm12804_vm1, %v3823_v12, %v3822_v50  ;;  %v3911_v49 = vclz %v7875_v30  ;;  %vm4389_vm7 = vcmp.eq.s32.totalorder %v4387_v13, 0 }
 0x4df   : > { %vm4392_vm2 = vcmp.eq.s32.totalorder %v4387_v13, 2  ;;  %v7485_v41 = vmul.f32 %v7357_v34, %v7319_v22  ;;  %vm1026_vm12 = vcmp.lt.s32.totalorder %v1025_v61, 2  ;;  %vm1027_vm14 = vcmp.eq.s32.totalorder %v1025_v61, 0  ;;  %v12810_v34 = vld [vmem:[#allocation35_spill] sm:$0xff] }
 0x4e0   : > { %vm1030_vm0 = vcmp.eq.s32.totalorder %v1025_v61, 2  ;;  %v7876_v42 = vadd.s32 4294967294, %v3911_v49  ;;  %v1029_v9 = vsel %vm1027_vm14, %v12799_v60, %v1028_v32  ;;  %v4391_v47 = vsel %vm4389_vm7, %v12799_v60, %v1028_v32  ;;  %v7369_v60 = vpop.permute.xlu1 %7368  ;;  %v12812_v61 = vld [vmem:[#allocation27_spill] sm:$0xff] }
 0x4e1   : > { %v1032_v28 = vsel %vm1030_vm0, %v1031_v0, %v12798_v40  ;;  %7518 = vst.msk [vmem:[%s8951_s17] sm:$0xff] %vm7517_vm3, %v7485_v41  ;;  %vm4388_vm6 = vcmp.lt.s32.totalorder %v4387_v13, 2  ;;  %v4394_v50 = vsel %vm4392_vm2, %v1031_v0, %v12798_v40  ;;  %vm12806_vm1 = vcmp.lt.s32.totalorder %v12805_v6, 0  ;;  %v12811_v13 = vld [vmem:[#allocation33_spill] sm:$0xff] }
 0x4e2   : > { %v1033_v18 = vsel %vm1026_vm12, %v1029_v9, %v1032_v28  ;;  %v914_v3 = vsel %vm12806_vm1, %v913_v29, %v12803_v2  ;;  %vm7877_vm5 = vcmp.lt.s32.totalorder %v7876_v42, 0  ;;  %vm12807_vm9 = vweird.f32 %v12795_v23  ;;  %v11578_v51 = vpop.eup %8424 }
 0x4e3   : > { %v1034_v53 = vsel %vm12807_vm9, nan, %v1033_v18  ;;  %v4395_v10 = vsel %vm4388_vm6, %v4391_v47, %v4394_v50  ;;  %v916_v38 = vsel %vm9346_vm8, 0, %v914_v3  ;;  %v3914_v12 = vsel %vm7877_vm5, 0, %v7876_v42  ;;  %vm12809_vm7 = vmmov %vm12807_vm9 }
 0x4e4   : > { %v3956_v19 = vmul.f32 %v11483_v44, %v1034_v53  ;;  %v4396_v7 = vsel %vm12809_vm7, nan, %v4395_v10  ;;  %v920_v62 = vadd.s32 3, %v916_v38  ;;  %v3915_v25 = vsub.s32 32, %v3914_v12  ;;  %v11585_v32 = vpop.eup %8426 }
 0x4e5   : > { %v3919_v58 = vsub.s32 4294967266, %v3914_v12  ;;  %v7290_v30 = vmul.f32 %v11493_v43, %v4396_v7  ;;  %v924_v40 = vxor.u32 2147483648, %v12810_v34  ;;  %v927_v15 = vxor.u32 2147483648, %v12811_v13 }
 0x4e6   : > { %v921_v0 = vand.u32 3, %v920_v62  ;;  %v4284_v22 = vand.u32 3, %v916_v38  ;;  %v1225_v2 = vsub.s32 4, %v12812_v61  ;;  %8428 = vsinq.f32 %v11513_v63 }
 0x4e7   : > { %v3827_v23 = vsel %vm11557_vm11, %v11158_v46, %v3824_v20  ;;  %v3920_v29 = vadd.s32 127, %v3919_v58  ;;  %v7322_v49 = vadd.f32 %v7290_v30, %v3956_v19  ;;  %v3916_v41 = vshll.u32 %v11530_v55, %v3914_v12  ;;  %v12815_v19 = vld [vmem:[#allocation50_spill] sm:$0xff] }
 0x4e8   : > { %v3917_v42 = vshrl.u32 %v3899_v36, %v3915_v25  ;;  %vm919_vm8 = vweird.f32 %v12805_v6  ;;  %vm923_vm9 = vcmp.eq.s32.totalorder %v921_v0, 0  ;;  %vm926_vm5 = vcmp.eq.s32.totalorder %v921_v0, 2  ;;  %v12816_v25 = vld [vmem:[#allocation49_spill] sm:$0xff] }
 0x4e9   : > { %v3921_v9 = vshll.u32 %v3920_v29, 23  ;;  %v7488_v28 = vmul.f32 %v7369_v60, %v7322_v49  ;;  %v925_v47 = vsel %vm923_vm9, %v12811_v13, %v924_v40  ;;  %vm922_vm2 = vcmp.lt.s32.totalorder %v921_v0, 2 }
 0x4ea   : > { %v928_v63 = vsel %vm926_vm5, %v927_v15, %v12810_v34  ;;  %vm4286_vm12 = vcmp.eq.s32.totalorder %v4284_v22, 0  ;;  %vm12813_vm14 = vcmp.lt.s32.totalorder %v9179_v37, 0  ;;  %vm4285_vm0 = vcmp.lt.s32.totalorder %v4284_v22, 2 }
 0x4eb   : > { %v1226_v20 = vsel %vm12813_vm14, %v1225_v2, %v12812_v61  ;;  %7521 = vst.msk [vmem:[%s8951_s17 + $0x18] sm:$0xff] %vm7517_vm3, %v7488_v28  ;;  %v929_v55 = vsel %vm922_vm2, %v925_v47, %v928_v63  ;;  %v4288_v36 = vsel %vm4286_vm12, %v12811_v13, %v924_v40  ;;  %vm4289_vm6 = vcmp.eq.s32.totalorder %v4284_v22, 2  ;;  %v12817_v40 = vld [vmem:[#allocation25_spill] sm:$0xff]  ;;  %v7365_v22 = vpop.permute.xlu0 %7364  ;;  %v12818_v2 = vld [vmem:[#allocation22_spill] sm:$0xff] }
 0x4ec   : > { %v3922_v18 = vor.u32 4788187, %v3921_v9  ;;  %v930_v50 = vsel %vm919_vm8, nan, %v929_v55  ;;  %v4291_v3 = vsel %vm4289_vm6, %v927_v15, %v12810_v34  ;;  %v1228_v10 = vsel %vm9681_vm13, 0, %v1226_v20 }
 0x4ed   : > { %v3955_v27 = vmul.f32 %v11483_v44, %v930_v50  ;;  %v4292_v38 = vsel %vm4285_vm0, %v4288_v36, %v4291_v3  ;;  %v1232_v12 = vadd.s32 3, %v1228_v10  ;;  %v1236_v7 = vxor.u32 2147483648, %v12815_v19 }
 0x4ee   : > { %v4293_v62 = vsel %vm919_vm8, nan, %v4292_v38  ;;  %v1239_v58 = vxor.u32 2147483648, %v12816_v25  ;;  %v4593_v30 = vand.u32 3, %v1228_v10  ;;  %v1121_v60 = vsub.s32 4, %v12817_v40  ;;  %v12821_v10 = vld [vmem:[#allocation48_spill] sm:$0xff] }
 0x4ef   : > { %8430 = vcosq.f32 %v3827_v23  ;;  %v7289_v34 = vmul.f32 %v11493_v43, %v4293_v62  ;;  %vm1231_vm1 = vweird.f32 %v9179_v37  ;;  %v1233_v0 = vand.u32 3, %v1232_v12  ;;  %v12822_v12 = vld [vmem:[#allocation41_spill] sm:$0xff] }
 0x4f0   : > { %v3918_v13 = vor.u32 %v3917_v42, %v3916_v41  ;;  %v3923_v15 = vand.u32 2147483647, %v3922_v18  ;;  %vm4594_vm13 = vcmp.lt.s32.totalorder %v4593_v30, 2  ;;  %vm4595_vm7 = vcmp.eq.s32.totalorder %v4593_v30, 0  ;;  %v11616_v61 = vpop.eup %8428 }
 0x4f1   : > { %v7321_v6 = vadd.f32 %v7289_v34, %v3955_v27  ;;  %vm1235_vm8 = vcmp.eq.s32.totalorder %v1233_v0, 0  ;;  %vm4598_vm9 = vcmp.eq.s32.totalorder %v4593_v30, 2  ;;  %vm12819_vm5 = vcmp.lt.s32.totalorder %v12818_v2, 0  ;;  %v12823_v30 = vld [vmem:[#allocation32_spill] sm:$0xff] }
 0x4f2   : > { %v1122_v29 = vsel %vm12819_vm5, %v1121_v60, %v12817_v40  ;;  %v1237_v49 = vsel %vm1235_vm8, %v12816_v25, %v1236_v7  ;;  %vm1238_vm2 = vcmp.eq.s32.totalorder %v1233_v0, 2  ;;  %v4597_v9 = vsel %vm4595_vm7, %v12816_v25, %v1236_v7  ;;  %v7377_v25 = vpop.permute.xlu1 %7376 }
 0x4f3   : > { %v4600_v41 = vsel %vm4598_vm9, %v1239_v58, %v12815_v19  ;;  %v7487_v42 = vmul.f32 %v7365_v22, %v7321_v6  ;;  %vm1234_vm12 = vcmp.lt.s32.totalorder %v1233_v0, 2  ;;  %v1240_v28 = vsel %vm1238_vm2, %v1239_v58, %v12815_v19 }
 0x4f4   : > { %v4601_v47 = vsel %vm4594_vm13, %v4597_v9, %v4600_v41  ;;  %v3925_v63 = vcvt.s32.f32 %v3918_v13  ;;  %v1241_v20 = vsel %vm1234_vm12, %v1237_v49, %v1240_v28  ;;  %v1124_v18 = vsel %vm9518_vm4, 0, %v1122_v29  ;;  %v12824_v29 = vld [vmem:[#allocation26_spill] sm:$0xff]  ;;  %v12826_v9 = vld [vmem:[#allocation60_spill] sm:$0xff] }
 0x4f5   : > { %v4602_v55 = vsel %vm1231_vm1, nan, %v4601_v47  ;;  %7520 = vst.msk [vmem:[%s8951_s17 + $0x10] sm:$0xff] %vm7517_vm3, %v7487_v42  ;;  %v1242_v50 = vsel %vm1231_vm1, nan, %v1241_v20  ;;  %v1128_v53 = vadd.s32 3, %v1124_v18  ;;  %v1132_v27 = vxor.u32 2147483648, %v12821_v10  ;;  %v12828_v20 = vld [vmem:[#allocation30_spill] sm:$0xff] }
 0x4f6   : > { %v7292_v3 = vmul.f32 %v11493_v43, %v4602_v55  ;;  %8432 = vsinq.f32 %v3827_v23  ;;  %v3958_v38 = vmul.f32 %v11483_v44, %v1242_v50  ;;  %v1135_v19 = vxor.u32 2147483648, %v12822_v12 }
 0x4f7   : > { %v4490_v7 = vand.u32 3, %v1124_v18  ;;  %v11637_v62 = vmul.f32 %v3925_v63, %v3923_v15  ;;  %vm1127_vm4 = vweird.f32 %v12818_v2  ;;  %v1129_v58 = vand.u32 3, %v1128_v53  ;;  %v7373_v53 = vpop.permute.xlu0 %7372  ;;  %v12832_v2 = vld [vmem:[#allocation54_spill] sm:$0xff] }
 0x4f8   : > { %v1433_v37 = vsub.s32 4, %v12823_v30  ;;  %v7324_v40 = vadd.f32 %v7292_v3, %v3958_v38  ;;  %vm12825_vm8 = vcmp.lt.s32.totalorder %v12824_v29, 0  ;;  %vm1439_vm9 = vweird.f32 %v12824_v29  ;;  %v12830_v38 = vld [vmem:[#allocation23_spill] sm:$0xff] }
 0x4f9   : > { %vm4491_vm14 = vcmp.lt.s32.totalorder %v4490_v7, 2  ;;  %vm4492_vm0 = vcmp.eq.s32.totalorder %v4490_v7, 0  ;;  %vm4495_vm6 = vcmp.eq.s32.totalorder %v4490_v7, 2  ;;  %v11641_v60 = vpop.eup %8430  ;;  %vm1130_vm1 = vcmp.lt.s32.totalorder %v1129_v58, 2  ;;  %v12833_v7 = vld [vmem:[#allocation52_spill] sm:$0xff] }
 0x4fa   : > { %vm1131_vm13 = vcmp.eq.s32.totalorder %v1129_v58, 0  ;;  %vm1134_vm7 = vcmp.eq.s32.totalorder %v1129_v58, 2  ;;  %v4494_v23 = vsel %vm4492_vm0, %v12822_v12, %v1132_v27  ;;  %v7490_v34 = vmul.f32 %v7377_v25, %v7324_v40 }
 0x4fb   : > { %v1133_v0 = vsel %vm1131_vm13, %v12822_v12, %v1132_v27  ;;  %v1136_v13 = vsel %vm1134_vm7, %v1135_v19, %v12821_v10  ;;  %v4497_v15 = vsel %vm4495_vm6, %v1135_v19, %v12821_v10  ;;  %v1434_v49 = vsel %vm12825_vm8, %v1433_v37, %v12823_v30  ;;  %v12829_v10 = vld [vmem:[#allocation59_spill] sm:$0xff] }
 0x4fc   : > { %v1137_v22 = vsel %vm1130_vm1, %v1133_v0, %v1136_v13  ;;  %v4498_v6 = vsel %vm4491_vm14, %v4494_v23, %v4497_v15  ;;  %v1444_v41 = vxor.u32 2147483648, %v12826_v9  ;;  %7523 = vst.msk [vmem:[%s8951_s17 + $0x28] sm:$0xff] %vm7517_vm3, %v7490_v34  ;;  %v1436_v63 = vsel %vm9841_vm15, 0, %v1434_v49  ;;  %v12835_v0 = vld [vmem:[#allocation43_spill] sm:$0xff] }
 0x4fd   : > { %v1138_v42 = vsel %vm1127_vm4, nan, %v1137_v22  ;;  %v4499_v28 = vsel %vm1127_vm4, nan, %v4498_v6  ;;  %v1329_v55 = vsub.s32 4, %v12828_v20  ;;  %v1440_v50 = vadd.s32 3, %v1436_v63 }
 0x4fe   : > { %v3957_v36 = vmul.f32 %v11483_v44, %v1138_v42  ;;  %v7291_v18 = vmul.f32 %v11493_v43, %v4499_v28  ;;  %v4799_v3 = vand.u32 3, %v1436_v63  ;;  %v1447_v27 = vxor.u32 2147483648, %v12829_v10 }
 0x4ff   : > { %vm12831_vm5 = vcmp.lt.s32.totalorder %v12830_v38, 0  ;;  %v1340_v19 = vxor.u32 2147483648, %v12832_v2  ;;  %v1343_v25 = vxor.u32 2147483648, %v12833_v7  ;;  %v1441_v30 = vand.u32 3, %v1440_v50 }
 0x500   : > { %v1330_v12 = vsel %vm12831_vm5, %v1329_v55, %v12828_v20  ;;  %v7323_v58 = vadd.f32 %v7291_v18, %v3957_v36  ;;  %vm4800_vm15 = vcmp.lt.s32.totalorder %v4799_v3, 2  ;;  %vm4801_vm2 = vcmp.eq.s32.totalorder %v4799_v3, 0  ;;  %v11669_v37 = vpop.eup %8432  ;;  %v12836_v20 = vld [vmem:[#allocation31_spill] sm:$0xff] }
 0x501   : > { %v4803_v40 = vsel %vm4801_vm2, %v12829_v10, %v1444_v41  ;;  %vm4804_vm12 = vcmp.eq.s32.totalorder %v4799_v3, 2  ;;  %v1332_v34 = vsel %vm9732_vm10, 0, %v1330_v12  ;;  %v1641_v13 = vsub.s32 4, %v12835_v0  ;;  %v12838_v3 = vld [vmem:[#allocation64_spill] sm:$0xff] }
 0x502   : > { %v7489_v15 = vmul.f32 %v7373_v53, %v7323_v58  ;;  %vm1442_vm4 = vcmp.lt.s32.totalorder %v1441_v30, 2  ;;  %vm1443_vm14 = vcmp.eq.s32.totalorder %v1441_v30, 0  ;;  %vm1446_vm0 = vcmp.eq.s32.totalorder %v1441_v30, 2 }
 0x503   : > { %v1445_v22 = vsel %vm1443_vm14, %v12829_v10, %v1444_v41  ;;  %v1448_v6 = vsel %vm1446_vm0, %v1447_v27, %v12826_v9  ;;  %v4806_v49 = vsel %vm4804_vm12, %v1447_v27, %v12826_v9  ;;  %v1336_v42 = vadd.s32 3, %v1332_v34  ;;  %v7385_v10 = vpop.permute.xlu1 %7384 }
 0x504   : > { %7522 = vst.msk [vmem:[%s8951_s17 + $0x20] sm:$0xff] %vm7517_vm3, %v7489_v15  ;;  %v1449_v28 = vsel %vm1442_vm4, %v1445_v22, %v1448_v6  ;;  %v4807_v47 = vsel %vm4800_vm15, %v4803_v40, %v4806_v49  ;;  %v4696_v63 = vand.u32 3, %v1332_v34  ;;  %vm12837_vm10 = vcmp.lt.s32.totalorder %v12836_v20, 0  ;;  %v12840_v15 = vld [vmem:[#allocation72_spill] sm:$0xff]  ;;  %v12841_v49 = vld [vmem:[#allocation70_spill] sm:$0xff] }
 0x505   : > { %v1642_v55 = vsel %vm12837_vm10, %v1641_v13, %v12835_v0  ;;  %v1450_v36 = vsel %vm1439_vm9, nan, %v1449_v28  ;;  %v4808_v41 = vsel %vm1439_vm9, nan, %v4807_v47  ;;  %vm1335_vm6 = vweird.f32 %v12830_v38  ;;  %v12842_v28 = vld [vmem:[#allocation38_spill] sm:$0xff] }
 0x506   : > { %v1337_v9 = vand.u32 3, %v1336_v42  ;;  %v3960_v18 = vmul.f32 %v11483_v44, %v1450_v36  ;;  %v7294_v50 = vmul.f32 %v11493_v43, %v4808_v41  ;;  %vm4698_vm1 = vcmp.eq.s32.totalorder %v4696_v63, 0 }
 0x507   : > { %vm12839_vm13 = vnez %v12838_v3  ;;  %v4700_v27 = vsel %vm4698_vm1, %v12833_v7, %v1340_v19  ;;  %vm4701_vm9 = vcmp.eq.s32.totalorder %v4696_v63, 2  ;;  %vm4697_vm15 = vcmp.lt.s32.totalorder %v4696_v63, 2  ;;  %v7381_v63 = vpop.permute.xlu0 %7380 }
 0x508   : > { %v1644_v53 = vsel %vm12839_vm13, 0, %v1642_v55  ;;  %vm1338_vm7 = vcmp.lt.s32.totalorder %v1337_v9, 2  ;;  %vm1339_vm8 = vcmp.eq.s32.totalorder %v1337_v9, 0  ;;  %vm1342_vm5 = vcmp.eq.s32.totalorder %v1337_v9, 2  ;;  %v12843_v55 = vld [vmem:[#allocation67_spill] sm:$0xff] }
 0x509   : > { %v7326_v12 = vadd.f32 %v7294_v50, %v3960_v18  ;;  %v1341_v29 = vsel %vm1339_vm8, %v12833_v7, %v1340_v19  ;;  %v1344_v58 = vsel %vm1342_vm5, %v1343_v25, %v12832_v2  ;;  %v4703_v40 = vsel %vm4701_vm9, %v1343_v25, %v12832_v2  ;;  %v12844_v50 = vld [vmem:[#allocation29_spill] sm:$0xff] }
 0x50a   : > { %v1345_v30 = vsel %vm1338_vm7, %v1341_v29, %v1344_v58  ;;  %v1648_v23 = vadd.s32 3, %v1644_v53  ;;  %v4704_v13 = vsel %vm4697_vm15, %v4700_v27, %v4703_v40  ;;  %v1652_v22 = vxor.u32 2147483648, %v12840_v15 }
 0x50b   : > { %v7492_v34 = vmul.f32 %v7385_v10, %v7326_v12  ;;  %v1346_v0 = vsel %vm1335_vm6, nan, %v1345_v30  ;;  %v4705_v19 = vsel %vm1335_vm6, nan, %v4704_v13  ;;  %v1655_v42 = vxor.u32 2147483648, %v12841_v49  ;;  %v12846_v30 = vld [vmem:[#allocation56_spill] sm:$0xff] }
 0x50c   : > { %v3959_v6 = vmul.f32 %v11483_v44, %v1346_v0  ;;  %v1649_v7 = vand.u32 3, %v1648_v23  ;;  %v7293_v2 = vmul.f32 %v11493_v43, %v4705_v19  ;;  %vm1647_vm2 = vweird.f32 %v12836_v20  ;;  %v12848_v23 = vld [vmem:[#allocation61_spill] sm:$0xff] }
 0x50d   : > { %7525 = vst.msk [vmem:[%s8951_s17 + $0x38] sm:$0xff] %vm7517_vm3, %v7492_v34  ;;  %v5005_v25 = vand.u32 3, %v1644_v53  ;;  %v1537_v47 = vsub.s32 4, %v12842_v28  ;;  %v1548_v36 = vxor.u32 2147483648, %v12843_v55  ;;  %vm12845_vm1 = vcmp.lt.s32.totalorder %v12844_v50, 0  ;;  %v12849_v19 = vld [vmem:[#allocation53_spill] sm:$0xff] }
 0x50e   : > { %vm1650_vm12 = vcmp.lt.s32.totalorder %v1649_v7, 2  ;;  %vm1651_vm4 = vcmp.eq.s32.totalorder %v1649_v7, 0  ;;  %vm1654_vm14 = vcmp.eq.s32.totalorder %v1649_v7, 2  ;;  %v7325_v38 = vadd.f32 %v7293_v2, %v3959_v6 }
 0x50f   : > { %v1653_v41 = vsel %vm1651_vm4, %v12841_v49, %v1652_v22  ;;  %v1656_v9 = vsel %vm1654_vm14, %v1655_v42, %v12840_v15  ;;  %vm5006_vm0 = vcmp.lt.s32.totalorder %v5005_v25, 2  ;;  %vm5007_vm10 = vcmp.eq.s32.totalorder %v5005_v25, 0 }
 0x510   : > { %v1657_v18 = vsel %vm1650_vm12, %v1653_v41, %v1656_v9  ;;  %vm5010_vm6 = vcmp.eq.s32.totalorder %v5005_v25, 2  ;;  %v1538_v3 = vsel %vm12845_vm1, %v1537_v47, %v12842_v28  ;;  %v7491_v53 = vmul.f32 %v7381_v63, %v7325_v38  ;;  %v7393_v25 = vpop.permute.xlu1 %7392  ;;  %v12852_v38 = vld [vmem:[#allocation42_spill] sm:$0xff] }
 0x511   : > { %v1658_v10 = vsel %vm1647_vm2, nan, %v1657_v18  ;;  %v5009_v27 = vsel %vm5007_vm10, %v12841_v49, %v1652_v22  ;;  %v5012_v12 = vsel %vm5010_vm6, %v1655_v42, %v12840_v15  ;;  %vm12847_vm13 = vnez %v12846_v30  ;;  %v12850_v15 = vld [vmem:[#allocation79_spill] sm:$0xff]  ;;  %v12851_v42 = vld [vmem:[#allocation78_spill] sm:$0xff] }
 0x512   : > { %v3962_v29 = vmul.f32 %v11483_v44, %v1658_v10  ;;  %v5013_v58 = vsel %vm5006_vm0, %v5009_v27, %v5012_v12  ;;  %v1540_v40 = vsel %vm12847_vm13, 0, %v1538_v3  ;;  %v1551_v34 = vxor.u32 2147483648, %v12848_v23  ;;  %7524 = vst.msk [vmem:[%s8951_s17 + $0x30] sm:$0xff] %vm7517_vm3, %v7491_v53  ;;  %v12856_v30 = vld [vmem:[#allocation47_spill] sm:$0xff] }
 0x513   : > { %v5014_v0 = vsel %vm1647_vm2, nan, %v5013_v58  ;;  %v1544_v13 = vadd.s32 3, %v1540_v40  ;;  %v4902_v6 = vand.u32 3, %v1540_v40  ;;  %v1849_v7 = vsub.s32 4, %v12849_v19 }
 0x514   : > { %v7296_v22 = vmul.f32 %v11493_v43, %v5014_v0  ;;  %vm1543_vm7 = vweird.f32 %v12844_v50  ;;  %v1860_v49 = vxor.u32 2147483648, %v12850_v15  ;;  %v1863_v2 = vxor.u32 2147483648, %v12851_v42 }
 0x515   : > { %v1545_v28 = vand.u32 3, %v1544_v13  ;;  %vm4903_vm8 = vcmp.lt.s32.totalorder %v4902_v6, 2  ;;  %vm4904_vm5 = vcmp.eq.s32.totalorder %v4902_v6, 0  ;;  %vm4907_vm9 = vcmp.eq.s32.totalorder %v4902_v6, 2  ;;  %v12857_v13 = vld [vmem:[#allocation37_spill] sm:$0xff] }
 0x516   : > { %v7328_v47 = vadd.f32 %v7296_v22, %v3962_v29  ;;  %v4906_v20 = vsel %vm4904_vm5, %v12848_v23, %v1548_v36  ;;  %v4909_v63 = vsel %vm4907_vm9, %v1551_v34, %v12843_v55  ;;  %vm12853_vm15 = vcmp.lt.s32.totalorder %v12852_v38, 0  ;;  %v12854_v29 = vld [vmem:[#allocation68_spill] sm:$0xff]  ;;  %v7389_v22 = vpop.permute.xlu0 %7388 }
 0x517   : > { %v1850_v41 = vsel %vm12853_vm15, %v1849_v7, %v12849_v19  ;;  %vm1546_vm2 = vcmp.lt.s32.totalorder %v1545_v28, 2  ;;  %vm1547_vm12 = vcmp.eq.s32.totalorder %v1545_v28, 0  ;;  %vm1550_vm4 = vcmp.eq.s32.totalorder %v1545_v28, 2  ;;  %v12859_v19 = vld [vmem:[#allocation75_spill] sm:$0xff] }
 0x518   : > { %v4910_v9 = vsel %vm4903_vm8, %v4906_v20, %v4909_v63  ;;  %v7494_v18 = vmul.f32 %v7393_v25, %v7328_v47  ;;  %v1549_v3 = vsel %vm1547_vm12, %v12848_v23, %v1548_v36  ;;  %v1552_v53 = vsel %vm1550_vm4, %v1551_v34, %v12843_v55  ;;  %v12860_v20 = vld [vmem:[#allocation65_spill] sm:$0xff] }
 0x519   : > { %v4911_v10 = vsel %vm1543_vm7, nan, %v4910_v9  ;;  %v1553_v27 = vsel %vm1546_vm2, %v1549_v3, %v1552_v53  ;;  %vm12855_vm14 = vnez %v12854_v29  ;;  %v1745_v40 = vsub.s32 4, %v12856_v30 }
 0x51a   : > { %v7295_v12 = vmul.f32 %v11493_v43, %v4911_v10  ;;  %v1852_v58 = vsel %vm12855_vm14, 0, %v1850_v41  ;;  %v3927_v0 = vxor.u32 2147483648, %v11637_v62  ;;  %7527 = vst.msk [vmem:[%s8951_s17 + $0x48] sm:$0xff] %vm7517_vm3, %v7494_v18  ;;  %v1554_v36 = vsel %vm1543_vm7, nan, %v1553_v27 }
 0x51b   : > { %v1856_v23 = vadd.s32 3, %v1852_v58  ;;  %v5211_v55 = vand.u32 3, %v1852_v58  ;;  %v3961_v34 = vmul.f32 %v11483_v44, %v1554_v36  ;;  %vm1855_vm0 = vweird.f32 %v12852_v38  ;;  %v12863_v36 = vld [vmem:[#allocation63_spill] sm:$0xff] }
 0x51c   : > { %vm12858_vm10 = vcmp.lt.s32.totalorder %v12857_v13, 0  ;;  %v1756_v7 = vxor.u32 2147483648, %v12859_v19  ;;  %vm12861_vm7 = vnez %v12860_v20  ;;  %vm1751_vm15 = vweird.f32 %v12857_v13  ;;  %v12867_v20 = vld [vmem:[#allocation81_spill] sm:$0xff] }
 0x51d   : > { %v1746_v6 = vsel %vm12858_vm10, %v1745_v40, %v12856_v30  ;;  %v1857_v25 = vand.u32 3, %v1856_v23  ;;  %vm5212_vm6 = vcmp.lt.s32.totalorder %v5211_v55, 2  ;;  %vm5213_vm1 = vcmp.eq.s32.totalorder %v5211_v55, 0  ;;  %v12862_v30 = vld [vmem:[#allocation73_spill] sm:$0xff] }
 0x51e   : > { %vm5216_vm13 = vcmp.eq.s32.totalorder %v5211_v55, 2  ;;  %v7327_v28 = vadd.f32 %v7295_v12, %v3961_v34  ;;  %v5215_v50 = vsel %vm5213_vm1, %v12851_v42, %v1860_v49  ;;  %v1748_v63 = vsel %vm12861_vm7, 0, %v1746_v6  ;;  %v12864_v34 = vld [vmem:[#allocation51_spill] sm:$0xff]  ;;  %v12866_v6 = vld [vmem:[#allocation85_spill] sm:$0xff] }
 0x51f   : > { %v5218_v47 = vsel %vm5216_vm13, %v1863_v2, %v12850_v15  ;;  %vm1858_vm8 = vcmp.lt.s32.totalorder %v1857_v25, 2  ;;  %vm1859_vm5 = vcmp.eq.s32.totalorder %v1857_v25, 0  ;;  %vm1862_vm9 = vcmp.eq.s32.totalorder %v1857_v25, 2 }
 0x520   : > { %v5219_v41 = vsel %vm5212_vm6, %v5215_v50, %v5218_v47  ;;  %v7493_v9 = vmul.f32 %v7389_v22, %v7327_v28  ;;  %v1861_v18 = vsel %vm1859_vm5, %v12851_v42, %v1860_v49  ;;  %v1864_v3 = vsel %vm1862_vm9, %v1863_v2, %v12850_v15  ;;  %v7401_v2 = vpop.permute.xlu1 %7400 }
 0x521   : > { %v5220_v53 = vsel %vm1855_vm0, nan, %v5219_v41  ;;  %v1865_v10 = vsel %vm1858_vm8, %v1861_v18, %v1864_v3  ;;  %v1752_v12 = vadd.s32 3, %v1748_v63  ;;  %v5108_v29 = vand.u32 3, %v1748_v63 }
 0x522   : > { %v7298_v27 = vmul.f32 %v11493_v43, %v5220_v53  ;;  %7526 = vst.msk [vmem:[%s8951_s17 + $0x40] sm:$0xff] %vm7517_vm3, %v7493_v9  ;;  %v1866_v58 = vsel %vm1855_vm0, nan, %v1865_v10  ;;  %v1759_v40 = vxor.u32 2147483648, %v12862_v30  ;;  %v2057_v23 = vsub.s32 4, %v12863_v36 }
 0x523   : > { %v2068_v49 = vxor.u32 2147483648, %v10537_v8  ;;  %v3964_v15 = vmul.f32 %v11483_v44, %v1866_v58  ;;  %v1753_v42 = vand.u32 3, %v1752_v12  ;;  %vm5109_vm2 = vcmp.lt.s32.totalorder %v5108_v29, 2 }
 0x524   : > { %vm5110_vm12 = vcmp.eq.s32.totalorder %v5108_v29, 0  ;;  %vm5113_vm4 = vcmp.eq.s32.totalorder %v5108_v29, 2  ;;  %vm12865_vm14 = vcmp.lt.s32.totalorder %v12864_v34, 0  ;;  %v2071_v22 = vxor.u32 2147483648, %v12866_v6 }
 0x525   : > { %v5112_v55 = vsel %vm5110_vm12, %v12862_v30, %v1756_v7  ;;  %v2058_v38 = vsel %vm12865_vm14, %v2057_v23, %v12863_v36  ;;  %v7330_v25 = vadd.f32 %v7298_v27, %v3964_v15  ;;  %vm1754_vm0 = vcmp.lt.s32.totalorder %v1753_v42, 2  ;;  %v12869_v27 = vld [vmem:[#allocation58_spill] sm:$0xff] }
 0x526   : > { %vm1755_vm10 = vcmp.eq.s32.totalorder %v1753_v42, 0  ;;  %vm1758_vm6 = vcmp.eq.s32.totalorder %v1753_v42, 2  ;;  %v5115_v47 = vsel %vm5113_vm4, %v1759_v40, %v12859_v19  ;;  %vm12868_vm1 = vnez %v12867_v20 }
 0x527   : > { %v1757_v28 = vsel %vm1755_vm10, %v12862_v30, %v1756_v7  ;;  %v1760_v50 = vsel %vm1758_vm6, %v1759_v40, %v12859_v19  ;;  %v2060_v63 = vsel %vm12868_vm1, 0, %v2058_v38  ;;  %vm3845_vm13 = vcmp.lt.s32.totalorder %v11308_v56, 0  ;;  %v7397_v30 = vpop.permute.xlu0 %7396  ;;  %v12870_v40 = vld [vmem:[#allocation45_spill] sm:$0xff] }
 0x528   : > { %v7496_v41 = vmul.f32 %v7401_v2, %v7330_v25  ;;  %v1761_v9 = vsel %vm1754_vm0, %v1757_v28, %v1760_v50  ;;  %v5116_v18 = vsel %vm5109_vm2, %v5112_v55, %v5115_v47  ;;  %v2064_v3 = vadd.s32 3, %v2060_v63  ;;  %v12872_v28 = vld [vmem:[#allocation74_spill] sm:$0xff] }
 0x529   : > { %v1762_v53 = vsel %vm1751_vm15, nan, %v1761_v9  ;;  %v5117_v7 = vsel %vm1751_vm15, nan, %v5116_v18  ;;  %v5417_v10 = vand.u32 3, %v2060_v63  ;;  %v1953_v12 = vsub.s32 4, %v12869_v27 }
 0x52a   : > { %7529 = vst.msk [vmem:[%s8951_s17 + $0x58] sm:$0xff] %vm7517_vm3, %v7496_v41  ;;  %v3963_v19 = vmul.f32 %v11483_v44, %v1762_v53  ;;  %v7297_v58 = vmul.f32 %v11493_v43, %v5117_v7  ;;  %vm2063_vm7 = vweird.f32 %v12864_v34  ;;  %v2065_v29 = vand.u32 3, %v2064_v3  ;;  %v12874_v41 = vld [vmem:[#allocation84_spill] sm:$0xff]  ;;  %v7409_v34 = vpop.permute.xlu1 %7408  ;;  %v12876_v7 = vld [vmem:[#allocation71_spill] sm:$0xff] }
 0x52b   : > { %vm5418_vm8 = vcmp.lt.s32.totalorder %v5417_v10, 2  ;;  %vm5419_vm5 = vcmp.eq.s32.totalorder %v5417_v10, 0  ;;  %vm5422_vm9 = vcmp.eq.s32.totalorder %v5417_v10, 2  ;;  %vm12871_vm2 = vcmp.lt.s32.totalorder %v12870_v40, 0 }
 0x52c   : > { %v1954_v13 = vsel %vm12871_vm2, %v1953_v12, %v12869_v27  ;;  %v7329_v36 = vadd.f32 %v7297_v58, %v3963_v19  ;;  %vm2066_vm15 = vcmp.lt.s32.totalorder %v2065_v29, 2  ;;  %vm2067_vm12 = vcmp.eq.s32.totalorder %v2065_v29, 0 }
 0x52d   : > { %vm2070_vm4 = vcmp.eq.s32.totalorder %v2065_v29, 2  ;;  %v2069_v23 = vsel %vm2067_vm12, %v12866_v6, %v2068_v49  ;;  %v5421_v42 = vsel %vm5419_vm5, %v12866_v6, %v2068_v49  ;;  %v5424_v2 = vsel %vm5422_vm9, %v2071_v22, %v10537_v8  ;;  %v12875_v6 = vld [vmem:[#allocation83_spill] sm:$0xff] }
 0x52e   : > { %v2072_v15 = vsel %vm2070_vm4, %v2071_v22, %v10537_v8  ;;  %v7495_v55 = vmul.f32 %v7397_v30, %v7329_v36  ;;  %v5425_v25 = vsel %vm5418_vm8, %v5421_v42, %v5424_v2  ;;  %vm12873_vm14 = vnez %v12872_v28  ;;  %v12879_v2 = vld [vmem:[#allocation66_spill] sm:$0xff] }
 0x52f   : > { %v2073_v38 = vsel %vm2066_vm15, %v2069_v23, %v2072_v15  ;;  %v1956_v50 = vsel %vm12873_vm14, 0, %v1954_v13  ;;  %v5426_v20 = vsel %vm2063_vm7, nan, %v5425_v25  ;;  %v1964_v9 = vxor.u32 2147483648, %v12874_v41 }
 0x530   : > { %v2074_v47 = vsel %vm2063_vm7, nan, %v2073_v38  ;;  %v1960_v63 = vadd.s32 3, %v1956_v50  ;;  %7528 = vst.msk [vmem:[%s8951_s17 + $0x50] sm:$0xff] %vm7517_vm3, %v7495_v55  ;;  %v7300_v8 = vmul.f32 %v11493_v43, %v5426_v20  ;;  %v1967_v22 = vxor.u32 2147483648, %v12875_v6  ;;  %v12880_v20 = vld [vmem:[#allocation95_spill] sm:$0xff] }
 0x531   : > { %v3966_v49 = vmul.f32 %v11483_v44, %v2074_v47  ;;  %v5314_v18 = vand.u32 3, %v1956_v50  ;;  %v11820_v3 = vsel %vm3845_vm13, %v3927_v0, %v11637_v62  ;;  %vm1959_vm0 = vweird.f32 %v12870_v40  ;;  %v7405_v47 = vpop.permute.xlu0 %7404  ;;  %v12883_v40 = vld [vmem:[#allocation93_spill] sm:$0xff] }
 0x532   : > { %v1961_v53 = vand.u32 3, %v1960_v63  ;;  %v2265_v10 = vsub.s32 4, %v12876_v7  ;;  %vm12877_vm9 = vcmp.lt.s32.totalorder %v9976_v14, 0  ;;  %vm2271_vm2 = vweird.f32 %v9976_v14 }
 0x533   : > { %v7332_v27 = vadd.f32 %v7300_v8, %v3966_v49  ;;  %vm5315_vm10 = vcmp.lt.s32.totalorder %v5314_v18, 2  ;;  %vm5316_vm6 = vcmp.eq.s32.totalorder %v5314_v18, 0  ;;  %vm5319_vm1 = vcmp.eq.s32.totalorder %v5314_v18, 2  ;;  %v12884_v8 = vld [vmem:[#allocation92_spill] sm:$0xff] }
 0x534   : > { %vm1962_vm7 = vcmp.lt.s32.totalorder %v1961_v53, 2  ;;  %vm1963_vm8 = vcmp.eq.s32.totalorder %v1961_v53, 0  ;;  %vm1966_vm5 = vcmp.eq.s32.totalorder %v1961_v53, 2  ;;  %v5318_v12 = vsel %vm5316_vm6, %v12875_v6, %v1964_v9 }
 0x535   : > { %v7498_v19 = vmul.f32 %v7409_v34, %v7332_v27  ;;  %v1965_v62 = vsel %vm1963_vm8, %v12875_v6, %v1964_v9  ;;  %v1968_v0 = vsel %vm1966_vm5, %v1967_v22, %v12874_v41  ;;  %v5321_v58 = vsel %vm5319_vm1, %v1967_v22, %v12874_v41  ;;  %v12881_v41 = vld [vmem:[#allocation57_spill] sm:$0xff]  ;;  %v12885_v34 = vld [vmem:[#allocation87_spill] sm:$0xff] }
 0x536   : > { %v1969_v29 = vsel %vm1962_vm7, %v1965_v62, %v1968_v0  ;;  %v5322_v30 = vsel %vm5315_vm10, %v5318_v12, %v5321_v58  ;;  %v2266_v13 = vsel %vm12877_vm9, %v2265_v10, %v12876_v7  ;;  %v2276_v36 = vxor.u32 2147483648, %v10570_v24  ;;  %v12887_v7 = vld [vmem:[#allocation82_spill] sm:$0xff] }
 0x537   : > { %7531 = vst.msk [vmem:[%s8951_s17 + $0x68] sm:$0xff] %vm7517_vm3, %v7498_v19  ;;  %v1970_v23 = vsel %vm1959_vm0, nan, %v1969_v29  ;;  %v5323_v15 = vsel %vm1959_vm0, nan, %v5322_v30  ;;  %vm12878_vm15 = vnez %v12676_v26  ;;  %v2161_v55 = vsub.s32 4, %v12879_v2 }
 0x538   : > { %v2268_v42 = vsel %vm12878_vm15, 0, %v2266_v13  ;;  %v3965_v38 = vmul.f32 %v11483_v44, %v1970_v23  ;;  %v7299_v25 = vmul.f32 %v11493_v43, %v5323_v15  ;;  %v2279_v63 = vxor.u32 2147483648, %v12880_v20  ;;  %v12888_v13 = vld [vmem:[#allocation69_spill] sm:$0xff] }
 0x539   : > { %v2272_v28 = vadd.s32 3, %v2268_v42  ;;  %v5623_v50 = vand.u32 3, %v2268_v42  ;;  %vm12882_vm12 = vcmp.lt.s32.totalorder %v12881_v41, 0  ;;  %v2172_v49 = vxor.u32 2147483648, %v12883_v40 }
 0x53a   : > { %v2162_v9 = vsel %vm12882_vm12, %v2161_v55, %v12879_v2  ;;  %v2175_v26 = vxor.u32 2147483648, %v12884_v8  ;;  %v7331_v6 = vadd.f32 %v7299_v25, %v3965_v38  ;;  %vm12886_vm10 = vnez %v12885_v34  ;;  %v12890_v55 = vld [vmem:[#allocation96_spill] sm:$0xff]  ;;  %v7417_v25 = vpop.permute.xlu1 %7416  ;;  %v12892_v34 = vld [vmem:[#allocation106_spill] sm:$0xff] }
 0x53b   : > { %v2273_v22 = vand.u32 3, %v2272_v28  ;;  %vm5624_vm4 = vcmp.lt.s32.totalorder %v5623_v50, 2  ;;  %vm5625_vm14 = vcmp.eq.s32.totalorder %v5623_v50, 0  ;;  %vm5628_vm0 = vcmp.eq.s32.totalorder %v5623_v50, 2 }
 0x53c   : > { %v5627_v18 = vsel %vm5625_vm14, %v12880_v20, %v2276_v36  ;;  %v2164_v53 = vsel %vm12886_vm10, 0, %v2162_v9  ;;  %v2473_v10 = vsub.s32 4, %v12887_v7  ;;  %v7497_v27 = vmul.f32 %v7405_v47, %v7331_v6 }
 0x53d   : > { %vm2274_vm6 = vcmp.lt.s32.totalorder %v2273_v22, 2  ;;  %vm2275_vm1 = vcmp.eq.s32.totalorder %v2273_v22, 0  ;;  %vm2278_vm7 = vcmp.eq.s32.totalorder %v2273_v22, 2  ;;  %v5630_v62 = vsel %vm5628_vm0, %v2279_v63, %v10570_v24 }
 0x53e   : > { %v2277_v12 = vsel %vm2275_vm1, %v12880_v20, %v2276_v36  ;;  %v2280_v19 = vsel %vm2278_vm7, %v2279_v63, %v10570_v24  ;;  %v2168_v0 = vadd.s32 3, %v2164_v53  ;;  %7530 = vst.msk [vmem:[%s8951_s17 + $0x60] sm:$0xff] %vm7517_vm3, %v7497_v27  ;;  %v5631_v29 = vsel %vm5624_vm4, %v5627_v18, %v5630_v62  ;;  %v7413_v62 = vpop.permute.xlu0 %7412 }
 0x53f   : > { %v2281_v58 = vsel %vm2274_vm6, %v2277_v12, %v2280_v19  ;;  %v5520_v30 = vand.u32 3, %v2164_v53  ;;  %vm12889_vm8 = vcmp.lt.s32.totalorder %v12888_v13, 0  ;;  %v5632_v36 = vsel %vm2271_vm2, nan, %v5631_v29  ;;  %v12894_v12 = vld [vmem:[#allocation77_spill] sm:$0xff] }
 0x540   : > { %v2474_v23 = vsel %vm12889_vm8, %v2473_v10, %v12887_v7  ;;  %v2282_v15 = vsel %vm2271_vm2, nan, %v2281_v58  ;;  %vm2167_vm5 = vweird.f32 %v12881_v41  ;;  %v2169_v24 = vand.u32 3, %v2168_v0  ;;  %v12893_v10 = vld [vmem:[#allocation102_spill] sm:$0xff] }
 0x541   : > { %v3968_v42 = vmul.f32 %v11483_v44, %v2282_v15  ;;  %v7302_v2 = vmul.f32 %v11493_v43, %v5632_v36  ;;  %vm5522_vm9 = vcmp.eq.s32.totalorder %v5520_v30, 0  ;;  %vm12891_vm15 = vnez %v12890_v55 }
 0x542   : > { %v2476_v38 = vsel %vm12891_vm15, 0, %v2474_v23  ;;  %vm2170_vm12 = vcmp.lt.s32.totalorder %v2169_v24, 2  ;;  %vm2171_vm4 = vcmp.eq.s32.totalorder %v2169_v24, 0  ;;  %vm2174_vm14 = vcmp.eq.s32.totalorder %v2169_v24, 2 }
 0x543   : > { %v5524_v28 = vsel %vm5522_vm9, %v12884_v8, %v2172_v49  ;;  %v7334_v50 = vadd.f32 %v7302_v2, %v3968_v42  ;;  %v2173_v14 = vsel %vm2171_vm4, %v12884_v8, %v2172_v49  ;;  %v2176_v47 = vsel %vm2174_vm14, %v2175_v26, %v12883_v40 }
 0x544   : > { %vm5525_vm2 = vcmp.eq.s32.totalorder %v5520_v30, 2  ;;  %v2177_v20 = vsel %vm2170_vm12, %v2173_v14, %v2176_v47  ;;  %vm5521_vm0 = vcmp.lt.s32.totalorder %v5520_v30, 2  ;;  %v2480_v9 = vadd.s32 3, %v2476_v38  ;;  %v12903_v47 = vld [vmem:[#allocation100_spill] sm:$0xff] }
 0x545   : > { %v5527_v63 = vsel %vm5525_vm2, %v2175_v26, %v12883_v40  ;;  %v7500_v6 = vmul.f32 %v7417_v25, %v7334_v50  ;;  %v2178_v22 = vsel %vm2167_vm5, nan, %v2177_v20  ;;  %v2484_v53 = vxor.u32 2147483648, %v12892_v34  ;;  %v12901_v50 = vld [vmem:[#allocation94_spill] sm:$0xff] }
 0x546   : > { %v5528_v18 = vsel %vm5521_vm0, %v5524_v28, %v5527_v63  ;;  %v3967_v7 = vmul.f32 %v11483_v44, %v2178_v22  ;;  %v2481_v8 = vand.u32 3, %v2480_v9  ;;  %v2487_v27 = vxor.u32 2147483648, %v12893_v10  ;;  %v12895_v44 = vld [vmem:[#allocation101_spill] sm:$0xff]  ;;  %v12904_v22 = vld [vmem:[#allocation90_spill] sm:$0xff] }
 0x547   : > { %v5529_v49 = vsel %vm2167_vm5, nan, %v5528_v18  ;;  %7533 = vst.msk [vmem:[%s8951_s17 + $0x78] sm:$0xff] %vm7517_vm3, %v7500_v6  ;;  %vm2479_vm10 = vweird.f32 %v12888_v13  ;;  %v5829_v26 = vand.u32 3, %v2476_v38  ;;  %v2369_v19 = vsub.s32 4, %v12894_v12  ;;  %v11904_v38 = vld [vmem:[#allocation9] ss:$0 sm:$0xff] }
 0x548   : > { %v7301_v40 = vmul.f32 %v11493_v43, %v5529_v49  ;;  %vm2482_vm6 = vcmp.lt.s32.totalorder %v2481_v8, 2  ;;  %vm2483_vm1 = vcmp.eq.s32.totalorder %v2481_v8, 0  ;;  %vm2486_vm7 = vcmp.eq.s32.totalorder %v2481_v8, 2  ;;  %v12896_v43 = vld [vmem:[#allocation62_spill] sm:$0xff]  ;;  %v12905_v49 = vld [vmem:[#allocation115_spill] sm:$0xff] }
 0x549   : > { %v2380_v0 = vxor.u32 2147483648, %v12895_v44  ;;  %v2485_v58 = vsel %vm2483_vm1, %v12893_v10, %v2484_v53  ;;  %v2488_v29 = vsel %vm2486_vm7, %v2487_v27, %v12892_v34  ;;  %vm5830_vm8 = vcmp.lt.s32.totalorder %v5829_v26, 2 }
 0x54a   : > { %v7333_v41 = vadd.f32 %v7301_v40, %v3967_v7  ;;  %v2489_v30 = vsel %vm2482_vm6, %v2485_v58, %v2488_v29  ;;  %vm5831_vm5 = vcmp.eq.s32.totalorder %v5829_v26, 0  ;;  %vm5834_vm9 = vcmp.eq.s32.totalorder %v5829_v26, 2 }
 0x54b   : > { %vm12897_vm15 = vcmp.lt.s32.totalorder %v12896_v43, 0  ;;  %v12898_v15 = vand.u32 2147483647, %v11308_v56  ;;  %v2490_v42 = vsel %vm2479_vm10, nan, %v2489_v30  ;;  %v5833_v2 = vsel %vm5831_vm5, %v12893_v10, %v2484_v53  ;;  %v7428_v10 = vpop.permute.xlu1 %7427 }
 0x54c   : > { %v2370_v23 = vsel %vm12897_vm15, %v2369_v19, %v12894_v12  ;;  %v7499_v24 = vmul.f32 %v7413_v62, %v7333_v41  ;;  %v5836_v55 = vsel %vm5834_vm9, %v2487_v27, %v12892_v34  ;;  %v3970_v25 = vmul.f32 %v11904_v38, %v2490_v42  ;;  %v11915_v34 = vld [vmem:[#allocation11] ss:$0 sm:$0xff]  ;;  %v12906_v12 = vld [vmem:[#allocation80_spill] sm:$0xff] }
 0x54d   : > { %vm11896_vm12 = vcmp.le.f32.partialorder %v12898_v15, 0.7853982  ;;  %v5837_v28 = vsel %vm5830_vm8, %v5833_v2, %v5836_v55  ;;  %vm12902_vm4 = vnez %v12901_v50  ;;  %v2383_v20 = vxor.u32 2147483648, %v12903_v47  ;;  %v12910_v2 = vld [vmem:[#allocation88_spill] sm:$0xff] }
 0x54e   : > { %v2372_v14 = vsel %vm12902_vm4, 0, %v2370_v23  ;;  %7532 = vst.msk [vmem:[%s8951_s17 + $0x70] sm:$0xff] %vm7517_vm3, %v7499_v24  ;;  %v5838_v63 = vsel %vm2479_vm10, nan, %v5837_v28  ;;  %v2681_v18 = vsub.s32 4, %v12904_v22  ;;  %vm2375_vm14 = vweird.f32 %v12896_v43  ;;  %v12908_v24 = vld [vmem:[#allocation103_spill] sm:$0xff] }
 0x54f   : > { %v2376_v9 = vadd.s32 3, %v2372_v14  ;;  %v5726_v6 = vand.u32 3, %v2372_v14  ;;  %v7304_v53 = vmul.f32 %v11915_v34, %v5838_v63  ;;  %v2692_v7 = vxor.u32 2147483648, %v10927_v21  ;;  %v12911_v14 = vld [vmem:[#allocation76_spill] sm:$0xff] }
 0x550   : > { %v2695_v8 = vxor.u32 2147483648, %v12905_v49  ;;  %vm12907_vm10 = vcmp.lt.s32.totalorder %v12906_v12, 0  ;;  %vm12909_vm5 = vnez %v12908_v24  ;;  %v2577_v55 = vsub.s32 4, %v12910_v2 }
 0x551   : > { %v2377_v27 = vand.u32 3, %v2376_v9  ;;  %vm5727_vm2 = vcmp.lt.s32.totalorder %v5726_v6, 2  ;;  %vm5728_vm0 = vcmp.eq.s32.totalorder %v5726_v6, 0  ;;  %vm5731_vm6 = vcmp.eq.s32.totalorder %v5726_v6, 2  ;;  %v7424_v9 = vpop.permute.xlu0 %7423 }
 0x552   : > { %v7336_v13 = vadd.f32 %v7304_v53, %v3970_v25  ;;  %v5730_v40 = vsel %vm5728_vm0, %v12903_v47, %v2380_v0  ;;  %v5733_v26 = vsel %vm5731_vm6, %v2383_v20, %v12895_v44  ;;  %v2682_v19 = vsel %vm12907_vm10, %v2681_v18, %v12904_v22  ;;  %v12914_v18 = vld [vmem:[#allocation98_spill] sm:$0xff] }
 0x553   : > { %vm2378_vm1 = vcmp.lt.s32.totalorder %v2377_v27, 2  ;;  %vm2379_vm7 = vcmp.eq.s32.totalorder %v2377_v27, 0  ;;  %vm2382_vm8 = vcmp.eq.s32.totalorder %v2377_v27, 2  ;;  %v5734_v62 = vsel %vm5727_vm2, %v5730_v40, %v5733_v26 }
 0x554   : > { %v7502_v41 = vmul.f32 %v7428_v10, %v7336_v13  ;;  %v2381_v58 = vsel %vm2379_vm7, %v12903_v47, %v2380_v0  ;;  %v2384_v29 = vsel %vm2382_vm8, %v2383_v20, %v12895_v44  ;;  %v5735_v30 = vsel %vm2375_vm14, nan, %v5734_v62  ;;  %v12913_v20 = vld [vmem:[#allocation108_spill] sm:$0xff] }
 0x555   : > { %v2385_v23 = vsel %vm2378_vm1, %v2381_v58, %v2384_v29  ;;  %v7303_v15 = vmul.f32 %v11915_v34, %v5735_v30  ;;  %v2684_v42 = vsel %vm12909_vm5, 0, %v2682_v19  ;;  %v11938_v25 = vsel %vm11896_vm12, %v11308_v56, %v11820_v3  ;;  %v12916_v30 = vld [vmem:[#allocation107_spill] sm:$0xff] }
 0x556   : > { %7535 = vst.msk [vmem:[%s8951_s17 + $0x88] sm:$0xff] %vm7517_vm3, %v7502_v41  ;;  %v2386_v44 = vsel %vm2375_vm14, nan, %v2385_v23  ;;  %v2688_v0 = vadd.s32 3, %v2684_v42  ;;  %v6035_v28 = vand.u32 3, %v2684_v42  ;;  %vm2687_vm9 = vweird.f32 %v12906_v12  ;;  %v7436_v42 = vpop.permute.xlu1 %7435 }
 0x557   : > { %v3969_v50 = vmul.f32 %v11904_v38, %v2386_v44  ;;  %vm12912_vm15 = vcmp.lt.s32.totalorder %v12911_v14, 0  ;;  %v2588_v63 = vxor.u32 2147483648, %v12913_v20  ;;  %vm12915_vm14 = vnez %v12914_v18  ;;  %v12921_v44 = vld [vmem:[#allocation119_spill] sm:$0xff] }
 0x558   : > { %v2578_v47 = vsel %vm12912_vm15, %v2577_v55, %v12910_v2  ;;  %v2689_v3 = vand.u32 3, %v2688_v0  ;;  %vm6036_vm4 = vcmp.lt.s32.totalorder %v6035_v28, 2  ;;  %vm6037_vm2 = vcmp.eq.s32.totalorder %v6035_v28, 0  ;;  %v12919_v55 = vld [vmem:[#allocation89_spill] sm:$0xff] }
 0x559   : > { %vm6040_vm0 = vcmp.eq.s32.totalorder %v6035_v28, 2  ;;  %v7335_v6 = vadd.f32 %v7303_v15, %v3969_v50  ;;  %v6039_v43 = vsel %vm6037_vm2, %v12905_v49, %v2692_v7  ;;  %v2580_v53 = vsel %vm12915_vm14, 0, %v2578_v47  ;;  %v12917_v15 = vld [vmem:[#allocation99_spill] sm:$0xff] }
 0x55a   : > { %v6042_v22 = vsel %vm6040_vm0, %v2695_v8, %v10927_v21  ;;  %vm2690_vm6 = vcmp.lt.s32.totalorder %v2689_v3, 2  ;;  %vm2691_vm10 = vcmp.eq.s32.totalorder %v2689_v3, 0  ;;  %vm2694_vm1 = vcmp.eq.s32.totalorder %v2689_v3, 2  ;;  %v12922_v3 = vld [vmem:[#allocation112_spill] sm:$0xff] }
 0x55b   : > { %v6043_v10 = vsel %vm6036_vm4, %v6039_v43, %v6042_v22  ;;  %vm2583_vm7 = vweird.f32 %v12911_v14  ;;  %v7501_v27 = vmul.f32 %v7424_v9, %v7335_v6  ;;  %v2693_v13 = vsel %vm2691_vm10, %v12905_v49, %v2692_v7  ;;  %v12918_v7 = vld [vmem:[#allocation120_spill] sm:$0xff] }
 0x55c   : > { %v2696_v40 = vsel %vm2694_vm1, %v2695_v8, %v10927_v21  ;;  %v6044_v26 = vsel %vm2687_vm9, nan, %v6043_v10  ;;  %v2584_v41 = vadd.s32 3, %v2580_v53  ;;  %v5932_v58 = vand.u32 3, %v2580_v53 }
 0x55d   : > { %v2697_v19 = vsel %vm2690_vm6, %v2693_v13, %v2696_v40  ;;  %v7306_v62 = vmul.f32 %v11915_v34, %v6044_v26  ;;  %7534 = vst.msk [vmem:[%s8951_s17 + $0x80] sm:$0xff] %vm7517_vm3, %v7501_v27  ;;  %v2591_v23 = vxor.u32 2147483648, %v12916_v30  ;;  %v2889_v24 = vsub.s32 4, %v12917_v15 }
 0x55e   : > { %v2698_v29 = vsel %vm2687_vm9, nan, %v2697_v19  ;;  %v2900_v49 = vxor.u32 2147483648, %v12918_v7  ;;  %v2585_v8 = vand.u32 3, %v2584_v41  ;;  %vm5933_vm8 = vcmp.lt.s32.totalorder %v5932_v58, 2  ;;  %v12925_v41 = vld [vmem:[#allocation86_spill] sm:$0xff] }
 0x55f   : > { %v3972_v21 = vmul.f32 %v11904_v38, %v2698_v29  ;;  %vm5934_vm5 = vcmp.eq.s32.totalorder %v5932_v58, 0  ;;  %vm5937_vm15 = vcmp.eq.s32.totalorder %v5932_v58, 2  ;;  %vm12920_vm4 = vcmp.lt.s32.totalorder %v12919_v55, 0 }
 0x560   : > { %v5936_v2 = vsel %vm5934_vm5, %v12916_v30, %v2588_v63  ;;  %v2890_v12 = vsel %vm12920_vm4, %v2889_v24, %v12917_v15  ;;  %v2903_v0 = vxor.u32 2147483648, %v12921_v44  ;;  %vm2586_vm9 = vcmp.lt.s32.totalorder %v2585_v8, 2 }
 0x561   : > { %v7338_v28 = vadd.f32 %v7306_v62, %v3972_v21  ;;  %vm2587_vm2 = vcmp.eq.s32.totalorder %v2585_v8, 0  ;;  %vm2590_vm0 = vcmp.eq.s32.totalorder %v2585_v8, 2  ;;  %v5939_v9 = vsel %vm5937_vm15, %v2591_v23, %v12913_v20  ;;  %v7432_v62 = vpop.permute.xlu0 %7431 }
 0x562   : > { %v2589_v50 = vsel %vm2587_vm2, %v12916_v30, %v2588_v63  ;;  %v2592_v47 = vsel %vm2590_vm0, %v2591_v23, %v12913_v20  ;;  %vm12923_vm14 = vnez %v12922_v3  ;;  %v5940_v18 = vsel %vm5933_vm8, %v5936_v2, %v5939_v9  ;;  %v12924_v63 = vld [vmem:[#allocation97_spill] sm:$0xff] }
 0x563   : > { %v2892_v6 = vsel %vm12923_vm14, 0, %v2890_v12  ;;  %v7504_v43 = vmul.f32 %v7436_v42, %v7338_v28  ;;  %v2593_v22 = vsel %vm2586_vm9, %v2589_v50, %v2592_v47  ;;  %v5941_v27 = vsel %vm2583_vm7, nan, %v5940_v18  ;;  %v12927_v42 = vld [vmem:[#allocation109_spill] sm:$0xff]  ;;  %v12929_v47 = vld [vmem:[#allocation118_spill] sm:$0xff] }
 0x564   : > { %v2896_v53 = vadd.s32 3, %v2892_v6  ;;  %v2594_v10 = vsel %vm2583_vm7, nan, %v2593_v22  ;;  %v6241_v13 = vand.u32 3, %v2892_v6  ;;  %v2785_v40 = vsub.s32 4, %v12924_v63  ;;  %v7444_v6 = vpop.permute.xlu1 %7443 }
 0x565   : > { %7537 = vst.msk [vmem:[%s8951_s17 + $0x98] sm:$0xff] %vm7517_vm3, %v7504_v43  ;;  %v3971_v20 = vmul.f32 %v11904_v38, %v2594_v10  ;;  %v7305_v26 = vmul.f32 %v11915_v34, %v5941_v27  ;;  %vm2895_vm6 = vweird.f32 %v12919_v55  ;;  %vm12926_vm5 = vcmp.lt.s32.totalorder %v12925_v41, 0  ;;  %v12931_v55 = vld [vmem:[#allocation111_spill] sm:$0xff] }
 0x566   : > { %v2897_v19 = vand.u32 3, %v2896_v53  ;;  %vm6242_vm10 = vcmp.lt.s32.totalorder %v6241_v13, 2  ;;  %vm6243_vm1 = vcmp.eq.s32.totalorder %v6241_v13, 0  ;;  %vm6246_vm8 = vcmp.eq.s32.totalorder %v6241_v13, 2 }
 0x567   : > { %v2786_v14 = vsel %vm12926_vm5, %v2785_v40, %v12924_v63  ;;  %v7337_v58 = vadd.f32 %v7305_v26, %v3971_v20  ;;  %v6245_v23 = vsel %vm6243_vm1, %v12921_v44, %v2900_v49  ;;  %v6248_v15 = vsel %vm6246_vm8, %v2903_v0, %v12918_v7 }
 0x568   : > { %vm2898_vm7 = vcmp.lt.s32.totalorder %v2897_v19, 2  ;;  %vm2899_vm15 = vcmp.eq.s32.totalorder %v2897_v19, 0  ;;  %vm2902_vm4 = vcmp.eq.s32.totalorder %v2897_v19, 2  ;;  %v6249_v8 = vsel %vm6242_vm10, %v6245_v23, %v6248_v15 }
 0x569   : > { %v2901_v29 = vsel %vm2899_vm15, %v12921_v44, %v2900_v49  ;;  %v2904_v30 = vsel %vm2902_vm4, %v2903_v0, %v12918_v7  ;;  %v7503_v24 = vmul.f32 %v7432_v62, %v7337_v58  ;;  %vm12928_vm9 = vnez %v12927_v42  ;;  %v12930_v44 = vld [vmem:[#allocation117_spill] sm:$0xff]  ;;  %v12935_v42 = vld [vmem:[#allocation126_spill] sm:$0xff] }
 0x56a   : > { %v2905_v21 = vsel %vm2898_vm7, %v2901_v29, %v2904_v30  ;;  %v2788_v2 = vsel %vm12928_vm9, 0, %v2786_v14  ;;  %v6250_v28 = vsel %vm2895_vm6, nan, %v6249_v8  ;;  %v2796_v9 = vxor.u32 2147483648, %v12929_v47  ;;  %v12934_v29 = vld [vmem:[#allocation105_spill] sm:$0xff]  ;;  %v7440_v8 = vpop.permute.xlu0 %7439 }
 0x56b   : > { %v2906_v12 = vsel %vm2895_vm6, nan, %v2905_v21  ;;  %v2792_v50 = vadd.s32 3, %v2788_v2  ;;  %7536 = vst.msk [vmem:[%s8951_s17 + $0x90] sm:$0xff] %vm7517_vm3, %v7503_v24  ;;  %v7308_v7 = vmul.f32 %v11915_v34, %v6250_v28  ;;  %v2799_v0 = vxor.u32 2147483648, %v12930_v44 }
 0x56c   : > { %v3974_v49 = vmul.f32 %v11904_v38, %v2906_v12  ;;  %v6138_v3 = vand.u32 3, %v2788_v2  ;;  %8434 = vcosq.f32 %v11938_v25  ;;  %vm2791_vm2 = vweird.f32 %v12925_v41  ;;  %v12936_v12 = vld [vmem:[#allocation91_spill] sm:$0xff]  ;;  %v12938_v41 = vld [vmem:[#allocation125_spill] sm:$0xff] }
 0x56d   : > { %v2793_v43 = vand.u32 3, %v2792_v50  ;;  %v3097_v22 = vsub.s32 4, %v12931_v55  ;;  %vm12932_vm5 = vcmp.lt.s32.totalorder %v10693_v1, 0  ;;  %vm3103_vm7 = vweird.f32 %v10693_v1 }
 0x56e   : > { %v7340_v18 = vadd.f32 %v7308_v7, %v3974_v49  ;;  %vm6139_vm0 = vcmp.lt.s32.totalorder %v6138_v3, 2  ;;  %vm6140_vm14 = vcmp.eq.s32.totalorder %v6138_v3, 0  ;;  %vm6143_vm6 = vcmp.eq.s32.totalorder %v6138_v3, 2  ;;  %v12942_v3 = vld [vmem:[#allocation122_spill] sm:$0xff] }
 0x56f   : > { %vm2794_vm10 = vcmp.lt.s32.totalorder %v2793_v43, 2  ;;  %vm2795_vm1 = vcmp.eq.s32.totalorder %v2793_v43, 0  ;;  %vm2798_vm8 = vcmp.eq.s32.totalorder %v2793_v43, 2  ;;  %v6142_v53 = vsel %vm6140_vm14, %v12930_v44, %v2796_v9 }
 0x570   : > { %v7506_v10 = vmul.f32 %v7444_v6, %v7340_v18  ;;  %v2797_v27 = vsel %vm2795_vm1, %v12930_v44, %v2796_v9  ;;  %v2800_v13 = vsel %vm2798_vm8, %v2799_v0, %v12929_v47  ;;  %v6145_v63 = vsel %vm6143_vm6, %v2799_v0, %v12929_v47  ;;  %v12939_v47 = vld [vmem:[#allocation123_spill] sm:$0xff]  ;;  %v12940_v44 = vld [vmem:[#allocation113_spill] sm:$0xff] }
 0x571   : > { %v2801_v40 = vsel %vm2794_vm10, %v2797_v27, %v2800_v13  ;;  %v6146_v20 = vsel %vm6139_vm0, %v6142_v53, %v6145_v63  ;;  %v3098_v26 = vsel %vm12932_vm5, %v3097_v22, %v12931_v55  ;;  %v3108_v19 = vxor.u32 2147483648, %v11180_v39 }
 0x572   : > { %7539 = vst.msk [vmem:[%s8951_s17 + $0xa8] sm:$0xff] %vm7517_vm3, %v7506_v10  ;;  %v2802_v62 = vsel %vm2791_vm2, nan, %v2801_v40  ;;  %v6147_v14 = vsel %vm2791_vm2, nan, %v6146_v20  ;;  %vm12933_vm15 = vnez %v12741_v5  ;;  %v2993_v30 = vsub.s32 4, %v12934_v29 }
 0x573   : > { %v3100_v58 = vsel %vm12933_vm15, 0, %v3098_v26  ;;  %v3973_v23 = vmul.f32 %v11904_v38, %v2802_v62  ;;  %v7307_v15 = vmul.f32 %v11915_v34, %v6147_v14  ;;  %v3111_v2 = vxor.u32 2147483648, %v12935_v42  ;;  %v12944_v14 = vld [vmem:[#allocation127_spill] sm:$0xff] }
 0x574   : > { %v3104_v24 = vadd.s32 3, %v3100_v58  ;;  %v6447_v21 = vand.u32 3, %v3100_v58  ;;  %vm12937_vm4 = vcmp.lt.s32.totalorder %v12936_v12, 0  ;;  %v3004_v50 = vxor.u32 2147483648, %v12938_v41 }
 0x575   : > { %v2994_v28 = vsel %vm12937_vm4, %v2993_v30, %v12934_v29  ;;  %v3007_v5 = vxor.u32 2147483648, %v12939_v47  ;;  %v7339_v9 = vadd.f32 %v7307_v15, %v3973_v23  ;;  %vm12941_vm14 = vnez %v12940_v44  ;;  %v7452_v29 = vpop.permute.xlu1 %7451  ;;  %v12947_v44 = vld [vmem:[#allocation132_spill] sm:$0xff] }
 0x576   : > { %v3105_v49 = vand.u32 3, %v3104_v24  ;;  %vm6448_vm9 = vcmp.lt.s32.totalorder %v6447_v21, 2  ;;  %vm6449_vm2 = vcmp.eq.s32.totalorder %v6447_v21, 0  ;;  %vm6452_vm0 = vcmp.eq.s32.totalorder %v6447_v21, 2  ;;  %v12041_v43 = vpop.eup %8434 }
 0x577   : > { %v6451_v7 = vsel %vm6449_vm2, %v12935_v42, %v3108_v19  ;;  %v2996_v0 = vsel %vm12941_vm14, 0, %v2994_v28  ;;  %v3305_v6 = vsub.s32 4, %v12942_v3  ;;  %v7505_v55 = vmul.f32 %v7440_v8, %v7339_v9  ;;  %v12946_v9 = vld [vmem:[#allocation134_spill] sm:$0xff] }
 0x578   : > { %vm3106_vm6 = vcmp.lt.s32.totalorder %v3105_v49, 2  ;;  %vm3107_vm10 = vcmp.eq.s32.totalorder %v3105_v49, 0  ;;  %vm3110_vm1 = vcmp.eq.s32.totalorder %v3105_v49, 2  ;;  %v6454_v53 = vsel %vm6452_vm0, %v3111_v2, %v11180_v39 }
 0x579   : > { %v3109_v22 = vsel %vm3107_vm10, %v12935_v42, %v3108_v19  ;;  %v3112_v18 = vsel %vm3110_vm1, %v3111_v2, %v11180_v39  ;;  %v3000_v10 = vadd.s32 3, %v2996_v0  ;;  %7538 = vst.msk [vmem:[%s8951_s17 + $0xa0] sm:$0xff] %vm7517_vm3, %v7505_v55  ;;  %v6455_v13 = vsel %vm6448_vm9, %v6451_v7, %v6454_v53  ;;  %v7448_v55 = vpop.permute.xlu0 %7447 }
 0x57a   : > { %v3113_v27 = vsel %vm3106_vm6, %v3109_v22, %v3112_v18  ;;  %v6344_v63 = vand.u32 3, %v2996_v0  ;;  %vm12943_vm8 = vcmp.lt.s32.totalorder %v10777_v54, 0  ;;  %v6456_v26 = vsel %vm3103_vm7, nan, %v6455_v13  ;;  %v12949_v22 = vld [vmem:[#allocation130_spill] sm:$0xff]  ;;  %v12950_v13 = vld [vmem:[#allocation104_spill] sm:$0xff] }
 0x57b   : > { %v3306_v40 = vsel %vm12943_vm8, %v3305_v6, %v12942_v3  ;;  %v3114_v20 = vsel %vm3103_vm7, nan, %v3113_v27  ;;  %vm2999_vm5 = vweird.f32 %v12936_v12  ;;  %v3001_v39 = vand.u32 3, %v3000_v10  ;;  %v12948_v3 = vld [vmem:[#allocation116_spill] sm:$0xff] }
 0x57c   : > { %v3976_v19 = vmul.f32 %v11904_v38, %v3114_v20  ;;  %v7310_v62 = vmul.f32 %v11915_v34, %v6456_v26  ;;  %vm6346_vm15 = vcmp.eq.s32.totalorder %v6344_v63, 0  ;;  %vm12945_vm4 = vnez %v12944_v14  ;;  %v12952_v14 = vld [vmem:[#allocation121_spill] sm:$0xff] }
 0x57d   : > { %v3308_v58 = vsel %vm12945_vm4, 0, %v3306_v40  ;;  %vm3002_vm9 = vcmp.lt.s32.totalorder %v3001_v39, 2  ;;  %vm3003_vm2 = vcmp.eq.s32.totalorder %v3001_v39, 0  ;;  %vm3006_vm0 = vcmp.eq.s32.totalorder %v3001_v39, 2 }
 0x57e   : > { %v6348_v30 = vsel %vm6346_vm15, %v12939_v47, %v3004_v50  ;;  %v7342_v23 = vadd.f32 %v7310_v62, %v3976_v19  ;;  %v3005_v1 = vsel %vm3003_vm2, %v12939_v47, %v3004_v50  ;;  %v3008_v15 = vsel %vm3006_vm0, %v3007_v5, %v12938_v41 }
 0x57f   : > { %vm6349_vm7 = vcmp.eq.s32.totalorder %v6344_v63, 2  ;;  %v3009_v24 = vsel %vm3002_vm9, %v3005_v1, %v3008_v15  ;;  %vm6345_vm14 = vcmp.lt.s32.totalorder %v6344_v63, 2  ;;  %v3312_v8 = vadd.s32 3, %v3308_v58 }
 0x580   : > { %v6351_v21 = vsel %vm6349_vm7, %v3007_v5, %v12938_v41  ;;  %v7508_v42 = vmul.f32 %v7452_v29, %v7342_v23  ;;  %v3010_v2 = vsel %vm2999_vm5, nan, %v3009_v24  ;;  %v3316_v49 = vxor.u32 2147483648, %v12946_v9  ;;  %v12954_v29 = vld [vmem:[#allocation129_spill] sm:$0xff]  ;;  %v12955_v24 = vld [vmem:[#allocation128_spill] sm:$0xff] }
 0x581   : > { %v6352_v28 = vsel %vm6345_vm14, %v6348_v30, %v6351_v21  ;;  %v3975_v7 = vmul.f32 %v11904_v38, %v3010_v2  ;;  %v3313_v47 = vand.u32 3, %v3312_v8  ;;  %v3319_v0 = vxor.u32 2147483648, %v12947_v44 }
 0x582   : > { %v6353_v50 = vsel %vm2999_vm5, nan, %v6352_v28  ;;  %7541 = vst.msk [vmem:[%s8951_s17 + $0xb8] sm:$0xff] %vm7517_vm3, %v7508_v42  ;;  %vm3311_vm6 = vweird.f32 %v10777_v54  ;;  %v6653_v5 = vand.u32 3, %v3308_v58  ;;  %v3201_v6 = vsub.s32 4, %v12948_v3  ;;  %v7460_v28 = vpop.permute.xlu1 %7459 }
 0x583   : > { %v7309_v41 = vmul.f32 %v11915_v34, %v6353_v50  ;;  %vm3314_vm10 = vcmp.lt.s32.totalorder %v3313_v47, 2  ;;  %vm3315_vm1 = vcmp.eq.s32.totalorder %v3313_v47, 0  ;;  %vm3318_vm8 = vcmp.eq.s32.totalorder %v3313_v47, 2  ;;  %v12956_v50 = vld [vmem:[#allocation114_spill] sm:$0xff] }
 0x584   : > { %v3212_v18 = vxor.u32 2147483648, %v12949_v22  ;;  %v3317_v53 = vsel %vm3315_vm1, %v12947_v44, %v3316_v49  ;;  %v3320_v10 = vsel %vm3318_vm8, %v3319_v0, %v12946_v9  ;;  %vm6654_vm5 = vcmp.lt.s32.totalorder %v6653_v5, 2 }
 0x585   : > { %v7341_v12 = vadd.f32 %v7309_v41, %v3975_v7  ;;  %v3321_v27 = vsel %vm3314_vm10, %v3317_v53, %v3320_v10  ;;  %vm6655_vm15 = vcmp.eq.s32.totalorder %v6653_v5, 0  ;;  %vm6658_vm4 = vcmp.eq.s32.totalorder %v6653_v5, 2  ;;  %v12960_v10 = vld [vmem:[#allocation124_spill] sm:$0xff] }
 0x586   : > { %vm12951_vm9 = vcmp.lt.s32.totalorder %v12950_v13, 0  ;;  %v3322_v20 = vsel %vm3311_vm6, nan, %v3321_v27  ;;  %v6657_v26 = vsel %vm6655_vm15, %v12947_v44, %v3316_v49  ;;  %v6660_v39 = vsel %vm6658_vm4, %v3319_v0, %v12946_v9 }
 0x587   : > { %v3202_v63 = vsel %vm12951_vm9, %v3201_v6, %v12948_v3  ;;  %v7507_v40 = vmul.f32 %v7448_v55, %v7341_v12  ;;  %v3978_v19 = vmul.f32 %v11904_v38, %v3322_v20  ;;  %v6661_v62 = vsel %vm6654_vm5, %v6657_v26, %v6660_v39  ;;  %v12958_v12 = vld [vmem:[#allocation136_spill] sm:$0xff]  ;;  %v12961_v20 = vld [vmem:[#allocation110_spill] sm:$0xff] }
 0x588   : > { %vm12953_vm2 = vnez %v12952_v14  ;;  %v3215_v30 = vxor.u32 2147483648, %v12954_v29  ;;  %v6662_v23 = vsel %vm3311_vm6, nan, %v6661_v62  ;;  %v3513_v21 = vsub.s32 4, %v12955_v24 }
 0x589   : > { %v3204_v58 = vsel %vm12953_vm2, 0, %v3202_v63  ;;  %7540 = vst.msk [vmem:[%s8951_s17 + $0xb0] sm:$0xff] %vm7517_vm3, %v7507_v40  ;;  %v7312_v8 = vmul.f32 %v11915_v34, %v6662_v23  ;;  %vm3207_vm0 = vweird.f32 %v12950_v13  ;;  %v3524_v42 = vxor.u32 2147483648, %v11433_v57 }
 0x58a   : > { %v3208_v1 = vadd.s32 3, %v3204_v58  ;;  %v6550_v15 = vand.u32 3, %v3204_v58  ;;  %v3527_v2 = vxor.u32 2147483648, %v11427_v52  ;;  %vm12957_vm6 = vcmp.lt.s32.totalorder %v12956_v50, 0  ;;  %v12963_v58 = vld [vmem:[#allocation131_spill] sm:$0xff] }
 0x58b   : > { %v7344_v49 = vadd.f32 %v7312_v8, %v3978_v19  ;;  %v3514_v47 = vsel %vm12957_vm6, %v3513_v21, %v12955_v24  ;;  %vm12959_vm15 = vnez %v12958_v12  ;;  %v3409_v27 = vsub.s32 4, %v12960_v10  ;;  %v7456_v19 = vpop.permute.xlu0 %7455 }
 0x58c   : > { %v3209_v9 = vand.u32 3, %v3208_v1  ;;  %vm6551_vm7 = vcmp.lt.s32.totalorder %v6550_v15, 2  ;;  %vm6552_vm14 = vcmp.eq.s32.totalorder %v6550_v15, 0  ;;  %vm6555_vm10 = vcmp.eq.s32.totalorder %v6550_v15, 2 }
 0x58d   : > { %v6554_v54 = vsel %vm6552_vm14, %v12954_v29, %v3212_v18  ;;  %v6557_v7 = vsel %vm6555_vm10, %v3215_v30, %v12949_v22  ;;  %v7510_v0 = vmul.f32 %v7460_v28, %v7344_v49  ;;  %v3516_v53 = vsel %vm12959_vm15, 0, %v3514_v47 }
 0x58e   : > { %vm3210_vm1 = vcmp.lt.s32.totalorder %v3209_v9, 2  ;;  %vm3211_vm8 = vcmp.eq.s32.totalorder %v3209_v9, 0  ;;  %vm3214_vm5 = vcmp.eq.s32.totalorder %v3209_v9, 2  ;;  %v6558_v44 = vsel %vm6551_vm7, %v6554_v54, %v6557_v7  ;;  %v12965_v54 = vld [vmem:[#allocation135_spill] sm:$0xff] }
 0x58f   : > { %v3213_v41 = vsel %vm3211_vm8, %v12954_v29, %v3212_v18  ;;  %v3216_v5 = vsel %vm3214_vm5, %v3215_v30, %v12949_v22  ;;  %v6559_v3 = vsel %vm3207_vm0, nan, %v6558_v44  ;;  %8436 = vsinq.f32 %v11938_v25  ;;  %7543 = vst.msk [vmem:[%s8951_s17 + $0xc8] sm:$0xff] %vm7517_vm3, %v7510_v0 }
 0x590   : > { %v3217_v6 = vsel %vm3210_vm1, %v3213_v41, %v3216_v5  ;;  %v7311_v55 = vmul.f32 %v11915_v34, %v6559_v3  ;;  %v3520_v63 = vadd.s32 3, %v3516_v53  ;;  %v6859_v22 = vand.u32 3, %v3516_v53 }
 0x591   : > { %v3218_v18 = vsel %vm3207_vm0, nan, %v3217_v6  ;;  %vm3519_vm4 = vweird.f32 %v12956_v50  ;;  %vm12962_vm9 = vcmp.lt.s32.totalorder %v12961_v20, 0  ;;  %v3420_v39 = vxor.u32 2147483648, %v11359_v17 }
 0x592   : > { %v3977_v40 = vmul.f32 %v11904_v38, %v3218_v18  ;;  %v3410_v26 = vsel %vm12962_vm9, %v3409_v27, %v12960_v10  ;;  %v3521_v62 = vand.u32 3, %v3520_v63  ;;  %vm6860_vm2 = vcmp.lt.s32.totalorder %v6859_v22, 2 }
 0x593   : > { %vm6861_vm7 = vcmp.eq.s32.totalorder %v6859_v22, 0  ;;  %vm6864_vm14 = vcmp.eq.s32.totalorder %v6859_v22, 2  ;;  %vm12964_vm0 = vnez %v12963_v58  ;;  %vm3415_vm8 = vweird.f32 %v12961_v20 }
 0x594   : > { %v7343_v25 = vadd.f32 %v7311_v55, %v3977_v40  ;;  %v6863_v13 = vsel %vm6861_vm7, %v11427_v52, %v3524_v42  ;;  %v6866_v14 = vsel %vm6864_vm14, %v3527_v2, %v11433_v57  ;;  %v3412_v29 = vsel %vm12964_vm0, 0, %v3410_v26  ;;  %v12968_v40 = vld [vmem:[#allocation133_spill] sm:$0xff] }
 0x595   : > { %vm3522_vm10 = vcmp.lt.s32.totalorder %v3521_v62, 2  ;;  %vm3523_vm6 = vcmp.eq.s32.totalorder %v3521_v62, 0  ;;  %vm3526_vm1 = vcmp.eq.s32.totalorder %v3521_v62, 2  ;;  %v6867_v30 = vsel %vm6860_vm2, %v6863_v13, %v6866_v14 }
 0x596   : > { %v7509_v23 = vmul.f32 %v7456_v19, %v7343_v25  ;;  %v3525_v1 = vsel %vm3523_vm6, %v11427_v52, %v3524_v42  ;;  %v3528_v15 = vsel %vm3526_vm1, %v3527_v2, %v11433_v57  ;;  %v6868_v24 = vsel %vm3519_vm4, nan, %v6867_v30  ;;  %v7468_v2 = vpop.permute.xlu1 %7467  ;;  %v7464_v19 = vpop.permute.xlu0 %7463 }
 0x597   : > { %v3529_v21 = vsel %vm3522_vm10, %v3525_v1, %v3528_v15  ;;  %v7314_v8 = vmul.f32 %v11915_v34, %v6868_v24  ;;  %v3416_v28 = vadd.s32 3, %v3412_v29  ;;  %v6756_v9 = vand.u32 3, %v3412_v29 }
 0x598   : > { %7542 = vst.msk [vmem:[%s8951_s17 + $0xc0] sm:$0xff] %vm7517_vm3, %v7509_v23  ;;  %v3530_v49 = vsel %vm3519_vm4, nan, %v3529_v21  ;;  %v3423_v7 = vxor.u32 2147483648, %v12965_v54  ;;  %v3721_v47 = vsub.s32 4, %v11356_v31  ;;  %v3732_v52 = vxor.u32 2147483648, %v11616_v61 }
 0x599   : > { %v3980_v57 = vmul.f32 %v11904_v38, %v3530_v49  ;;  %v3417_v42 = vand.u32 3, %v3416_v28  ;;  %vm6757_vm5 = vcmp.lt.s32.totalorder %v6756_v9, 2  ;;  %vm6758_vm15 = vcmp.eq.s32.totalorder %v6756_v9, 0  ;;  %v12147_v41 = vpop.eup %8436 }
 0x59a   : > { %v6760_v44 = vsel %vm6758_vm15, %v12965_v54, %v3420_v39  ;;  %vm6761_vm9 = vcmp.eq.s32.totalorder %v6756_v9, 2  ;;  %vm12966_vm2 = vcmp.lt.s32.totalorder %v11144_v4, 0  ;;  %v3735_v0 = vxor.u32 2147483648, %v11585_v32 }
 0x59b   : > { %v3722_v50 = vsel %vm12966_vm2, %v3721_v47, %v11356_v31  ;;  %v7346_v5 = vadd.f32 %v7314_v8, %v3980_v57  ;;  %vm3418_vm4 = vcmp.lt.s32.totalorder %v3417_v42, 2  ;;  %vm3419_vm7 = vcmp.eq.s32.totalorder %v3417_v42, 0 }
 0x59c   : > { %vm3422_vm14 = vcmp.eq.s32.totalorder %v3417_v42, 2  ;;  %v3421_v3 = vsel %vm3419_vm7, %v12965_v54, %v3420_v39  ;;  %v6763_v55 = vsel %vm6761_vm9, %v3423_v7, %v11359_v17  ;;  %vm12967_vm0 = vnez %v12789_v45 }
 0x59d   : > { %v3424_v6 = vsel %vm3422_vm14, %v3423_v7, %v11359_v17  ;;  %v3724_v12 = vsel %vm12967_vm0, 0, %v3722_v50  ;;  %v7512_v53 = vmul.f32 %v7468_v2, %v7346_v5  ;;  %v6764_v10 = vsel %vm6757_vm5, %v6760_v44, %v6763_v55 }
 0x59e   : > { %v3425_v31 = vsel %vm3418_vm4, %v3421_v3, %v3424_v6  ;;  %v3728_v27 = vadd.s32 3, %v3724_v12  ;;  %v6765_v63 = vsel %vm3415_vm8, nan, %v6764_v10  ;;  %v7065_v22 = vand.u32 3, %v3724_v12 }
 0x59f   : > { %v3426_v18 = vsel %vm3415_vm8, nan, %v3425_v31  ;;  %v3617_v26 = vsub.s32 4, %v12968_v40  ;;  %7545 = vst.msk [vmem:[%s8951_s17 + $0xd8] sm:$0xff] %vm7517_vm3, %v7512_v53  ;;  %v7313_v45 = vmul.f32 %v11915_v34, %v6765_v63  ;;  %vm3727_vm10 = vweird.f32 %v11144_v4  ;;  %v7472_v53 = vpop.permute.xlu0 %7471 }
 0x5a0   : > { %v3979_v17 = vmul.f32 %v11904_v38, %v3426_v18  ;;  %v3729_v39 = vand.u32 3, %v3728_v27  ;;  %vm7066_vm6 = vcmp.lt.s32.totalorder %v7065_v22, 2  ;;  %vm7067_vm1 = vcmp.eq.s32.totalorder %v7065_v22, 0 }
 0x5a1   : > { %vm7070_vm5 = vcmp.eq.s32.totalorder %v7065_v22, 2  ;;  %vm12969_vm15 = vcmp.lt.s32.totalorder %v11059_v11, 0  ;;  %v7069_v14 = vsel %vm7067_vm1, %v11585_v32, %v3732_v52  ;;  %vm12970_vm4 = vnez %v12784_v59  ;;  %v7476_v59 = vpop.permute.xlu1 %7475 }
 0x5a2   : > { %v3618_v20 = vsel %vm12969_vm15, %v3617_v26, %v12968_v40  ;;  %v7345_v62 = vadd.f32 %v7313_v45, %v3979_v17  ;;  %vm3730_vm8 = vcmp.lt.s32.totalorder %v3729_v39, 2  ;;  %vm3731_vm9 = vcmp.eq.s32.totalorder %v3729_v39, 0 }
 0x5a3   : > { %vm3734_vm2 = vcmp.eq.s32.totalorder %v3729_v39, 2  ;;  %v3733_v25 = vsel %vm3731_vm9, %v11585_v32, %v3732_v52  ;;  %v7072_v58 = vsel %vm7070_vm5, %v3735_v0, %v11616_v61  ;;  %v3620_v1 = vsel %vm12970_vm4, 0, %v3618_v20 }
 0x5a4   : > { %v3736_v13 = vsel %vm3734_vm2, %v3735_v0, %v11616_v61  ;;  %v7511_v29 = vmul.f32 %v7464_v19, %v7345_v62  ;;  %v7073_v23 = vsel %vm7066_vm6, %v7069_v14, %v7072_v58  ;;  %v3624_v21 = vadd.s32 3, %v3620_v1 }
 0x5a5   : > { %v3737_v30 = vsel %vm3730_vm8, %v3733_v25, %v3736_v13  ;;  %v7074_v24 = vsel %vm3727_vm10, nan, %v7073_v23  ;;  %v3628_v8 = vxor.u32 2147483648, %v11578_v51  ;;  %v3631_v28 = vxor.u32 2147483648, %v11542_v33 }
 0x5a6   : > { %v3738_v15 = vsel %vm3727_vm10, nan, %v3737_v30  ;;  %7544 = vst.msk [vmem:[%s8951_s17 + $0xd0] sm:$0xff] %vm7517_vm3, %v7511_v29  ;;  %v7316_v61 = vmul.f32 %v11915_v34, %v7074_v24  ;;  %v6962_v9 = vand.u32 3, %v3620_v1  ;;  %vm3623_vm7 = vweird.f32 %v11059_v11 }
 0x5a7   : > { %v3982_v32 = vmul.f32 %v11904_v38, %v3738_v15  ;;  %v3625_v49 = vand.u32 3, %v3624_v21  ;;  %v3929_v54 = vsub.s32 4, %v11519_v48  ;;  %v3940_v0 = vxor.u32 2147483648, %v12147_v41 }
 0x5a8   : > { %vm6963_vm14 = vcmp.lt.s32.totalorder %v6962_v9, 2  ;;  %vm6964_vm0 = vcmp.eq.s32.totalorder %v6962_v9, 0  ;;  %vm6967_vm10 = vcmp.eq.s32.totalorder %v6962_v9, 2  ;;  %v3943_v31 = vxor.u32 2147483648, %v12041_v43 }
 0x5a9   : > { %v7348_v4 = vadd.f32 %v7316_v61, %v3982_v32  ;;  %vm3626_vm6 = vcmp.lt.s32.totalorder %v3625_v49, 2  ;;  %vm3627_vm1 = vcmp.eq.s32.totalorder %v3625_v49, 0  ;;  %vm3630_vm5 = vcmp.eq.s32.totalorder %v3625_v49, 2  ;;  %v7480_v32 = vpop.permute.xlu0 %7479 }
 0x5aa   : > { %v6966_v7 = vsel %vm6964_vm0, %v11542_v33, %v3628_v8  ;;  %v3629_v52 = vsel %vm3627_vm1, %v11542_v33, %v3628_v8  ;;  %v3632_v57 = vsel %vm3630_vm5, %v3631_v28, %v11578_v51  ;;  %v6969_v42 = vsel %vm6967_vm10, %v3631_v28, %v11578_v51 }
 0x5ab   : > { %v7514_v47 = vmul.f32 %v7476_v59, %v7348_v4  ;;  %v3633_v2 = vsel %vm3626_vm6, %v3629_v52, %v3632_v57  ;;  %v6970_v44 = vsel %vm6963_vm14, %v6966_v7, %v6969_v42  ;;  %v3930_v50 = vsel %vm3845_vm13, %v3929_v54, %v11519_v48 }
 0x5ac   : > { %v3634_v5 = vsel %vm3623_vm7, nan, %v3633_v2  ;;  %v6971_v33 = vsel %vm3623_vm7, nan, %v6970_v44  ;;  %v3932_v3 = vsel %vm11896_vm12, 0, %v3930_v50  ;;  %v3825_v51 = vsub.s32 4, %v11425_v16 }
 0x5ad   : > { %7547 = vst.msk [vmem:[%s8951_s17 + $0xe8] sm:$0xff] %vm7517_vm3, %v7514_v47  ;;  %v3981_v6 = vmul.f32 %v11904_v38, %v3634_v5  ;;  %v7315_v55 = vmul.f32 %v11915_v34, %v6971_v33  ;;  %v3936_v48 = vadd.s32 3, %v3932_v3  ;;  %v7271_v12 = vand.u32 3, %v3932_v3 }
 0x5ae   : > { %vm3935_vm13 = vweird.f32 %v11308_v56  ;;  %vm12971_vm15 = vcmp.lt.s32.totalorder %v11158_v46, 0  ;;  %v3836_v27 = vxor.u32 2147483648, %v11669_v37  ;;  %v3839_v19 = vxor.u32 2147483648, %v11641_v60 }
 0x5af   : > { %v3826_v11 = vsel %vm12971_vm15, %v3825_v51, %v11425_v16  ;;  %v7347_v10 = vadd.f32 %v7315_v55, %v3981_v6  ;;  %v3937_v36 = vand.u32 3, %v3936_v48  ;;  %vm7273_vm12 = vcmp.eq.s32.totalorder %v7271_v12, 0 }
 0x5b0   : > { %vm7272_vm8 = vcmp.lt.s32.totalorder %v7271_v12, 2  ;;  %v7275_v18 = vsel %vm7273_vm12, %v12041_v43, %v3940_v0  ;;  %vm7276_vm9 = vcmp.eq.s32.totalorder %v7271_v12, 2  ;;  %v3828_v63 = vsel %vm11557_vm11, 0, %v3826_v11 }
 0x5b1   : > { %v7513_v22 = vmul.f32 %v7472_v53, %v7347_v10  ;;  %vm3938_vm2 = vcmp.lt.s32.totalorder %v3937_v36, 2  ;;  %vm3939_vm4 = vcmp.eq.s32.totalorder %v3937_v36, 0  ;;  %vm3942_vm7 = vcmp.eq.s32.totalorder %v3937_v36, 2 }
 0x5b2   : > { %v3941_v40 = vsel %vm3939_vm4, %v12041_v43, %v3940_v0  ;;  %v3944_v16 = vsel %vm3942_vm7, %v3943_v31, %v12147_v41  ;;  %v7278_v26 = vsel %vm7276_vm9, %v3943_v31, %v12147_v41  ;;  %v3832_v17 = vadd.s32 3, %v3828_v63  ;;  %v7484_v41 = vpop.permute.xlu1 %7483 }
 0x5b3   : > { %7546 = vst.msk [vmem:[%s8951_s17 + $0xe0] sm:$0xff] %vm7517_vm3, %v7513_v22  ;;  %v3945_v45 = vsel %vm3938_vm2, %v3941_v40, %v3944_v16  ;;  %v7279_v39 = vsel %vm7272_vm8, %v7275_v18, %v7278_v26  ;;  %v7168_v20 = vand.u32 3, %v3828_v63  ;;  %vm3831_vm1 = vweird.f32 %v11158_v46 }
 0x5b4   : > { %v3946_v35 = vsel %vm3935_vm13, nan, %v3945_v45  ;;  %v7280_v62 = vsel %vm3935_vm13, nan, %v7279_v39  ;;  %v3833_v25 = vand.u32 3, %v3832_v17 }
 0x5b5   : > { %v3984_v43 = vmul.f32 %v11904_v38, %v3946_v35  ;;  %v7318_v13 = vmul.f32 %v11915_v34, %v7280_v62  ;;  %vm7170_vm11 = vcmp.eq.s32.totalorder %v7168_v20, 0  ;;  %vm7173_vm6 = vcmp.eq.s32.totalorder %v7168_v20, 2 }
 0x5b6   : > { %vm3834_vm14 = vcmp.lt.s32.totalorder %v3833_v25, 2  ;;  %vm3835_vm0 = vcmp.eq.s32.totalorder %v3833_v25, 0  ;;  %vm3838_vm10 = vcmp.eq.s32.totalorder %v3833_v25, 2  ;;  %v7172_v14 = vsel %vm7170_vm11, %v11641_v60, %v3836_v27 }
 0x5b7   : > { %v7350_v58 = vadd.f32 %v7318_v13, %v3984_v43  ;;  %v3837_v29 = vsel %vm3835_vm0, %v11641_v60, %v3836_v27  ;;  %v3840_v30 = vsel %vm3838_vm10, %v3839_v19, %v11669_v37  ;;  %vm7169_vm5 = vcmp.lt.s32.totalorder %v7168_v20, 2 }
 0x5b8   : > { %v3841_v56 = vsel %vm3834_vm14, %v3837_v29, %v3840_v30  ;;  %v7175_v23 = vsel %vm7173_vm6, %v3839_v19, %v11669_v37 }
 0x5b9   : > { %v7516_v1 = vmul.f32 %v7484_v41, %v7350_v58  ;;  %v3842_v15 = vsel %vm3831_vm1, nan, %v3841_v56  ;;  %v7176_v24 = vsel %vm7169_vm5, %v7172_v14, %v7175_v23 }
 0x5ba   : > { %v3983_v21 = vmul.f32 %v11904_v38, %v3842_v15  ;;  %v7177_v8 = vsel %vm3831_vm1, nan, %v7176_v24 }
 0x5bb   : > { %7549 = vst.msk [vmem:[%s8951_s17 + $0xf8] sm:$0xff] %vm7517_vm3, %v7516_v1  ;;  %v7317_v60 = vmul.f32 %v11915_v34, %v7177_v8 }
 0x5bd   : > { %v7349_v61 = vadd.f32 %v7317_v60, %v3983_v21 }
 0x5bf   : > { %v7515_v28 = vmul.f32 %v7480_v32, %v7349_v61 }
 0x5c1   : > { %7548 = vst.msk [vmem:[%s8951_s17 + $0xf0] sm:$0xff] %vm7517_vm3, %v7515_v28 }
 0x5c2   : > { %s8013_s28 = sshll.u32 %s8641_s21, 11  ;;  %s7583_s14 = sshll.u32 %s8951_s17, 4  ;;  %s7584_s14 = int_to_ptr.vmem [resolvable:$true] %s7583_s14 }
 0x5c3   : > { %s7566_s6 = scalar_lea.hbm %s12285_s5, %s8013_s28  ;;  %s8670_s24 = smov 2048  }
 0x5c4   : > { %p12972_p2 = scmp.ne.s32.totalorder %s12535_s10, 0  ;;  %s8671_s15 = smov 4096  }
 0x5c5   : > { %s8672_s7 = smov 16   ;;  %s8673_s30 = smov 128  }
 0x5c6   : > { %8189 = sst [smem:[#allocation14]] (%p12972_p2), %s8670_s24  ;;  %s8674_s21 = smov 8  }
 0x5c7   : > { %8190 = sst [smem:[#allocation14 + $0x1]] (%p12972_p2), %s8671_s15  ;;  %s8675_s16 = smov [#allocation13]  }
 0x5c8   : > { %8191 = sst [smem:[#allocation14 + $0x2]] (%p12972_p2), %s8672_s7  ;;  %s8676_s8 = smov 0  }
 0x5c9   : > { %8192 = sst [smem:[#allocation14 + $0x3]] (%p12972_p2), %s8673_s30 }
 0x5ca   : > { %8193 = sst [smem:[#allocation14 + $0x4]] (%p12972_p2), %s8673_s30 }
 0x5cb   : > { %8194 = sst [smem:[#allocation14 + $0x5]] (%p12972_p2), %s8674_s21 }
 0x5cc   : > { %8195 = dma.general (%p12972_p2), %s7584_s14, 4096, %s7566_s6, %s7551_s9, %s8675_s16, [#allocation14], %s8676_s8, 0  }
 0x5cd PF: > { %s7611_s26 = sand.u32 1, %s8629_s18   ;;  %p12973_p10 = scmp.ne.s32.totalorder %s12536_s12, 0 }
 0x5ce   : > { %p12974_p11 = scmp.ge.s32.totalorder %s8649_s23, 2  ;;  %s7612_s17 = scalar_lea.sflag [#allocation5], %s7611_s26 }
 0x5d0   : > { %p8215_p0 = pnand %p12974_p11, %p12973_p10 }
 0x5d2   : > { %8624 = dma.done.wait (!%p8215_p0), %s7612_s17, 4096  }
 0x5d3   : > { %8626 = vsyncadd (!%p8215_p0), %s7612_s17, 4294963200  ;;  %s23_s23 = sadd.s32 1, %s8649_s23   ;;  %s12975_s18 = smov %s8633_s19 }
 0x5d4   : > { %p20_p7 = scmp.ge.s32.totalorder %s23_s23, 4   ;;  %s12976_s19 = smov %s8637_s20 }
 0x5d5   : > { %s12977_s20 = smov %s8884_s11  ;;  %s12978_s21 = smov %s8645_s22 }
 0x5d6   : > { %s12979_s22 = smov %s12981_s27  ;;  %22 = sbr.rel (!%p20_p7) target bundleno = 8 (0x8), region = 110 }
 0x5dd   :  { %7617 = vsyncpa [#allocation4], 1 }
 0x5de   :  { %7619 = vsyncpa [#allocation4 + $0x1], 1 }
 0x5df   :  { %7620 = vsyncpa [#allocation7], 1 }
 0x5e0   :  { %7621 = vsyncpa [#allocation10], 1 }
 0x5e1   :  { %7622 = vsyncpa [#allocation5], 1 }
 0x5e2   :  { %7624 = vsyncpa [#allocation5 + $0x1], 1 }

</bundles_post_ra>
